<compile_context>
chip_gen: v7x
topology: tpu7x:2x2x1
jax: 0.10.0
libtpu: 0.0.40
codegen_flags: <defaults>
</compile_context>

<pallas_src>
import numpy as np
import jax
import jax.numpy as jnp
from jax.experimental import pallas as pl
from jax.experimental.pallas import tpu as pltpu

num_atom_type = 120
num_chirality_tag = 3


# ----------------------------------------------------------------------------
# Pallas kernel: one batch-tile of Bt molecules per grid step.
# ----------------------------------------------------------------------------
def gcn_kernel(x_ref, adj_ref, pool_ref, invn_ref, w_ref, b_ref, out_ref):
    f32, bf16 = jnp.float32, jnp.bfloat16
    G, S, _ = adj_ref.shape          # G diagonal groups of side S per tile
    M, D = x_ref.shape               # M = Bt * N flattened nodes

    adj = adj_ref[...]               # [G, S, S] bf16 group-block-diag A_hat
    b_all = b_ref[...]               # [4, D]   f32 biases (zero-padded)
    b1, bc1, b2, bc2 = b_all[0:1], b_all[1:2], b_all[2:3], b_all[3:4]

    def aggregate(v_bf):             # per-molecule A_hat @ v as G MXU matmuls
        vg = v_bf.reshape(G, S, D)   # free: S is a multiple of the sublane tile
        agg = jnp.einsum("gij,gjd->gid", adj, vg, preferred_element_type=f32)
        return agg.reshape(M, D)

    # x = dropout(relu(l1(x)))                (dropout = identity, eval mode)
    x = jnp.maximum(
        jnp.dot(x_ref[...], w_ref[0], preferred_element_type=f32) + b1, 0.0)
    x_bf = x.astype(bf16)

    # h_1 = relu(conv1(x))  ==  relu(A_hat @ (x @ Wc1) + bc1)
    xw = jnp.dot(x_bf, w_ref[1], preferred_element_type=f32).astype(bf16)
    h1 = jnp.maximum(aggregate(xw) + bc1, 0.0)

    # xl = l2(x);  h_1 = dropout(h_1 + xl)
    xl = jnp.dot(x_bf, w_ref[2], preferred_element_type=f32) + b2
    h1 = h1 + xl

    # h_2 = relu(conv2(h_1));  h_2 = dropout(h_2 + xl)
    hw = jnp.dot(h1.astype(bf16), w_ref[3], preferred_element_type=f32).astype(bf16)
    h2 = jnp.maximum(aggregate(hw) + bc2, 0.0)
    h2 = h2 + xl

    # Mean pool: one MXU matmul with the exact 0/1 mask (bf16), then the
    # 1/num_atoms scale on the f32 path (num_atoms == 0 guarded host-side).
    pooled = jnp.dot(pool_ref[0], h2.astype(bf16), preferred_element_type=f32)
    out_ref[...] = pooled * invn_ref[...]


# ----------------------------------------------------------------------------
# Wrapper.
# ----------------------------------------------------------------------------
def _round_up(x, m):
    return (x + m - 1) // m * m


def _pad2(a, rows, cols):
    return jnp.pad(a, ((0, rows - a.shape[0]), (0, cols - a.shape[1])))


def _choose_group(n, target=128):
    """Pad n and pick g so the adjacency block side S = g * n_pad is a multiple
    of `target` (== target when n <= target). At production N >= 128, g == 1."""
    if n >= target:
        return _round_up(n, target), 1
    n_pad = n
    while target % n_pad != 0:
        n_pad += 1
    return n_pad, target // n_pad


def gcn_forward(x_emb, adj, mask, params, *, block_b=128, lane=128):
    """x_emb: [B,N,E] f32, adj: [B,N,N] f32 (normalized A_hat),
    mask: [B,N,1] f32 -> [B,H] f32."""
    B, N, E = x_emb.shape
    H = params["wc1"].shape[1]
    D = _round_up(max(E, H), lane)           # lane-dense padded feature width

    # Pad atoms so the adjacency group block side is lane/MXU native.
    N_pad, g = _choose_group(N, target=lane)
    if N_pad != N:
        pn = N_pad - N
        x_emb = jnp.pad(x_emb, ((0, 0), (0, pn), (0, 0)))
        adj = jnp.pad(adj, ((0, 0), (0, pn), (0, pn)))
        mask = jnp.pad(mask, ((0, 0), (0, pn), (0, 0)))
    S = g * N_pad

    # Pad batch to a multiple of the batch tile.
    assert block_b % g == 0, "batch tile must hold whole adjacency groups"
    Bp = _round_up(B, block_b)
    if Bp != B:
        pb = Bp - B
        x_emb = jnp.pad(x_emb, ((0, pb), (0, 0), (0, 0)))
        adj = jnp.pad(adj, ((0, pb), (0, 0), (0, 0)))
        mask = jnp.pad(mask, ((0, pb), (0, 0), (0, 0)))
    T = Bp // block_b
    M = block_b * N_pad                      # flattened nodes per tile
    G = block_b // g                         # adjacency groups per tile

    # Flattened, lane-padded node features -> [Bp*N_pad, D] bf16.
    x_flat = jnp.pad(x_emb, ((0, 0), (0, 0), (0, D - E)))
    x_flat = x_flat.reshape(Bp * N_pad, D).astype(jnp.bfloat16)

    # Adjacency as MXU-sized diagonal group blocks [Bp/g, S, S] bf16.
    if g == 1:
        adj_bd = adj
    else:
        eye_g = jnp.eye(g, dtype=adj.dtype)
        adj_bd = jnp.einsum("tbij,bc->tbicj",
                            adj.reshape(Bp // g, g, N_pad, N_pad),
                            eye_g).reshape(Bp // g, S, S)
    adj_bd = adj_bd.astype(jnp.bfloat16)

    # Pool matrix = block-diagonal 0/1 mask [T, Bt, M] bf16 (exact), with the
    # 1/num_atoms scale kept on the f32 path; num_atoms == 0 -> zero row.
    mask2 = mask[..., 0]
    n_atoms = jnp.sum(mask2, axis=1)                               # [Bp]
    inv_n = jnp.where(n_atoms > 0, 1.0 / jnp.maximum(n_atoms, 1.0), 0.0)
    inv_n = inv_n.reshape(Bp, 1).astype(jnp.float32)
    eye_b = jnp.eye(block_b, dtype=mask2.dtype)
    pool = jnp.einsum("tbn,bc->tbcn", mask2.reshape(T, block_b, N_pad),
                      eye_b).reshape(T, block_b, M).astype(jnp.bfloat16)

    # Consolidated weight / bias slabs (padded to D x D / D).
    w_stack = jnp.stack([_pad2(params["w1"], D, D),
                         _pad2(params["wc1"], D, D),
                         _pad2(params["w2"], D, D),
                         _pad2(params["wc2"], D, D)]).astype(jnp.bfloat16)
    b_stack = jnp.concatenate([_pad2(params["b1"], 1, D),
                               _pad2(params["bc1"], 1, D),
                               _pad2(params["b2"], 1, D),
                               _pad2(params["bc2"], 1, D)],
                              axis=0).astype(jnp.float32)

    # VMEM / cost bookkeeping (headroom-capped for v7x's 64 MiB physical VMEM).
    tile_bytes = (M * D * 2 + G * S * S * 2 + block_b * M * 2 + block_b * 4
                  + 4 * D * D * 2 + 4 * D * 4 + block_b * D * 4)
    vmem_limit = int(min(max(4 * tile_bytes, 32 * 1024 * 1024),
                         48 * 1024 * 1024))
    flops = T * (4 * 2 * M * D * D            # weight matmuls
                 + 2 * 2 * G * S * S * D      # adjacency aggregations
                 + 2 * block_b * M * D)       # pooling matmul
    bytes_accessed = (x_flat.size * 2 + adj_bd.size * 2 + pool.size * 2
                      + inv_n.size * 4 + w_stack.size * 2 + b_stack.size * 4
                      + Bp * D * 4)

    out = pl.pallas_call(
        gcn_kernel,
        out_shape=jax.ShapeDtypeStruct((Bp, D), jnp.float32),
        grid=(T,),
        in_specs=[
            pl.BlockSpec((M, D), lambda t: (t, 0)),               # node feats
            pl.BlockSpec((G, S, S), lambda t: (t, 0, 0)),         # adjacency
            pl.BlockSpec((1, block_b, M), lambda t: (t, 0, 0)),   # 0/1 pool
            pl.BlockSpec((block_b, 1), lambda t: (t, 0)),         # 1/n (f32)
            pl.BlockSpec((4, D, D), lambda t: (0, 0, 0)),         # weights
            pl.BlockSpec((4, D), lambda t: (0, 0)),               # biases
        ],
        out_specs=pl.BlockSpec((block_b, D), lambda t: (t, 0)),   # lane-dense
        compiler_params=pltpu.CompilerParams(
            dimension_semantics=("parallel",),
            vmem_limit_bytes=vmem_limit),
        cost_estimate=pl.CostEstimate(flops=int(flops), transcendentals=0,
                                      bytes_accessed=int(bytes_accessed)),
    )(x_flat, adj_bd, pool, inv_n, w_stack, b_stack)
    return out[:B, :H]


# ----------------------------------------------------------------------------
# Glue: deterministic parameter init + synthetic graph construction.
# ----------------------------------------------------------------------------
def xavier_uniform(key, fan_in, fan_out):
    bound = float(np.sqrt(6.0 / (fan_in + fan_out)))
    return jax.random.uniform(key, (fan_in, fan_out), jnp.float32,
                              minval=-bound, maxval=bound)


def make_params(key, emb_dim, hidden):
    ks = jax.random.split(key, 10)
    small = lambda k, n: 0.1 * jax.random.normal(k, (1, n), jnp.float32)
    return {
        "emb1": xavier_uniform(ks[0], num_atom_type, emb_dim),
        "emb2": xavier_uniform(ks[1], num_chirality_tag, emb_dim),
        # Linear / GCNConv weights stored as [in, out] (y = x @ W + b).
        "w1":  xavier_uniform(ks[2], emb_dim, emb_dim),
        "b1":  small(ks[3], emb_dim),
        "wc1": xavier_uniform(ks[4], emb_dim, hidden),
        "bc1": small(ks[5], hidden),
        "w2":  xavier_uniform(ks[6], emb_dim, hidden),
        "b2":  small(ks[7], hidden),
        "wc2": xavier_uniform(ks[8], hidden, hidden),
        "bc2": small(ks[9], hidden),
    }


def chain_adj(n_atoms, n_max):
    """Chain molecule -> normalized dense A_hat = D^-1/2 (A+I) D^-1/2 [N,N]."""
    A = np.zeros((n_max, n_max), np.float32)
    if n_atoms > 1:
        idx = np.arange(n_atoms - 1)
        A[idx, idx + 1] = 1.0
        A[idx + 1, idx] = 1.0
    d = np.arange(n_atoms)
    A[d, d] = 1.0                           # self loops on valid atoms only
    deg = A.sum(axis=1)
    dis = np.where(deg > 0, 1.0 / np.sqrt(np.maximum(deg, 1e-12)), 0.0)
    return (dis[:, None] * A) * dis[None, :]


# ----------------------------------------------------------------------------
# References.
# ----------------------------------------------------------------------------
def _ref_one_f32(x, a, m, p):
    x1 = jnp.maximum(x @ p["w1"] + p["b1"], 0.0)
    h1 = jnp.maximum(a @ (x1 @ p["wc1"]) + p["bc1"], 0.0)
    xl = x1 @ p["w2"] + p["b2"]
    h1 = h1 + xl
    h2 = jnp.maximum(a @ (h1 @ p["wc2"]) + p["bc2"], 0.0)
    h2 = h2 + xl
    n = jnp.maximum(jnp.sum(m), 1.0)
    return jnp.sum(h2 * m, axis=0) / n


def _ref_one_bf16(x, a, m, p):
    """Mirrors the kernel's bf16-input / f32-accumulate cast pattern."""
    bf = lambda t: t.astype(jnp.bfloat16)
    dot = lambda u, v: jnp.dot(bf(u), bf(v), preferred_element_type=jnp.float32)
    x1 = jnp.maximum(dot(x, p["w1"]) + p["b1"], 0.0)
    h1 = jnp.maximum(dot(a, dot(x1, p["wc1"])) + p["bc1"], 0.0)
    xl = dot(x1, p["w2"]) + p["b2"]
    h1 = h1 + xl
    h2 = jnp.maximum(dot(a, dot(h1, p["wc2"])) + p["bc2"], 0.0)
    h2 = h2 + xl
    n = jnp.maximum(jnp.sum(m), 1.0)
    return dot(m[:, 0][None, :], h2)[0] / n


if __name__ == "__main__":
    # Small test shapes (production: N~64-128, H~256-300, B in the hundreds).
    emb_dim, hidden = 32, 32
    B, N_max, Bt = 512, 8, 128      # 4 batch tiles; M = Bt*N = 1024 rows/tile

    key = jax.random.PRNGKey(0)
    kp, k_at, k_ch = jax.random.split(key, 3)
    params = make_params(kp, emb_dim, hidden)

    # Synthetic chain "molecules" with 3..8 atoms.
    sizes = [3 + (i % 6) for i in range(B)]
    atom_types = jax.random.randint(k_at, (B, N_max), 0, num_atom_type)
    chirality = jax.random.randint(k_ch, (B, N_max), 0, num_chirality_tag)

    mask_np = np.zeros((B, N_max, 1), np.float32)
    adj_np = np.zeros((B, N_max, N_max), np.float32)
    for i, n in enumerate(sizes):
        mask_np[i, :n, 0] = 1.0
        adj_np[i] = chain_adj(n, N_max)
    mask = jnp.asarray(mask_np)
    adj = jnp.asarray(adj_np)

    # Embedding lookup: x_embedding1(x[:,0]) + x_embedding2(x[:,1]), pad -> 0.
    x_emb = (params["emb1"][atom_types] + params["emb2"][chirality]) * mask

    out = gcn_forward(x_emb, adj, mask, params, block_b=Bt)
    jax.block_until_ready(out)
    assert out.shape == (B, hidden)

    # Tight check against a reference with the same bf16 quantization pattern.
    ref_bf16 = jax.vmap(lambda x, a, m: _ref_one_bf16(x, a, m, params))(
        x_emb, adj, mask)
    np.testing.assert_allclose(np.asarray(out), np.asarray(ref_bf16),
                               rtol=2e-3, atol=2e-3)

    # Loose sanity check against the pure-f32 semantic reference.
    ref_f32 = jax.vmap(lambda x, a, m: _ref_one_f32(x, a, m, params))(
        x_emb, adj, mask)
    np.testing.assert_allclose(np.asarray(out), np.asarray(ref_f32),
                               rtol=5e-2, atol=5e-2)

    print("KERNEL_OK")
</pallas_src>

<mosaic_0001>
module attributes {stable_mosaic.version = 11 : i64} {
  func.func @gcn_kernel(%arg0: i32, %arg1: memref<1024x128xbf16, #tpu.memory_space<vmem>>, %arg2: memref<8x128x128xbf16, #tpu.memory_space<vmem>>, %arg3: memref<1x128x1024xbf16, #tpu.memory_space<vmem>>, %arg4: memref<128x1xf32, #tpu.memory_space<vmem>>, %arg5: memref<4x128x128xbf16, #tpu.memory_space<vmem>>, %arg6: memref<4x128xf32, #tpu.memory_space<vmem>>, %arg7: memref<128x128xf32, #tpu.memory_space<vmem>>) attributes {dimension_semantics = [#tpu.dimension_semantics<parallel>], iteration_bounds = array<i64: 4>, scalar_prefetch = 0 : i64, scratch_operands = 0 : i64, tpu.core_type = #tpu.core_type<tc>, window_params = [{transform_indices = @transform_0, window_bounds = array<i64: 1024, 128>}, {transform_indices = @transform_1, window_bounds = array<i64: 8, 128, 128>}, {transform_indices = @transform_2, window_bounds = array<i64: 1, 128, 1024>}, {transform_indices = @transform_3, window_bounds = array<i64: 128, 1>}, {pipeline_mode = #tpu.pipeline_mode<synchronous>, transform_indices = @transform_4, window_bounds = array<i64: 4, 128, 128>}, {pipeline_mode = #tpu.pipeline_mode<synchronous>, transform_indices = @transform_5, window_bounds = array<i64: 4, 128>}, {transform_indices = @transform_6, window_bounds = array<i64: 128, 128>}]} {
    %c0 = arith.constant 0 : index
    %c0_0 = arith.constant 0 : index
    %c0_1 = arith.constant 0 : index
    %0 = vector.load %arg2[%c0, %c0_0, %c0_1] : memref<8x128x128xbf16, #tpu.memory_space<vmem>>, vector<8x128x128xbf16>
    %c0_2 = arith.constant 0 : index
    %c0_3 = arith.constant 0 : index
    %1 = vector.load %arg6[%c0_2, %c0_3] : memref<4x128xf32, #tpu.memory_space<vmem>>, vector<4x128xf32>
    %2 = vector.extract_strided_slice %1 {offsets = [0, 0], sizes = [1, 128], strides = [1, 1]} : vector<4x128xf32> to vector<1x128xf32>
    %3 = vector.extract_strided_slice %1 {offsets = [1, 0], sizes = [1, 128], strides = [1, 1]} : vector<4x128xf32> to vector<1x128xf32>
    %4 = vector.extract_strided_slice %1 {offsets = [2, 0], sizes = [1, 128], strides = [1, 1]} : vector<4x128xf32> to vector<1x128xf32>
    %5 = vector.extract_strided_slice %1 {offsets = [3, 0], sizes = [1, 128], strides = [1, 1]} : vector<4x128xf32> to vector<1x128xf32>
    %c0_4 = arith.constant 0 : index
    %c0_5 = arith.constant 0 : index
    %6 = vector.load %arg1[%c0_4, %c0_5] : memref<1024x128xbf16, #tpu.memory_space<vmem>>, vector<1024x128xbf16>
    %c0_6 = arith.constant 0 : index
    %c0_7 = arith.constant 0 : index
    %c0_8 = arith.constant 0 : index
    %7 = vector.load %arg5[%c0_6, %c0_7, %c0_8] : memref<4x128x128xbf16, #tpu.memory_space<vmem>>, vector<1x128x128xbf16>
    %8 = vector.shape_cast %7 : vector<1x128x128xbf16> to vector<128x128xbf16>
    %cst = arith.constant dense<0.000000e+00> : vector<1024x128xf32>
    %9 = tpu.matmul %6, %8, %cst {dimension_numbers = #tpu.dot_dimension_numbers<[1], [0], [0], [1], [0, 0, 1, 1], [], []>} : vector<1024x128xbf16>, vector<128x128xbf16>, vector<1024x128xf32> -> vector<1024x128xf32>
    %10 = vector.broadcast %2 : vector<1x128xf32> to vector<1024x128xf32>
    %11 = arith.addf %9, %10 : vector<1024x128xf32>
    %cst_9 = arith.constant 0.000000e+00 : f32
    %12 = vector.broadcast %cst_9 : f32 to vector<1024x128xf32>
    %13 = arith.maximumf %11, %12 : vector<1024x128xf32>
    %14 = arith.truncf %13 : vector<1024x128xf32> to vector<1024x128xbf16>
    %c1 = arith.constant 1 : index
    %c0_10 = arith.constant 0 : index
    %c0_11 = arith.constant 0 : index
    %15 = vector.load %arg5[%c1, %c0_10, %c0_11] : memref<4x128x128xbf16, #tpu.memory_space<vmem>>, vector<1x128x128xbf16>
    %16 = vector.shape_cast %15 : vector<1x128x128xbf16> to vector<128x128xbf16>
    %cst_12 = arith.constant dense<0.000000e+00> : vector<1024x128xf32>
    %17 = tpu.matmul %14, %16, %cst_12 {dimension_numbers = #tpu.dot_dimension_numbers<[1], [0], [0], [1], [0, 0, 1, 1], [], []>} : vector<1024x128xbf16>, vector<128x128xbf16>, vector<1024x128xf32> -> vector<1024x128xf32>
    %18 = arith.truncf %17 : vector<1024x128xf32> to vector<1024x128xbf16>
    %19 = vector.shape_cast %18 : vector<1024x128xbf16> to vector<8x128x128xbf16>
    "tpu.trace_start"() <{level = 10 : i32, message = "gij,gjd->gid"}> : () -> ()
    %cst_13 = arith.constant dense<0.000000e+00> : vector<8x128x128xf32>
    %20 = tpu.matmul %0, %19, %cst_13 {dimension_numbers = #tpu.dot_dimension_numbers<[2], [1], [1], [2], [0, 0, 0, 1, 1, 2], [0], [0]>} : vector<8x128x128xbf16>, vector<8x128x128xbf16>, vector<8x128x128xf32> -> vector<8x128x128xf32>
    "tpu.trace_stop"() : () -> ()
    %21 = vector.shape_cast %20 : vector<8x128x128xf32> to vector<1024x128xf32>
    %22 = vector.broadcast %3 : vector<1x128xf32> to vector<1024x128xf32>
    %23 = arith.addf %21, %22 : vector<1024x128xf32>
    %cst_14 = arith.constant 0.000000e+00 : f32
    %24 = vector.broadcast %cst_14 : f32 to vector<1024x128xf32>
    %25 = arith.maximumf %23, %24 : vector<1024x128xf32>
    %c2 = arith.constant 2 : index
    %c0_15 = arith.constant 0 : index
    %c0_16 = arith.constant 0 : index
    %26 = vector.load %arg5[%c2, %c0_15, %c0_16] : memref<4x128x128xbf16, #tpu.memory_space<vmem>>, vector<1x128x128xbf16>
    %27 = vector.shape_cast %26 : vector<1x128x128xbf16> to vector<128x128xbf16>
    %cst_17 = arith.constant dense<0.000000e+00> : vector<1024x128xf32>
    %28 = tpu.matmul %14, %27, %cst_17 {dimension_numbers = #tpu.dot_dimension_numbers<[1], [0], [0], [1], [0, 0, 1, 1], [], []>} : vector<1024x128xbf16>, vector<128x128xbf16>, vector<1024x128xf32> -> vector<1024x128xf32>
    %29 = vector.broadcast %4 : vector<1x128xf32> to vector<1024x128xf32>
    %30 = arith.addf %28, %29 : vector<1024x128xf32>
    %31 = arith.addf %25, %30 : vector<1024x128xf32>
    %32 = arith.truncf %31 : vector<1024x128xf32> to vector<1024x128xbf16>
    %c3 = arith.constant 3 : index
    %c0_18 = arith.constant 0 : index
    %c0_19 = arith.constant 0 : index
    %33 = vector.load %arg5[%c3, %c0_18, %c0_19] : memref<4x128x128xbf16, #tpu.memory_space<vmem>>, vector<1x128x128xbf16>
    %34 = vector.shape_cast %33 : vector<1x128x128xbf16> to vector<128x128xbf16>
    %cst_20 = arith.constant dense<0.000000e+00> : vector<1024x128xf32>
    %35 = tpu.matmul %32, %34, %cst_20 {dimension_numbers = #tpu.dot_dimension_numbers<[1], [0], [0], [1], [0, 0, 1, 1], [], []>} : vector<1024x128xbf16>, vector<128x128xbf16>, vector<1024x128xf32> -> vector<1024x128xf32>
    %36 = arith.truncf %35 : vector<1024x128xf32> to vector<1024x128xbf16>
    %37 = vector.shape_cast %36 : vector<1024x128xbf16> to vector<8x128x128xbf16>
    "tpu.trace_start"() <{level = 10 : i32, message = "gij,gjd->gid"}> : () -> ()
    %cst_21 = arith.constant dense<0.000000e+00> : vector<8x128x128xf32>
    %38 = tpu.matmul %0, %37, %cst_21 {dimension_numbers = #tpu.dot_dimension_numbers<[2], [1], [1], [2], [0, 0, 0, 1, 1, 2], [0], [0]>} : vector<8x128x128xbf16>, vector<8x128x128xbf16>, vector<8x128x128xf32> -> vector<8x128x128xf32>
    "tpu.trace_stop"() : () -> ()
    %39 = vector.shape_cast %38 : vector<8x128x128xf32> to vector<1024x128xf32>
    %40 = vector.broadcast %5 : vector<1x128xf32> to vector<1024x128xf32>
    %41 = arith.addf %39, %40 : vector<1024x128xf32>
    %cst_22 = arith.constant 0.000000e+00 : f32
    %42 = vector.broadcast %cst_22 : f32 to vector<1024x128xf32>
    %43 = arith.maximumf %41, %42 : vector<1024x128xf32>
    %44 = arith.addf %43, %30 : vector<1024x128xf32>
    %c0_23 = arith.constant 0 : index
    %c0_24 = arith.constant 0 : index
    %c0_25 = arith.constant 0 : index
    %45 = vector.load %arg3[%c0_23, %c0_24, %c0_25] : memref<1x128x1024xbf16, #tpu.memory_space<vmem>>, vector<1x128x1024xbf16>
    %46 = vector.shape_cast %45 : vector<1x128x1024xbf16> to vector<128x1024xbf16>
    %47 = arith.truncf %44 : vector<1024x128xf32> to vector<1024x128xbf16>
    %cst_26 = arith.constant dense<0.000000e+00> : vector<128x128xf32>
    %48 = tpu.matmul %46, %47, %cst_26 {dimension_numbers = #tpu.dot_dimension_numbers<[1], [0], [0], [1], [0, 0, 1, 1], [], []>} : vector<128x1024xbf16>, vector<1024x128xbf16>, vector<128x128xf32> -> vector<128x128xf32>
    %c0_27 = arith.constant 0 : index
    %c0_28 = arith.constant 0 : index
    %49 = vector.load %arg4[%c0_27, %c0_28] : memref<128x1xf32, #tpu.memory_space<vmem>>, vector<128x1xf32>
    %50 = vector.broadcast %49 : vector<128x1xf32> to vector<128x128xf32>
    %51 = arith.mulf %48, %50 : vector<128x128xf32>
    %c0_29 = arith.constant 0 : index
    %c0_30 = arith.constant 0 : index
    %52 = vector.load %arg7[%c0_29, %c0_30] : memref<128x128xf32, #tpu.memory_space<vmem>>, vector<128x128xf32>
    tpu.vector_store %arg7[%c0_29, %c0_30], %51 {strides = array<i32>} : memref<128x128xf32, #tpu.memory_space<vmem>>, vector<128x128xf32>,
    return
  }
  func.func @transform_0(%arg0: i32) -> (i32, i32) {
    %c0_i32 = arith.constant 0 : i32
    %c0_i32_0 = arith.constant 0 : i32
    return %arg0, %c0_i32 : i32, i32
  }
  func.func @transform_1(%arg0: i32) -> (i32, i32, i32) {
    %c0_i32 = arith.constant 0 : i32
    %c0_i32_0 = arith.constant 0 : i32
    %c0_i32_1 = arith.constant 0 : i32
    return %arg0, %c0_i32, %c0_i32_0 : i32, i32, i32
  }
  func.func @transform_2(%arg0: i32) -> (i32, i32, i32) {
    %c0_i32 = arith.constant 0 : i32
    %c0_i32_0 = arith.constant 0 : i32
    %c0_i32_1 = arith.constant 0 : i32
    return %arg0, %c0_i32, %c0_i32_0 : i32, i32, i32
  }
  func.func @transform_3(%arg0: i32) -> (i32, i32) {
    %c0_i32 = arith.constant 0 : i32
    %c0_i32_0 = arith.constant 0 : i32
    return %arg0, %c0_i32 : i32, i32
  }
  func.func @transform_4(%arg0: i32) -> (i32, i32, i32) {
    %c0_i32 = arith.constant 0 : i32
    %c0_i32_0 = arith.constant 0 : i32
    %c0_i32_1 = arith.constant 0 : i32
    %c0_i32_2 = arith.constant 0 : i32
    return %c0_i32, %c0_i32_0, %c0_i32_1 : i32, i32, i32
  }
  func.func @transform_5(%arg0: i32) -> (i32, i32) {
    %c0_i32 = arith.constant 0 : i32
    %c0_i32_0 = arith.constant 0 : i32
    %c0_i32_1 = arith.constant 0 : i32
    return %c0_i32, %c0_i32_0 : i32, i32
  }
  func.func @transform_6(%arg0: i32) -> (i32, i32) {
    %c0_i32 = arith.constant 0 : i32
    %c0_i32_0 = arith.constant 0 : i32
    return %arg0, %c0_i32 : i32, i32
  }
}

</mosaic_0001>

<bundles_post_ra>
// kernel: tpu_custom_call.1
= control target key start
LH: loop header
LB: loop body
LE: loop exit
PB: predicated region body
PF: predicated region fallthrough
CT: control target
= control target key end

     0   :  { %s13150_s0 = inlined_call_operand.hbm [shape: bf16[4096,128], index: 0, kind: input, shape index: {}]   ;;  %s13151_s1 = inlined_call_operand.hbm [shape: bf16[32,128,128], index: 1, kind: input, shape index: {}]   ;;  %s13152_s2 = inlined_call_operand.hbm [shape: bf16[4,128,1024], index: 2, kind: input, shape index: {}]   ;;  %s13153_s3 = inlined_call_operand.vmem [shape: f32[512,1], index: 3, kind: input, shape index: {}]   ;;  %s13154_s4 = inlined_call_operand.vmem [shape: bf16[4,128,128], index: 4, kind: input, shape index: {}]   ;;  %s13155_s5 = inlined_call_operand.vmem [shape: f32[4,128], index: 5, kind: input, shape index: {}]   ;;  %s13156_s6 = inlined_call_operand.hbm [shape: f32[512,128], index: 6, kind: output, shape index: {}]  }
   0x1   :  { %13289 = sst [smem:[#allocation116_spill]] %s13150_s0 }
   0x2   :  { %13290 = sst [smem:[#allocation117_spill]] %s13151_s1 }
   0x3   :  { %11 = vsyncpa [#allocation3], 0 }
   0x4   :  { %13 = vsyncpa [#allocation3 + $0x1], 0 }
   0x5   :  { %14 = vsyncpa [#allocation6], 0 }
   0x6   :  { %16 = vsyncpa [#allocation6 + $0x1], 0 }
   0x7   :  { %17 = vsyncpa [#allocation4], 0 }
   0x8   :  { %19 = vsyncpa [#allocation4 + $0x1], 0  ;;  %s10353_s21 = smov 0   ;;  %s10355_s22 = smov 0  }
   0x9   :  { %s10357_s23 = smov 0   ;;  %s10359_s24 = smov 0  }
   0xa LB: > { %s10374_s25 = sadd.s32 4294967295, %s10305_s24   ;;  %s7664_s26 = sadd.s32 4294967294, %s10305_s24   ;;  %s10305_s24 = sphi %s10359_s24, %s13671_s24   ;;  %s10301_s23 = sphi %s10357_s23, %s13675_s23   ;;  %s10297_s22 = sphi %s10355_s22, %s13674_s22   ;;  %s10293_s21 = sphi %s10353_s21, %s13673_s21  }
   0xb   : > { %s10378_s27 = sadd.s32 1, %s10305_s24   ;;  %s32_s28 = sadd.s32 1, %s10301_s23 }
   0xc   : > { %13291 = sst [smem:[#allocation12_spill]] %s10378_s27  ;;  %s29_s29 = ssub.s32 %s10305_s24, %s10378_s27 }
   0xd   : > { %p39_p0 = scmp.ne.s32.totalorder %s10301_s23, %s10297_s22  ;;  %p30_p1 = scmp.eq.s32.totalorder %s29_s29, 0 }
   0xe   : > { %p40_p2 = scmp.eq.s32.totalorder %s10305_s24, 0  ;;  %p45_p3 = scmp.ne.s32.totalorder %s10297_s22, %s10293_s21 }
   0xf   : > { %p46_p4 = scmp.eq.s32.totalorder %s10374_s25, 0  ;;  %p189_p7 = scmp.eq.s32.totalorder %s10374_s25, 3 }
  0x10   : > { %s10390_s30 = scalar_select %p30_p1, %s10301_s23, %s32_s28  }
  0x11   : > { %p41_p5 = por %p40_p2, %p39_p0  ;;  %p10392_p6 = por %p46_p4, %p45_p3 }
  0x12   : > { %13292 = sst [smem:[#allocation13_spill]] %s10390_s30  ;;  %p195_p8 = scmp.eq.s32.totalorder %s7664_s26, 3 }
  0x13   : > { %s13293_s7 = scalar_select %p10392_p6, 1, 0 }
  0x14   : > { %p9876_p9 = scmp.lt.s32.totalorder %s10305_s24, 4  ;;  %p10398_p10 = por %p189_p7, %p39_p0 }
  0x15   : > { %p10402_p11 = por %p195_p8, %p45_p3  ;;  %s13157_s10 = sand.u32 1, %s10301_s23  }
  0x16   : > { %s13294_s8 = scalar_select %p10398_p10, 1, 0 }
  0x17   : > { %s13295_s9 = scalar_select %p10402_p11, 1, 0 }
  0x18   : > { %s10408_s11 = sshll.u32 %s10305_s24, 13  ;;  %s10412_s12 = sshll.u32 %s13157_s10, 9 }
  0x19   : > { %p10414_p12 = pnand %p9876_p9, %p41_p5  ;;  %s242_s14 = sand.u32 1, %s10305_s24  }
  0x1a   : > { %s13297_s1 = sld [smem:[#allocation117_spill]]  ;;  %s246_s18 = scalar_lea.vmem [#allocation5], %s10412_s12 }
  0x1b   : > { %s254_s19 = sshll.u32 %s246_s18, 4  ;;  %s10429_s20 = scalar_lea.sflag [#allocation6], %s242_s14  ;;  %s10426_s19 = int_to_ptr.vmem [resolvable:$true] %s254_s19 }
  0x1c   : > { %p10435_p1 = pneg %p10414_p12 }
  0x20   : > { %s10423_s17 = scalar_lea.hbm %s13297_s1, %s10408_s11  ;;  %s10150_s16 = scalar_lea.hbm %s13297_s1, 32768 }
  0x21   : > { %s10145_s26 = scalar_lea.hbm %s10423_s17, 8192  ;;  %p10151_p4 = scmp.lt.u32.totalorder %s10423_s17, %s13297_s1 }
  0x22   : > { %p10146_p0 = scmp.ne.s32.totalorder %s10423_s17, %s10145_s26  ;;  %p10152_p5 = scmp.lt.u32.totalorder %s10150_s16, %s10145_s26 }
  0x23   : > { %p10154_p8 = scmp.lt.u32.totalorder %s10145_s26, %s10423_s17 }
  0x24   : > { %p10148_p2 = pnand %p10435_p1, %p10146_p0  ;;  %p10153_p7 = por %p10152_p5, %p10151_p4 }
  0x26   : > { %p10149_p3 = pneg %p10148_p2  ;;  %p10155_p9 = por %p10154_p8, %p10153_p7 }
  0x28   : > { %p10156_p13 = pnand %p10155_p9, %p10149_p3 }
  0x2a   : > { %10159 = shalt.err (!%p10156_p13)
}
  0x2b   : > { %s10160_s14 = scalar_lea.vmem %s10426_s19, 8192  ;;  %s10307_s29 = smov [#allocation5]  }
  0x2c   : > { %p10161_p0 = scmp.ne.s32.totalorder %s10426_s19, %s10160_s14  ;;  %s10165_s15 = sshll.u32 %s10307_s29, 4  ;;  %s10166_s15 = int_to_ptr.vmem [resolvable:$false] %s10165_s15 }
  0x2d   : > { %s10167_s10 = scalar_lea.vmem %s10166_s15, 16384  ;;  %p10168_p10 = scmp.lt.s32.totalorder %s10426_s19, %s10166_s15 }
  0x2e   : > { %p10163_p2 = pnand %p10161_p0, %p10435_p1  ;;  %p10169_p6 = scmp.lt.s32.totalorder %s10167_s10, %s10160_s14 }
  0x30   : > { %p10164_p11 = pneg %p10163_p2  ;;  %p10170_p4 = por %p10169_p6, %p10168_p10 }
  0x32   : > { %p10171_p5 = pnand %p10170_p4, %p10164_p11 }
  0x34   : > { %10174 = shalt.err (!%p10171_p5)
}
  0x35   : > { %s13160_s26 = smov 64   ;;  %s13161_s16 = smov 4  }
  0x36   : > { %9868 = dma.hbm_to_vmem [thread:$0]  (!%p10414_p12), %s10423_s17, 8192, %s10426_s19, %s10429_s20, %s13160_s26, %s13160_s26, %s13161_s16  }
  0x37   : > { %p292_p6 = scmp.lt.s32.totalorder %s10305_s24, 5  ;;  %s13299_s0 = sld [smem:[#allocation116_spill]] }
  0x38   : > { %p13300_p10 = scmp.ge.s32.totalorder %s10305_s24, 1  ;;  %s225_s10 = scalar_lea.vmem [#allocation2], %s10412_s12 }
  0x39   : > { %s232_s1 = sshll.u32 %s225_s10, 4  ;;  %s13302_s17 = sand.u32 1, %s10301_s23   ;;  %s10476_s1 = int_to_ptr.vmem [resolvable:$true] %s232_s1 }
  0x3a   : > { %p10471_p11 = pnand %p13300_p10, %p292_p6  ;;  %s10480_s19 = scalar_lea.sflag [#allocation3], %s13302_s17 }
  0x3c   : > { %s13301_s15 = scalar_select %p10471_p11, 1, 0 }
  0x3d   : > { %s10467_s29 = scalar_lea.hbm %s13299_s0, %s10408_s11  ;;  %s10180_s16 = scalar_lea.hbm %s13299_s0, 32768 }
  0x3e   : > { %s10175_s26 = scalar_lea.hbm %s10467_s29, 8192  ;;  %p10181_p8 = scmp.lt.u32.totalorder %s10467_s29, %s13299_s0 }
  0x3f   : > { %p10176_p13 = scmp.ne.s32.totalorder %s10467_s29, %s10175_s26  ;;  %p10182_p9 = scmp.lt.u32.totalorder %s10180_s16, %s10175_s26 }
  0x40   : > { %p10184_p2 = scmp.lt.u32.totalorder %s10175_s26, %s10467_s29 }
  0x41   : > { %p10178_p3 = pnand %p10176_p13, %p10435_p1  ;;  %p10183_p0 = por %p10182_p9, %p10181_p8 }
  0x43   : > { %p10179_p7 = pneg %p10178_p3  ;;  %p10185_p4 = por %p10184_p2, %p10183_p0 }
  0x45   : > { %p10186_p5 = pnand %p10185_p4, %p10179_p7 }
  0x47   : > { %10189 = shalt.err (!%p10186_p5)
}
  0x48   : > { %s10190_s10 = scalar_lea.vmem %s10476_s1, 8192  ;;  %s10310_s17 = smov [#allocation2]  }
  0x49   : > { %p10191_p6 = scmp.ne.s32.totalorder %s10476_s1, %s10190_s10  ;;  %s10195_s18 = sshll.u32 %s10310_s17, 4  ;;  %s10196_s18 = int_to_ptr.vmem [resolvable:$false] %s10195_s18 }
  0x4a   : > { %s10197_s27 = scalar_lea.vmem %s10196_s18, 16384  ;;  %p10198_p3 = scmp.lt.s32.totalorder %s10476_s1, %s10196_s18 }
  0x4b   : > { %p10193_p10 = pnand %p10191_p6, %p10435_p1  ;;  %p10199_p11 = scmp.lt.s32.totalorder %s10197_s27, %s10190_s10 }
  0x4d   : > { %p10194_p13 = pneg %p10193_p10  ;;  %p10200_p8 = por %p10199_p11, %p10198_p3 }
  0x4f   : > { %p10201_p9 = pnand %p10200_p8, %p10194_p13 }
  0x51   : > { %10204 = shalt.err (!%p10201_p9)
}
  0x52   : > { %s13303_s30 = smov 4   ;;  %s13304_s26 = smov 64  }
  0x53   : > { %9865 = dma.hbm_to_vmem [thread:$0]  (!%p10414_p12), %s10467_s29, 8192, %s10476_s1, %s10480_s19, %s13304_s26, %s13304_s26, %s13303_s30  }
  0x54   : > { %s10511_s17 = scalar_lea.hbm %s13152_s2, %s10408_s11  ;;  %s268_s10 = scalar_lea.vmem [#allocation7], %s10412_s12 }
  0x55   : > { %s275_s18 = sshll.u32 %s268_s10, 4  ;;  %s10205_s27 = scalar_lea.hbm %s10511_s17, 8192  ;;  %s10514_s18 = int_to_ptr.vmem [resolvable:$true] %s275_s18 }
  0x56   : > { %p10206_p11 = scmp.ne.s32.totalorder %s10511_s17, %s10205_s27  ;;  %s10210_s29 = scalar_lea.hbm %s13152_s2, 32768 }
  0x57   : > { %p10211_p2 = scmp.lt.u32.totalorder %s10511_s17, %s13152_s2  ;;  %p10212_p4 = scmp.lt.u32.totalorder %s10210_s29, %s10205_s27 }
  0x58   : > { %p10208_p7 = pnand %p10206_p11, %p10435_p1  ;;  %p10214_p6 = scmp.lt.u32.totalorder %s10205_s27, %s10511_s17 }
  0x59   : > { %p10213_p5 = por %p10212_p4, %p10211_p2 }
  0x5a   : > { %p10209_p0 = pneg %p10208_p7 }
  0x5b   : > { %p10215_p10 = por %p10214_p6, %p10213_p5 }
  0x5d   : > { %p10216_p13 = pnand %p10215_p10, %p10209_p0 }
  0x5f   : > { %10219 = shalt.err (!%p10216_p13)
}
  0x60   : > { %s10220_s12 = scalar_lea.vmem %s10514_s18, 8192  ;;  %s10311_s0 = smov [#allocation7]  }
  0x61   : > { %p10221_p3 = scmp.ne.s32.totalorder %s10514_s18, %s10220_s12  ;;  %s10225_s30 = sshll.u32 %s10311_s0, 4  ;;  %s10226_s30 = int_to_ptr.vmem [resolvable:$false] %s10225_s30 }
  0x62   : > { %s10227_s26 = scalar_lea.vmem %s10226_s30, 16384  ;;  %p10228_p11 = scmp.lt.s32.totalorder %s10514_s18, %s10226_s30 }
  0x63   : > { %p10223_p8 = pnand %p10221_p3, %p10435_p1  ;;  %p10229_p7 = scmp.lt.s32.totalorder %s10227_s26, %s10220_s12 }
  0x65   : > { %p10224_p9 = pneg %p10223_p8  ;;  %p10230_p2 = por %p10229_p7, %p10228_p11 }
  0x67   : > { %p10231_p4 = pnand %p10230_p2, %p10224_p9 }
  0x69   : > { %10234 = shalt.err (!%p10231_p4)
}
  0x6a   : > { %s10312_s16 = smov 512   ;;  %s10313_s14 = smov 32  }
  0x6b   : > { %9871 = dma.hbm_to_vmem [thread:$0]  (!%p10414_p12), %s10511_s17, 8192, %s10514_s18, %s10429_s20, %s10312_s16, %s10312_s16, %s10313_s14  }
  0x6c   : > { %p13305_p1 = scmp.ne.s32.totalorder %s13301_s15, 0 }
  0x6e   : > { %296 = sbr.rel (%p13305_p1) target bundleno = 2094 (0x82e), region = 44 }
  0x75   : > { %s10541_s28 = sand.u32 1, %s10297_s22   ;;  %p13306_p0 = scmp.ne.s32.totalorder %s13293_s7, 0 }
  0x76   : > { %s10544_s10 = sshll.u32 %s10541_s28, 9  ;;  %s299_s27 = scalar_lea.sflag [#allocation3], %s10541_s28 }
  0x77   : > { %s10548_s1 = scalar_lea.vmem [#allocation2], %s10544_s10 }
  0x78   : > { %10280 = dma.done.wait (%p13306_p0), %s299_s27, 8192  }
  0x79   : > { %10282 = vsyncadd (%p13306_p0), %s299_s27, 4294959104  ;;  %s307_s13 = sand.u32 1, %s10374_s25   ;;  %s10556_s15 = scalar_lea.vmem [#allocation5], %s10544_s10 }
  0x7a   : > { %s308_s20 = scalar_lea.sflag [#allocation6], %s307_s13 }
  0x7b   : > { %10284 = dma.done.wait (%p13306_p0), %s308_s20, 16384  }
  0x7c   : > { %10286 = vsyncadd (%p13306_p0), %s308_s20, 4294950912  ;;  %v9919_v0 = vld [vmem:[%s13154_s4] sm:$0xff]   ;;  %v9920_v1 = vld [vmem:[%s13154_s4 + $0x8] sm:$0xff]   ;;  %s12291_s7 = scalar_lea.vmem [#allocation7], %s10544_s10  ;;  %s7682_s10 = sshll.u32 %s10374_s25, 4 }
  0x7d   : > { %8766 = vmatprep.subr.bf16.mxu0 %v9919_v0  ;;  %v9921_v2 = vld [vmem:[%s13154_s4 + $0x10] sm:$0xff]   ;;  %v9922_v3 = vld [vmem:[%s13154_s4 + $0x18] sm:$0xff]   ;;  %v9927_v4 = vld [vmem:[%s10548_s1] sm:$0xff]   ;;  %p367_p12 = scmp.lt.s32.totalorder %s7682_s10, 63  ;;  %s7681_s14 = sshll.u32 %s10541_s28, 7 }
  0x7e   : > { %8767 = vmatpush3.bf16.msra.mxu0 %v9919_v0  ;;  %8782 = vmatprep.mubr.bf16.mxu0 %v9927_v4  ;;  %v9923_v5 = vld [vmem:[%s13154_s4 + $0x20] sm:$0xff]   ;;  %v9924_v6 = vld [vmem:[%s13154_s4 + $0x28] sm:$0xff]   ;;  %v9925_v7 = vld [vmem:[%s13154_s4 + $0x30] sm:$0xff]   ;;  %v647_v4 = vlaneseq  ;;  %s13068_s27 = scalar_lea.vmem [#allocation8], %s7681_s14  ;;  %s7965_s13 = sshll.u32 %s10374_s25, 11 }
  0x7f   : > { %8768 = vmatprep.subr.bf16.mxu0 %v9920_v1  ;;  %v9926_v8 = vld [vmem:[%s13154_s4 + $0x38] sm:$0xff]   ;;  %v9928_v9 = vld [vmem:[%s10548_s1 + $0x8] sm:$0xff]   ;;  %v9929_v10 = vld [vmem:[%s10548_s1 + $0x10] sm:$0xff]   ;;  %s13677_s10 = smov (!%p367_p12, %s7682_s10), 63  ;;  %s7536_s20 = sshll.u32 %s13068_s27, 4  ;;  %s13105_s20 = int_to_ptr.vmem [resolvable:$true] %s7536_s20 }
  0x80   : > { %v9930_v11 = vld [vmem:[%s10548_s1 + $0x18] sm:$0xff]   ;;  %v9931_v12 = vld [vmem:[%s10548_s1 + $0x20] sm:$0xff]   ;;  %v9932_v13 = vld [vmem:[%s10548_s1 + $0x28] sm:$0xff]   ;;  %s13103_s29 = scalar_lea.hbm %s13156_s6, %s7965_s13  ;;  %s7523_s25 = scalar_lea.sflag [#allocation4], %s10541_s28 }
  0x81   : > { %v9933_v14 = vld [vmem:[%s10548_s1 + $0x30] sm:$0xff]   ;;  %v9934_v15 = vld [vmem:[%s10548_s1 + $0x38] sm:$0xff]   ;;  %v9935_v16 = vld [vmem:[%s10548_s1 + $0x40] sm:$0xff]   ;;  %s10235_s19 = scalar_lea.vmem %s13105_s20, 2048  ;;  %p13669_p6 = scmp.ne.s32.totalorder %s13294_s8, 0 }
  0x82   : > { %8769 = vmatpush3.bf16.msra.mxu0 %v9920_v1  ;;  %v9936_v17 = vld [vmem:[%s10548_s1 + $0x48] sm:$0xff]   ;;  %v9937_v18 = vld [vmem:[%s10548_s1 + $0x50] sm:$0xff]   ;;  %v9938_v19 = vld [vmem:[%s10548_s1 + $0x58] sm:$0xff]   ;;  %p10236_p5 = scmp.ne.s32.totalorder %s13105_s20, %s10235_s19 }
  0x83   : > { %8770 = vmatprep.subr.bf16.mxu0 %v9921_v2  ;;  %v9939_v20 = vld [vmem:[%s10548_s1 + $0x60] sm:$0xff]   ;;  %v9940_v21 = vld [vmem:[%s10548_s1 + $0x68] sm:$0xff]   ;;  %v9941_v22 = vld [vmem:[%s10548_s1 + $0x70] sm:$0xff]  }
  0x84   : > { %v9942_v23 = vld [vmem:[%s10548_s1 + $0x78] sm:$0xff]   ;;  %v9943_v24 = vld [vmem:[%s10548_s1 + $0x80] sm:$0xff]   ;;  %v9944_v26 = vld [vmem:[%s10548_s1 + $0x88] sm:$0xff]   ;;  %p10237_p10 = pnand %p10236_p5, %p13669_p6 }
  0x85   : > { %v9975_v25 = vld [vmem:[%s13154_s4 + $0x40] sm:$0xff]   ;;  %v9945_v27 = vld [vmem:[%s10548_s1 + $0x90] sm:$0xff]   ;;  %v9978_v28 = vld [vmem:[%s13154_s4 + $0x48] sm:$0xff]  }
  0x86   : > { %8771 = vmatpush3.bf16.msra.mxu0 %v9921_v2  ;;  %8910 = vmatprep.subr.bf16.mxu1 %v9975_v25  ;;  %v9979_v29 = vld [vmem:[%s13154_s4 + $0x50] sm:$0xff]   ;;  %v9946_v30 = vld [vmem:[%s10548_s1 + $0x98] sm:$0xff]   ;;  %v9947_v31 = vld [vmem:[%s10548_s1 + $0xa0] sm:$0xff]   ;;  %p10238_p13 = pneg %p10237_p10 }
  0x87   : > { %8772 = vmatprep.subr.bf16.mxu0 %v9922_v3  ;;  %8911 = vmatpush3.bf16.msra.mxu1 %v9975_v25  ;;  %v9982_v32 = vld [vmem:[%s13154_s4 + $0x58] sm:$0xff]   ;;  %v9983_v33 = vld [vmem:[%s13154_s4 + $0x60] sm:$0xff]   ;;  %v9948_v34 = vld [vmem:[%s10548_s1 + $0xa8] sm:$0xff]  }
  0x88   : > { %8912 = vmatprep.subr.bf16.mxu1 %v9978_v28  ;;  %v9949_v35 = vld [vmem:[%s10548_s1 + $0xb0] sm:$0xff]   ;;  %v9986_v36 = vld [vmem:[%s13154_s4 + $0x68] sm:$0xff]   ;;  %v9950_v37 = vld [vmem:[%s10548_s1 + $0xb8] sm:$0xff]  }
  0x89   : > { %v9987_v38 = vld [vmem:[%s13154_s4 + $0x70] sm:$0xff]   ;;  %v9951_v39 = vld [vmem:[%s10548_s1 + $0xc0] sm:$0xff]   ;;  %v9990_v40 = vld [vmem:[%s13154_s4 + $0x78] sm:$0xff]  }
  0x8a   : > { %8773 = vmatpush3.bf16.msra.mxu0 %v9922_v3  ;;  %v9952_v41 = vld [vmem:[%s10548_s1 + $0xc8] sm:$0xff]   ;;  %v9953_v42 = vld [vmem:[%s10548_s1 + $0xd0] sm:$0xff]   ;;  %v9954_v43 = vld [vmem:[%s10548_s1 + $0xd8] sm:$0xff]  }
  0x8b   : > { %8774 = vmatprep.subr.bf16.mxu0 %v9923_v5  ;;  %8913 = vmatpush3.bf16.msra.mxu1 %v9978_v28  ;;  %v9955_v44 = vld [vmem:[%s10548_s1 + $0xe0] sm:$0xff]   ;;  %v9956_v45 = vld [vmem:[%s10548_s1 + $0xe8] sm:$0xff]   ;;  %v9957_v46 = vld [vmem:[%s10548_s1 + $0xf0] sm:$0xff]  }
  0x8c   : > { %8914 = vmatprep.subr.bf16.mxu1 %v9979_v29  ;;  %v9958_v47 = vld [vmem:[%s10548_s1 + $0xf8] sm:$0xff]   ;;  %v9959_v48 = vld [vmem:[%s10548_s1 + $0x100] sm:$0xff]   ;;  %v9960_v49 = vld [vmem:[%s10548_s1 + $0x108] sm:$0xff]  }
  0x8d   : > { %v9961_v50 = vld [vmem:[%s10548_s1 + $0x110] sm:$0xff]   ;;  %v9962_v51 = vld [vmem:[%s10548_s1 + $0x118] sm:$0xff]   ;;  %v9963_v52 = vld [vmem:[%s10548_s1 + $0x120] sm:$0xff]  }
  0x8e   : > { %8775 = vmatpush3.bf16.msra.mxu0 %v9923_v5  ;;  %v9964_v53 = vld [vmem:[%s10548_s1 + $0x128] sm:$0xff]   ;;  %v9965_v54 = vld [vmem:[%s10548_s1 + $0x130] sm:$0xff]   ;;  %v9966_v55 = vld [vmem:[%s10548_s1 + $0x138] sm:$0xff]  }
  0x8f   : > { %8776 = vmatprep.subr.bf16.mxu0 %v9924_v6  ;;  %8915 = vmatpush3.bf16.msra.mxu1 %v9979_v29  ;;  %v9967_v56 = vld [vmem:[%s10548_s1 + $0x140] sm:$0xff]   ;;  %v9968_v57 = vld [vmem:[%s10548_s1 + $0x148] sm:$0xff]   ;;  %v9969_v58 = vld [vmem:[%s10548_s1 + $0x150] sm:$0xff]  }
  0x90   : > { %8916 = vmatprep.subr.bf16.mxu1 %v9982_v32  ;;  %v9970_v59 = vld [vmem:[%s10548_s1 + $0x158] sm:$0xff]   ;;  %v9971_v60 = vld [vmem:[%s10548_s1 + $0x160] sm:$0xff]   ;;  %v9972_v61 = vld [vmem:[%s10548_s1 + $0x168] sm:$0xff]  }
  0x91   : > { %v9973_v62 = vld [vmem:[%s10548_s1 + $0x170] sm:$0xff]   ;;  %v9974_v63 = vld [vmem:[%s10548_s1 + $0x178] sm:$0xff]   ;;  %v9976_v0 = vld [vmem:[%s10548_s1 + $0x180] sm:$0xff]  }
  0x92   : > { %8777 = vmatpush3.bf16.msra.mxu0 %v9924_v6  ;;  %v9977_v1 = vld [vmem:[%s10548_s1 + $0x188] sm:$0xff]   ;;  %v9980_v2 = vld [vmem:[%s10548_s1 + $0x190] sm:$0xff]   ;;  %v9981_v3 = vld [vmem:[%s10548_s1 + $0x198] sm:$0xff]   ;;  %v10663_v6 = vshrl.u32 %v647_v4, 7 }
  0x93   : > { %8778 = vmatprep.subr.bf16.mxu0 %v9925_v7  ;;  %8917 = vmatpush3.bf16.msra.mxu1 %v9982_v32  ;;  %v9984_v5 = vld [vmem:[%s10548_s1 + $0x1a0] sm:$0xff]  }
  0x94   : > { %8918 = vmatprep.subr.bf16.mxu1 %v9983_v33  ;;  %13307 = vst [vmem:[#allocation14_spill] sm:$0xff] %v10663_v6 }
  0x96   : > { %8779 = vmatpush3.bf16.msra.mxu0 %v9925_v7  ;;  %v9985_v7 = vld [vmem:[%s10548_s1 + $0x1a8] sm:$0xff]  }
  0x97   : > { %8780 = vmatprep.subr.bf16.mxu0 %v9926_v8  ;;  %8919 = vmatpush3.bf16.msra.mxu1 %v9983_v33 }
  0x98   : > { %8920 = vmatprep.subr.bf16.mxu1 %v9986_v36 }
  0x9a   : > { %8781 = vmatpush3.bf16.msra.mxu0 %v9926_v8  ;;  %v649_v8 = vsub.s32 0, %v10663_v6 }
  0x9b   : > { %8921 = vmatpush3.bf16.msra.mxu1 %v9986_v36 }
  0x9c   : > { %8922 = vmatprep.subr.bf16.mxu1 %v9987_v38 }
  0x9d   : > { %8783 = vmatmul.mubr.bf16.vlgmr.msra.gmra.mrb[0].mxu0 %v9928_v9  ;;  %v502_v9 = vld [vmem:[%s13155_s5] sm:$0xf] }
  0x9e   : > { %8786 = vmatprep.mubr.bf16.mxu0 %v9929_v10  ;;  %v9988_v10 = vld [vmem:[%s10548_s1 + $0x1b0] sm:$0xff]  }
  0x9f   : > { %8923 = vmatpush3.bf16.msra.mxu1 %v9987_v38 }
  0xa0   : > { %8924 = vmatprep.subr.bf16.mxu1 %v9990_v40 }
  0xa3   : > { %8925 = vmatpush3.bf16.msra.mxu1 %v9990_v40 }
  0xa5   : > { %8787 = vmatmul.mubr.bf16.gmra.mrb[4].mxu0 %v9930_v11  ;;  %v10671_v11 = vrot.slane %v502_v9, %v649_v8 }
  0xa6   : > { %8790 = vmatprep.mubr.bf16.mxu0 %v9931_v12 }
  0xad   : > { %8791 = vmatmul.mubr.bf16.gmra.mrb[8].mxu0 %v9932_v13 }
  0xae   : > { %8794 = vmatprep.mubr.bf16.mxu0 %v9933_v14 }
  0xb5   : > { %8795 = vmatmul.mubr.bf16.gmra.mrb[12].mxu0 %v9934_v15  ;;  %v9989_v15 = vld [vmem:[%s10548_s1 + $0x1b8] sm:$0xff]  }
  0xb6   : > { %8798 = vmatprep.mubr.bf16.mxu0 %v9935_v16 }
  0xbd   : > { %8799 = vmatmul.mubr.bf16.gmra.mrb[16].mxu0 %v9936_v17 }
  0xbe   : > { %8802 = vmatprep.mubr.bf16.mxu0 %v9937_v18  ;;  %v9991_v18 = vld [vmem:[%s10548_s1 + $0x1c0] sm:$0xff]  }
  0xc5   : > { %8803 = vmatmul.mubr.bf16.gmra.mrb[20].mxu0 %v9938_v19 }
  0xc6   : > { %8806 = vmatprep.mubr.bf16.mxu0 %v9939_v20 }
  0xcd   : > { %8807 = vmatmul.mubr.bf16.gmra.mrb[24].mxu0 %v9940_v21 }
  0xce   : > { %8810 = vmatprep.mubr.bf16.mxu0 %v9941_v22 }
  0xd5   : > { %8811 = vmatmul.mubr.bf16.gmra.mrb[28].mxu0 %v9942_v23 }
  0xd6   : > { %8814 = vmatprep.mubr.bf16.mxu0 %v9943_v24 }
  0xdd   : > { %8815 = vmatmul.mubr.bf16.gmra.mrb[32].mxu0 %v9944_v26 }
  0xde   : > { %8818 = vmatprep.mubr.bf16.mxu0 %v9945_v27 }
  0xe5   : > { %8819 = vmatmul.mubr.bf16.gmra.mrb[36].mxu0 %v9946_v30 }
  0xe6   : > { %8822 = vmatprep.mubr.bf16.mxu0 %v9947_v31  ;;  %v9992_v31 = vld [vmem:[%s10548_s1 + $0x1c8] sm:$0xff]  }
  0xed   : > { %8823 = vmatmul.mubr.bf16.gmra.mrb[40].mxu0 %v9948_v34  ;;  %v9993_v34 = vld [vmem:[%s10548_s1 + $0x1d0] sm:$0xff]  }
  0xee   : > { %8826 = vmatprep.mubr.bf16.mxu0 %v9949_v35 }
  0xf5   : > { %8827 = vmatmul.mubr.bf16.gmra.mrb[44].mxu0 %v9950_v37 }
  0xf6   : > { %8830 = vmatprep.mubr.bf16.mxu0 %v9951_v39 }
  0xfd   : > { %8831 = vmatmul.mubr.bf16.gmra.mrb[48].mxu0 %v9952_v41 }
  0xfe   : > { %8834 = vmatprep.mubr.bf16.mxu0 %v9953_v42 }
 0x105   : > { %8835 = vmatmul.mubr.bf16.gmra.mrb[52].mxu0 %v9954_v43 }
 0x106   : > { %8838 = vmatprep.mubr.bf16.mxu0 %v9955_v44 }
 0x10d   : > { %8839 = vmatmul.mubr.bf16.gmra.mrb[56].mxu0 %v9956_v45 }
 0x10e   : > { %8842 = vmatprep.mubr.bf16.mxu0 %v9957_v46 }
 0x115   : > { %8843 = vmatmul.mubr.bf16.gmra.mrb[60].mxu0 %v9958_v47  ;;  %v9994_v47 = vld [vmem:[%s10548_s1 + $0x1d8] sm:$0xff]  }
 0x116   : > { %8846 = vmatprep.mubr.bf16.mxu0 %v9959_v48 }
 0x11d   : > { %8847 = vmatmul.mubr.bf16.gmra.mrb[64].mxu0 %v9960_v49 }
 0x11e   : > { %8850 = vmatprep.mubr.bf16.mxu0 %v9961_v50  ;;  %v9995_v50 = vld [vmem:[%s10548_s1 + $0x1e0] sm:$0xff]  }
 0x125   : > { %8851 = vmatmul.mubr.bf16.gmra.mrb[68].mxu0 %v9962_v51 }
 0x126   : > { %8854 = vmatprep.mubr.bf16.mxu0 %v9963_v52 }
 0x12d   : > { %8855 = vmatmul.mubr.bf16.gmra.mrb[72].mxu0 %v9964_v53 }
 0x12e   : > { %8858 = vmatprep.mubr.bf16.mxu0 %v9965_v54 }
 0x135   : > { %8859 = vmatmul.mubr.bf16.gmra.mrb[76].mxu0 %v9966_v55 }
 0x136   : > { %8862 = vmatprep.mubr.bf16.mxu0 %v9967_v56 }
 0x13d   : > { %8863 = vmatmul.mubr.bf16.gmra.mrb[80].mxu0 %v9968_v57 }
 0x13e   : > { %8866 = vmatprep.mubr.bf16.mxu0 %v9969_v58 }
 0x145   : > { %8867 = vmatmul.mubr.bf16.gmra.mrb[84].mxu0 %v9970_v59 }
 0x146   : > { %8870 = vmatprep.mubr.bf16.mxu0 %v9971_v60 }
 0x14d   : > { %8871 = vmatmul.mubr.bf16.gmra.mrb[88].mxu0 %v9972_v61 }
 0x14e   : > { %8874 = vmatprep.mubr.bf16.mxu0 %v9973_v62 }
 0x155   : > { %8875 = vmatmul.mubr.bf16.gmra.mrb[92].mxu0 %v9974_v63  ;;  %v9996_v63 = vld [vmem:[%s10548_s1 + $0x1e8] sm:$0xff]  }
 0x156   : > { %8878 = vmatprep.mubr.bf16.mxu0 %v9976_v0 }
 0x15d   : > { %8879 = vmatmul.mubr.bf16.gmra.mrb[96].mxu0 %v9977_v1 }
 0x15e   : > { %8882 = vmatprep.mubr.bf16.mxu0 %v9980_v2  ;;  %v9997_v2 = vld [vmem:[%s10548_s1 + $0x1f0] sm:$0xff]  }
 0x165   : > { %8883 = vmatmul.mubr.bf16.gmra.mrb[100].mxu0 %v9981_v3 }
 0x166   : > { %8886 = vmatprep.mubr.bf16.mxu0 %v9984_v5 }
 0x16d   : > { %8887 = vmatmul.mubr.bf16.gmra.mrb[104].mxu0 %v9985_v7 }
 0x16e   : > { %8890 = vmatprep.mubr.bf16.mxu0 %v9988_v10 }
 0x170   : > { %v8784_v12 = vpop.f32.mrb[0].mxu0 }
 0x171   : > { %v1126_v13 = vadd.f32 %v8784_v12, %v10671_v11  ;;  %v1117_v14 = vpop.f32.mrb[1].mxu0 }
 0x172   : > { %v1118_v16 = vadd.f32 %v1117_v14, %v10671_v11  ;;  %v8785_v17 = vpop.f32.mrb[2].mxu0 }
 0x173   : > { %v1129_v19 = vadd.f32 %v8785_v17, %v10671_v11  ;;  %v1120_v20 = vpop.f32.mrb[3].mxu0  ;;  %v1630_v22 = vmax.f32 %v1126_v13, 0.0  ;;  %v9998_v17 = vld [vmem:[%s10548_s1 + $0x1f8] sm:$0xff]   ;;  %s10315_s1 = smov [#allocation8]  }
 0x174   : > { %v1121_v21 = vadd.f32 %v1120_v20, %v10671_v11  ;;  %v1628_v24 = vmax.f32 %v1118_v16, 0.0  ;;  %s10239_s11 = sshll.u32 %s10315_s1, 4  ;;  %s10240_s11 = int_to_ptr.vmem [resolvable:$false] %s10239_s11 }
 0x175   : > { %v1631_v23 = vmax.f32 %v1129_v19, 0.0  ;;  %8891 = vmatmul.mubr.bf16.gmra.mrb[108].mxu0 %v9989_v15  ;;  %s10241_s12 = scalar_lea.vmem %s10240_s11, 4096  ;;  %p10242_p3 = scmp.lt.s32.totalorder %s13105_s20, %s10240_s11 }
 0x176   : > { %v1629_v25 = vmax.f32 %v1121_v21, 0.0  ;;  %8894 = vmatprep.mubr.bf16.mxu0 %v9991_v18  ;;  %p10243_p8 = scmp.lt.s32.totalorder %s10241_s12, %s10235_s19 }
 0x177   : > { %v10679_v26 = vpack.c.bf16 %v1631_v23, %v1630_v22 }
 0x178   : > { %v8788_v27 = vpop.f32.mrb[4].mxu0  ;;  %v10681_v28 = vpack.c.bf16 %v1629_v25, %v1628_v24  ;;  %p10244_p9 = por %p10243_p8, %p10242_p3 }
 0x179   : > { %v1142_v29 = vadd.f32 %v8788_v27, %v10671_v11  ;;  %v1133_v30 = vpop.f32.mrb[5].mxu0 }
 0x17a   : > { %v1134_v32 = vadd.f32 %v1133_v30, %v10671_v11  ;;  %v8789_v33 = vpop.f32.mrb[6].mxu0  ;;  %8926 = vmatprep.mubr.bf16.mxu1 %v10681_v28  ;;  %p10245_p11 = pnand %p10244_p9, %p10238_p13 }
 0x17b   : > { %v1145_v35 = vadd.f32 %v8789_v33, %v10671_v11  ;;  %v1136_v36 = vpop.f32.mrb[7].mxu0  ;;  %8927 = vmatmul.mubr.bf16.vlgmr.msra.gmra.mrb[0].mxu1 %v10679_v26  ;;  %v1634_v38 = vmax.f32 %v1142_v29, 0.0 }
 0x17c   : > { %v1137_v37 = vadd.f32 %v1136_v36, %v10671_v11  ;;  %v1632_v40 = vmax.f32 %v1134_v32, 0.0 }
 0x17d   : > { %v1635_v39 = vmax.f32 %v1145_v35, 0.0  ;;  %8895 = vmatmul.mubr.bf16.gmra.mrb[112].mxu0 %v9992_v31 }
 0x17e   : > { %v1633_v41 = vmax.f32 %v1137_v37, 0.0  ;;  %8898 = vmatprep.mubr.bf16.mxu0 %v9993_v34 }
 0x17f   : > { %v10691_v42 = vpack.c.bf16 %v1635_v39, %v1634_v38 }
 0x180   : > { %v8792_v43 = vpop.f32.mrb[8].mxu0  ;;  %v10693_v44 = vpack.c.bf16 %v1633_v41, %v1632_v40 }
 0x181   : > { %v1158_v45 = vadd.f32 %v8792_v43, %v10671_v11  ;;  %v1149_v46 = vpop.f32.mrb[9].mxu0 }
 0x182   : > { %v1150_v48 = vadd.f32 %v1149_v46, %v10671_v11  ;;  %v8793_v49 = vpop.f32.mrb[10].mxu0  ;;  %8930 = vmatprep.mubr.bf16.mxu1 %v10693_v44 }
 0x183   : > { %v1161_v51 = vadd.f32 %v8793_v49, %v10671_v11  ;;  %v1152_v52 = vpop.f32.mrb[11].mxu0  ;;  %8931 = vmatmul.mubr.bf16.gmra.mrb[4].mxu1 %v10691_v42  ;;  %v1638_v54 = vmax.f32 %v1158_v45, 0.0 }
 0x184   : > { %v1153_v53 = vadd.f32 %v1152_v52, %v10671_v11  ;;  %v1636_v56 = vmax.f32 %v1150_v48, 0.0 }
 0x185   : > { %v1639_v55 = vmax.f32 %v1161_v51, 0.0  ;;  %8899 = vmatmul.mubr.bf16.gmra.mrb[116].mxu0 %v9994_v47 }
 0x186   : > { %v1637_v57 = vmax.f32 %v1153_v53, 0.0  ;;  %8902 = vmatprep.mubr.bf16.mxu0 %v9995_v50 }
 0x187   : > { %v10703_v58 = vpack.c.bf16 %v1639_v55, %v1638_v54 }
 0x188   : > { %v8796_v59 = vpop.f32.mrb[12].mxu0  ;;  %v10705_v60 = vpack.c.bf16 %v1637_v57, %v1636_v56 }
 0x189   : > { %v1174_v61 = vadd.f32 %v8796_v59, %v10671_v11  ;;  %v1165_v62 = vpop.f32.mrb[13].mxu0 }
 0x18a   : > { %v1166_v0 = vadd.f32 %v1165_v62, %v10671_v11  ;;  %v8797_v1 = vpop.f32.mrb[14].mxu0  ;;  %8934 = vmatprep.mubr.bf16.mxu1 %v10705_v60 }
 0x18b   : > { %v1177_v3 = vadd.f32 %v8797_v1, %v10671_v11  ;;  %v1168_v4 = vpop.f32.mrb[15].mxu0  ;;  %8935 = vmatmul.mubr.bf16.gmra.mrb[8].mxu1 %v10703_v58  ;;  %v1642_v7 = vmax.f32 %v1174_v61, 0.0 }
 0x18c   : > { %v1169_v5 = vadd.f32 %v1168_v4, %v10671_v11  ;;  %v1640_v9 = vmax.f32 %v1166_v0, 0.0 }
 0x18d   : > { %v1643_v8 = vmax.f32 %v1177_v3, 0.0  ;;  %8903 = vmatmul.mubr.bf16.gmra.mrb[120].mxu0 %v9996_v63 }
 0x18e   : > { %v1641_v10 = vmax.f32 %v1169_v5, 0.0  ;;  %8906 = vmatprep.mubr.bf16.mxu0 %v9997_v2 }
 0x18f   : > { %v10715_v12 = vpack.c.bf16 %v1643_v8, %v1642_v7 }
 0x190   : > { %v8800_v13 = vpop.f32.mrb[16].mxu0  ;;  %v10717_v14 = vpack.c.bf16 %v1641_v10, %v1640_v9 }
 0x191   : > { %v1190_v15 = vadd.f32 %v8800_v13, %v10671_v11  ;;  %v1181_v16 = vpop.f32.mrb[17].mxu0 }
 0x192   : > { %v1182_v18 = vadd.f32 %v1181_v16, %v10671_v11  ;;  %v8801_v19 = vpop.f32.mrb[18].mxu0  ;;  %8938 = vmatprep.mubr.bf16.mxu1 %v10717_v14 }
 0x193   : > { %v1193_v20 = vadd.f32 %v8801_v19, %v10671_v11  ;;  %v1184_v21 = vpop.f32.mrb[19].mxu0  ;;  %8939 = vmatmul.mubr.bf16.gmra.mrb[12].mxu1 %v10715_v12  ;;  %v1646_v23 = vmax.f32 %v1190_v15, 0.0 }
 0x194   : > { %v1185_v22 = vadd.f32 %v1184_v21, %v10671_v11  ;;  %v1644_v25 = vmax.f32 %v1182_v18, 0.0 }
 0x195   : > { %v1647_v24 = vmax.f32 %v1193_v20, 0.0  ;;  %8907 = vmatmul.mubr.bf16.gmra.mrb[124].mxu0 %v9998_v17 }
 0x196   : > { %v1645_v27 = vmax.f32 %v1185_v22, 0.0 }
 0x197   : > { %v10726_v29 = vpack.c.bf16 %v1647_v24, %v1646_v23 }
 0x198   : > { %v8804_v30 = vpop.f32.mrb[20].mxu0  ;;  %v10728_v31 = vpack.c.bf16 %v1645_v27, %v1644_v25 }
 0x199   : > { %v1206_v32 = vadd.f32 %v8804_v30, %v10671_v11  ;;  %v1197_v33 = vpop.f32.mrb[21].mxu0 }
 0x19a   : > { %v1198_v34 = vadd.f32 %v1197_v33, %v10671_v11  ;;  %v8805_v35 = vpop.f32.mrb[22].mxu0  ;;  %8942 = vmatprep.mubr.bf16.mxu1 %v10728_v31 }
 0x19b   : > { %v1209_v36 = vadd.f32 %v8805_v35, %v10671_v11  ;;  %v1200_v37 = vpop.f32.mrb[23].mxu0  ;;  %8943 = vmatmul.mubr.bf16.gmra.mrb[16].mxu1 %v10726_v29  ;;  %v1650_v39 = vmax.f32 %v1206_v32, 0.0 }
 0x19c   : > { %v1201_v38 = vadd.f32 %v1200_v37, %v10671_v11  ;;  %v1648_v41 = vmax.f32 %v1198_v34, 0.0 }
 0x19d   : > { %v1651_v40 = vmax.f32 %v1209_v36, 0.0 }
 0x19e   : > { %v1649_v43 = vmax.f32 %v1201_v38, 0.0 }
 0x19f   : > { %v10736_v45 = vpack.c.bf16 %v1651_v40, %v1650_v39 }
 0x1a0   : > { %v8808_v46 = vpop.f32.mrb[24].mxu0  ;;  %v10738_v47 = vpack.c.bf16 %v1649_v43, %v1648_v41 }
 0x1a1   : > { %v1222_v48 = vadd.f32 %v8808_v46, %v10671_v11  ;;  %v1213_v49 = vpop.f32.mrb[25].mxu0 }
 0x1a2   : > { %v1214_v50 = vadd.f32 %v1213_v49, %v10671_v11  ;;  %v8809_v51 = vpop.f32.mrb[26].mxu0  ;;  %8946 = vmatprep.mubr.bf16.mxu1 %v10738_v47 }
 0x1a3   : > { %v1225_v52 = vadd.f32 %v8809_v51, %v10671_v11  ;;  %v1216_v53 = vpop.f32.mrb[27].mxu0  ;;  %8947 = vmatmul.mubr.bf16.gmra.mrb[20].mxu1 %v10736_v45  ;;  %v1654_v55 = vmax.f32 %v1222_v48, 0.0 }
 0x1a4   : > { %v1217_v54 = vadd.f32 %v1216_v53, %v10671_v11  ;;  %v1652_v57 = vmax.f32 %v1214_v50, 0.0 }
 0x1a5   : > { %v1655_v56 = vmax.f32 %v1225_v52, 0.0 }
 0x1a6   : > { %v1653_v59 = vmax.f32 %v1217_v54, 0.0 }
 0x1a7   : > { %v10746_v61 = vpack.c.bf16 %v1655_v56, %v1654_v55 }
 0x1a8   : > { %v8812_v62 = vpop.f32.mrb[28].mxu0  ;;  %v10748_v63 = vpack.c.bf16 %v1653_v59, %v1652_v57 }
 0x1a9   : > { %v1238_v0 = vadd.f32 %v8812_v62, %v10671_v11  ;;  %v1229_v1 = vpop.f32.mrb[29].mxu0 }
 0x1aa   : > { %v1230_v2 = vadd.f32 %v1229_v1, %v10671_v11  ;;  %v8813_v3 = vpop.f32.mrb[30].mxu0  ;;  %8950 = vmatprep.mubr.bf16.mxu1 %v10748_v63 }
 0x1ab   : > { %v1241_v4 = vadd.f32 %v8813_v3, %v10671_v11  ;;  %v1232_v5 = vpop.f32.mrb[31].mxu0  ;;  %8951 = vmatmul.mubr.bf16.gmra.mrb[24].mxu1 %v10746_v61  ;;  %v1658_v8 = vmax.f32 %v1238_v0, 0.0 }
 0x1ac   : > { %v1233_v7 = vadd.f32 %v1232_v5, %v10671_v11  ;;  %v1656_v10 = vmax.f32 %v1230_v2, 0.0 }
 0x1ad   : > { %v1659_v9 = vmax.f32 %v1241_v4, 0.0 }
 0x1ae   : > { %v1657_v13 = vmax.f32 %v1233_v7, 0.0 }
 0x1af   : > { %v10756_v15 = vpack.c.bf16 %v1659_v9, %v1658_v8 }
 0x1b0   : > { %v8816_v16 = vpop.f32.mrb[32].mxu0  ;;  %v10758_v17 = vpack.c.bf16 %v1657_v13, %v1656_v10 }
 0x1b1   : > { %v1254_v18 = vadd.f32 %v8816_v16, %v10671_v11  ;;  %v1245_v19 = vpop.f32.mrb[33].mxu0 }
 0x1b2   : > { %v1246_v20 = vadd.f32 %v1245_v19, %v10671_v11  ;;  %v8817_v21 = vpop.f32.mrb[34].mxu0  ;;  %8954 = vmatprep.mubr.bf16.mxu1 %v10758_v17 }
 0x1b3   : > { %v1257_v22 = vadd.f32 %v8817_v21, %v10671_v11  ;;  %v1248_v23 = vpop.f32.mrb[35].mxu0  ;;  %8955 = vmatmul.mubr.bf16.gmra.mrb[28].mxu1 %v10756_v15  ;;  %v1662_v25 = vmax.f32 %v1254_v18, 0.0 }
 0x1b4   : > { %v1249_v24 = vadd.f32 %v1248_v23, %v10671_v11  ;;  %v1660_v30 = vmax.f32 %v1246_v20, 0.0 }
 0x1b5   : > { %v1663_v27 = vmax.f32 %v1257_v22, 0.0 }
 0x1b6   : > { %v1661_v32 = vmax.f32 %v1249_v24, 0.0 }
 0x1b7   : > { %v10766_v33 = vpack.c.bf16 %v1663_v27, %v1662_v25 }
 0x1b8   : > { %v8820_v34 = vpop.f32.mrb[36].mxu0  ;;  %v10768_v35 = vpack.c.bf16 %v1661_v32, %v1660_v30 }
 0x1b9   : > { %v1270_v36 = vadd.f32 %v8820_v34, %v10671_v11  ;;  %v1261_v37 = vpop.f32.mrb[37].mxu0 }
 0x1ba   : > { %v1262_v38 = vadd.f32 %v1261_v37, %v10671_v11  ;;  %v8821_v39 = vpop.f32.mrb[38].mxu0  ;;  %8958 = vmatprep.mubr.bf16.mxu1 %v10768_v35 }
 0x1bb   : > { %v1273_v40 = vadd.f32 %v8821_v39, %v10671_v11  ;;  %v1264_v41 = vpop.f32.mrb[39].mxu0  ;;  %8959 = vmatmul.mubr.bf16.gmra.mrb[32].mxu1 %v10766_v33  ;;  %v1666_v46 = vmax.f32 %v1270_v36, 0.0 }
 0x1bc   : > { %v1265_v43 = vadd.f32 %v1264_v41, %v10671_v11  ;;  %v1664_v49 = vmax.f32 %v1262_v38, 0.0 }
 0x1bd   : > { %v1667_v48 = vmax.f32 %v1273_v40, 0.0 }
 0x1be   : > { %v1665_v50 = vmax.f32 %v1265_v43, 0.0 }
 0x1bf   : > { %v10776_v51 = vpack.c.bf16 %v1667_v48, %v1666_v46 }
 0x1c0   : > { %v8824_v52 = vpop.f32.mrb[40].mxu0  ;;  %v10778_v53 = vpack.c.bf16 %v1665_v50, %v1664_v49 }
 0x1c1   : > { %v1286_v54 = vadd.f32 %v8824_v52, %v10671_v11  ;;  %v1277_v55 = vpop.f32.mrb[41].mxu0 }
 0x1c2   : > { %v1278_v56 = vadd.f32 %v1277_v55, %v10671_v11  ;;  %v8825_v57 = vpop.f32.mrb[42].mxu0  ;;  %8962 = vmatprep.mubr.bf16.mxu1 %v10778_v53 }
 0x1c3   : > { %v1289_v59 = vadd.f32 %v8825_v57, %v10671_v11  ;;  %v1280_v62 = vpop.f32.mrb[43].mxu0  ;;  %8963 = vmatmul.mubr.bf16.gmra.mrb[36].mxu1 %v10776_v51  ;;  %v1670_v1 = vmax.f32 %v1286_v54, 0.0 }
 0x1c4   : > { %v1281_v0 = vadd.f32 %v1280_v62, %v10671_v11  ;;  %v1668_v3 = vmax.f32 %v1278_v56, 0.0 }
 0x1c5   : > { %v1671_v2 = vmax.f32 %v1289_v59, 0.0 }
 0x1c6   : > { %v1669_v4 = vmax.f32 %v1281_v0, 0.0 }
 0x1c7   : > { %v10786_v5 = vpack.c.bf16 %v1671_v2, %v1670_v1 }
 0x1c8   : > { %v8828_v7 = vpop.f32.mrb[44].mxu0  ;;  %v10788_v8 = vpack.c.bf16 %v1669_v4, %v1668_v3 }
 0x1c9   : > { %v1302_v9 = vadd.f32 %v8828_v7, %v10671_v11  ;;  %v1293_v10 = vpop.f32.mrb[45].mxu0 }
 0x1ca   : > { %v1294_v13 = vadd.f32 %v1293_v10, %v10671_v11  ;;  %v8829_v16 = vpop.f32.mrb[46].mxu0  ;;  %8966 = vmatprep.mubr.bf16.mxu1 %v10788_v8 }
 0x1cb   : > { %v1305_v18 = vadd.f32 %v8829_v16, %v10671_v11  ;;  %v1296_v19 = vpop.f32.mrb[47].mxu0  ;;  %8967 = vmatmul.mubr.bf16.gmra.mrb[40].mxu1 %v10786_v5  ;;  %v1674_v21 = vmax.f32 %v1302_v9, 0.0 }
 0x1cc   : > { %v1297_v20 = vadd.f32 %v1296_v19, %v10671_v11  ;;  %v1672_v23 = vmax.f32 %v1294_v13, 0.0 }
 0x1cd   : > { %v1675_v22 = vmax.f32 %v1305_v18, 0.0 }
 0x1ce   : > { %v1673_v24 = vmax.f32 %v1297_v20, 0.0 }
 0x1cf   : > { %v10796_v25 = vpack.c.bf16 %v1675_v22, %v1674_v21 }
 0x1d0   : > { %v8832_v27 = vpop.f32.mrb[48].mxu0  ;;  %v10798_v30 = vpack.c.bf16 %v1673_v24, %v1672_v23 }
 0x1d1   : > { %v1318_v32 = vadd.f32 %v8832_v27, %v10671_v11  ;;  %v1309_v34 = vpop.f32.mrb[49].mxu0 }
 0x1d2   : > { %v1310_v36 = vadd.f32 %v1309_v34, %v10671_v11  ;;  %v8833_v37 = vpop.f32.mrb[50].mxu0  ;;  %8970 = vmatprep.mubr.bf16.mxu1 %v10798_v30 }
 0x1d3   : > { %v1321_v38 = vadd.f32 %v8833_v37, %v10671_v11  ;;  %v1312_v39 = vpop.f32.mrb[51].mxu0  ;;  %8971 = vmatmul.mubr.bf16.gmra.mrb[44].mxu1 %v10796_v25  ;;  %v1678_v41 = vmax.f32 %v1318_v32, 0.0 }
 0x1d4   : > { %v1313_v40 = vadd.f32 %v1312_v39, %v10671_v11  ;;  %v1676_v46 = vmax.f32 %v1310_v36, 0.0 }
 0x1d5   : > { %v1679_v43 = vmax.f32 %v1321_v38, 0.0 }
 0x1d6   : > { %v1677_v48 = vmax.f32 %v1313_v40, 0.0 }
 0x1d7   : > { %v10806_v49 = vpack.c.bf16 %v1679_v43, %v1678_v41 }
 0x1d8   : > { %v8836_v50 = vpop.f32.mrb[52].mxu0  ;;  %v10808_v52 = vpack.c.bf16 %v1677_v48, %v1676_v46 }
 0x1d9   : > { %v1334_v54 = vadd.f32 %v8836_v50, %v10671_v11  ;;  %v1325_v55 = vpop.f32.mrb[53].mxu0 }
 0x1da   : > { %v1326_v56 = vadd.f32 %v1325_v55, %v10671_v11  ;;  %v8837_v57 = vpop.f32.mrb[54].mxu0  ;;  %8974 = vmatprep.mubr.bf16.mxu1 %v10808_v52 }
 0x1db   : > { %v1337_v59 = vadd.f32 %v8837_v57, %v10671_v11  ;;  %v1328_v62 = vpop.f32.mrb[55].mxu0  ;;  %8975 = vmatmul.mubr.bf16.gmra.mrb[48].mxu1 %v10806_v49  ;;  %v1682_v1 = vmax.f32 %v1334_v54, 0.0 }
 0x1dc   : > { %v1329_v0 = vadd.f32 %v1328_v62, %v10671_v11  ;;  %v1680_v3 = vmax.f32 %v1326_v56, 0.0 }
 0x1dd   : > { %v1683_v2 = vmax.f32 %v1337_v59, 0.0 }
 0x1de   : > { %v1681_v4 = vmax.f32 %v1329_v0, 0.0 }
 0x1df   : > { %v10816_v7 = vpack.c.bf16 %v1683_v2, %v1682_v1 }
 0x1e0   : > { %v8840_v9 = vpop.f32.mrb[56].mxu0  ;;  %v10818_v10 = vpack.c.bf16 %v1681_v4, %v1680_v3 }
 0x1e1   : > { %v1350_v13 = vadd.f32 %v8840_v9, %v10671_v11  ;;  %v1341_v16 = vpop.f32.mrb[57].mxu0 }
 0x1e2   : > { %v1342_v18 = vadd.f32 %v1341_v16, %v10671_v11  ;;  %v8841_v19 = vpop.f32.mrb[58].mxu0  ;;  %8978 = vmatprep.mubr.bf16.mxu1 %v10818_v10 }
 0x1e3   : > { %v1353_v20 = vadd.f32 %v8841_v19, %v10671_v11  ;;  %v1344_v21 = vpop.f32.mrb[59].mxu0  ;;  %8979 = vmatmul.mubr.bf16.gmra.mrb[52].mxu1 %v10816_v7  ;;  %v1686_v23 = vmax.f32 %v1350_v13, 0.0 }
 0x1e4   : > { %v1345_v22 = vadd.f32 %v1344_v21, %v10671_v11  ;;  %v1684_v27 = vmax.f32 %v1342_v18, 0.0 }
 0x1e5   : > { %v1687_v24 = vmax.f32 %v1353_v20, 0.0 }
 0x1e6   : > { %v1685_v32 = vmax.f32 %v1345_v22, 0.0 }
 0x1e7   : > { %v10826_v34 = vpack.c.bf16 %v1687_v24, %v1686_v23 }
 0x1e8   : > { %v8844_v36 = vpop.f32.mrb[60].mxu0  ;;  %v10828_v37 = vpack.c.bf16 %v1685_v32, %v1684_v27 }
 0x1e9   : > { %v1366_v38 = vadd.f32 %v8844_v36, %v10671_v11  ;;  %v1357_v39 = vpop.f32.mrb[61].mxu0 }
 0x1ea   : > { %v1358_v40 = vadd.f32 %v1357_v39, %v10671_v11  ;;  %v8845_v41 = vpop.f32.mrb[62].mxu0  ;;  %8982 = vmatprep.mubr.bf16.mxu1 %v10828_v37 }
 0x1eb   : > { %v1369_v43 = vadd.f32 %v8845_v41, %v10671_v11  ;;  %v1360_v46 = vpop.f32.mrb[63].mxu0  ;;  %8983 = vmatmul.mubr.bf16.gmra.mrb[56].mxu1 %v10826_v34  ;;  %v1690_v50 = vmax.f32 %v1366_v38, 0.0 }
 0x1ec   : > { %v1361_v48 = vadd.f32 %v1360_v46, %v10671_v11  ;;  %v1688_v55 = vmax.f32 %v1358_v40, 0.0 }
 0x1ed   : > { %v1691_v54 = vmax.f32 %v1369_v43, 0.0 }
 0x1ee   : > { %v1689_v56 = vmax.f32 %v1361_v48, 0.0 }
 0x1ef   : > { %v10836_v57 = vpack.c.bf16 %v1691_v54, %v1690_v50 }
 0x1f0   : > { %v8848_v59 = vpop.f32.mrb[64].mxu0  ;;  %v10838_v62 = vpack.c.bf16 %v1689_v56, %v1688_v55 }
 0x1f1   : > { %v1382_v0 = vadd.f32 %v8848_v59, %v10671_v11  ;;  %v1373_v1 = vpop.f32.mrb[65].mxu0 }
 0x1f2   : > { %v1374_v2 = vadd.f32 %v1373_v1, %v10671_v11  ;;  %v8849_v3 = vpop.f32.mrb[66].mxu0  ;;  %8986 = vmatprep.mubr.bf16.mxu1 %v10838_v62 }
 0x1f3   : > { %v1385_v4 = vadd.f32 %v8849_v3, %v10671_v11  ;;  %v1376_v9 = vpop.f32.mrb[67].mxu0  ;;  %8987 = vmatmul.mubr.bf16.gmra.mrb[60].mxu1 %v10836_v57  ;;  %v1694_v16 = vmax.f32 %v1382_v0, 0.0 }
 0x1f4   : > { %v1377_v13 = vadd.f32 %v1376_v9, %v10671_v11  ;;  %v1692_v19 = vmax.f32 %v1374_v2, 0.0 }
 0x1f5   : > { %v1695_v18 = vmax.f32 %v1385_v4, 0.0 }
 0x1f6   : > { %v1693_v20 = vmax.f32 %v1377_v13, 0.0 }
 0x1f7   : > { %v10846_v21 = vpack.c.bf16 %v1695_v18, %v1694_v16 }
 0x1f8   : > { %v8852_v22 = vpop.f32.mrb[68].mxu0  ;;  %v10848_v23 = vpack.c.bf16 %v1693_v20, %v1692_v19 }
 0x1f9   : > { %v1398_v24 = vadd.f32 %v8852_v22, %v10671_v11  ;;  %v1389_v27 = vpop.f32.mrb[69].mxu0 }
 0x1fa   : > { %v1390_v32 = vadd.f32 %v1389_v27, %v10671_v11  ;;  %v8853_v36 = vpop.f32.mrb[70].mxu0  ;;  %8990 = vmatprep.mubr.bf16.mxu1 %v10848_v23 }
 0x1fb   : > { %v1401_v38 = vadd.f32 %v8853_v36, %v10671_v11  ;;  %v1392_v39 = vpop.f32.mrb[71].mxu0  ;;  %8991 = vmatmul.mubr.bf16.gmra.mrb[64].mxu1 %v10846_v21  ;;  %v1698_v41 = vmax.f32 %v1398_v24, 0.0 }
 0x1fc   : > { %v1393_v40 = vadd.f32 %v1392_v39, %v10671_v11  ;;  %v1696_v46 = vmax.f32 %v1390_v32, 0.0 }
 0x1fd   : > { %v1699_v43 = vmax.f32 %v1401_v38, 0.0 }
 0x1fe   : > { %v1697_v48 = vmax.f32 %v1393_v40, 0.0 }
 0x1ff   : > { %v10856_v50 = vpack.c.bf16 %v1699_v43, %v1698_v41 }
 0x200   : > { %v8856_v54 = vpop.f32.mrb[72].mxu0  ;;  %v10858_v55 = vpack.c.bf16 %v1697_v48, %v1696_v46 }
 0x201   : > { %v1414_v56 = vadd.f32 %v8856_v54, %v10671_v11  ;;  %v1405_v59 = vpop.f32.mrb[73].mxu0 }
 0x202   : > { %v1406_v0 = vadd.f32 %v1405_v59, %v10671_v11  ;;  %v8857_v1 = vpop.f32.mrb[74].mxu0  ;;  %8994 = vmatprep.mubr.bf16.mxu1 %v10858_v55 }
 0x203   : > { %v1417_v2 = vadd.f32 %v8857_v1, %v10671_v11  ;;  %v1408_v3 = vpop.f32.mrb[75].mxu0  ;;  %8995 = vmatmul.mubr.bf16.gmra.mrb[68].mxu1 %v10856_v50  ;;  %v1702_v9 = vmax.f32 %v1414_v56, 0.0 }
 0x204   : > { %v1409_v4 = vadd.f32 %v1408_v3, %v10671_v11  ;;  %v1700_v16 = vmax.f32 %v1406_v0, 0.0 }
 0x205   : > { %v1703_v13 = vmax.f32 %v1417_v2, 0.0 }
 0x206   : > { %v1701_v18 = vmax.f32 %v1409_v4, 0.0  ;;  %v9999_v4 = vld [vmem:[%s10556_s15] sm:$0xff]  }
 0x207   : > { %v10866_v19 = vpack.c.bf16 %v1703_v13, %v1702_v9  ;;  %9070 = vmatprep.mubr.bf16.mxu0 %v9999_v4 }
 0x208   : > { %v8860_v20 = vpop.f32.mrb[76].mxu0  ;;  %v10868_v22 = vpack.c.bf16 %v1701_v18, %v1700_v16 }
 0x209   : > { %v1430_v24 = vadd.f32 %v8860_v20, %v10671_v11  ;;  %v1421_v27 = vpop.f32.mrb[77].mxu0 }
 0x20a   : > { %v1422_v32 = vadd.f32 %v1421_v27, %v10671_v11  ;;  %v8861_v36 = vpop.f32.mrb[78].mxu0  ;;  %8998 = vmatprep.mubr.bf16.mxu1 %v10868_v22 }
 0x20b   : > { %v1433_v38 = vadd.f32 %v8861_v36, %v10671_v11  ;;  %v1424_v39 = vpop.f32.mrb[79].mxu0  ;;  %8999 = vmatmul.mubr.bf16.gmra.mrb[72].mxu1 %v10866_v19  ;;  %v1706_v41 = vmax.f32 %v1430_v24, 0.0 }
 0x20c   : > { %v1425_v40 = vadd.f32 %v1424_v39, %v10671_v11  ;;  %v1704_v46 = vmax.f32 %v1422_v32, 0.0 }
 0x20d   : > { %v1707_v43 = vmax.f32 %v1433_v38, 0.0 }
 0x20e   : > { %v1705_v48 = vmax.f32 %v1425_v40, 0.0 }
 0x20f   : > { %v10876_v54 = vpack.c.bf16 %v1707_v43, %v1706_v41 }
 0x210   : > { %v8864_v56 = vpop.f32.mrb[80].mxu0  ;;  %v10878_v59 = vpack.c.bf16 %v1705_v48, %v1704_v46 }
 0x211   : > { %v1446_v0 = vadd.f32 %v8864_v56, %v10671_v11  ;;  %v1437_v1 = vpop.f32.mrb[81].mxu0 }
 0x212   : > { %v1438_v2 = vadd.f32 %v1437_v1, %v10671_v11  ;;  %v8865_v3 = vpop.f32.mrb[82].mxu0  ;;  %9002 = vmatprep.mubr.bf16.mxu1 %v10878_v59 }
 0x213   : > { %v1449_v9 = vadd.f32 %v8865_v3, %v10671_v11  ;;  %v1440_v13 = vpop.f32.mrb[83].mxu0  ;;  %9003 = vmatmul.mubr.bf16.gmra.mrb[76].mxu1 %v10876_v54  ;;  %v1710_v18 = vmax.f32 %v1446_v0, 0.0 }
 0x214   : > { %v1441_v16 = vadd.f32 %v1440_v13, %v10671_v11  ;;  %v1708_v24 = vmax.f32 %v1438_v2, 0.0 }
 0x215   : > { %v1711_v20 = vmax.f32 %v1449_v9, 0.0 }
 0x216   : > { %v1709_v27 = vmax.f32 %v1441_v16, 0.0 }
 0x217   : > { %v10887_v32 = vpack.c.bf16 %v1711_v20, %v1710_v18 }
 0x218   : > { %v8868_v36 = vpop.f32.mrb[84].mxu0  ;;  %v10889_v38 = vpack.c.bf16 %v1709_v27, %v1708_v24 }
 0x219   : > { %v1462_v39 = vadd.f32 %v8868_v36, %v10671_v11  ;;  %v1453_v40 = vpop.f32.mrb[85].mxu0 }
 0x21a   : > { %v1454_v41 = vadd.f32 %v1453_v40, %v10671_v11  ;;  %v8869_v43 = vpop.f32.mrb[86].mxu0  ;;  %9006 = vmatprep.mubr.bf16.mxu1 %v10889_v38 }
 0x21b   : > { %v1465_v46 = vadd.f32 %v8869_v43, %v10671_v11  ;;  %v1456_v48 = vpop.f32.mrb[87].mxu0  ;;  %9007 = vmatmul.mubr.bf16.gmra.mrb[80].mxu1 %v10887_v32  ;;  %v1714_v0 = vmax.f32 %v1462_v39, 0.0 }
 0x21c   : > { %v1457_v56 = vadd.f32 %v1456_v48, %v10671_v11  ;;  %v1712_v2 = vmax.f32 %v1454_v41, 0.0 }
 0x21d   : > { %v1715_v1 = vmax.f32 %v1465_v46, 0.0 }
 0x21e   : > { %v1713_v3 = vmax.f32 %v1457_v56, 0.0 }
 0x21f   : > { %v10897_v4 = vpack.c.bf16 %v1715_v1, %v1714_v0 }
 0x220   : > { %v8872_v9 = vpop.f32.mrb[88].mxu0  ;;  %v10899_v13 = vpack.c.bf16 %v1713_v3, %v1712_v2 }
 0x221   : > { %13308 = vst [vmem:[#allocation15_spill] sm:$0xff] %v10897_v4  ;;  %v1478_v16 = vadd.f32 %v8872_v9, %v10671_v11  ;;  %v1469_v18 = vpop.f32.mrb[89].mxu0 }
 0x222   : > { %v1470_v20 = vadd.f32 %v1469_v18, %v10671_v11  ;;  %v8873_v24 = vpop.f32.mrb[90].mxu0  ;;  %9010 = vmatprep.mubr.bf16.mxu1 %v10899_v13 }
 0x223   : > { %v1481_v27 = vadd.f32 %v8873_v24, %v10671_v11  ;;  %v1472_v36 = vpop.f32.mrb[91].mxu0  ;;  %9011 = vmatmul.mubr.bf16.gmra.mrb[84].mxu1 %v10897_v4  ;;  %v1718_v40 = vmax.f32 %v1478_v16, 0.0 }
 0x224   : > { %v1473_v39 = vadd.f32 %v1472_v36, %v10671_v11  ;;  %v1716_v43 = vmax.f32 %v1470_v20, 0.0 }
 0x225   : > { %v1719_v41 = vmax.f32 %v1481_v27, 0.0 }
 0x226   : > { %v1717_v46 = vmax.f32 %v1473_v39, 0.0 }
 0x227   : > { %v10907_v48 = vpack.c.bf16 %v1719_v41, %v1718_v40 }
 0x228   : > { %v8876_v56 = vpop.f32.mrb[92].mxu0  ;;  %v10909_v0 = vpack.c.bf16 %v1717_v46, %v1716_v43 }
 0x229   : > { %13309 = vst [vmem:[#allocation16_spill] sm:$0xff] %v10907_v48  ;;  %v1494_v1 = vadd.f32 %v8876_v56, %v10671_v11  ;;  %v1485_v2 = vpop.f32.mrb[93].mxu0 }
 0x22a   : > { %13310 = vst [vmem:[#allocation17_spill] sm:$0xff] %v10909_v0  ;;  %v1486_v3 = vadd.f32 %v1485_v2, %v10671_v11  ;;  %v8877_v9 = vpop.f32.mrb[94].mxu0  ;;  %9014 = vmatprep.mubr.bf16.mxu1 %v10909_v0 }
 0x22b   : > { %v1497_v18 = vadd.f32 %v8877_v9, %v10671_v11  ;;  %v1488_v24 = vpop.f32.mrb[95].mxu0  ;;  %9015 = vmatmul.mubr.bf16.gmra.mrb[88].mxu1 %v10907_v48  ;;  %v1722_v20 = vmax.f32 %v1494_v1, 0.0 }
 0x22c   : > { %v1489_v16 = vadd.f32 %v1488_v24, %v10671_v11  ;;  %v1720_v36 = vmax.f32 %v1486_v3, 0.0 }
 0x22d   : > { %v1723_v27 = vmax.f32 %v1497_v18, 0.0 }
 0x22e   : > { %v1721_v39 = vmax.f32 %v1489_v16, 0.0 }
 0x22f   : > { %v10917_v40 = vpack.c.bf16 %v1723_v27, %v1722_v20 }
 0x230   : > { %v8880_v41 = vpop.f32.mrb[96].mxu0  ;;  %v10919_v43 = vpack.c.bf16 %v1721_v39, %v1720_v36 }
 0x231   : > { %13311 = vst [vmem:[#allocation18_spill] sm:$0xff] %v10917_v40  ;;  %v1510_v46 = vadd.f32 %v8880_v41, %v10671_v11  ;;  %v1501_v56 = vpop.f32.mrb[97].mxu0 }
 0x232   : > { %13312 = vst [vmem:[#allocation19_spill] sm:$0xff] %v10919_v43  ;;  %v1502_v2 = vadd.f32 %v1501_v56, %v10671_v11  ;;  %v8881_v9 = vpop.f32.mrb[98].mxu0  ;;  %9018 = vmatprep.mubr.bf16.mxu1 %v10919_v43 }
 0x233   : > { %v1513_v6 = vadd.f32 %v8881_v9, %v10671_v11  ;;  %v1504_v24 = vpop.f32.mrb[99].mxu0  ;;  %9019 = vmatmul.mubr.bf16.gmra.mrb[92].mxu1 %v10917_v40  ;;  %v1726_v3 = vmax.f32 %v1510_v46, 0.0 }
 0x234   : > { %v1505_v1 = vadd.f32 %v1504_v24, %v10671_v11  ;;  %v1724_v16 = vmax.f32 %v1502_v2, 0.0 }
 0x235   : > { %v1727_v18 = vmax.f32 %v1513_v6, 0.0 }
 0x236   : > { %v1725_v20 = vmax.f32 %v1505_v1, 0.0 }
 0x237   : > { %v10927_v27 = vpack.c.bf16 %v1727_v18, %v1726_v3 }
 0x238   : > { %v8884_v36 = vpop.f32.mrb[100].mxu0  ;;  %v10929_v39 = vpack.c.bf16 %v1725_v20, %v1724_v16 }
 0x239   : > { %13313 = vst [vmem:[#allocation20_spill] sm:$0xff] %v10927_v27  ;;  %v1526_v41 = vadd.f32 %v8884_v36, %v10671_v11  ;;  %v1517_v56 = vpop.f32.mrb[101].mxu0 }
 0x23a   : > { %13314 = vst [vmem:[#allocation21_spill] sm:$0xff] %v10929_v39  ;;  %v1518_v43 = vadd.f32 %v1517_v56, %v10671_v11  ;;  %v8885_v9 = vpop.f32.mrb[102].mxu0  ;;  %9022 = vmatprep.mubr.bf16.mxu1 %v10929_v39 }
 0x23b   : > { %v1529_v40 = vadd.f32 %v8885_v9, %v10671_v11  ;;  %v1520_v24 = vpop.f32.mrb[103].mxu0  ;;  %9023 = vmatmul.mubr.bf16.gmra.mrb[96].mxu1 %v10927_v27  ;;  %v1730_v46 = vmax.f32 %v1526_v41, 0.0 }
 0x23c   : > { %v1521_v6 = vadd.f32 %v1520_v24, %v10671_v11  ;;  %v1728_v1 = vmax.f32 %v1518_v43, 0.0 }
 0x23d   : > { %v1731_v2 = vmax.f32 %v1529_v40, 0.0 }
 0x23e   : > { %v1729_v3 = vmax.f32 %v1521_v6, 0.0 }
 0x23f   : > { %v10937_v18 = vpack.c.bf16 %v1731_v2, %v1730_v46 }
 0x240   : > { %v8888_v16 = vpop.f32.mrb[104].mxu0  ;;  %v10939_v20 = vpack.c.bf16 %v1729_v3, %v1728_v1 }
 0x241   : > { %13315 = vst [vmem:[#allocation22_spill] sm:$0xff] %v10937_v18  ;;  %v1542_v36 = vadd.f32 %v8888_v16, %v10671_v11  ;;  %v1533_v56 = vpop.f32.mrb[105].mxu0 }
 0x242   : > { %13316 = vst [vmem:[#allocation23_spill] sm:$0xff] %v10939_v20  ;;  %v1534_v39 = vadd.f32 %v1533_v56, %v10671_v11  ;;  %v8889_v9 = vpop.f32.mrb[106].mxu0  ;;  %9026 = vmatprep.mubr.bf16.mxu1 %v10939_v20 }
 0x243   : > { %v1545_v27 = vadd.f32 %v8889_v9, %v10671_v11  ;;  %v1536_v24 = vpop.f32.mrb[107].mxu0  ;;  %9027 = vmatmul.mubr.bf16.gmra.mrb[100].mxu1 %v10937_v18  ;;  %v1734_v43 = vmax.f32 %v1542_v36, 0.0 }
 0x244   : > { %v1537_v40 = vadd.f32 %v1536_v24, %v10671_v11  ;;  %v1732_v6 = vmax.f32 %v1534_v39, 0.0 }
 0x245   : > { %v1735_v41 = vmax.f32 %v1545_v27, 0.0 }
 0x246   : > { %v1733_v46 = vmax.f32 %v1537_v40, 0.0 }
 0x247   : > { %v10947_v2 = vpack.c.bf16 %v1735_v41, %v1734_v43 }
 0x248   : > { %v8892_v1 = vpop.f32.mrb[108].mxu0  ;;  %v10949_v3 = vpack.c.bf16 %v1733_v46, %v1732_v6 }
 0x249   : > { %13317 = vst [vmem:[#allocation24_spill] sm:$0xff] %v10947_v2  ;;  %v1558_v16 = vadd.f32 %v8892_v1, %v10671_v11  ;;  %v1549_v56 = vpop.f32.mrb[109].mxu0 }
 0x24a   : > { %13318 = vst [vmem:[#allocation25_spill] sm:$0xff] %v10949_v3  ;;  %v1550_v20 = vadd.f32 %v1549_v56, %v10671_v11  ;;  %v8893_v9 = vpop.f32.mrb[110].mxu0  ;;  %9030 = vmatprep.mubr.bf16.mxu1 %v10949_v3 }
 0x24b   : > { %v1561_v18 = vadd.f32 %v8893_v9, %v10671_v11  ;;  %v1552_v24 = vpop.f32.mrb[111].mxu0  ;;  %9031 = vmatmul.mubr.bf16.gmra.mrb[104].mxu1 %v10947_v2  ;;  %v1738_v39 = vmax.f32 %v1558_v16, 0.0 }
 0x24c   : > { %v1553_v27 = vadd.f32 %v1552_v24, %v10671_v11  ;;  %v1736_v40 = vmax.f32 %v1550_v20, 0.0 }
 0x24d   : > { %v1739_v36 = vmax.f32 %v1561_v18, 0.0 }
 0x24e   : > { %v1737_v43 = vmax.f32 %v1553_v27, 0.0  ;;  %v8928_v41 = vpop.f32.mrb[0].mxu1 }
 0x24f   : > { %v1919_v6 = vpop.f32.mrb[1].mxu1  ;;  %v10957_v46 = vpack.c.bf16 %v1739_v36, %v1738_v39 }
 0x250   : > { %v8929_v1 = vpop.f32.mrb[2].mxu1  ;;  %v10959_v56 = vpack.c.bf16 %v1737_v43, %v1736_v40  ;;  %v8896_v48 = vpop.f32.mrb[112].mxu0 }
 0x251   : > { %13319 = vst [vmem:[#allocation26_spill] sm:$0xff] %v10957_v46  ;;  %v2431_v3 = vpack.c.bf16 %v8929_v1, %v8928_v41  ;;  %v1922_v0 = vpop.f32.mrb[3].mxu1  ;;  %v1574_v9 = vadd.f32 %v8896_v48, %v10671_v11  ;;  %v1565_v4 = vpop.f32.mrb[113].mxu0 }
 0x252   : > { %13320 = vst [vmem:[#allocation27_spill] sm:$0xff] %v10959_v56  ;;  %v2430_v2 = vpack.c.bf16 %v1922_v0, %v1919_v6  ;;  %9034 = vmatprep.mubr.bf16.mxu1 %v10959_v56  ;;  %v1566_v18 = vadd.f32 %v1565_v4, %v10671_v11  ;;  %v8897_v20 = vpop.f32.mrb[114].mxu0 }
 0x253   : > { %9035 = vmatmul.mubr.bf16.gmra.mrb[108].mxu1 %v10957_v46  ;;  %v1742_v16 = vmax.f32 %v1574_v9, 0.0  ;;  %v1577_v24 = vadd.f32 %v8897_v20, %v10671_v11  ;;  %v1568_v27 = vpop.f32.mrb[115].mxu0 }
 0x254   : > { %9054 = vmatprep.subr.bf16.mxu0 %v2430_v2  ;;  %v1740_v39 = vmax.f32 %v1566_v18, 0.0  ;;  %v1569_v36 = vadd.f32 %v1568_v27, %v10671_v11 }
 0x255   : > { %9055 = vmatpush3.bf16.msra.mxu0 %v2430_v2  ;;  %v1743_v40 = vmax.f32 %v1577_v24, 0.0 }
 0x256   : > { %v8932_v48 = vpop.f32.mrb[4].mxu1  ;;  %9056 = vmatprep.subr.bf16.mxu0 %v2431_v3  ;;  %v1741_v0 = vmax.f32 %v1569_v36, 0.0 }
 0x257   : > { %v1935_v43 = vpop.f32.mrb[5].mxu1  ;;  %v10967_v41 = vpack.c.bf16 %v1743_v40, %v1742_v16 }
 0x258   : > { %v8933_v4 = vpop.f32.mrb[6].mxu1  ;;  %v8900_v6 = vpop.f32.mrb[116].mxu0  ;;  %v10969_v1 = vpack.c.bf16 %v1741_v0, %v1740_v39 }
 0x259   : > { %13321 = vst [vmem:[#allocation28_spill] sm:$0xff] %v10967_v41  ;;  %v2433_v9 = vpack.c.bf16 %v8933_v4, %v8932_v48  ;;  %v1938_v46 = vpop.f32.mrb[7].mxu1  ;;  %9057 = vmatpush3.bf16.msra.mxu0 %v2431_v3  ;;  %v1590_v20 = vadd.f32 %v8900_v6, %v10671_v11  ;;  %v1581_v18 = vpop.f32.mrb[117].mxu0 }
 0x25a   : > { %13322 = vst [vmem:[#allocation29_spill] sm:$0xff] %v10969_v1  ;;  %v2432_v56 = vpack.c.bf16 %v1938_v46, %v1935_v43  ;;  %v1582_v2 = vadd.f32 %v1581_v18, %v10671_v11  ;;  %v8901_v24 = vpop.f32.mrb[118].mxu0  ;;  %9038 = vmatprep.mubr.bf16.mxu1 %v10969_v1 }
 0x25b   : > { %v1746_v27 = vmax.f32 %v1590_v20, 0.0  ;;  %v1593_v16 = vadd.f32 %v8901_v24, %v10671_v11  ;;  %v1584_v36 = vpop.f32.mrb[119].mxu0  ;;  %9039 = vmatmul.mubr.bf16.gmra.mrb[112].mxu1 %v10967_v41 }
 0x25c   : > { %9058 = vmatprep.subr.bf16.mxu0 %v2432_v56  ;;  %v1744_v39 = vmax.f32 %v1582_v2, 0.0  ;;  %v1585_v40 = vadd.f32 %v1584_v36, %v10671_v11 }
 0x25d   : > { %9059 = vmatpush3.bf16.msra.mxu0 %v2432_v56  ;;  %v1747_v3 = vmax.f32 %v1593_v16, 0.0 }
 0x25e   : > { %v8936_v48 = vpop.f32.mrb[8].mxu1  ;;  %9060 = vmatprep.subr.bf16.mxu0 %v2433_v9  ;;  %v1745_v46 = vmax.f32 %v1585_v40, 0.0 }
 0x25f   : > { %v1951_v0 = vpop.f32.mrb[9].mxu1  ;;  %v10977_v43 = vpack.c.bf16 %v1747_v3, %v1746_v27 }
 0x260   : > { %v8937_v4 = vpop.f32.mrb[10].mxu1  ;;  %v8904_v6 = vpop.f32.mrb[120].mxu0  ;;  %v10979_v20 = vpack.c.bf16 %v1745_v46, %v1744_v39 }
 0x261   : > { %13323 = vst [vmem:[#allocation30_spill] sm:$0xff] %v10977_v43  ;;  %v2435_v18 = vpack.c.bf16 %v8937_v4, %v8936_v48  ;;  %v1954_v24 = vpop.f32.mrb[11].mxu1  ;;  %9061 = vmatpush3.bf16.msra.mxu0 %v2433_v9  ;;  %v1606_v41 = vadd.f32 %v8904_v6, %v10671_v11  ;;  %v1597_v2 = vpop.f32.mrb[121].mxu0 }
 0x262   : > { %13324 = vst [vmem:[#allocation31_spill] sm:$0xff] %v10979_v20  ;;  %v2434_v1 = vpack.c.bf16 %v1954_v24, %v1951_v0  ;;  %v1598_v56 = vadd.f32 %v1597_v2, %v10671_v11  ;;  %v8905_v16 = vpop.f32.mrb[122].mxu0  ;;  %9042 = vmatprep.mubr.bf16.mxu1 %v10979_v20 }
 0x263   : > { %v1750_v36 = vmax.f32 %v1606_v41, 0.0  ;;  %v1609_v27 = vadd.f32 %v8905_v16, %v10671_v11  ;;  %v1600_v40 = vpop.f32.mrb[123].mxu0  ;;  %9043 = vmatmul.mubr.bf16.gmra.mrb[116].mxu1 %v10977_v43 }
 0x264   : > { %9062 = vmatprep.subr.bf16.mxu0 %v2434_v1  ;;  %v1748_v39 = vmax.f32 %v1598_v56, 0.0  ;;  %v1601_v3 = vadd.f32 %v1600_v40, %v10671_v11 }
 0x265   : > { %9063 = vmatpush3.bf16.msra.mxu0 %v2434_v1  ;;  %v1751_v9 = vmax.f32 %v1609_v27, 0.0 }
 0x266   : > { %v8940_v48 = vpop.f32.mrb[12].mxu1  ;;  %9064 = vmatprep.subr.bf16.mxu0 %v2435_v18  ;;  %v1749_v46 = vmax.f32 %v1601_v3, 0.0 }
 0x267   : > { %v1967_v0 = vpop.f32.mrb[13].mxu1  ;;  %v10987_v4 = vpack.c.bf16 %v1751_v9, %v1750_v36 }
 0x268   : > { %v8941_v6 = vpop.f32.mrb[14].mxu1  ;;  %v8908_v24 = vpop.f32.mrb[124].mxu0  ;;  %v10989_v41 = vpack.c.bf16 %v1749_v46, %v1748_v39 }
 0x269   : > { %13325 = vst [vmem:[#allocation32_spill] sm:$0xff] %v10987_v4  ;;  %v2437_v2 = vpack.c.bf16 %v8941_v6, %v8940_v48  ;;  %v1970_v16 = vpop.f32.mrb[15].mxu1  ;;  %9065 = vmatpush3.bf16.msra.mxu0 %v2435_v18  ;;  %v1622_v43 = vadd.f32 %v8908_v24, %v10671_v11  ;;  %v1613_v56 = vpop.f32.mrb[125].mxu0  ;;  %v10000_v24 = vld [vmem:[%s10556_s15 + $0x8] sm:$0xff]  }
 0x26a   : > { %13326 = vst [vmem:[#allocation33_spill] sm:$0xff] %v10989_v41  ;;  %v2436_v20 = vpack.c.bf16 %v1970_v16, %v1967_v0  ;;  %v1614_v1 = vadd.f32 %v1613_v56, %v10671_v11  ;;  %v8909_v27 = vpop.f32.mrb[126].mxu0  ;;  %9046 = vmatprep.mubr.bf16.mxu1 %v10989_v41 }
 0x26b   : > { %v1754_v40 = vmax.f32 %v1622_v43, 0.0  ;;  %v1625_v36 = vadd.f32 %v8909_v27, %v10671_v11  ;;  %v1616_v3 = vpop.f32.mrb[127].mxu0  ;;  %9047 = vmatmul.mubr.bf16.gmra.mrb[120].mxu1 %v10987_v4 }
 0x26c   : > { %9066 = vmatprep.subr.bf16.mxu0 %v2436_v20  ;;  %v1752_v39 = vmax.f32 %v1614_v1, 0.0  ;;  %v1617_v18 = vadd.f32 %v1616_v3, %v10671_v11  ;;  %v10001_v1 = vld [vmem:[%s10556_s15 + $0x40] sm:$0xff]   ;;  %v10003_v11 = vld [vmem:[%s10556_s15 + $0x10] sm:$0xff]   ;;  %v10004_v3 = vld [vmem:[%s10556_s15 + $0x18] sm:$0xff]  }
 0x26d   : > { %9067 = vmatpush3.bf16.msra.mxu0 %v2436_v20  ;;  %v1755_v9 = vmax.f32 %v1625_v36, 0.0 }
 0x26e   : > { %v8944_v48 = vpop.f32.mrb[16].mxu1  ;;  %9068 = vmatprep.subr.bf16.mxu0 %v2437_v2  ;;  %v1753_v46 = vmax.f32 %v1617_v18, 0.0  ;;  %v10005_v18 = vld [vmem:[%s10556_s15 + $0x20] sm:$0xff]  }
 0x26f   : > { %v1983_v0 = vpop.f32.mrb[17].mxu1  ;;  %v10997_v6 = vpack.c.bf16 %v1755_v9, %v1754_v40 }
 0x270   : > { %v8945_v43 = vpop.f32.mrb[18].mxu1  ;;  %v11000_v16 = vpack.c.bf16 %v1753_v46, %v1752_v39 }
 0x271   : > { %13327 = vst [vmem:[#allocation34_spill] sm:$0xff] %v10997_v6  ;;  %v2439_v56 = vpack.c.bf16 %v8945_v43, %v8944_v48  ;;  %v1986_v27 = vpop.f32.mrb[19].mxu1  ;;  %9069 = vmatpush3.bf16.msra.mxu0 %v2437_v2 }
 0x272   : > { %13328 = vst [vmem:[#allocation35_spill] sm:$0xff] %v11000_v16  ;;  %v2438_v4 = vpack.c.bf16 %v1986_v27, %v1983_v0  ;;  %9050 = vmatprep.mubr.bf16.mxu1 %v11000_v16  ;;  %v10006_v0 = vld [vmem:[%s10556_s15 + $0x28] sm:$0xff]   ;;  %v10007_v27 = vld [vmem:[%s10556_s15 + $0x30] sm:$0xff]  }
 0x273   : > { %9051 = vmatmul.mubr.bf16.gmra.mrb[124].mxu1 %v10997_v6 }
 0x274   : > { %9086 = vmatprep.subr.bf16.mxu1 %v2438_v4  ;;  %9071 = vmatmul.mubr.bf16.vlgmr.msra.gmra.mrb[128].mxu0 %v10000_v24 }
 0x275   : > { %9087 = vmatpush3.bf16.msra.mxu1 %v2438_v4  ;;  %9102 = vmatprep.mubr.bf16.mxu1 %v10001_v1 }
 0x276   : > { %v8948_v20 = vpop.f32.mrb[20].mxu1  ;;  %9088 = vmatprep.subr.bf16.mxu1 %v2439_v56  ;;  %9074 = vmatprep.mubr.bf16.mxu0 %v10003_v11 }
 0x277   : > { %v1999_v40 = vpop.f32.mrb[21].mxu1 }
 0x278   : > { %v8949_v36 = vpop.f32.mrb[22].mxu1 }
 0x279   : > { %v2441_v2 = vpack.c.bf16 %v8949_v36, %v8948_v20  ;;  %v2002_v39 = vpop.f32.mrb[23].mxu1  ;;  %9089 = vmatpush3.bf16.msra.mxu1 %v2439_v56 }
 0x27a   : > { %v2440_v9 = vpack.c.bf16 %v2002_v39, %v1999_v40  ;;  %v10008_v40 = vld [vmem:[%s10556_s15 + $0x38] sm:$0xff]   ;;  %v10009_v39 = vld [vmem:[%s10556_s15 + $0x80] sm:$0xff]  }
 0x27c   : > { %9090 = vmatprep.subr.bf16.mxu1 %v2440_v9  ;;  %9075 = vmatmul.mubr.bf16.gmra.mrb[132].mxu0 %v10004_v3 }
 0x27d   : > { %9091 = vmatpush3.bf16.msra.mxu1 %v2440_v9  ;;  %9078 = vmatprep.mubr.bf16.mxu0 %v10005_v18 }
 0x27e   : > { %v8952_v48 = vpop.f32.mrb[24].mxu1  ;;  %9092 = vmatprep.subr.bf16.mxu1 %v2441_v2 }
 0x27f   : > { %v2015_v4 = vpop.f32.mrb[25].mxu1 }
 0x280   : > { %v8953_v46 = vpop.f32.mrb[26].mxu1 }
 0x281   : > { %v2443_v43 = vpack.c.bf16 %v8953_v46, %v8952_v48  ;;  %v2018_v24 = vpop.f32.mrb[27].mxu1  ;;  %9093 = vmatpush3.bf16.msra.mxu1 %v2441_v2 }
 0x282   : > { %v2442_v1 = vpack.c.bf16 %v2018_v24, %v2015_v4  ;;  %v10002_v4 = vld [vmem:[%s10556_s15 + $0x48] sm:$0xff]   ;;  %v10011_v24 = vld [vmem:[%s10556_s15 + $0x50] sm:$0xff]  }
 0x284   : > { %9094 = vmatprep.subr.bf16.mxu1 %v2442_v1  ;;  %9079 = vmatmul.mubr.bf16.gmra.mrb[136].mxu0 %v10006_v0 }
 0x285   : > { %9095 = vmatpush3.bf16.msra.mxu1 %v2442_v1  ;;  %9082 = vmatprep.mubr.bf16.mxu0 %v10007_v27 }
 0x286   : > { %v8956_v56 = vpop.f32.mrb[28].mxu1  ;;  %9096 = vmatprep.subr.bf16.mxu1 %v2443_v43 }
 0x287   : > { %v2031_v11 = vpop.f32.mrb[29].mxu1 }
 0x288   : > { %v8957_v20 = vpop.f32.mrb[30].mxu1 }
 0x289   : > { %v2445_v36 = vpack.c.bf16 %v8957_v20, %v8956_v56  ;;  %v2034_v3 = vpop.f32.mrb[31].mxu1  ;;  %9097 = vmatpush3.bf16.msra.mxu1 %v2443_v43 }
 0x28a   : > { %v2444_v18 = vpack.c.bf16 %v2034_v3, %v2031_v11  ;;  %v10012_v11 = vld [vmem:[%s10556_s15 + $0x58] sm:$0xff]   ;;  %v10013_v3 = vld [vmem:[%s10556_s15 + $0x60] sm:$0xff]  }
 0x28c   : > { %9098 = vmatprep.subr.bf16.mxu1 %v2444_v18  ;;  %9083 = vmatmul.mubr.bf16.gmra.mrb[140].mxu0 %v10008_v40 }
 0x28d   : > { %9099 = vmatpush3.bf16.msra.mxu1 %v2444_v18  ;;  %9134 = vmatprep.mubr.bf16.mxu0 %v10009_v39 }
 0x28e   : > { %v8960_v2 = vpop.f32.mrb[32].mxu1  ;;  %9100 = vmatprep.subr.bf16.mxu1 %v2445_v36 }
 0x28f   : > { %v2047_v9 = vpop.f32.mrb[33].mxu1 }
 0x290   : > { %v8961_v48 = vpop.f32.mrb[34].mxu1 }
 0x291   : > { %v2447_v46 = vpack.c.bf16 %v8961_v48, %v8960_v2  ;;  %v2050_v0 = vpop.f32.mrb[35].mxu1  ;;  %9101 = vmatpush3.bf16.msra.mxu1 %v2445_v36 }
 0x292   : > { %v2446_v27 = vpack.c.bf16 %v2050_v0, %v2047_v9  ;;  %v10014_v9 = vld [vmem:[%s10556_s15 + $0x68] sm:$0xff]   ;;  %v10015_v0 = vld [vmem:[%s10556_s15 + $0x70] sm:$0xff]  }
 0x294   : > { %9118 = vmatprep.subr.bf16.mxu0 %v2446_v27  ;;  %9103 = vmatmul.mubr.bf16.vlgmr.msra.gmra.mrb[128].mxu1 %v10002_v4 }
 0x295   : > { %9119 = vmatpush3.bf16.msra.mxu0 %v2446_v27  ;;  %9106 = vmatprep.mubr.bf16.mxu1 %v10011_v24 }
 0x296   : > { %v8964_v43 = vpop.f32.mrb[36].mxu1  ;;  %9120 = vmatprep.subr.bf16.mxu0 %v2447_v46 }
 0x297   : > { %v2063_v1 = vpop.f32.mrb[37].mxu1 }
 0x298   : > { %v8965_v56 = vpop.f32.mrb[38].mxu1 }
 0x299   : > { %v2449_v20 = vpack.c.bf16 %v8965_v56, %v8964_v43  ;;  %v2066_v40 = vpop.f32.mrb[39].mxu1  ;;  %9121 = vmatpush3.bf16.msra.mxu0 %v2447_v46 }
 0x29a   : > { %v2448_v39 = vpack.c.bf16 %v2066_v40, %v2063_v1  ;;  %v10016_v1 = vld [vmem:[%s10556_s15 + $0x78] sm:$0xff]   ;;  %v10017_v40 = vld [vmem:[%s10556_s15 + $0xc0] sm:$0xff]  }
 0x29c   : > { %9122 = vmatprep.subr.bf16.mxu0 %v2448_v39  ;;  %9107 = vmatmul.mubr.bf16.gmra.mrb[132].mxu1 %v10012_v11 }
 0x29d   : > { %9123 = vmatpush3.bf16.msra.mxu0 %v2448_v39  ;;  %9110 = vmatprep.mubr.bf16.mxu1 %v10013_v3 }
 0x29e   : > { %v8968_v36 = vpop.f32.mrb[40].mxu1  ;;  %9124 = vmatprep.subr.bf16.mxu0 %v2449_v20 }
 0x29f   : > { %v2079_v18 = vpop.f32.mrb[41].mxu1 }
 0x2a0   : > { %v8969_v2 = vpop.f32.mrb[42].mxu1 }
 0x2a1   : > { %v2451_v48 = vpack.c.bf16 %v8969_v2, %v8968_v36  ;;  %v2082_v4 = vpop.f32.mrb[43].mxu1  ;;  %9125 = vmatpush3.bf16.msra.mxu0 %v2449_v20 }
 0x2a2   : > { %v2450_v24 = vpack.c.bf16 %v2082_v4, %v2079_v18  ;;  %v10010_v18 = vld [vmem:[%s10556_s15 + $0x88] sm:$0xff]   ;;  %v10019_v4 = vld [vmem:[%s10556_s15 + $0x90] sm:$0xff]  }
 0x2a4   : > { %9126 = vmatprep.subr.bf16.mxu0 %v2450_v24  ;;  %9111 = vmatmul.mubr.bf16.gmra.mrb[136].mxu1 %v10014_v9 }
 0x2a5   : > { %9127 = vmatpush3.bf16.msra.mxu0 %v2450_v24  ;;  %9114 = vmatprep.mubr.bf16.mxu1 %v10015_v0 }
 0x2a6   : > { %v8972_v46 = vpop.f32.mrb[44].mxu1  ;;  %9128 = vmatprep.subr.bf16.mxu0 %v2451_v48 }
 0x2a7   : > { %v2095_v27 = vpop.f32.mrb[45].mxu1 }
 0x2a8   : > { %v8973_v43 = vpop.f32.mrb[46].mxu1 }
 0x2a9   : > { %v2453_v56 = vpack.c.bf16 %v8973_v43, %v8972_v46  ;;  %v2098_v11 = vpop.f32.mrb[47].mxu1  ;;  %9129 = vmatpush3.bf16.msra.mxu0 %v2451_v48 }
 0x2aa   : > { %v2452_v3 = vpack.c.bf16 %v2098_v11, %v2095_v27  ;;  %v10020_v27 = vld [vmem:[%s10556_s15 + $0x98] sm:$0xff]   ;;  %v10021_v11 = vld [vmem:[%s10556_s15 + $0xa0] sm:$0xff]  }
 0x2ac   : > { %9130 = vmatprep.subr.bf16.mxu0 %v2452_v3  ;;  %9115 = vmatmul.mubr.bf16.gmra.mrb[140].mxu1 %v10016_v1 }
 0x2ad   : > { %9131 = vmatpush3.bf16.msra.mxu0 %v2452_v3  ;;  %9166 = vmatprep.mubr.bf16.mxu1 %v10017_v40 }
 0x2ae   : > { %v8976_v20 = vpop.f32.mrb[48].mxu1  ;;  %9132 = vmatprep.subr.bf16.mxu0 %v2453_v56 }
 0x2af   : > { %v2111_v39 = vpop.f32.mrb[49].mxu1 }
 0x2b0   : > { %v8977_v36 = vpop.f32.mrb[50].mxu1 }
 0x2b1   : > { %v2455_v2 = vpack.c.bf16 %v8977_v36, %v8976_v20  ;;  %v2114_v9 = vpop.f32.mrb[51].mxu1  ;;  %9133 = vmatpush3.bf16.msra.mxu0 %v2453_v56 }
 0x2b2   : > { %v2454_v0 = vpack.c.bf16 %v2114_v9, %v2111_v39  ;;  %v10022_v39 = vld [vmem:[%s10556_s15 + $0xa8] sm:$0xff]   ;;  %v10023_v9 = vld [vmem:[%s10556_s15 + $0xb0] sm:$0xff]  }
 0x2b4   : > { %9150 = vmatprep.subr.bf16.mxu1 %v2454_v0  ;;  %9135 = vmatmul.mubr.bf16.vlgmr.msra.gmra.mrb[144].mxu0 %v10010_v18 }
 0x2b5   : > { %9151 = vmatpush3.bf16.msra.mxu1 %v2454_v0  ;;  %9138 = vmatprep.mubr.bf16.mxu0 %v10019_v4 }
 0x2b6   : > { %v8980_v48 = vpop.f32.mrb[52].mxu1  ;;  %9152 = vmatprep.subr.bf16.mxu1 %v2455_v2 }
 0x2b7   : > { %v2127_v24 = vpop.f32.mrb[53].mxu1 }
 0x2b8   : > { %v8981_v46 = vpop.f32.mrb[54].mxu1 }
 0x2b9   : > { %v2457_v43 = vpack.c.bf16 %v8981_v46, %v8980_v48  ;;  %v2130_v1 = vpop.f32.mrb[55].mxu1  ;;  %9153 = vmatpush3.bf16.msra.mxu1 %v2455_v2 }
 0x2ba   : > { %v2456_v40 = vpack.c.bf16 %v2130_v1, %v2127_v24  ;;  %v10024_v24 = vld [vmem:[%s10556_s15 + $0xb8] sm:$0xff]   ;;  %v10025_v1 = vld [vmem:[%s10556_s15 + $0x100] sm:$0xff]  }
 0x2bc   : > { %9154 = vmatprep.subr.bf16.mxu1 %v2456_v40  ;;  %9139 = vmatmul.mubr.bf16.gmra.mrb[148].mxu0 %v10020_v27 }
 0x2bd   : > { %9155 = vmatpush3.bf16.msra.mxu1 %v2456_v40  ;;  %9142 = vmatprep.mubr.bf16.mxu0 %v10021_v11 }
 0x2be   : > { %v8984_v56 = vpop.f32.mrb[56].mxu1  ;;  %9156 = vmatprep.subr.bf16.mxu1 %v2457_v43 }
 0x2bf   : > { %v2143_v3 = vpop.f32.mrb[57].mxu1 }
 0x2c0   : > { %v8985_v20 = vpop.f32.mrb[58].mxu1 }
 0x2c1   : > { %v2459_v36 = vpack.c.bf16 %v8985_v20, %v8984_v56  ;;  %v2146_v18 = vpop.f32.mrb[59].mxu1  ;;  %9157 = vmatpush3.bf16.msra.mxu1 %v2457_v43 }
 0x2c2   : > { %v2458_v4 = vpack.c.bf16 %v2146_v18, %v2143_v3  ;;  %v10018_v3 = vld [vmem:[%s10556_s15 + $0xc8] sm:$0xff]  }
 0x2c4   : > { %9158 = vmatprep.subr.bf16.mxu1 %v2458_v4  ;;  %9143 = vmatmul.mubr.bf16.gmra.mrb[152].mxu0 %v10022_v39 }
 0x2c5   : > { %9159 = vmatpush3.bf16.msra.mxu1 %v2458_v4  ;;  %9146 = vmatprep.mubr.bf16.mxu0 %v10023_v9 }
 0x2c6   : > { %v8988_v2 = vpop.f32.mrb[60].mxu1  ;;  %9160 = vmatprep.subr.bf16.mxu1 %v2459_v36 }
 0x2c7   : > { %v2159_v0 = vpop.f32.mrb[61].mxu1 }
 0x2c8   : > { %v8989_v48 = vpop.f32.mrb[62].mxu1 }
 0x2c9   : > { %v2461_v46 = vpack.c.bf16 %v8989_v48, %v8988_v2  ;;  %v2162_v27 = vpop.f32.mrb[63].mxu1  ;;  %9161 = vmatpush3.bf16.msra.mxu1 %v2459_v36 }
 0x2ca   : > { %v2460_v11 = vpack.c.bf16 %v2162_v27, %v2159_v0 }
 0x2cc   : > { %9162 = vmatprep.subr.bf16.mxu1 %v2460_v11  ;;  %9147 = vmatmul.mubr.bf16.gmra.mrb[156].mxu0 %v10024_v24 }
 0x2cd   : > { %9163 = vmatpush3.bf16.msra.mxu1 %v2460_v11  ;;  %9198 = vmatprep.mubr.bf16.mxu0 %v10025_v1 }
 0x2ce   : > { %v8992_v43 = vpop.f32.mrb[64].mxu1  ;;  %9164 = vmatprep.subr.bf16.mxu1 %v2461_v46 }
 0x2cf   : > { %v2175_v40 = vpop.f32.mrb[65].mxu1 }
 0x2d0   : > { %v8993_v56 = vpop.f32.mrb[66].mxu1 }
 0x2d1   : > { %v2463_v20 = vpack.c.bf16 %v8993_v56, %v8992_v43  ;;  %v2178_v39 = vpop.f32.mrb[67].mxu1  ;;  %9165 = vmatpush3.bf16.msra.mxu1 %v2461_v46 }
 0x2d2   : > { %v2462_v18 = vpack.c.bf16 %v2178_v39, %v2175_v40 }
 0x2d4   : > { %9182 = vmatprep.subr.bf16.mxu0 %v2462_v18  ;;  %9167 = vmatmul.mubr.bf16.vlgmr.msra.gmra.mrb[144].mxu1 %v10018_v3 }
 0x2d5   : > { %9183 = vmatpush3.bf16.msra.mxu0 %v2462_v18 }
 0x2d6   : > { %v8996_v9 = vpop.f32.mrb[68].mxu1  ;;  %9184 = vmatprep.subr.bf16.mxu0 %v2463_v20 }
 0x2d7   : > { %v2191_v36 = vpop.f32.mrb[69].mxu1 }
 0x2d8   : > { %v8997_v4 = vpop.f32.mrb[70].mxu1 }
 0x2d9   : > { %v2465_v2 = vpack.c.bf16 %v8997_v4, %v8996_v9  ;;  %v2194_v0 = vpop.f32.mrb[71].mxu1  ;;  %9185 = vmatpush3.bf16.msra.mxu0 %v2463_v20 }
 0x2da   : > { %v2464_v48 = vpack.c.bf16 %v2194_v0, %v2191_v36 }
 0x2dc   : > { %9186 = vmatprep.subr.bf16.mxu0 %v2464_v48 }
 0x2dd   : > { %9187 = vmatpush3.bf16.msra.mxu0 %v2464_v48 }
 0x2de   : > { %v9000_v24 = vpop.f32.mrb[72].mxu1  ;;  %9188 = vmatprep.subr.bf16.mxu0 %v2465_v2 }
 0x2df   : > { %v2207_v27 = vpop.f32.mrb[73].mxu1 }
 0x2e0   : > { %v9001_v1 = vpop.f32.mrb[74].mxu1 }
 0x2e1   : > { %v2467_v11 = vpack.c.bf16 %v9001_v1, %v9000_v24  ;;  %v2210_v46 = vpop.f32.mrb[75].mxu1  ;;  %9189 = vmatpush3.bf16.msra.mxu0 %v2465_v2  ;;  %v10026_v2 = vld [vmem:[%s10556_s15 + $0x108] sm:$0xff]   ;;  %v10027_v24 = vld [vmem:[%s10556_s15 + $0x110] sm:$0xff]  }
 0x2e2   : > { %v2466_v43 = vpack.c.bf16 %v2210_v46, %v2207_v27 }
 0x2e4   : > { %9190 = vmatprep.subr.bf16.mxu0 %v2466_v43 }
 0x2e5   : > { %9191 = vmatpush3.bf16.msra.mxu0 %v2466_v43  ;;  %v10028_v43 = vld [vmem:[%s10556_s15 + $0x118] sm:$0xff]  }
 0x2e6   : > { %v9004_v40 = vpop.f32.mrb[76].mxu1  ;;  %9192 = vmatprep.subr.bf16.mxu0 %v2467_v11 }
 0x2e7   : > { %v2223_v56 = vpop.f32.mrb[77].mxu1 }
 0x2e8   : > { %v9005_v3 = vpop.f32.mrb[78].mxu1 }
 0x2e9   : > { %v2469_v20 = vpack.c.bf16 %v9005_v3, %v9004_v40  ;;  %v2226_v39 = vpop.f32.mrb[79].mxu1  ;;  %9193 = vmatpush3.bf16.msra.mxu0 %v2467_v11  ;;  %v10029_v3 = vld [vmem:[%s10556_s15 + $0x120] sm:$0xff]  }
 0x2ea   : > { %v2468_v18 = vpack.c.bf16 %v2226_v39, %v2223_v56 }
 0x2ec   : > { %9194 = vmatprep.subr.bf16.mxu0 %v2468_v18 }
 0x2ed   : > { %9195 = vmatpush3.bf16.msra.mxu0 %v2468_v18 }
 0x2ee   : > { %v9008_v9 = vpop.f32.mrb[80].mxu1  ;;  %9196 = vmatprep.subr.bf16.mxu0 %v2469_v20 }
 0x2ef   : > { %v2239_v36 = vpop.f32.mrb[81].mxu1 }
 0x2f0   : > { %v9009_v4 = vpop.f32.mrb[82].mxu1 }
 0x2f1   : > { %v2471_v0 = vpack.c.bf16 %v9009_v4, %v9008_v9  ;;  %v2242_v48 = vpop.f32.mrb[83].mxu1  ;;  %9197 = vmatpush3.bf16.msra.mxu0 %v2469_v20 }
 0x2f2   : > { %v2470_v27 = vpack.c.bf16 %v2242_v48, %v2239_v36  ;;  %v10030_v36 = vld [vmem:[%s10556_s15 + $0x128] sm:$0xff]   ;;  %v10031_v48 = vld [vmem:[%s10556_s15 + $0x130] sm:$0xff]  }
 0x2f4   : > { %9214 = vmatprep.subr.bf16.mxu1 %v2470_v27  ;;  %9199 = vmatmul.mubr.bf16.vlgmr.msra.gmra.mrb[160].mxu0 %v10026_v2 }
 0x2f5   : > { %9215 = vmatpush3.bf16.msra.mxu1 %v2470_v27  ;;  %9202 = vmatprep.mubr.bf16.mxu0 %v10027_v24 }
 0x2f6   : > { %v9012_v1 = vpop.f32.mrb[84].mxu1  ;;  %9216 = vmatprep.subr.bf16.mxu1 %v2471_v0 }
 0x2f7   : > { %v2255_v11 = vpop.f32.mrb[85].mxu1 }
 0x2f8   : > { %v9013_v46 = vpop.f32.mrb[86].mxu1 }
 0x2f9   : > { %v2473_v40 = vpack.c.bf16 %v9013_v46, %v9012_v1  ;;  %v2258_v56 = vpop.f32.mrb[87].mxu1  ;;  %9217 = vmatpush3.bf16.msra.mxu1 %v2471_v0 }
 0x2fa   : > { %v2472_v39 = vpack.c.bf16 %v2258_v56, %v2255_v11  ;;  %v10032_v11 = vld [vmem:[%s10556_s15 + $0x138] sm:$0xff]   ;;  %v10033_v56 = vld [vmem:[%s10556_s15 + $0x180] sm:$0xff]  }
 0x2fc   : > { %9218 = vmatprep.subr.bf16.mxu1 %v2472_v39  ;;  %9203 = vmatmul.mubr.bf16.gmra.mrb[164].mxu0 %v10028_v43 }
 0x2fd   : > { %9219 = vmatpush3.bf16.msra.mxu1 %v2472_v39  ;;  %9206 = vmatprep.mubr.bf16.mxu0 %v10029_v3 }
 0x2fe   : > { %v9016_v20 = vpop.f32.mrb[88].mxu1  ;;  %9220 = vmatprep.subr.bf16.mxu1 %v2473_v40 }
 0x2ff   : > { %v2271_v18 = vpop.f32.mrb[89].mxu1 }
 0x300   : > { %v9017_v9 = vpop.f32.mrb[90].mxu1 }
 0x301   : > { %v2475_v4 = vpack.c.bf16 %v9017_v9, %v9016_v20  ;;  %v2274_v2 = vpop.f32.mrb[91].mxu1  ;;  %9221 = vmatpush3.bf16.msra.mxu1 %v2473_v40 }
 0x302   : > { %v2474_v24 = vpack.c.bf16 %v2274_v2, %v2271_v18 }
 0x304   : > { %9222 = vmatprep.subr.bf16.mxu1 %v2474_v24  ;;  %9207 = vmatmul.mubr.bf16.gmra.mrb[168].mxu0 %v10030_v36 }
 0x305   : > { %9223 = vmatpush3.bf16.msra.mxu1 %v2474_v24  ;;  %9210 = vmatprep.mubr.bf16.mxu0 %v10031_v48 }
 0x306   : > { %v9020_v0 = vpop.f32.mrb[92].mxu1  ;;  %9224 = vmatprep.subr.bf16.mxu1 %v2475_v4 }
 0x307   : > { %v2287_v27 = vpop.f32.mrb[93].mxu1 }
 0x308   : > { %v9021_v1 = vpop.f32.mrb[94].mxu1 }
 0x309   : > { %v2477_v46 = vpack.c.bf16 %v9021_v1, %v9020_v0  ;;  %v2290_v43 = vpop.f32.mrb[95].mxu1  ;;  %9225 = vmatpush3.bf16.msra.mxu1 %v2475_v4 }
 0x30a   : > { %v2476_v3 = vpack.c.bf16 %v2290_v43, %v2287_v27 }
 0x30c   : > { %9226 = vmatprep.subr.bf16.mxu1 %v2476_v3  ;;  %9211 = vmatmul.mubr.bf16.gmra.mrb[172].mxu0 %v10032_v11 }
 0x30d   : > { %9227 = vmatpush3.bf16.msra.mxu1 %v2476_v3  ;;  %9262 = vmatprep.mubr.bf16.mxu0 %v10033_v56 }
 0x30e   : > { %v9024_v40 = vpop.f32.mrb[96].mxu1  ;;  %9228 = vmatprep.subr.bf16.mxu1 %v2477_v46 }
 0x30f   : > { %v2303_v39 = vpop.f32.mrb[97].mxu1 }
 0x310   : > { %v9025_v20 = vpop.f32.mrb[98].mxu1 }
 0x311   : > { %v2479_v18 = vpack.c.bf16 %v9025_v20, %v9024_v40  ;;  %v2306_v9 = vpop.f32.mrb[99].mxu1  ;;  %9229 = vmatpush3.bf16.msra.mxu1 %v2477_v46 }
 0x312   : > { %v2478_v36 = vpack.c.bf16 %v2306_v9, %v2303_v39 }
 0x314   : > { %9246 = vmatprep.subr.bf16.mxu0 %v2478_v36 }
 0x315   : > { %9247 = vmatpush3.bf16.msra.mxu0 %v2478_v36 }
 0x316   : > { %v9028_v2 = vpop.f32.mrb[100].mxu1  ;;  %9248 = vmatprep.subr.bf16.mxu0 %v2479_v18 }
 0x317   : > { %v2319_v48 = vpop.f32.mrb[101].mxu1 }
 0x318   : > { %v9029_v4 = vpop.f32.mrb[102].mxu1 }
 0x319   : > { %v2481_v24 = vpack.c.bf16 %v9029_v4, %v9028_v2  ;;  %v2322_v0 = vpop.f32.mrb[103].mxu1  ;;  %9249 = vmatpush3.bf16.msra.mxu0 %v2479_v18  ;;  %v10035_v2 = vld [vmem:[%s13154_s4 + $0x80] sm:$0xff]   ;;  %v10037_v4 = vld [vmem:[%s10556_s15 + $0x190] sm:$0xff]  }
 0x31a   : > { %v2480_v27 = vpack.c.bf16 %v2322_v0, %v2319_v48  ;;  %v10034_v48 = vld [vmem:[%s10556_s15 + $0x188] sm:$0xff]   ;;  %v10049_v0 = vld [vmem:[%s10556_s15 + $0xd0] sm:$0xff]  }
 0x31b   : > { %9170 = vmatprep.mubr.bf16.mxu1 %v10049_v0 }
 0x31c   : > { %9250 = vmatprep.subr.bf16.mxu0 %v2480_v27 }
 0x31d   : > { %9251 = vmatpush3.bf16.msra.mxu0 %v2480_v27  ;;  %v10050_v27 = vld [vmem:[%s10556_s15 + $0xd8] sm:$0xff]  }
 0x31e   : > { %v9032_v1 = vpop.f32.mrb[104].mxu1  ;;  %9252 = vmatprep.subr.bf16.mxu0 %v2481_v24  ;;  %9171 = vmatmul.mubr.bf16.gmra.mrb[148].mxu1 %v10050_v27  ;;  %v10048_v27 = vld [vmem:[%s13154_s4 + $0xb8] sm:$0xff]  }
 0x31f   : > { %v2335_v11 = vpop.f32.mrb[105].mxu1 }
 0x320   : > { %v9033_v43 = vpop.f32.mrb[106].mxu1 }
 0x321   : > { %v2483_v56 = vpack.c.bf16 %v9033_v43, %v9032_v1  ;;  %v2338_v3 = vpop.f32.mrb[107].mxu1  ;;  %9253 = vmatpush3.bf16.msra.mxu0 %v2481_v24  ;;  %v10036_v24 = vld [vmem:[%s13154_s4 + $0x88] sm:$0xff]   ;;  %v10039_v1 = vld [vmem:[%s13154_s4 + $0x90] sm:$0xff]   ;;  %v10041_v43 = vld [vmem:[%s10556_s15 + $0x1a0] sm:$0xff]  }
 0x322   : > { %v2482_v46 = vpack.c.bf16 %v2338_v3, %v2335_v11  ;;  %v10038_v11 = vld [vmem:[%s10556_s15 + $0x198] sm:$0xff]   ;;  %v10051_v3 = vld [vmem:[%s10556_s15 + $0xe0] sm:$0xff]  }
 0x323   : > { %9174 = vmatprep.mubr.bf16.mxu1 %v10051_v3 }
 0x324   : > { %9254 = vmatprep.subr.bf16.mxu0 %v2482_v46 }
 0x325   : > { %9255 = vmatpush3.bf16.msra.mxu0 %v2482_v46  ;;  %v10052_v46 = vld [vmem:[%s10556_s15 + $0xe8] sm:$0xff]  }
 0x326   : > { %v9036_v40 = vpop.f32.mrb[108].mxu1  ;;  %9256 = vmatprep.subr.bf16.mxu0 %v2483_v56  ;;  %9175 = vmatmul.mubr.bf16.gmra.mrb[152].mxu1 %v10052_v46 }
 0x327   : > { %v2351_v39 = vpop.f32.mrb[109].mxu1 }
 0x328   : > { %v9037_v20 = vpop.f32.mrb[110].mxu1 }
 0x329   : > { %v2485_v18 = vpack.c.bf16 %v9037_v20, %v9036_v40  ;;  %v2354_v9 = vpop.f32.mrb[111].mxu1  ;;  %9257 = vmatpush3.bf16.msra.mxu0 %v2483_v56  ;;  %v10040_v56 = vld [vmem:[%s13154_s4 + $0x98] sm:$0xff]   ;;  %v10043_v40 = vld [vmem:[%s13154_s4 + $0xa0] sm:$0xff]   ;;  %v10045_v20 = vld [vmem:[%s10556_s15 + $0x1b0] sm:$0xff]  }
 0x32a   : > { %v2484_v36 = vpack.c.bf16 %v2354_v9, %v2351_v39  ;;  %v10042_v39 = vld [vmem:[%s10556_s15 + $0x1a8] sm:$0xff]   ;;  %v10053_v9 = vld [vmem:[%s10556_s15 + $0xf0] sm:$0xff]  }
 0x32b   : > { %9178 = vmatprep.mubr.bf16.mxu1 %v10053_v9 }
 0x32c   : > { %9258 = vmatprep.subr.bf16.mxu0 %v2484_v36 }
 0x32d   : > { %9259 = vmatpush3.bf16.msra.mxu0 %v2484_v36  ;;  %v10054_v36 = vld [vmem:[%s10556_s15 + $0xf8] sm:$0xff]  }
 0x32e   : > { %9260 = vmatprep.subr.bf16.mxu0 %v2485_v18  ;;  %9179 = vmatmul.mubr.bf16.gmra.mrb[156].mxu1 %v10054_v36 }
 0x331   : > { %9261 = vmatpush3.bf16.msra.mxu0 %v2485_v18  ;;  %v10044_v18 = vld [vmem:[%s13154_s4 + $0xa8] sm:$0xff]  }
 0x332   : > { %9310 = vmatprep.subr.bf16.mxu0 %v10035_v2 }
 0x334   : > { %9263 = vmatmul.mubr.bf16.vlgmr.msra.gmra.mrb[176].mxu0 %v10034_v48 }
 0x335   : > { %9311 = vmatpush3.bf16.msra.mxu0 %v10035_v2  ;;  %9266 = vmatprep.mubr.bf16.mxu0 %v10037_v4  ;;  %v10047_v2 = vld [vmem:[%s13154_s4 + $0xb0] sm:$0xff]   ;;  %v10046_v4 = vld [vmem:[%s10556_s15 + $0x1b8] sm:$0xff]  }
 0x336   : > { %9312 = vmatprep.subr.bf16.mxu0 %v10036_v24 }
 0x339   : > { %9313 = vmatpush3.bf16.msra.mxu0 %v10036_v24 }
 0x33a   : > { %9314 = vmatprep.subr.bf16.mxu0 %v10039_v1 }
 0x33c   : > { %9267 = vmatmul.mubr.bf16.gmra.mrb[180].mxu0 %v10038_v11 }
 0x33d   : > { %9315 = vmatpush3.bf16.msra.mxu0 %v10039_v1  ;;  %9270 = vmatprep.mubr.bf16.mxu0 %v10041_v43 }
 0x33e   : > { %9316 = vmatprep.subr.bf16.mxu0 %v10040_v56 }
 0x341   : > { %9317 = vmatpush3.bf16.msra.mxu0 %v10040_v56 }
 0x342   : > { %9318 = vmatprep.subr.bf16.mxu0 %v10043_v40 }
 0x344   : > { %9271 = vmatmul.mubr.bf16.gmra.mrb[184].mxu0 %v10042_v39 }
 0x345   : > { %9319 = vmatpush3.bf16.msra.mxu0 %v10043_v40  ;;  %9274 = vmatprep.mubr.bf16.mxu0 %v10045_v20  ;;  %v9040_v20 = vpop.f32.mrb[112].mxu1 }
 0x346   : > { %9320 = vmatprep.subr.bf16.mxu0 %v10044_v18 }
 0x347   : > { %v11070_v48 = vpop.f32.mrb[128].mxu0 }
 0x348   : > { %v11073_v24 = vpop.f32.mrb[129].mxu0 }
 0x349   : > { %9321 = vmatpush3.bf16.msra.mxu0 %v10044_v18  ;;  %v11075_v0 = vpop.f32.mrb[130].mxu0  ;;  %v2367_v18 = vpop.f32.mrb[113].mxu1 }
 0x34a   : > { %9322 = vmatprep.subr.bf16.mxu0 %v10047_v2  ;;  %v11080_v1 = vpop.f32.mrb[131].mxu0 }
 0x34c   : > { %9275 = vmatmul.mubr.bf16.gmra.mrb[188].mxu0 %v10046_v4 }
 0x34d   : > { %9323 = vmatpush3.bf16.msra.mxu0 %v10047_v2  ;;  %9326 = vmatprep.mubr.bf16.mxu0 %v10681_v28 }
 0x34e   : > { %9324 = vmatprep.subr.bf16.mxu0 %v10048_v27 }
 0x34f   : > { %v11083_v11 = vpop.f32.mrb[132].mxu0 }
 0x350   : > { %v11085_v43 = vpop.f32.mrb[133].mxu0 }
 0x351   : > { %9325 = vmatpush3.bf16.msra.mxu0 %v10048_v27  ;;  %v11087_v56 = vpop.f32.mrb[134].mxu0 }
 0x352   : > { %v11089_v3 = vpop.f32.mrb[135].mxu0 }
 0x354   : > { %9327 = vmatmul.mubr.bf16.vlgmr.msra.gmra.mrb[192].mxu0 %v10679_v26  ;;  %v9041_v26 = vpop.f32.mrb[114].mxu1 }
 0x355   : > { %9330 = vmatprep.mubr.bf16.mxu0 %v10693_v44  ;;  %v2487_v36 = vpack.c.bf16 %v9041_v26, %v9040_v20  ;;  %v2370_v2 = vpop.f32.mrb[115].mxu1 }
 0x356   : > { %v2486_v27 = vpack.c.bf16 %v2370_v2, %v2367_v18  ;;  %v9044_v16 = vpop.f32.mrb[116].mxu1 }
 0x357   : > { %v11093_v46 = vpop.f32.mrb[136].mxu0 }
 0x358   : > { %v11095_v40 = vpop.f32.mrb[137].mxu0  ;;  %9278 = vmatprep.subr.bf16.mxu1 %v2486_v27 }
 0x359   : > { %v11097_v39 = vpop.f32.mrb[138].mxu0 }
 0x35a   : > { %v11099_v28 = vpop.f32.mrb[139].mxu0 }
 0x35c   : > { %9331 = vmatmul.mubr.bf16.gmra.mrb[196].mxu0 %v10691_v42  ;;  %v10055_v42 = vld [vmem:[%s10556_s15 + $0x140] sm:$0xff]  }
 0x35d   : > { %9334 = vmatprep.mubr.bf16.mxu0 %v10705_v60  ;;  %v10056_v60 = vld [vmem:[%s10556_s15 + $0x148] sm:$0xff]   ;;  %9230 = vmatprep.mubr.bf16.mxu1 %v10055_v42 }
 0x35e   : > { %9231 = vmatmul.mubr.bf16.vlgmr.msra.gmra.mrb[160].mxu1 %v10056_v60 }
 0x35f   : > { %v11103_v9 = vpop.f32.mrb[140].mxu0  ;;  %9279 = vmatpush3.bf16.msra.mxu1 %v2486_v27 }
 0x360   : > { %13329 = vst [vmem:[#allocation36_spill] sm:$0xff] %v11103_v9  ;;  %v11105_v44 = vpop.f32.mrb[141].mxu0  ;;  %v2383_v9 = vpop.f32.mrb[117].mxu1  ;;  %9280 = vmatprep.subr.bf16.mxu1 %v2487_v36 }
 0x361   : > { %v11107_v4 = vpop.f32.mrb[142].mxu0  ;;  %v9045_v41 = vpop.f32.mrb[118].mxu1 }
 0x362   : > { %v11109_v6 = vpop.f32.mrb[143].mxu0  ;;  %v2489_v20 = vpack.c.bf16 %v9045_v41, %v9044_v16  ;;  %v2386_v26 = vpop.f32.mrb[119].mxu1  ;;  %v10057_v41 = vld [vmem:[%s10556_s15 + $0x150] sm:$0xff]  }
 0x363   : > { %v2488_v18 = vpack.c.bf16 %v2386_v26, %v2383_v9  ;;  %9281 = vmatpush3.bf16.msra.mxu1 %v2487_v36  ;;  %9234 = vmatprep.mubr.bf16.mxu1 %v10057_v41 }
 0x364   : > { %9335 = vmatmul.mubr.bf16.gmra.mrb[200].mxu0 %v10703_v58  ;;  %v9048_v58 = vpop.f32.mrb[120].mxu1 }
 0x365   : > { %9338 = vmatprep.mubr.bf16.mxu0 %v10717_v14  ;;  %9282 = vmatprep.subr.bf16.mxu1 %v2488_v18  ;;  %v2399_v14 = vpop.f32.mrb[121].mxu1 }
 0x366   : > { %v9049_v2 = vpop.f32.mrb[122].mxu1 }
 0x367   : > { %9283 = vmatpush3.bf16.msra.mxu1 %v2488_v18  ;;  %v2491_v42 = vpack.c.bf16 %v9049_v2, %v9048_v58  ;;  %v2402_v60 = vpop.f32.mrb[123].mxu1  ;;  %v10061_v18 = vld [vmem:[%s10556_s15 + $0x170] sm:$0xff]   ;;  %v10062_v58 = vld [vmem:[%s10556_s15 + $0x178] sm:$0xff]  }
 0x368   : > { %9284 = vmatprep.subr.bf16.mxu1 %v2489_v20  ;;  %v2490_v27 = vpack.c.bf16 %v2402_v60, %v2399_v14 }
 0x36b   : > { %9285 = vmatpush3.bf16.msra.mxu1 %v2489_v20  ;;  %v10059_v20 = vld [vmem:[%s10556_s15 + $0x160] sm:$0xff]  }
 0x36c   : > { %9339 = vmatmul.mubr.bf16.gmra.mrb[204].mxu0 %v10715_v12  ;;  %9286 = vmatprep.subr.bf16.mxu1 %v2490_v27  ;;  %v10058_v12 = vld [vmem:[%s10556_s15 + $0x158] sm:$0xff]  }
 0x36d   : > { %9342 = vmatprep.mubr.bf16.mxu0 %v10728_v31  ;;  %v9052_v31 = vpop.f32.mrb[124].mxu1  ;;  %9235 = vmatmul.mubr.bf16.gmra.mrb[164].mxu1 %v10058_v12 }
 0x36e   : > { %v2415_v16 = vpop.f32.mrb[125].mxu1  ;;  %9238 = vmatprep.mubr.bf16.mxu1 %v10059_v20  ;;  %v10072_v20 = vld [vmem:[%s10556_s15 + $0x1e8] sm:$0xff]  }
 0x36f   : > { %v9053_v9 = vpop.f32.mrb[126].mxu1  ;;  %9287 = vmatpush3.bf16.msra.mxu1 %v2490_v27  ;;  %v10065_v27 = vld [vmem:[%s13154_s4 + $0xc0] sm:$0xff]  }
 0x370   : > { %v2493_v36 = vpack.c.bf16 %v9053_v9, %v9052_v31  ;;  %v2418_v26 = vpop.f32.mrb[127].mxu1  ;;  %9288 = vmatprep.subr.bf16.mxu1 %v2491_v42  ;;  %v10068_v31 = vld [vmem:[%s10556_s15 + $0x1d8] sm:$0xff]  }
 0x373   : > { %9289 = vmatpush3.bf16.msra.mxu1 %v2491_v42  ;;  %v10063_v42 = vld [vmem:[%s10556_s15 + $0x1c0] sm:$0xff]  }
 0x374   : > { %9343 = vmatmul.mubr.bf16.gmra.mrb[208].mxu0 %v10726_v29  ;;  %v2492_v29 = vpack.c.bf16 %v2418_v26, %v2415_v16 }
 0x375   : > { %9346 = vmatprep.mubr.bf16.mxu0 %v10738_v47  ;;  %v10060_v47 = vld [vmem:[%s10556_s15 + $0x168] sm:$0xff]  }
 0x376   : > { %9290 = vmatprep.subr.bf16.mxu1 %v2492_v29  ;;  %9239 = vmatmul.mubr.bf16.gmra.mrb[168].mxu1 %v10060_v47 }
 0x377   : > { %9291 = vmatpush3.bf16.msra.mxu1 %v2492_v29  ;;  %9242 = vmatprep.mubr.bf16.mxu1 %v10061_v18  ;;  %v10071_v29 = vld [vmem:[%s13154_s4 + $0xd8] sm:$0xff]  }
 0x378   : > { %9292 = vmatprep.subr.bf16.mxu1 %v2493_v36 }
 0x37b   : > { %9293 = vmatpush3.bf16.msra.mxu1 %v2493_v36 }
 0x37c   : > { %9347 = vmatmul.mubr.bf16.gmra.mrb[212].mxu0 %v10736_v45  ;;  %9454 = vmatprep.subr.bf16.mxu1 %v10065_v27 }
 0x37d   : > { %9350 = vmatprep.mubr.bf16.mxu0 %v10748_v63 }
 0x37e   : > { %9243 = vmatmul.mubr.bf16.gmra.mrb[172].mxu1 %v10062_v58 }
 0x37f   : > { %9294 = vmatprep.mubr.bf16.mxu1 %v10063_v42 }
 0x384   : > { %9351 = vmatmul.mubr.bf16.gmra.mrb[216].mxu0 %v10746_v61  ;;  %v10064_v61 = vld [vmem:[%s10556_s15 + $0x1c8] sm:$0xff]  }
 0x385   : > { %9354 = vmatprep.mubr.bf16.mxu0 %v10758_v17 }
 0x386   : > { %9295 = vmatmul.mubr.bf16.vlgmr.msra.gmra.mrb[176].mxu1 %v10064_v61  ;;  %v10075_v61 = vld [vmem:[%s13154_s4 + $0xe8] sm:$0xff]  }
 0x387   : > { %v11129_v45 = vpop.f32.mrb[144].mxu0  ;;  %9455 = vmatpush3.bf16.msra.mxu1 %v10065_v27  ;;  %v10076_v27 = vld [vmem:[%s10556_s15 + $0x1f8] sm:$0xff]  }
 0x388   : > { %v11131_v63 = vpop.f32.mrb[145].mxu0 }
 0x389   : > { %v11133_v14 = vpop.f32.mrb[146].mxu0 }
 0x38a   : > { %v11135_v2 = vpop.f32.mrb[147].mxu0 }
 0x38c   : > { %9355 = vmatmul.mubr.bf16.gmra.mrb[220].mxu0 %v10756_v15  ;;  %v10066_v15 = vld [vmem:[%s10556_s15 + $0x1d0] sm:$0xff]  }
 0x38d   : > { %9358 = vmatprep.mubr.bf16.mxu0 %v10768_v35  ;;  %v10067_v35 = vld [vmem:[%s13154_s4 + $0xc8] sm:$0xff]   ;;  %9298 = vmatprep.mubr.bf16.mxu1 %v10066_v15  ;;  %v10077_v15 = vld [vmem:[%s13154_s4 + $0xf0] sm:$0xff]  }
 0x38e   : > { %9456 = vmatprep.subr.bf16.mxu1 %v10067_v35  ;;  %9299 = vmatmul.mubr.bf16.gmra.mrb[180].mxu1 %v10068_v31 }
 0x38f   : > { %v11141_v17 = vpop.f32.mrb[148].mxu0  ;;  %9457 = vmatpush3.bf16.msra.mxu1 %v10067_v35 }
 0x390   : > { %v11143_v60 = vpop.f32.mrb[149].mxu0 }
 0x391   : > { %v11148_v41 = vpop.f32.mrb[150].mxu0 }
 0x392   : > { %v11150_v12 = vpop.f32.mrb[151].mxu0 }
 0x394   : > { %9359 = vmatmul.mubr.bf16.gmra.mrb[224].mxu0 %v10766_v33  ;;  %v10069_v33 = vld [vmem:[%s13154_s4 + $0xd0] sm:$0xff]  }
 0x395   : > { %9362 = vmatprep.mubr.bf16.mxu0 %v10778_v53  ;;  %9458 = vmatprep.subr.bf16.mxu1 %v10069_v33  ;;  %v10070_v53 = vld [vmem:[%s10556_s15 + $0x1e0] sm:$0xff]  }
 0x396   : > { %9459 = vmatpush3.bf16.msra.mxu1 %v10069_v33  ;;  %9302 = vmatprep.mubr.bf16.mxu1 %v10070_v53 }
 0x397   : > { %v11159_v16 = vpop.f32.mrb[152].mxu0  ;;  %9460 = vmatprep.subr.bf16.mxu1 %v10071_v29  ;;  %9303 = vmatmul.mubr.bf16.gmra.mrb[184].mxu1 %v10072_v20 }
 0x398   : > { %v11161_v9 = vpop.f32.mrb[153].mxu0 }
 0x399   : > { %v11166_v36 = vpop.f32.mrb[154].mxu0 }
 0x39a   : > { %v11168_v26 = vpop.f32.mrb[155].mxu0  ;;  %9461 = vmatpush3.bf16.msra.mxu1 %v10071_v29 }
 0x39c   : > { %9363 = vmatmul.mubr.bf16.gmra.mrb[228].mxu0 %v10776_v51  ;;  %v10073_v51 = vld [vmem:[%s13154_s4 + $0xe0] sm:$0xff]  }
 0x39d   : > { %9366 = vmatprep.mubr.bf16.mxu0 %v10788_v8  ;;  %9462 = vmatprep.subr.bf16.mxu1 %v10073_v51  ;;  %v10074_v8 = vld [vmem:[%s10556_s15 + $0x1f0] sm:$0xff]  }
 0x39e   : > { %9463 = vmatpush3.bf16.msra.mxu1 %v10073_v51  ;;  %9306 = vmatprep.mubr.bf16.mxu1 %v10074_v8 }
 0x39f   : > { %v11177_v47 = vpop.f32.mrb[156].mxu0  ;;  %9464 = vmatprep.subr.bf16.mxu1 %v10075_v61  ;;  %9307 = vmatmul.mubr.bf16.gmra.mrb[188].mxu1 %v10076_v27 }
 0x3a0   : > { %v11179_v18 = vpop.f32.mrb[157].mxu0 }
 0x3a1   : > { %v11184_v58 = vpop.f32.mrb[158].mxu0 }
 0x3a2   : > { %v11186_v42 = vpop.f32.mrb[159].mxu0  ;;  %9465 = vmatpush3.bf16.msra.mxu1 %v10075_v61 }
 0x3a3   : > { %9466 = vmatprep.subr.bf16.mxu1 %v10077_v15 }
 0x3a4   : > { %9367 = vmatmul.mubr.bf16.gmra.mrb[232].mxu0 %v10786_v5  ;;  %v10078_v5 = vld [vmem:[%s13154_s4 + $0xf8] sm:$0xff]  }
 0x3a5   : > { %9370 = vmatprep.mubr.bf16.mxu0 %v10798_v30  ;;  %v11207_v30 = vpop.f32.mrb[128].mxu1 }
 0x3a6   : > { %9467 = vmatpush3.bf16.msra.mxu1 %v10077_v15 }
 0x3a7   : > { %9468 = vmatprep.subr.bf16.mxu1 %v10078_v5 }
 0x3aa   : > { %9469 = vmatpush3.bf16.msra.mxu1 %v10078_v5 }
 0x3ac   : > { %9371 = vmatmul.mubr.bf16.gmra.mrb[236].mxu0 %v10796_v25  ;;  %v11209_v25 = vpop.f32.mrb[129].mxu1 }
 0x3ad   : > { %9374 = vmatprep.mubr.bf16.mxu0 %v10808_v52  ;;  %v11212_v35 = vpop.f32.mrb[130].mxu1 }
 0x3ae   : > { %v11215_v52 = vpop.f32.mrb[131].mxu1 }
 0x3b4   : > { %9375 = vmatmul.mubr.bf16.gmra.mrb[240].mxu0 %v10806_v49 }
 0x3b5   : > { %9378 = vmatprep.mubr.bf16.mxu0 %v10818_v10 }
 0x3bc   : > { %9379 = vmatmul.mubr.bf16.gmra.mrb[244].mxu0 %v10816_v7 }
 0x3bd   : > { %9382 = vmatprep.mubr.bf16.mxu0 %v10828_v37  ;;  %v11225_v37 = vpop.f32.mrb[132].mxu1 }
 0x3be   : > { %v11227_v33 = vpop.f32.mrb[133].mxu1 }
 0x3c4   : > { %9383 = vmatmul.mubr.bf16.gmra.mrb[248].mxu0 %v10826_v34  ;;  %v11230_v34 = vpop.f32.mrb[134].mxu1 }
 0x3c5   : > { %9386 = vmatprep.mubr.bf16.mxu0 %v10838_v62  ;;  %v11233_v62 = vpop.f32.mrb[135].mxu1 }
 0x3c6   : > { %v11243_v8 = vpop.f32.mrb[136].mxu1 }
 0x3c7   : > { %v11217_v31 = vpop.f32.mrb[160].mxu0  ;;  %v11245_v61 = vpop.f32.mrb[137].mxu1 }
 0x3c8   : > { %13330 = vst [vmem:[#allocation37_spill] sm:$0xff] %v11217_v31  ;;  %v11219_v49 = vpop.f32.mrb[161].mxu0  ;;  %v13369_v31 = vld [vmem:[#allocation20_spill] sm:$0xff] }
 0x3c9   : > { %13331 = vst [vmem:[#allocation38_spill] sm:$0xff] %v11219_v49  ;;  %v11221_v10 = vpop.f32.mrb[162].mxu0 }
 0x3ca   : > { %13332 = vst [vmem:[#allocation39_spill] sm:$0xff] %v11221_v10  ;;  %v11223_v7 = vpop.f32.mrb[163].mxu0 }
 0x3cb   : > { %13333 = vst [vmem:[#allocation40_spill] sm:$0xff] %v11223_v7  ;;  %v13361_v7 = vld [vmem:[#allocation21_spill] sm:$0xff] }
 0x3cc   : > { %9387 = vmatmul.mubr.bf16.gmra.mrb[252].mxu0 %v10836_v57  ;;  %v11248_v57 = vpop.f32.mrb[138].mxu1 }
 0x3cd   : > { %9390 = vmatprep.mubr.bf16.mxu0 %v10848_v23  ;;  %v11251_v23 = vpop.f32.mrb[139].mxu1 }
 0x3cf   : > { %v11235_v53 = vpop.f32.mrb[164].mxu0 }
 0x3d0   : > { %13334 = vst [vmem:[#allocation41_spill] sm:$0xff] %v11235_v53  ;;  %v11237_v29 = vpop.f32.mrb[165].mxu0 }
 0x3d1   : > { %13335 = vst [vmem:[#allocation42_spill] sm:$0xff] %v11237_v29  ;;  %v11239_v20 = vpop.f32.mrb[166].mxu0 }
 0x3d2   : > { %13336 = vst [vmem:[#allocation43_spill] sm:$0xff] %v11239_v20  ;;  %v11241_v51 = vpop.f32.mrb[167].mxu0 }
 0x3d3   : > { %13337 = vst [vmem:[#allocation44_spill] sm:$0xff] %v11241_v51  ;;  %v11261_v51 = vpop.f32.mrb[140].mxu1 }
 0x3d4   : > { %9391 = vmatmul.mubr.bf16.gmra.mrb[0].mxu0 %v10846_v21  ;;  %v11263_v20 = vpop.f32.mrb[141].mxu1 }
 0x3d5   : > { %9394 = vmatprep.mubr.bf16.mxu0 %v10858_v55  ;;  %v11266_v21 = vpop.f32.mrb[142].mxu1 }
 0x3d6   : > { %v11269_v55 = vpop.f32.mrb[143].mxu1 }
 0x3d7   : > { %v11253_v27 = vpop.f32.mrb[168].mxu0 }
 0x3d8   : > { %13338 = vst [vmem:[#allocation45_spill] sm:$0xff] %v11253_v27  ;;  %v11255_v15 = vpop.f32.mrb[169].mxu0 }
 0x3d9   : > { %13339 = vst [vmem:[#allocation46_spill] sm:$0xff] %v11255_v15  ;;  %v11257_v5 = vpop.f32.mrb[170].mxu0 }
 0x3da   : > { %13340 = vst [vmem:[#allocation47_spill] sm:$0xff] %v11257_v5  ;;  %v11259_v29 = vpop.f32.mrb[171].mxu0 }
 0x3db   : > { %13341 = vst [vmem:[#allocation48_spill] sm:$0xff] %v11259_v29  ;;  %v13359_v29 = vld [vmem:[#allocation18_spill] sm:$0xff] }
 0x3dc   : > { %9395 = vmatmul.mubr.bf16.gmra.mrb[4].mxu0 %v10856_v50  ;;  %v13346_v50 = vld [vmem:[#allocation15_spill] sm:$0xff] }
 0x3dd   : > { %9398 = vmatprep.mubr.bf16.mxu0 %v10868_v22  ;;  %v13347_v22 = vld [vmem:[#allocation17_spill] sm:$0xff] }
 0x3df   : > { %v11271_v53 = vpop.f32.mrb[172].mxu0 }
 0x3e0   : > { %13342 = vst [vmem:[#allocation49_spill] sm:$0xff] %v11271_v53  ;;  %v11273_v27 = vpop.f32.mrb[173].mxu0 }
 0x3e1   : > { %13343 = vst [vmem:[#allocation50_spill] sm:$0xff] %v11273_v27  ;;  %v11275_v15 = vpop.f32.mrb[174].mxu0  ;;  %v11287_v27 = vpop.f32.mrb[144].mxu1 }
 0x3e2   : > { %13344 = vst [vmem:[#allocation51_spill] sm:$0xff] %v11275_v15  ;;  %v11277_v5 = vpop.f32.mrb[175].mxu0  ;;  %v11289_v15 = vpop.f32.mrb[145].mxu1 }
 0x3e3   : > { %13345 = vst [vmem:[#allocation52_spill] sm:$0xff] %v11277_v5  ;;  %13348 = vst [vmem:[#allocation15_spill] sm:$0xff] %v11289_v15  ;;  %v13349_v5 = vld [vmem:[#allocation16_spill] sm:$0xff]  ;;  %v13391_v15 = vld [vmem:[#allocation26_spill] sm:$0xff] }
 0x3e4   : > { %9399 = vmatmul.mubr.bf16.gmra.mrb[8].mxu0 %v10866_v19  ;;  %v11292_v19 = vpop.f32.mrb[146].mxu1 }
 0x3e5   : > { %9402 = vmatprep.mubr.bf16.mxu0 %v10878_v59  ;;  %13350 = vst [vmem:[#allocation17_spill] sm:$0xff] %v11292_v19  ;;  %v13351_v59 = vld [vmem:[#allocation19_spill] sm:$0xff] }
 0x3ec   : > { %9403 = vmatmul.mubr.bf16.gmra.mrb[12].mxu0 %v10876_v54  ;;  %v11295_v54 = vpop.f32.mrb[147].mxu1 }
 0x3ed   : > { %9406 = vmatprep.mubr.bf16.mxu0 %v10889_v38  ;;  %13352 = vst [vmem:[#allocation16_spill] sm:$0xff] %v11295_v54 }
 0x3f4   : > { %9407 = vmatmul.mubr.bf16.gmra.mrb[16].mxu0 %v10887_v32 }
 0x3f5   : > { %9410 = vmatprep.mubr.bf16.mxu0 %v10899_v13 }
 0x3fc   : > { %9411 = vmatmul.mubr.bf16.gmra.mrb[20].mxu0 %v13346_v50 }
 0x3fd   : > { %9414 = vmatprep.mubr.bf16.mxu0 %v13347_v22  ;;  %v11305_v22 = vpop.f32.mrb[148].mxu1 }
 0x3fe   : > { %13357 = vst [vmem:[#allocation56_spill] sm:$0xff] %v11305_v22  ;;  %v11307_v53 = vpop.f32.mrb[149].mxu1 }
 0x3ff   : > { %13358 = vst [vmem:[#allocation57_spill] sm:$0xff] %v11307_v53 }
 0x404   : > { %9415 = vmatmul.mubr.bf16.gmra.mrb[24].mxu0 %v13349_v5  ;;  %v11310_v5 = vpop.f32.mrb[150].mxu1 }
 0x405   : > { %9418 = vmatprep.mubr.bf16.mxu0 %v13351_v59  ;;  %13360 = vst [vmem:[#allocation18_spill] sm:$0xff] %v11310_v5  ;;  %v11313_v59 = vpop.f32.mrb[151].mxu1  ;;  %v13371_v5 = vld [vmem:[#allocation23_spill] sm:$0xff] }
 0x406   : > { %13362 = vst [vmem:[#allocation21_spill] sm:$0xff] %v11313_v59 }
 0x407   : > { %v11297_v38 = vpop.f32.mrb[176].mxu0 }
 0x408   : > { %13353 = vst [vmem:[#allocation19_spill] sm:$0xff] %v11297_v38  ;;  %v11299_v32 = vpop.f32.mrb[177].mxu0 }
 0x409   : > { %13354 = vst [vmem:[#allocation53_spill] sm:$0xff] %v11299_v32  ;;  %v11301_v13 = vpop.f32.mrb[178].mxu0 }
 0x40a   : > { %13355 = vst [vmem:[#allocation54_spill] sm:$0xff] %v11301_v13  ;;  %v11303_v50 = vpop.f32.mrb[179].mxu0 }
 0x40b   : > { %13356 = vst [vmem:[#allocation55_spill] sm:$0xff] %v11303_v50  ;;  %v11323_v50 = vpop.f32.mrb[152].mxu1 }
 0x40c   : > { %9419 = vmatmul.mubr.bf16.gmra.mrb[28].mxu0 %v13359_v29  ;;  %13367 = vst [vmem:[#allocation62_spill] sm:$0xff] %v11323_v50  ;;  %v11325_v10 = vpop.f32.mrb[153].mxu1 }
 0x40d   : > { %9422 = vmatprep.mubr.bf16.mxu0 %v13361_v7  ;;  %13368 = vst [vmem:[#allocation63_spill] sm:$0xff] %v11325_v10  ;;  %v11328_v29 = vpop.f32.mrb[154].mxu1  ;;  %v13379_v10 = vld [vmem:[#allocation22_spill] sm:$0xff] }
 0x40e   : > { %13370 = vst [vmem:[#allocation20_spill] sm:$0xff] %v11328_v29  ;;  %v11331_v7 = vpop.f32.mrb[155].mxu1  ;;  %v13381_v29 = vld [vmem:[#allocation25_spill] sm:$0xff] }
 0x40f   : > { %v11315_v49 = vpop.f32.mrb[180].mxu0  ;;  %13372 = vst [vmem:[#allocation23_spill] sm:$0xff] %v11331_v7  ;;  %v13383_v7 = vld [vmem:[#allocation14_spill] sm:$0xff] }
 0x410   : > { %13363 = vst [vmem:[#allocation58_spill] sm:$0xff] %v11315_v49  ;;  %v11317_v38 = vpop.f32.mrb[181].mxu0 }
 0x411   : > { %13364 = vst [vmem:[#allocation59_spill] sm:$0xff] %v11317_v38  ;;  %v11319_v32 = vpop.f32.mrb[182].mxu0 }
 0x412   : > { %13365 = vst [vmem:[#allocation60_spill] sm:$0xff] %v11319_v32  ;;  %v11321_v13 = vpop.f32.mrb[183].mxu0 }
 0x413   : > { %13366 = vst [vmem:[#allocation61_spill] sm:$0xff] %v11321_v13  ;;  %v11341_v13 = vpop.f32.mrb[156].mxu1 }
 0x414   : > { %9423 = vmatmul.mubr.bf16.gmra.mrb[32].mxu0 %v13369_v31  ;;  %13377 = vst [vmem:[#allocation68_spill] sm:$0xff] %v11341_v13  ;;  %v11343_v50 = vpop.f32.mrb[157].mxu1  ;;  %v13389_v13 = vld [vmem:[#allocation27_spill] sm:$0xff] }
 0x415   : > { %9426 = vmatprep.mubr.bf16.mxu0 %v13371_v5  ;;  %13378 = vst [vmem:[#allocation69_spill] sm:$0xff] %v11343_v50  ;;  %v11346_v31 = vpop.f32.mrb[158].mxu1 }
 0x416   : > { %13380 = vst [vmem:[#allocation22_spill] sm:$0xff] %v11346_v31  ;;  %v11349_v5 = vpop.f32.mrb[159].mxu1 }
 0x417   : > { %v11333_v59 = vpop.f32.mrb[184].mxu0  ;;  %13382 = vst [vmem:[#allocation25_spill] sm:$0xff] %v11349_v5 }
 0x418   : > { %13373 = vst [vmem:[#allocation64_spill] sm:$0xff] %v11333_v59  ;;  %v11335_v49 = vpop.f32.mrb[185].mxu0  ;;  %v3656_v59 = vsub.s32 1, %v13383_v7 }
 0x419   : > { %13374 = vst [vmem:[#allocation65_spill] sm:$0xff] %v11335_v49  ;;  %v11337_v38 = vpop.f32.mrb[186].mxu0 }
 0x41a   : > { %13375 = vst [vmem:[#allocation66_spill] sm:$0xff] %v11337_v38  ;;  %v11339_v32 = vpop.f32.mrb[187].mxu0 }
 0x41b   : > { %13376 = vst [vmem:[#allocation67_spill] sm:$0xff] %v11339_v32  ;;  %v3933_v32 = vsub.s32 2, %v13383_v7 }
 0x41c   : > { %9427 = vmatmul.mubr.bf16.gmra.mrb[36].mxu0 %v13379_v10  ;;  %v10079_v10 = vld [vmem:[%s13155_s5] sm:$0xf] }
 0x41d   : > { %9430 = vmatprep.mubr.bf16.mxu0 %v13381_v29  ;;  %v11362_v50 = vrot.slane %v10079_v10, %v3656_v59  ;;  %v13388_v29 = vld [vmem:[#allocation24_spill] sm:$0xff]  ;;  %v11367_v5 = vrot.slane %v10079_v10, %v3933_v32 }
 0x41f   : > { %v11352_v53 = vpop.f32.mrb[188].mxu0  ;;  %v3661_v7 = vadd.f32 %v11075_v0, %v11362_v50  ;;  %v3659_v59 = vadd.f32 %v11362_v50, %v11080_v1 }
 0x420   : > { %13384 = vst [vmem:[#allocation70_spill] sm:$0xff] %v11352_v53  ;;  %v11354_v49 = vpop.f32.mrb[189].mxu0 }
 0x421   : > { %13385 = vst [vmem:[#allocation71_spill] sm:$0xff] %v11354_v49  ;;  %v11357_v38 = vpop.f32.mrb[190].mxu0  ;;  %v3660_v49 = vadd.f32 %v11070_v48, %v11362_v50  ;;  %v3789_v48 = vmax.f32 %v3661_v7, 0.0  ;;  %v13392_v7 = vld [vmem:[#allocation29_spill] sm:$0xff] }
 0x422   : > { %13386 = vst [vmem:[#allocation72_spill] sm:$0xff] %v11357_v38  ;;  %v11364_v31 = vpop.f32.mrb[191].mxu0  ;;  %v3658_v38 = vadd.f32 %v11362_v50, %v11073_v24  ;;  %v3787_v24 = vmax.f32 %v3659_v59, 0.0 }
 0x423   : > { %13387 = vst [vmem:[#allocation73_spill] sm:$0xff] %v11364_v31 }
 0x424   : > { %9431 = vmatmul.mubr.bf16.gmra.mrb[40].mxu0 %v13388_v29  ;;  %v3788_v29 = vmax.f32 %v3660_v49, 0.0  ;;  %v3786_v54 = vmax.f32 %v3658_v38, 0.0  ;;  %v3665_v38 = vadd.f32 %v11087_v56, %v11362_v50 }
 0x425   : > { %9434 = vmatprep.mubr.bf16.mxu0 %v13389_v13 }
 0x426   : > { %v3793_v56 = vmax.f32 %v3665_v38, 0.0  ;;  %v13394_v38 = vld [vmem:[#allocation31_spill] sm:$0xff] }
 0x427   : > { %v9328_v53 = vpop.f32.mrb[192].mxu0 }
 0x428   : > { %v11379_v31 = vadd.f32 %v9328_v53, %v11367_v5  ;;  %v4017_v32 = vpop.f32.mrb[193].mxu0 }
 0x429   : > { %v11382_v10 = vadd.f32 %v4017_v32, %v11367_v5  ;;  %v9329_v13 = vpop.f32.mrb[194].mxu0 }
 0x42a   : > { %v11385_v22 = vadd.f32 %v9329_v13, %v11367_v5  ;;  %v4020_v0 = vpop.f32.mrb[195].mxu0  ;;  %v4530_v1 = vadd.f32 %v11379_v31, %v3788_v29  ;;  %v3664_v13 = vadd.f32 %v11083_v11, %v11362_v50  ;;  %v3662_v29 = vadd.f32 %v11362_v50, %v11085_v43 }
 0x42b   : > { %v11388_v19 = vadd.f32 %v4020_v0, %v11367_v5  ;;  %v4528_v32 = vadd.f32 %v11382_v10, %v3786_v54 }
 0x42c   : > { %v4531_v53 = vadd.f32 %v11385_v22, %v3789_v48  ;;  %9435 = vmatmul.mubr.bf16.gmra.mrb[44].mxu0 %v13391_v15  ;;  %v3663_v48 = vadd.f32 %v11362_v50, %v11089_v3 }
 0x42d   : > { %13390 = vst [vmem:[#allocation24_spill] sm:$0xff] %v11388_v19  ;;  %v4529_v49 = vadd.f32 %v11388_v19, %v3787_v24  ;;  %9438 = vmatprep.mubr.bf16.mxu0 %v13392_v7  ;;  %v3792_v19 = vmax.f32 %v3664_v13, 0.0 }
 0x42e   : > { %v4657_v59 = vpack.c.bf16 %v4531_v53, %v4530_v1  ;;  %v3790_v53 = vmax.f32 %v3662_v29, 0.0  ;;  %v3791_v3 = vmax.f32 %v3663_v48, 0.0  ;;  %v3669_v29 = vadd.f32 %v11097_v39, %v11362_v50 }
 0x42f   : > { %v9332_v15 = vpop.f32.mrb[196].mxu0  ;;  %v4656_v0 = vpack.c.bf16 %v4529_v49, %v4528_v32 }
 0x430   : > { %v11405_v54 = vadd.f32 %v9332_v15, %v11367_v5  ;;  %v4033_v24 = vpop.f32.mrb[197].mxu0  ;;  %v3797_v39 = vmax.f32 %v3669_v29, 0.0  ;;  %v13398_v29 = vld [vmem:[#allocation33_spill] sm:$0xff] }
 0x431   : > { %v11408_v7 = vadd.f32 %v4033_v24, %v11367_v5  ;;  %v9333_v11 = vpop.f32.mrb[198].mxu0  ;;  %9470 = vmatprep.mubr.bf16.mxu1 %v4656_v0  ;;  %v13393_v24 = vld [vmem:[#allocation28_spill] sm:$0xff] }
 0x432   : > { %v11411_v1 = vadd.f32 %v9333_v11, %v11367_v5  ;;  %v4036_v43 = vpop.f32.mrb[199].mxu0  ;;  %9471 = vmatmul.mubr.bf16.vlgmr.msra.gmra.mrb[192].mxu1 %v4657_v59  ;;  %v4534_v49 = vadd.f32 %v11405_v54, %v3792_v19  ;;  %v3668_v59 = vadd.f32 %v11093_v46, %v11362_v50  ;;  %v3666_v19 = vadd.f32 %v11362_v50, %v11095_v40 }
 0x433   : > { %v11414_v32 = vadd.f32 %v4036_v43, %v11367_v5  ;;  %v4532_v0 = vadd.f32 %v11408_v7, %v3790_v53  ;;  %v3667_v11 = vadd.f32 %v11362_v50, %v11099_v28 }
 0x434   : > { %v4535_v15 = vadd.f32 %v11411_v1, %v3793_v56  ;;  %9439 = vmatmul.mubr.bf16.gmra.mrb[48].mxu0 %v13393_v24 }
 0x435   : > { %v4533_v13 = vadd.f32 %v11414_v32, %v3791_v3  ;;  %9442 = vmatprep.mubr.bf16.mxu0 %v13394_v38  ;;  %v3796_v38 = vmax.f32 %v3668_v59, 0.0  ;;  %v3795_v28 = vmax.f32 %v3667_v11, 0.0 }
 0x436   : > { %v4659_v48 = vpack.c.bf16 %v4535_v15, %v4534_v49  ;;  %v3794_v15 = vmax.f32 %v3666_v19, 0.0  ;;  %v3673_v19 = vadd.f32 %v11107_v4, %v11362_v50 }
 0x437   : > { %v9336_v56 = vpop.f32.mrb[200].mxu0  ;;  %v4658_v43 = vpack.c.bf16 %v4533_v13, %v4532_v0 }
 0x438   : > { %v11431_v53 = vadd.f32 %v9336_v56, %v11367_v5  ;;  %v4049_v3 = vpop.f32.mrb[201].mxu0  ;;  %v3801_v4 = vmax.f32 %v3673_v19, 0.0  ;;  %v13404_v19 = vld [vmem:[#allocation32_spill] sm:$0xff] }
 0x439   : > { %v11434_v24 = vadd.f32 %v4049_v3, %v11367_v5  ;;  %v9337_v46 = vpop.f32.mrb[202].mxu0  ;;  %9474 = vmatprep.mubr.bf16.mxu1 %v4658_v43  ;;  %v13397_v3 = vld [vmem:[#allocation30_spill] sm:$0xff] }
 0x43a   : > { %v11437_v49 = vadd.f32 %v9337_v46, %v11367_v5  ;;  %v4052_v40 = vpop.f32.mrb[203].mxu0  ;;  %9475 = vmatmul.mubr.bf16.gmra.mrb[196].mxu1 %v4659_v48  ;;  %v4538_v13 = vadd.f32 %v11431_v53, %v3796_v38  ;;  %v13399_v46 = vld [vmem:[#allocation36_spill] sm:$0xff]  ;;  %v3670_v38 = vadd.f32 %v11362_v50, %v11105_v44 }
 0x43b   : > { %13395 = vst [vmem:[#allocation27_spill] sm:$0xff] %v11434_v24  ;;  %v11440_v0 = vadd.f32 %v4052_v40, %v11367_v5  ;;  %v4536_v43 = vadd.f32 %v11434_v24, %v3794_v15  ;;  %v3672_v48 = vadd.f32 %v13399_v46, %v11362_v50 }
 0x43c   : > { %v4539_v56 = vadd.f32 %v11437_v49, %v3797_v39  ;;  %9443 = vmatmul.mubr.bf16.gmra.mrb[52].mxu0 %v13397_v3  ;;  %v3671_v39 = vadd.f32 %v11362_v50, %v11109_v6  ;;  %v3798_v6 = vmax.f32 %v3670_v38, 0.0 }
 0x43d   : > { %13396 = vst [vmem:[#allocation26_spill] sm:$0xff] %v11440_v0  ;;  %v4537_v59 = vadd.f32 %v11440_v0, %v3795_v28  ;;  %9446 = vmatprep.mubr.bf16.mxu0 %v13398_v29  ;;  %v3800_v0 = vmax.f32 %v3672_v48, 0.0  ;;  %v3676_v48 = vadd.f32 %v11207_v30, %v11362_v50  ;;  %v3675_v30 = vadd.f32 %v11362_v50, %v11215_v52 }
 0x43e   : > { %v4661_v11 = vpack.c.bf16 %v4539_v56, %v4538_v13  ;;  %v11465_v56 = vpop.f32.mrb[160].mxu1 }
 0x43f   : > { %v9340_v40 = vpop.f32.mrb[204].mxu0  ;;  %v4660_v3 = vpack.c.bf16 %v4537_v59, %v4536_v43  ;;  %v3799_v43 = vmax.f32 %v3671_v39, 0.0  ;;  %v3674_v39 = vadd.f32 %v11362_v50, %v11209_v25 }
 0x440   : > { %v11457_v15 = vadd.f32 %v9340_v40, %v11367_v5  ;;  %v4065_v28 = vpop.f32.mrb[205].mxu0  ;;  %v11470_v40 = vpop.f32.mrb[161].mxu1 }
 0x441   : > { %v11460_v29 = vadd.f32 %v4065_v28, %v11367_v5  ;;  %v9341_v46 = vpop.f32.mrb[206].mxu0  ;;  %9478 = vmatprep.mubr.bf16.mxu1 %v4660_v3 }
 0x442   : > { %13400 = vst [vmem:[#allocation29_spill] sm:$0xff] %v11457_v15  ;;  %v11463_v13 = vadd.f32 %v9341_v46, %v11367_v5  ;;  %v4068_v44 = vpop.f32.mrb[207].mxu0  ;;  %9479 = vmatmul.mubr.bf16.gmra.mrb[200].mxu1 %v4661_v11  ;;  %v4542_v28 = vadd.f32 %v11457_v15, %v3800_v0  ;;  %v11477_v46 = vpop.f32.mrb[162].mxu1  ;;  %v3677_v0 = vadd.f32 %v11212_v35, %v11362_v50  ;;  %v3804_v15 = vmax.f32 %v3676_v48, 0.0 }
 0x443   : > { %13401 = vst [vmem:[#allocation28_spill] sm:$0xff] %v11460_v29  ;;  %v11468_v59 = vadd.f32 %v4068_v44, %v11367_v5  ;;  %v4540_v11 = vadd.f32 %v11460_v29, %v3798_v6  ;;  %v13405_v44 = vld [vmem:[#allocation35_spill] sm:$0xff]  ;;  %v11484_v24 = vpop.f32.mrb[163].mxu1 }
 0x444   : > { %13402 = vst [vmem:[#allocation31_spill] sm:$0xff] %v11463_v13  ;;  %v4543_v3 = vadd.f32 %v11463_v13, %v3801_v4  ;;  %9447 = vmatmul.mubr.bf16.gmra.mrb[56].mxu0 %v13404_v19  ;;  %v3805_v29 = vmax.f32 %v3677_v0, 0.0  ;;  %v11499_v52 = vpop.f32.mrb[164].mxu1  ;;  %v3680_v0 = vadd.f32 %v11225_v37, %v11362_v50  ;;  %v3679_v37 = vadd.f32 %v11362_v50, %v11233_v62 }
 0x445   : > { %13403 = vst [vmem:[#allocation30_spill] sm:$0xff] %v11468_v59  ;;  %v4541_v38 = vadd.f32 %v11468_v59, %v3799_v43  ;;  %9450 = vmatprep.mubr.bf16.mxu0 %v13405_v44  ;;  %v3802_v59 = vmax.f32 %v3674_v39, 0.0 }
 0x446   : > { %v4663_v4 = vpack.c.bf16 %v4543_v3, %v4542_v28  ;;  %v3803_v3 = vmax.f32 %v3675_v30, 0.0  ;;  %v3807_v62 = vmax.f32 %v3679_v37, 0.0 }
 0x447   : > { %v9344_v19 = vpop.f32.mrb[208].mxu0  ;;  %v4662_v13 = vpack.c.bf16 %v4541_v38, %v4540_v11  ;;  %v11504_v11 = vpop.f32.mrb[165].mxu1 }
 0x448   : > { %v11491_v6 = vadd.f32 %v9344_v19, %v11367_v5  ;;  %v4081_v43 = vpop.f32.mrb[209].mxu0  ;;  %v11511_v19 = vpop.f32.mrb[166].mxu1 }
 0x449   : > { %v11494_v25 = vadd.f32 %v4081_v43, %v11367_v5  ;;  %v9345_v44 = vpop.f32.mrb[210].mxu0  ;;  %9482 = vmatprep.mubr.bf16.mxu1 %v4662_v13  ;;  %v13410_v13 = vld [vmem:[#allocation34_spill] sm:$0xff]  ;;  %v3678_v43 = vadd.f32 %v11362_v50, %v11227_v33 }
 0x44a   : > { %13406 = vst [vmem:[#allocation33_spill] sm:$0xff] %v11491_v6  ;;  %v11497_v35 = vadd.f32 %v9345_v44, %v11367_v5  ;;  %v4084_v28 = vpop.f32.mrb[211].mxu0  ;;  %9483 = vmatmul.mubr.bf16.gmra.mrb[204].mxu1 %v4663_v4  ;;  %v4546_v38 = vadd.f32 %v11491_v6, %v3804_v15  ;;  %v11517_v44 = vpop.f32.mrb[167].mxu1  ;;  %v3681_v15 = vadd.f32 %v11230_v34, %v11362_v50  ;;  %v3808_v6 = vmax.f32 %v3680_v0, 0.0 }
 0x44b   : > { %13407 = vst [vmem:[#allocation36_spill] sm:$0xff] %v11494_v25  ;;  %v11502_v48 = vadd.f32 %v4084_v28, %v11367_v5  ;;  %v4544_v4 = vadd.f32 %v11494_v25, %v3802_v59  ;;  %v10080_v28 = vld [vmem:[%s10556_s15] sm:$0xff]  }
 0x44c   : > { %13408 = vst [vmem:[#allocation32_spill] sm:$0xff] %v11497_v35  ;;  %v4547_v39 = vadd.f32 %v11497_v35, %v3805_v29  ;;  %9451 = vmatmul.mubr.bf16.gmra.mrb[60].mxu0 %v13410_v13 }
 0x44d   : > { %13409 = vst [vmem:[#allocation35_spill] sm:$0xff] %v11502_v48  ;;  %v4545_v30 = vadd.f32 %v11502_v48, %v3803_v3  ;;  %9614 = vmatprep.mubr.bf16.mxu0 %v10080_v28  ;;  %v3806_v48 = vmax.f32 %v3678_v43, 0.0  ;;  %v3809_v28 = vmax.f32 %v3681_v15, 0.0 }
 0x44e   : > { %v4665_v29 = vpack.c.bf16 %v4547_v39, %v4546_v38  ;;  %v11533_v39 = vpop.f32.mrb[168].mxu1 }
 0x44f   : > { %v9348_v13 = vpop.f32.mrb[212].mxu0  ;;  %v4664_v35 = vpack.c.bf16 %v4545_v30, %v4544_v4  ;;  %v11538_v4 = vpop.f32.mrb[169].mxu1 }
 0x450   : > { %v11525_v59 = vadd.f32 %v9348_v13, %v11367_v5  ;;  %v4097_v3 = vpop.f32.mrb[213].mxu0  ;;  %v11544_v15 = vpop.f32.mrb[170].mxu1  ;;  %v3682_v13 = vadd.f32 %v11362_v50, %v11245_v61 }
 0x451   : > { %v11528_v33 = vadd.f32 %v4097_v3, %v11367_v5  ;;  %v9349_v25 = vpop.f32.mrb[214].mxu0  ;;  %9486 = vmatprep.mubr.bf16.mxu1 %v4664_v35  ;;  %v3684_v35 = vadd.f32 %v11243_v8, %v11362_v50  ;;  %v11550_v37 = vpop.f32.mrb[171].mxu1  ;;  %v3685_v3 = vadd.f32 %v11248_v57, %v11362_v50 }
 0x452   : > { %13411 = vst [vmem:[#allocation34_spill] sm:$0xff] %v11525_v59  ;;  %v11531_v34 = vadd.f32 %v9349_v25, %v11367_v5  ;;  %v4100_v38 = vpop.f32.mrb[215].mxu0  ;;  %9487 = vmatmul.mubr.bf16.gmra.mrb[208].mxu1 %v4665_v29  ;;  %v4550_v30 = vadd.f32 %v11525_v59, %v3808_v6 }
 0x453   : > { %13412 = vst [vmem:[#allocation74_spill] sm:$0xff] %v11528_v33  ;;  %v11536_v0 = vadd.f32 %v4100_v38, %v11367_v5  ;;  %v4548_v25 = vadd.f32 %v11528_v33, %v3806_v48  ;;  %v3813_v33 = vmax.f32 %v3685_v3, 0.0  ;;  %v3688_v3 = vadd.f32 %v11261_v51, %v11362_v50 }
 0x454   : > { %13413 = vst [vmem:[#allocation75_spill] sm:$0xff] %v11531_v34  ;;  %v4551_v43 = vadd.f32 %v11531_v34, %v3809_v28  ;;  %v3683_v28 = vadd.f32 %v11362_v50, %v11251_v23  ;;  %v3812_v34 = vmax.f32 %v3684_v35, 0.0 }
 0x455   : > { %13414 = vst [vmem:[#allocation76_spill] sm:$0xff] %v11536_v0  ;;  %v4549_v29 = vadd.f32 %v11536_v0, %v3807_v62  ;;  %v3810_v62 = vmax.f32 %v3682_v13, 0.0 }
 0x456   : > { %v4667_v6 = vpack.c.bf16 %v4551_v43, %v4550_v30  ;;  %v11565_v43 = vpop.f32.mrb[172].mxu1  ;;  %v3811_v23 = vmax.f32 %v3683_v28, 0.0  ;;  %v3686_v28 = vadd.f32 %v11362_v50, %v11263_v20 }
 0x457   : > { %v9352_v38 = vpop.f32.mrb[216].mxu0  ;;  %v4666_v8 = vpack.c.bf16 %v4549_v29, %v4548_v25  ;;  %v11570_v25 = vpop.f32.mrb[173].mxu1 }
 0x458   : > { %v11557_v59 = vadd.f32 %v9352_v38, %v11367_v5  ;;  %v4113_v48 = vpop.f32.mrb[217].mxu0  ;;  %v11576_v38 = vpop.f32.mrb[174].mxu1 }
 0x459   : > { %v11560_v0 = vadd.f32 %v4113_v48, %v11367_v5  ;;  %v9353_v61 = vpop.f32.mrb[218].mxu0  ;;  %9490 = vmatprep.mubr.bf16.mxu1 %v4666_v8  ;;  %v11582_v48 = vpop.f32.mrb[175].mxu1 }
 0x45a   : > { %13415 = vst [vmem:[#allocation77_spill] sm:$0xff] %v11557_v59  ;;  %v11563_v57 = vadd.f32 %v9353_v61, %v11367_v5  ;;  %v4116_v30 = vpop.f32.mrb[219].mxu0  ;;  %9491 = vmatmul.mubr.bf16.gmra.mrb[212].mxu1 %v4667_v6  ;;  %v4554_v29 = vadd.f32 %v11557_v59, %v3812_v34  ;;  %v3689_v61 = vadd.f32 %v11266_v21, %v11362_v50 }
 0x45b   : > { %13416 = vst [vmem:[#allocation78_spill] sm:$0xff] %v11560_v0  ;;  %v11568_v35 = vadd.f32 %v4116_v30, %v11367_v5  ;;  %v4552_v8 = vadd.f32 %v11560_v0, %v3810_v62 }
 0x45c   : > { %13417 = vst [vmem:[#allocation79_spill] sm:$0xff] %v11563_v57  ;;  %v4555_v13 = vadd.f32 %v11563_v57, %v3813_v33  ;;  %v3687_v33 = vadd.f32 %v11362_v50, %v11269_v55  ;;  %v3816_v57 = vmax.f32 %v3688_v3, 0.0  ;;  %v3817_v0 = vmax.f32 %v3689_v61, 0.0 }
 0x45d   : > { %13418 = vst [vmem:[#allocation80_spill] sm:$0xff] %v11568_v35  ;;  %v4553_v6 = vadd.f32 %v11568_v35, %v3811_v23  ;;  %v3814_v23 = vmax.f32 %v3686_v28, 0.0 }
 0x45e   : > { %v4669_v34 = vpack.c.bf16 %v4555_v13, %v4554_v29  ;;  %v11597_v13 = vpop.f32.mrb[176].mxu1  ;;  %v3815_v55 = vmax.f32 %v3687_v33, 0.0  ;;  %v3693_v33 = vadd.f32 %v11133_v14, %v11362_v50 }
 0x45f   : > { %v9356_v30 = vpop.f32.mrb[220].mxu0  ;;  %v4668_v51 = vpack.c.bf16 %v4553_v6, %v4552_v8  ;;  %v11602_v8 = vpop.f32.mrb[177].mxu1 }
 0x460   : > { %v11589_v59 = vadd.f32 %v9356_v30, %v11367_v5  ;;  %v4129_v62 = vpop.f32.mrb[221].mxu0  ;;  %v11606_v30 = vpop.f32.mrb[178].mxu1  ;;  %v3821_v14 = vmax.f32 %v3693_v33, 0.0 }
 0x461   : > { %v11592_v35 = vadd.f32 %v4129_v62, %v11367_v5  ;;  %v9357_v20 = vpop.f32.mrb[222].mxu0  ;;  %9494 = vmatprep.mubr.bf16.mxu1 %v4668_v51  ;;  %v11610_v62 = vpop.f32.mrb[179].mxu1 }
 0x462   : > { %13419 = vst [vmem:[#allocation81_spill] sm:$0xff] %v11589_v59  ;;  %v11595_v21 = vadd.f32 %v9357_v20, %v11367_v5  ;;  %v4132_v29 = vpop.f32.mrb[223].mxu0  ;;  %9495 = vmatmul.mubr.bf16.gmra.mrb[216].mxu1 %v4669_v34  ;;  %v4558_v6 = vadd.f32 %v11589_v59, %v3816_v57  ;;  %v3692_v34 = vadd.f32 %v11129_v45, %v11362_v50  ;;  %v13441_v59 = vld [vmem:[#allocation16_spill] sm:$0xff] }
 0x463   : > { %13420 = vst [vmem:[#allocation82_spill] sm:$0xff] %v11592_v35  ;;  %v11600_v3 = vadd.f32 %v4132_v29, %v11367_v5  ;;  %v4556_v61 = vadd.f32 %v11592_v35, %v3814_v23  ;;  %v3690_v57 = vadd.f32 %v11362_v50, %v11131_v63 }
 0x464   : > { %13421 = vst [vmem:[#allocation83_spill] sm:$0xff] %v11595_v21  ;;  %v4559_v28 = vadd.f32 %v11595_v21, %v3817_v0  ;;  %v3691_v0 = vadd.f32 %v11362_v50, %v11135_v2  ;;  %v3820_v35 = vmax.f32 %v3692_v34, 0.0 }
 0x465   : > { %13422 = vst [vmem:[#allocation84_spill] sm:$0xff] %v11600_v3  ;;  %v4557_v51 = vadd.f32 %v11600_v3, %v3815_v55  ;;  %v3818_v2 = vmax.f32 %v3690_v57, 0.0  ;;  %v3696_v57 = vadd.f32 %v11141_v17, %v11362_v50 }
 0x466   : > { %v4671_v20 = vpack.c.bf16 %v4559_v28, %v4558_v6  ;;  %v11629_v28 = vpop.f32.mrb[180].mxu1 }
 0x467   : > { %v9360_v29 = vpop.f32.mrb[224].mxu0  ;;  %v4670_v21 = vpack.c.bf16 %v4557_v51, %v4556_v61  ;;  %v3819_v61 = vmax.f32 %v3691_v0, 0.0  ;;  %v3697_v0 = vadd.f32 %v11148_v41, %v11362_v50 }
 0x468   : > { %v11621_v23 = vadd.f32 %v9360_v29, %v11367_v5  ;;  %v4145_v55 = vpop.f32.mrb[225].mxu0  ;;  %v11634_v29 = vpop.f32.mrb[181].mxu1 }
 0x469   : > { %v11624_v3 = vadd.f32 %v4145_v55, %v11367_v5  ;;  %v9361_v45 = vpop.f32.mrb[226].mxu0  ;;  %9498 = vmatprep.mubr.bf16.mxu1 %v4670_v21  ;;  %v11638_v34 = vpop.f32.mrb[182].mxu1  ;;  %v3825_v41 = vmax.f32 %v3697_v0, 0.0 }
 0x46a   : > { %13423 = vst [vmem:[#allocation85_spill] sm:$0xff] %v11621_v23  ;;  %v11627_v6 = vadd.f32 %v9361_v45, %v11367_v5  ;;  %v4148_v63 = vpop.f32.mrb[227].mxu0  ;;  %9499 = vmatmul.mubr.bf16.gmra.mrb[220].mxu1 %v4671_v20  ;;  %v4562_v55 = vadd.f32 %v11621_v23, %v3820_v35  ;;  %v11642_v20 = vpop.f32.mrb[183].mxu1  ;;  %v3694_v35 = vadd.f32 %v11362_v50, %v11143_v60 }
 0x46b   : > { %13424 = vst [vmem:[#allocation86_spill] sm:$0xff] %v11624_v3  ;;  %v11632_v51 = vadd.f32 %v4148_v63, %v11367_v5  ;;  %v4560_v33 = vadd.f32 %v11624_v3, %v3818_v2  ;;  %v3824_v3 = vmax.f32 %v3696_v57, 0.0 }
 0x46c   : > { %13425 = vst [vmem:[#allocation87_spill] sm:$0xff] %v11627_v6  ;;  %v4563_v21 = vadd.f32 %v11627_v6, %v3821_v14  ;;  %v3695_v14 = vadd.f32 %v11362_v50, %v11150_v12  ;;  %v3822_v12 = vmax.f32 %v3694_v35, 0.0  ;;  %v3700_v35 = vadd.f32 %v11159_v16, %v11362_v50 }
 0x46d   : > { %13426 = vst [vmem:[#allocation88_spill] sm:$0xff] %v11632_v51  ;;  %v4561_v45 = vadd.f32 %v11632_v51, %v3819_v61 }
 0x46e   : > { %v4673_v63 = vpack.c.bf16 %v4563_v21, %v4562_v55  ;;  %v11661_v21 = vpop.f32.mrb[184].mxu1 }
 0x46f   : > { %v9364_v6 = vpop.f32.mrb[228].mxu0  ;;  %v4672_v23 = vpack.c.bf16 %v4561_v45, %v4560_v33  ;;  %v3823_v33 = vmax.f32 %v3695_v14, 0.0  ;;  %v11666_v45 = vpop.f32.mrb[185].mxu1  ;;  %v3701_v14 = vadd.f32 %v11166_v36, %v11362_v50 }
 0x470   : > { %v11653_v2 = vadd.f32 %v9364_v6, %v11367_v5  ;;  %v4161_v61 = vpop.f32.mrb[229].mxu0  ;;  %v11670_v57 = vpop.f32.mrb[186].mxu1 }
 0x471   : > { %v11656_v51 = vadd.f32 %v4161_v61, %v11367_v5  ;;  %v9365_v17 = vpop.f32.mrb[230].mxu0  ;;  %9502 = vmatprep.mubr.bf16.mxu1 %v4672_v23  ;;  %v3829_v36 = vmax.f32 %v3701_v14, 0.0 }
 0x472   : > { %13427 = vst [vmem:[#allocation89_spill] sm:$0xff] %v11653_v2  ;;  %v11659_v55 = vadd.f32 %v9365_v17, %v11367_v5  ;;  %v4164_v60 = vpop.f32.mrb[231].mxu0  ;;  %9503 = vmatmul.mubr.bf16.gmra.mrb[224].mxu1 %v4673_v63  ;;  %v4566_v61 = vadd.f32 %v11653_v2, %v3824_v3  ;;  %v11674_v63 = vpop.f32.mrb[187].mxu1  ;;  %v3698_v3 = vadd.f32 %v11362_v50, %v11161_v9 }
 0x473   : > { %13428 = vst [vmem:[#allocation90_spill] sm:$0xff] %v11656_v51  ;;  %v11664_v6 = vadd.f32 %v4164_v60, %v11367_v5  ;;  %v4564_v0 = vadd.f32 %v11656_v51, %v3822_v12  ;;  %v3828_v51 = vmax.f32 %v3700_v35, 0.0 }
 0x474   : > { %13429 = vst [vmem:[#allocation91_spill] sm:$0xff] %v11659_v55  ;;  %v4567_v23 = vadd.f32 %v11659_v55, %v3825_v41  ;;  %v3699_v41 = vadd.f32 %v11362_v50, %v11168_v26  ;;  %v3826_v26 = vmax.f32 %v3698_v3, 0.0  ;;  %v3704_v3 = vadd.f32 %v11177_v47, %v11362_v50 }
 0x475   : > { %13430 = vst [vmem:[#allocation92_spill] sm:$0xff] %v11664_v6  ;;  %v4565_v17 = vadd.f32 %v11664_v6, %v3823_v33 }
 0x476   : > { %v4675_v60 = vpack.c.bf16 %v4567_v23, %v4566_v61  ;;  %v11693_v23 = vpop.f32.mrb[188].mxu1 }
 0x477   : > { %v9368_v55 = vpop.f32.mrb[232].mxu0  ;;  %v4674_v2 = vpack.c.bf16 %v4565_v17, %v4564_v0  ;;  %v3827_v0 = vmax.f32 %v3699_v41, 0.0  ;;  %v11698_v17 = vpop.f32.mrb[189].mxu1  ;;  %v3705_v41 = vadd.f32 %v11184_v58, %v11362_v50 }
 0x478   : > { %v11685_v12 = vadd.f32 %v9368_v55, %v11367_v5  ;;  %v4177_v33 = vpop.f32.mrb[233].mxu0  ;;  %v11702_v35 = vpop.f32.mrb[190].mxu1 }
 0x479   : > { %v11688_v6 = vadd.f32 %v4177_v33, %v11367_v5  ;;  %v9369_v16 = vpop.f32.mrb[234].mxu0  ;;  %9506 = vmatprep.mubr.bf16.mxu1 %v4674_v2  ;;  %v3833_v58 = vmax.f32 %v3705_v41, 0.0  ;;  %v13439_v41 = vld [vmem:[#allocation15_spill] sm:$0xff] }
 0x47a   : > { %13431 = vst [vmem:[#allocation93_spill] sm:$0xff] %v11685_v12  ;;  %v11691_v61 = vadd.f32 %v9369_v16, %v11367_v5  ;;  %v4180_v9 = vpop.f32.mrb[235].mxu0  ;;  %9507 = vmatmul.mubr.bf16.gmra.mrb[228].mxu1 %v4675_v60  ;;  %v4570_v33 = vadd.f32 %v11685_v12, %v3828_v51  ;;  %v11706_v60 = vpop.f32.mrb[191].mxu1  ;;  %v3702_v51 = vadd.f32 %v11362_v50, %v11179_v18 }
 0x47b   : > { %13432 = vst [vmem:[#allocation94_spill] sm:$0xff] %v11688_v6  ;;  %v11696_v55 = vadd.f32 %v4180_v9, %v11367_v5  ;;  %v4568_v14 = vadd.f32 %v11688_v6, %v3826_v26  ;;  %v3832_v6 = vmax.f32 %v3704_v3, 0.0 }
 0x47c   : > { %13433 = vst [vmem:[#allocation95_spill] sm:$0xff] %v11691_v61  ;;  %v4571_v2 = vadd.f32 %v11691_v61, %v3829_v36  ;;  %v3703_v36 = vadd.f32 %v11362_v50, %v11186_v42 }
 0x47d   : > { %13434 = vst [vmem:[#allocation96_spill] sm:$0xff] %v11696_v55  ;;  %v4569_v16 = vadd.f32 %v11696_v55, %v3827_v0 }
 0x47e   : > { %v4677_v9 = vpack.c.bf16 %v4571_v2, %v4570_v33  ;;  %v3830_v2 = vmax.f32 %v3702_v51, 0.0  ;;  %v3831_v42 = vmax.f32 %v3703_v36, 0.0 }
 0x47f   : > { %v9372_v61 = vpop.f32.mrb[236].mxu0  ;;  %v4676_v12 = vpack.c.bf16 %v4569_v16, %v4568_v14 }
 0x480   : > { %v11717_v26 = vadd.f32 %v9372_v61, %v11367_v5  ;;  %v4193_v0 = vpop.f32.mrb[237].mxu0 }
 0x481   : > { %v11720_v55 = vadd.f32 %v4193_v0, %v11367_v5  ;;  %v9373_v47 = vpop.f32.mrb[238].mxu0  ;;  %9510 = vmatprep.mubr.bf16.mxu1 %v4676_v12  ;;  %v3708_v0 = vadd.f32 %v11287_v27, %v11362_v50 }
 0x482   : > { %13435 = vst [vmem:[#allocation97_spill] sm:$0xff] %v11717_v26  ;;  %v11723_v33 = vadd.f32 %v9373_v47, %v11367_v5  ;;  %v4196_v18 = vpop.f32.mrb[239].mxu0  ;;  %9511 = vmatmul.mubr.bf16.gmra.mrb[232].mxu1 %v4677_v9  ;;  %v4574_v61 = vadd.f32 %v11717_v26, %v3832_v6  ;;  %v3706_v47 = vadd.f32 %v11362_v50, %v13439_v41  ;;  %v13440_v9 = vld [vmem:[#allocation17_spill] sm:$0xff] }
 0x483   : > { %13436 = vst [vmem:[#allocation98_spill] sm:$0xff] %v11720_v55  ;;  %v11726_v14 = vadd.f32 %v4196_v18, %v11367_v5  ;;  %v4572_v12 = vadd.f32 %v11720_v55, %v3830_v2  ;;  %v3709_v51 = vadd.f32 %v13440_v9, %v11362_v50  ;;  %v3707_v6 = vadd.f32 %v11362_v50, %v13441_v59  ;;  %v13449_v55 = vld [vmem:[#allocation21_spill] sm:$0xff] }
 0x484   : > { %13437 = vst [vmem:[#allocation99_spill] sm:$0xff] %v11723_v33  ;;  %v4575_v16 = vadd.f32 %v11723_v33, %v3833_v58  ;;  %v3836_v58 = vmax.f32 %v3708_v0, 0.0  ;;  %v3834_v2 = vmax.f32 %v3706_v47, 0.0 }
 0x485   : > { %13438 = vst [vmem:[#allocation100_spill] sm:$0xff] %v11726_v14  ;;  %v4573_v3 = vadd.f32 %v11726_v14, %v3831_v42  ;;  %v3837_v41 = vmax.f32 %v3709_v51, 0.0  ;;  %v13447_v51 = vld [vmem:[#allocation57_spill] sm:$0xff] }
 0x486   : > { %v4679_v36 = vpack.c.bf16 %v4575_v16, %v4574_v61  ;;  %v3835_v16 = vmax.f32 %v3707_v6, 0.0 }
 0x487   : > { %v9376_v18 = vpop.f32.mrb[240].mxu0  ;;  %v4678_v26 = vpack.c.bf16 %v4573_v3, %v4572_v12  ;;  %v13446_v3 = vld [vmem:[#allocation56_spill] sm:$0xff] }
 0x488   : > { %v11741_v33 = vadd.f32 %v9376_v18, %v11367_v5  ;;  %v4209_v27 = vpop.f32.mrb[241].mxu0  ;;  %v3712_v47 = vadd.f32 %v13446_v3, %v11362_v50 }
 0x489   : > { %v11744_v42 = vadd.f32 %v4209_v27, %v11367_v5  ;;  %v9377_v14 = vpop.f32.mrb[242].mxu0  ;;  %9514 = vmatprep.mubr.bf16.mxu1 %v4678_v26 }
 0x48a   : > { %13442 = vst [vmem:[#allocation15_spill] sm:$0xff] %v11741_v33  ;;  %v11747_v9 = vadd.f32 %v9377_v14, %v11367_v5  ;;  %v4212_v61 = vpop.f32.mrb[243].mxu0  ;;  %9515 = vmatmul.mubr.bf16.gmra.mrb[236].mxu1 %v4679_v36  ;;  %v4578_v0 = vadd.f32 %v11741_v33, %v3836_v58  ;;  %v3710_v14 = vadd.f32 %v11362_v50, %v13447_v51  ;;  %v13448_v36 = vld [vmem:[#allocation18_spill] sm:$0xff] }
 0x48b   : > { %13443 = vst [vmem:[#allocation17_spill] sm:$0xff] %v11744_v42  ;;  %v11750_v59 = vadd.f32 %v4212_v61, %v11367_v5  ;;  %v4576_v18 = vadd.f32 %v11744_v42, %v3834_v2  ;;  %v3713_v6 = vadd.f32 %v13448_v36, %v11362_v50  ;;  %v3711_v58 = vadd.f32 %v11362_v50, %v13449_v55  ;;  %v13457_v42 = vld [vmem:[#allocation23_spill] sm:$0xff] }
 0x48c   : > { %13444 = vst [vmem:[#allocation16_spill] sm:$0xff] %v11747_v9  ;;  %v4579_v12 = vadd.f32 %v11747_v9, %v3837_v41  ;;  %v3840_v41 = vmax.f32 %v3712_v47, 0.0  ;;  %v3838_v2 = vmax.f32 %v3710_v14, 0.0 }
 0x48d   : > { %13445 = vst [vmem:[#allocation101_spill] sm:$0xff] %v11750_v59  ;;  %v4577_v26 = vadd.f32 %v11750_v59, %v3835_v16  ;;  %v3841_v51 = vmax.f32 %v3713_v6, 0.0  ;;  %v13455_v6 = vld [vmem:[#allocation63_spill] sm:$0xff] }
 0x48e   : > { %v4681_v27 = vpack.c.bf16 %v4579_v12, %v4578_v0  ;;  %v3839_v12 = vmax.f32 %v3711_v58, 0.0 }
 0x48f   : > { %v9380_v61 = vpop.f32.mrb[244].mxu0  ;;  %v4680_v33 = vpack.c.bf16 %v4577_v26, %v4576_v18  ;;  %v13454_v26 = vld [vmem:[#allocation62_spill] sm:$0xff] }
 0x490   : > { %v11765_v9 = vadd.f32 %v9380_v61, %v11367_v5  ;;  %v4225_v3 = vpop.f32.mrb[245].mxu0  ;;  %v3716_v14 = vadd.f32 %v13454_v26, %v11362_v50 }
 0x491   : > { %v11768_v16 = vadd.f32 %v4225_v3, %v11367_v5  ;;  %v9381_v59 = vpop.f32.mrb[246].mxu0  ;;  %9518 = vmatprep.mubr.bf16.mxu1 %v4680_v33 }
 0x492   : > { %13450 = vst [vmem:[#allocation56_spill] sm:$0xff] %v11765_v9  ;;  %v11771_v36 = vadd.f32 %v9381_v59, %v11367_v5  ;;  %v4228_v0 = vpop.f32.mrb[247].mxu0  ;;  %9519 = vmatmul.mubr.bf16.gmra.mrb[240].mxu1 %v4681_v27  ;;  %v4582_v47 = vadd.f32 %v11765_v9, %v3840_v41  ;;  %v3714_v59 = vadd.f32 %v11362_v50, %v13455_v6  ;;  %v13456_v27 = vld [vmem:[#allocation20_spill] sm:$0xff] }
 0x493   : > { %13451 = vst [vmem:[#allocation57_spill] sm:$0xff] %v11768_v16  ;;  %v11774_v55 = vadd.f32 %v4228_v0, %v11367_v5  ;;  %v4580_v61 = vadd.f32 %v11768_v16, %v3838_v2  ;;  %v3717_v58 = vadd.f32 %v13456_v27, %v11362_v50  ;;  %v3715_v41 = vadd.f32 %v11362_v50, %v13457_v42  ;;  %v13465_v16 = vld [vmem:[#allocation25_spill] sm:$0xff] }
 0x494   : > { %13452 = vst [vmem:[#allocation18_spill] sm:$0xff] %v11771_v36  ;;  %v4583_v18 = vadd.f32 %v11771_v36, %v3841_v51  ;;  %v3844_v51 = vmax.f32 %v3716_v14, 0.0  ;;  %v3842_v2 = vmax.f32 %v3714_v59, 0.0 }
 0x495   : > { %13453 = vst [vmem:[#allocation21_spill] sm:$0xff] %v11774_v55  ;;  %v4581_v33 = vadd.f32 %v11774_v55, %v3839_v12  ;;  %v3845_v6 = vmax.f32 %v3717_v58, 0.0  ;;  %v13463_v58 = vld [vmem:[#allocation69_spill] sm:$0xff] }
 0x496   : > { %v4683_v3 = vpack.c.bf16 %v4583_v18, %v4582_v47  ;;  %v3843_v18 = vmax.f32 %v3715_v41, 0.0 }
 0x497   : > { %v9384_v0 = vpop.f32.mrb[248].mxu0  ;;  %v4682_v9 = vpack.c.bf16 %v4581_v33, %v4580_v61  ;;  %v13462_v33 = vld [vmem:[#allocation68_spill] sm:$0xff] }
 0x498   : > { %v11789_v36 = vadd.f32 %v9384_v0, %v11367_v5  ;;  %v4241_v26 = vpop.f32.mrb[249].mxu0  ;;  %v3720_v59 = vadd.f32 %v13462_v33, %v11362_v50 }
 0x499   : > { %v11792_v12 = vadd.f32 %v4241_v26, %v11367_v5  ;;  %v9385_v55 = vpop.f32.mrb[250].mxu0  ;;  %9522 = vmatprep.mubr.bf16.mxu1 %v4682_v9 }
 0x49a   : > { %13458 = vst [vmem:[#allocation62_spill] sm:$0xff] %v11789_v36  ;;  %v11795_v27 = vadd.f32 %v9385_v55, %v11367_v5  ;;  %v4244_v47 = vpop.f32.mrb[251].mxu0  ;;  %9523 = vmatmul.mubr.bf16.gmra.mrb[244].mxu1 %v4683_v3  ;;  %v4586_v14 = vadd.f32 %v11789_v36, %v3844_v51  ;;  %v3718_v55 = vadd.f32 %v11362_v50, %v13463_v58  ;;  %v13464_v3 = vld [vmem:[#allocation22_spill] sm:$0xff] }
 0x49b   : > { %13459 = vst [vmem:[#allocation63_spill] sm:$0xff] %v11792_v12  ;;  %v11798_v42 = vadd.f32 %v4244_v47, %v11367_v5  ;;  %v4584_v0 = vadd.f32 %v11792_v12, %v3842_v2  ;;  %v3721_v41 = vadd.f32 %v13464_v3, %v11362_v50  ;;  %v3719_v51 = vadd.f32 %v11362_v50, %v13465_v16 }
 0x49c   : > { %13460 = vst [vmem:[#allocation20_spill] sm:$0xff] %v11795_v27  ;;  %v4587_v61 = vadd.f32 %v11795_v27, %v3845_v6  ;;  %v3848_v6 = vmax.f32 %v3720_v59, 0.0  ;;  %v3846_v2 = vmax.f32 %v3718_v55, 0.0 }
 0x49d   : > { %13461 = vst [vmem:[#allocation23_spill] sm:$0xff] %v11798_v42  ;;  %v4585_v9 = vadd.f32 %v11798_v42, %v3843_v18  ;;  %v3849_v58 = vmax.f32 %v3721_v41, 0.0 }
 0x49e   : > { %v4685_v26 = vpack.c.bf16 %v4587_v61, %v4586_v14  ;;  %v3847_v61 = vmax.f32 %v3719_v51, 0.0 }
 0x49f   : > { %v9388_v47 = vpop.f32.mrb[252].mxu0  ;;  %v4684_v36 = vpack.c.bf16 %v4585_v9, %v4584_v0 }
 0x4a0   : > { %v11813_v27 = vadd.f32 %v9388_v47, %v11367_v5  ;;  %v4257_v33 = vpop.f32.mrb[253].mxu0 }
 0x4a1   : > { %v11816_v18 = vadd.f32 %v4257_v33, %v11367_v5  ;;  %v9389_v42 = vpop.f32.mrb[254].mxu0  ;;  %9526 = vmatprep.mubr.bf16.mxu1 %v4684_v36  ;;  %v13470_v36 = vld [vmem:[#allocation37_spill] sm:$0xff] }
 0x4a2   : > { %13466 = vst [vmem:[#allocation68_spill] sm:$0xff] %v11813_v27  ;;  %v11819_v3 = vadd.f32 %v9389_v42, %v11367_v5  ;;  %v4260_v14 = vpop.f32.mrb[255].mxu0  ;;  %9527 = vmatmul.mubr.bf16.gmra.mrb[248].mxu1 %v4685_v26  ;;  %v4590_v59 = vadd.f32 %v11813_v27, %v3848_v6  ;;  %v3724_v41 = vadd.f32 %v13470_v36, %v11362_v50  ;;  %v13471_v42 = vld [vmem:[#allocation39_spill] sm:$0xff]  ;;  %v13472_v26 = vld [vmem:[#allocation38_spill] sm:$0xff] }
 0x4a3   : > { %13467 = vst [vmem:[#allocation69_spill] sm:$0xff] %v11816_v18  ;;  %v11822_v16 = vadd.f32 %v4260_v14, %v11367_v5  ;;  %v4588_v9 = vadd.f32 %v11816_v18, %v3846_v2  ;;  %v3725_v47 = vadd.f32 %v13471_v42, %v11362_v50  ;;  %v3722_v51 = vadd.f32 %v11362_v50, %v13472_v26  ;;  %v13473_v14 = vld [vmem:[#allocation40_spill] sm:$0xff] }
 0x4a4   : > { %13468 = vst [vmem:[#allocation22_spill] sm:$0xff] %v11819_v3  ;;  %v4591_v0 = vadd.f32 %v11819_v3, %v3849_v58  ;;  %v3723_v12 = vadd.f32 %v11362_v50, %v13473_v14 }
 0x4a5   : > { %13469 = vst [vmem:[#allocation25_spill] sm:$0xff] %v11822_v16  ;;  %v4589_v55 = vadd.f32 %v11822_v16, %v3847_v61  ;;  %v3852_v16 = vmax.f32 %v3724_v41, 0.0  ;;  %v3853_v42 = vmax.f32 %v3725_v47, 0.0  ;;  %v3850_v26 = vmax.f32 %v3722_v51, 0.0  ;;  %v13478_v41 = vld [vmem:[#allocation41_spill] sm:$0xff]  ;;  %v13480_v51 = vld [vmem:[#allocation42_spill] sm:$0xff] }
 0x4a6   : > { %v4687_v33 = vpack.c.bf16 %v4591_v0, %v4590_v59  ;;  %v3851_v14 = vmax.f32 %v3723_v12, 0.0  ;;  %v3728_v47 = vadd.f32 %v13478_v41, %v11362_v50  ;;  %v3726_v12 = vadd.f32 %v11362_v50, %v13480_v51 }
 0x4a7   : > { %v9392_v6 = vpop.f32.mrb[0].mxu0  ;;  %v4686_v27 = vpack.c.bf16 %v4589_v55, %v4588_v9 }
 0x4a8   : > { %v11837_v58 = vadd.f32 %v9392_v6, %v11367_v5  ;;  %v4273_v2 = vpop.f32.mrb[1].mxu0  ;;  %v3854_v51 = vmax.f32 %v3726_v12, 0.0  ;;  %v13488_v12 = vld [vmem:[#allocation46_spill] sm:$0xff] }
 0x4a9   : > { %v11840_v61 = vadd.f32 %v4273_v2, %v11367_v5  ;;  %v9393_v36 = vpop.f32.mrb[2].mxu0  ;;  %9530 = vmatprep.mubr.bf16.mxu1 %v4686_v27 }
 0x4aa   : > { %13474 = vst [vmem:[#allocation37_spill] sm:$0xff] %v11837_v58  ;;  %v11843_v59 = vadd.f32 %v9393_v36, %v11367_v5  ;;  %v4276_v0 = vpop.f32.mrb[3].mxu0  ;;  %9531 = vmatmul.mubr.bf16.gmra.mrb[252].mxu1 %v4687_v33  ;;  %v4594_v55 = vadd.f32 %v11837_v58, %v3852_v16  ;;  %v13479_v36 = vld [vmem:[#allocation43_spill] sm:$0xff] }
 0x4ab   : > { %13475 = vst [vmem:[#allocation39_spill] sm:$0xff] %v11840_v61  ;;  %v11846_v9 = vadd.f32 %v4276_v0, %v11367_v5  ;;  %v4592_v2 = vadd.f32 %v11840_v61, %v3850_v26  ;;  %v3729_v18 = vadd.f32 %v13479_v36, %v11362_v50  ;;  %v13481_v0 = vld [vmem:[#allocation44_spill] sm:$0xff] }
 0x4ac   : > { %13476 = vst [vmem:[#allocation38_spill] sm:$0xff] %v11843_v59  ;;  %v4595_v6 = vadd.f32 %v11843_v59, %v3853_v42  ;;  %v3727_v3 = vadd.f32 %v11362_v50, %v13481_v0 }
 0x4ad   : > { %13477 = vst [vmem:[#allocation40_spill] sm:$0xff] %v11846_v9  ;;  %v4593_v27 = vadd.f32 %v11846_v9, %v3851_v14  ;;  %v3856_v9 = vmax.f32 %v3728_v47, 0.0  ;;  %v3857_v36 = vmax.f32 %v3729_v18, 0.0  ;;  %v13486_v18 = vld [vmem:[#allocation45_spill] sm:$0xff] }
 0x4ae   : > { %v4689_v33 = vpack.c.bf16 %v4595_v6, %v4594_v55  ;;  %v3855_v0 = vmax.f32 %v3727_v3, 0.0  ;;  %v3732_v47 = vadd.f32 %v13486_v18, %v11362_v50  ;;  %v3730_v3 = vadd.f32 %v11362_v50, %v13488_v12 }
 0x4af   : > { %v9396_v16 = vpop.f32.mrb[4].mxu0  ;;  %v4688_v58 = vpack.c.bf16 %v4593_v27, %v4592_v2 }
 0x4b0   : > { %v11861_v42 = vadd.f32 %v9396_v16, %v11367_v5  ;;  %v4289_v26 = vpop.f32.mrb[5].mxu0  ;;  %v3858_v12 = vmax.f32 %v3730_v3, 0.0  ;;  %v13494_v3 = vld [vmem:[#allocation50_spill] sm:$0xff] }
 0x4b1   : > { %v11864_v14 = vadd.f32 %v4289_v26, %v11367_v5  ;;  %v9397_v41 = vpop.f32.mrb[6].mxu0  ;;  %9534 = vmatprep.mubr.bf16.mxu1 %v4688_v58 }
 0x4b2   : > { %13482 = vst [vmem:[#allocation41_spill] sm:$0xff] %v11861_v42  ;;  %v11867_v55 = vadd.f32 %v9397_v41, %v11367_v5  ;;  %v4292_v6 = vpop.f32.mrb[7].mxu0  ;;  %9535 = vmatmul.mubr.bf16.gmra.mrb[0].mxu1 %v4689_v33  ;;  %v4598_v27 = vadd.f32 %v11861_v42, %v3856_v9  ;;  %v13487_v41 = vld [vmem:[#allocation47_spill] sm:$0xff] }
 0x4b3   : > { %13483 = vst [vmem:[#allocation43_spill] sm:$0xff] %v11864_v14  ;;  %v11870_v2 = vadd.f32 %v4292_v6, %v11367_v5  ;;  %v4596_v26 = vadd.f32 %v11864_v14, %v3854_v51  ;;  %v3733_v61 = vadd.f32 %v13487_v41, %v11362_v50  ;;  %v13489_v6 = vld [vmem:[#allocation48_spill] sm:$0xff] }
 0x4b4   : > { %13484 = vst [vmem:[#allocation42_spill] sm:$0xff] %v11867_v55  ;;  %v4599_v16 = vadd.f32 %v11867_v55, %v3857_v36  ;;  %v3731_v59 = vadd.f32 %v11362_v50, %v13489_v6 }
 0x4b5   : > { %13485 = vst [vmem:[#allocation44_spill] sm:$0xff] %v11870_v2  ;;  %v4597_v58 = vadd.f32 %v11870_v2, %v3855_v0  ;;  %v3860_v2 = vmax.f32 %v3732_v47, 0.0  ;;  %v3861_v41 = vmax.f32 %v3733_v61, 0.0  ;;  %v13492_v61 = vld [vmem:[#allocation49_spill] sm:$0xff] }
 0x4b6   : > { %v4691_v33 = vpack.c.bf16 %v4599_v16, %v4598_v27  ;;  %v3859_v6 = vmax.f32 %v3731_v59, 0.0  ;;  %v3736_v47 = vadd.f32 %v13492_v61, %v11362_v50  ;;  %v3734_v59 = vadd.f32 %v11362_v50, %v13494_v3 }
 0x4b7   : > { %v9400_v9 = vpop.f32.mrb[8].mxu0  ;;  %v4690_v42 = vpack.c.bf16 %v4597_v58, %v4596_v26 }
 0x4b8   : > { %v11885_v36 = vadd.f32 %v9400_v9, %v11367_v5  ;;  %v4305_v51 = vpop.f32.mrb[9].mxu0  ;;  %v3862_v3 = vmax.f32 %v3734_v59, 0.0  ;;  %v3739_v59 = vadd.f32 %v11362_v50, %v11484_v24 }
 0x4b9   : > { %v11888_v0 = vadd.f32 %v4305_v51, %v11367_v5  ;;  %v9401_v18 = vpop.f32.mrb[10].mxu0  ;;  %9538 = vmatprep.mubr.bf16.mxu1 %v4690_v42 }
 0x4ba   : > { %13490 = vst [vmem:[#allocation45_spill] sm:$0xff] %v11885_v36  ;;  %v11891_v27 = vadd.f32 %v9401_v18, %v11367_v5  ;;  %v4308_v16 = vpop.f32.mrb[11].mxu0  ;;  %9539 = vmatmul.mubr.bf16.gmra.mrb[4].mxu1 %v4691_v33  ;;  %v4602_v58 = vadd.f32 %v11885_v36, %v3860_v2  ;;  %v13493_v18 = vld [vmem:[#allocation51_spill] sm:$0xff]  ;;  %v3867_v24 = vmax.f32 %v3739_v59, 0.0  ;;  %v3743_v59 = vadd.f32 %v11362_v50, %v11517_v44 }
 0x4bb   : > { %v11894_v26 = vadd.f32 %v4308_v16, %v11367_v5  ;;  %v4600_v51 = vadd.f32 %v11888_v0, %v3858_v12  ;;  %v3737_v14 = vadd.f32 %v13493_v18, %v11362_v50  ;;  %v13495_v16 = vld [vmem:[#allocation52_spill] sm:$0xff] }
 0x4bc   : > { %v4603_v9 = vadd.f32 %v11891_v27, %v3861_v41  ;;  %v3735_v55 = vadd.f32 %v11362_v50, %v13495_v16  ;;  %v3871_v44 = vmax.f32 %v3743_v59, 0.0  ;;  %v3747_v59 = vadd.f32 %v11362_v50, %v11550_v37 }
 0x4bd   : > { %13491 = vst [vmem:[#allocation47_spill] sm:$0xff] %v11894_v26  ;;  %v4601_v42 = vadd.f32 %v11894_v26, %v3859_v6  ;;  %v3864_v26 = vmax.f32 %v3736_v47, 0.0  ;;  %v3865_v18 = vmax.f32 %v3737_v14, 0.0  ;;  %v3738_v47 = vadd.f32 %v11362_v50, %v11470_v40 }
 0x4be   : > { %v4693_v33 = vpack.c.bf16 %v4603_v9, %v4602_v58  ;;  %v3863_v16 = vmax.f32 %v3735_v55, 0.0  ;;  %v3741_v55 = vadd.f32 %v11477_v46, %v11362_v50  ;;  %v3875_v37 = vmax.f32 %v3747_v59, 0.0 }
 0x4bf   : > { %v9404_v2 = vpop.f32.mrb[12].mxu0  ;;  %v4692_v36 = vpack.c.bf16 %v4601_v42, %v4600_v51  ;;  %v3751_v59 = vadd.f32 %v11362_v50, %v11582_v48 }
 0x4c0   : > { %v11909_v41 = vadd.f32 %v9404_v2, %v11367_v5  ;;  %v4321_v12 = vpop.f32.mrb[13].mxu0  ;;  %v3869_v40 = vmax.f32 %v3741_v55, 0.0 }
 0x4c1   : > { %v11912_v6 = vadd.f32 %v4321_v12, %v11367_v5  ;;  %v9405_v61 = vpop.f32.mrb[14].mxu0  ;;  %9542 = vmatprep.mubr.bf16.mxu1 %v4692_v36  ;;  %v3740_v12 = vadd.f32 %v11465_v56, %v11362_v50  ;;  %v3879_v48 = vmax.f32 %v3751_v59, 0.0 }
 0x4c2   : > { %v11915_v58 = vadd.f32 %v9405_v61, %v11367_v5  ;;  %v4324_v9 = vpop.f32.mrb[15].mxu0  ;;  %9543 = vmatmul.mubr.bf16.gmra.mrb[8].mxu1 %v4693_v33  ;;  %v4606_v42 = vadd.f32 %v11909_v41, %v3864_v26 }
 0x4c3   : > { %v11918_v51 = vadd.f32 %v4324_v9, %v11367_v5  ;;  %v4604_v36 = vadd.f32 %v11912_v6, %v3862_v3  ;;  %v3866_v3 = vmax.f32 %v3738_v47, 0.0 }
 0x4c4   : > { %v4607_v2 = vadd.f32 %v11915_v58, %v3865_v18  ;;  %v3868_v18 = vmax.f32 %v3740_v12, 0.0 }
 0x4c5   : > { %13496 = vst [vmem:[#allocation46_spill] sm:$0xff] %v11918_v51  ;;  %v4605_v14 = vadd.f32 %v11918_v51, %v3863_v16 }
 0x4c6   : > { %v4695_v33 = vpack.c.bf16 %v4607_v2, %v4606_v42 }
 0x4c7   : > { %v9408_v26 = vpop.f32.mrb[16].mxu0  ;;  %v4694_v61 = vpack.c.bf16 %v4605_v14, %v4604_v36  ;;  %v3744_v14 = vadd.f32 %v11499_v52, %v11362_v50 }
 0x4c8   : > { %v11933_v9 = vadd.f32 %v9408_v26, %v11367_v5  ;;  %v4337_v56 = vpop.f32.mrb[17].mxu0 }
 0x4c9   : > { %v11936_v16 = vadd.f32 %v4337_v56, %v11367_v5  ;;  %v9409_v51 = vpop.f32.mrb[18].mxu0  ;;  %9546 = vmatprep.mubr.bf16.mxu1 %v4694_v61  ;;  %v3872_v56 = vmax.f32 %v3744_v14, 0.0 }
 0x4ca   : > { %v11939_v42 = vadd.f32 %v9409_v51, %v11367_v5  ;;  %v4340_v46 = vpop.f32.mrb[19].mxu0  ;;  %9547 = vmatmul.mubr.bf16.gmra.mrb[12].mxu1 %v4695_v33  ;;  %v4610_v12 = vadd.f32 %v11933_v9, %v3868_v18  ;;  %v3742_v51 = vadd.f32 %v11362_v50, %v11504_v11  ;;  %v3745_v33 = vadd.f32 %v11511_v19, %v11362_v50 }
 0x4cb   : > { %v11942_v2 = vadd.f32 %v4340_v46, %v11367_v5  ;;  %v4608_v47 = vadd.f32 %v11936_v16, %v3866_v3 }
 0x4cc   : > { %v4611_v36 = vadd.f32 %v11939_v42, %v3869_v40  ;;  %v3870_v3 = vmax.f32 %v3742_v51, 0.0  ;;  %v3873_v11 = vmax.f32 %v3745_v33, 0.0 }
 0x4cd   : > { %v4609_v55 = vadd.f32 %v11942_v2, %v3867_v24 }
 0x4ce   : > { %v4697_v26 = vpack.c.bf16 %v4611_v36, %v4610_v12 }
 0x4cf   : > { %v9412_v61 = vpop.f32.mrb[20].mxu0  ;;  %v4696_v18 = vpack.c.bf16 %v4609_v55, %v4608_v47  ;;  %v3748_v55 = vadd.f32 %v11533_v39, %v11362_v50 }
 0x4d0   : > { %v11957_v40 = vadd.f32 %v9412_v61, %v11367_v5  ;;  %v4353_v52 = vpop.f32.mrb[21].mxu0  ;;  %v3746_v61 = vadd.f32 %v11362_v50, %v11538_v4 }
 0x4d1   : > { %v11960_v46 = vadd.f32 %v4353_v52, %v11367_v5  ;;  %v9413_v24 = vpop.f32.mrb[22].mxu0  ;;  %9550 = vmatprep.mubr.bf16.mxu1 %v4696_v18 }
 0x4d2   : > { %v11963_v12 = vadd.f32 %v9413_v24, %v11367_v5  ;;  %v4356_v19 = vpop.f32.mrb[23].mxu0  ;;  %9551 = vmatmul.mubr.bf16.gmra.mrb[16].mxu1 %v4697_v26  ;;  %v4614_v14 = vadd.f32 %v11957_v40, %v3872_v56  ;;  %v3749_v26 = vadd.f32 %v11544_v15, %v11362_v50  ;;  %v3876_v24 = vmax.f32 %v3748_v55, 0.0 }
 0x4d3   : > { %v11966_v36 = vadd.f32 %v4356_v19, %v11367_v5  ;;  %v4612_v51 = vadd.f32 %v11960_v46, %v3870_v3  ;;  %v3874_v3 = vmax.f32 %v3746_v61, 0.0 }
 0x4d4   : > { %v4615_v47 = vadd.f32 %v11963_v12, %v3873_v11  ;;  %v3877_v4 = vmax.f32 %v3749_v26, 0.0 }
 0x4d5   : > { %v4613_v33 = vadd.f32 %v11966_v36, %v3871_v44 }
 0x4d6   : > { %v4699_v18 = vpack.c.bf16 %v4615_v47, %v4614_v14 }
 0x4d7   : > { %v9416_v56 = vpop.f32.mrb[24].mxu0  ;;  %v4698_v52 = vpack.c.bf16 %v4613_v33, %v4612_v51  ;;  %v3752_v33 = vadd.f32 %v11565_v43, %v11362_v50 }
 0x4d8   : > { %v11981_v11 = vadd.f32 %v9416_v56, %v11367_v5  ;;  %v4369_v39 = vpop.f32.mrb[25].mxu0  ;;  %v3750_v56 = vadd.f32 %v11362_v50, %v11570_v25 }
 0x4d9   : > { %v11984_v19 = vadd.f32 %v4369_v39, %v11367_v5  ;;  %v9417_v44 = vpop.f32.mrb[26].mxu0  ;;  %9554 = vmatprep.mubr.bf16.mxu1 %v4698_v52 }
 0x4da   : > { %v11987_v14 = vadd.f32 %v9417_v44, %v11367_v5  ;;  %v4372_v15 = vpop.f32.mrb[27].mxu0  ;;  %9555 = vmatmul.mubr.bf16.gmra.mrb[20].mxu1 %v4699_v18  ;;  %v4618_v55 = vadd.f32 %v11981_v11, %v3876_v24  ;;  %v3753_v18 = vadd.f32 %v11576_v38, %v11362_v50  ;;  %v3880_v44 = vmax.f32 %v3752_v33, 0.0 }
 0x4db   : > { %v11990_v47 = vadd.f32 %v4372_v15, %v11367_v5  ;;  %v4616_v61 = vadd.f32 %v11984_v19, %v3874_v3  ;;  %v3878_v3 = vmax.f32 %v3750_v56, 0.0 }
 0x4dc   : > { %v4619_v51 = vadd.f32 %v11987_v14, %v3877_v4  ;;  %v3881_v25 = vmax.f32 %v3753_v18, 0.0 }
 0x4dd   : > { %13497 = vst [vmem:[#allocation48_spill] sm:$0xff] %v11990_v47  ;;  %v4617_v26 = vadd.f32 %v11990_v47, %v3875_v37 }
 0x4de   : > { %v4701_v52 = vpack.c.bf16 %v4619_v51, %v4618_v55 }
 0x4df   : > { %v9420_v24 = vpop.f32.mrb[28].mxu0  ;;  %v4700_v39 = vpack.c.bf16 %v4617_v26, %v4616_v61 }
 0x4e0   : > { %v12005_v4 = vadd.f32 %v9420_v24, %v11367_v5  ;;  %v4385_v43 = vpop.f32.mrb[29].mxu0  ;;  %v13502_v24 = vld [vmem:[#allocation19_spill] sm:$0xff] }
 0x4e1   : > { %v12008_v15 = vadd.f32 %v4385_v43, %v11367_v5  ;;  %v9421_v37 = vpop.f32.mrb[30].mxu0  ;;  %9558 = vmatprep.mubr.bf16.mxu1 %v4700_v39  ;;  %v3756_v18 = vadd.f32 %v13502_v24, %v11362_v50  ;;  %v13503_v39 = vld [vmem:[#allocation54_spill] sm:$0xff] }
 0x4e2   : > { %13498 = vst [vmem:[#allocation49_spill] sm:$0xff] %v12005_v4  ;;  %v12011_v55 = vadd.f32 %v9421_v37, %v11367_v5  ;;  %v4388_v38 = vpop.f32.mrb[31].mxu0  ;;  %9559 = vmatmul.mubr.bf16.gmra.mrb[24].mxu1 %v4701_v52  ;;  %v4622_v33 = vadd.f32 %v12005_v4, %v3880_v44  ;;  %v3757_v43 = vadd.f32 %v13503_v39, %v11362_v50  ;;  %v13504_v52 = vld [vmem:[#allocation53_spill] sm:$0xff] }
 0x4e3   : > { %13499 = vst [vmem:[#allocation51_spill] sm:$0xff] %v12008_v15  ;;  %v12014_v51 = vadd.f32 %v4388_v38, %v11367_v5  ;;  %v4620_v26 = vadd.f32 %v12008_v15, %v3878_v3  ;;  %v3754_v59 = vadd.f32 %v11362_v50, %v13504_v52  ;;  %v13505_v38 = vld [vmem:[#allocation55_spill] sm:$0xff] }
 0x4e4   : > { %13500 = vst [vmem:[#allocation50_spill] sm:$0xff] %v12011_v55  ;;  %v4623_v61 = vadd.f32 %v12011_v55, %v3881_v25  ;;  %v3755_v47 = vadd.f32 %v11362_v50, %v13505_v38  ;;  %v3885_v39 = vmax.f32 %v3757_v43, 0.0 }
 0x4e5   : > { %13501 = vst [vmem:[#allocation52_spill] sm:$0xff] %v12014_v51  ;;  %v4621_v56 = vadd.f32 %v12014_v51, %v3879_v48  ;;  %v3884_v51 = vmax.f32 %v3756_v18, 0.0  ;;  %v3882_v52 = vmax.f32 %v3754_v59, 0.0  ;;  %v13510_v18 = vld [vmem:[#allocation58_spill] sm:$0xff]  ;;  %v13512_v59 = vld [vmem:[#allocation59_spill] sm:$0xff] }
 0x4e6   : > { %v4703_v37 = vpack.c.bf16 %v4623_v61, %v4622_v33  ;;  %v3883_v38 = vmax.f32 %v3755_v47, 0.0  ;;  %v3760_v43 = vadd.f32 %v13510_v18, %v11362_v50  ;;  %v3758_v47 = vadd.f32 %v11362_v50, %v13512_v59 }
 0x4e7   : > { %v9424_v44 = vpop.f32.mrb[32].mxu0  ;;  %v4702_v4 = vpack.c.bf16 %v4621_v56, %v4620_v26 }
 0x4e8   : > { %v12029_v25 = vadd.f32 %v9424_v44, %v11367_v5  ;;  %v4401_v3 = vpop.f32.mrb[33].mxu0  ;;  %v3886_v59 = vmax.f32 %v3758_v47, 0.0  ;;  %v13520_v47 = vld [vmem:[#allocation65_spill] sm:$0xff] }
 0x4e9   : > { %v12032_v48 = vadd.f32 %v4401_v3, %v11367_v5  ;;  %v9425_v24 = vpop.f32.mrb[34].mxu0  ;;  %9562 = vmatprep.mubr.bf16.mxu1 %v4702_v4 }
 0x4ea   : > { %13506 = vst [vmem:[#allocation19_spill] sm:$0xff] %v12029_v25  ;;  %v12035_v33 = vadd.f32 %v9425_v24, %v11367_v5  ;;  %v4404_v61 = vpop.f32.mrb[35].mxu0  ;;  %9563 = vmatmul.mubr.bf16.gmra.mrb[28].mxu1 %v4703_v37  ;;  %v4626_v56 = vadd.f32 %v12029_v25, %v3884_v51  ;;  %v13511_v24 = vld [vmem:[#allocation60_spill] sm:$0xff] }
 0x4eb   : > { %13507 = vst [vmem:[#allocation54_spill] sm:$0xff] %v12032_v48  ;;  %v12038_v26 = vadd.f32 %v4404_v61, %v11367_v5  ;;  %v4624_v3 = vadd.f32 %v12032_v48, %v3882_v52  ;;  %v3761_v15 = vadd.f32 %v13511_v24, %v11362_v50  ;;  %v13513_v61 = vld [vmem:[#allocation61_spill] sm:$0xff] }
 0x4ec   : > { %13508 = vst [vmem:[#allocation53_spill] sm:$0xff] %v12035_v33  ;;  %v4627_v44 = vadd.f32 %v12035_v33, %v3885_v39  ;;  %v3759_v55 = vadd.f32 %v11362_v50, %v13513_v61 }
 0x4ed   : > { %13509 = vst [vmem:[#allocation55_spill] sm:$0xff] %v12038_v26  ;;  %v4625_v4 = vadd.f32 %v12038_v26, %v3883_v38  ;;  %v3888_v26 = vmax.f32 %v3760_v43, 0.0  ;;  %v3889_v24 = vmax.f32 %v3761_v15, 0.0  ;;  %v13518_v15 = vld [vmem:[#allocation64_spill] sm:$0xff] }
 0x4ee   : > { %v4705_v37 = vpack.c.bf16 %v4627_v44, %v4626_v56  ;;  %v3887_v61 = vmax.f32 %v3759_v55, 0.0  ;;  %v3764_v43 = vadd.f32 %v13518_v15, %v11362_v50  ;;  %v3762_v55 = vadd.f32 %v11362_v50, %v13520_v47 }
 0x4ef   : > { %v9428_v51 = vpop.f32.mrb[36].mxu0  ;;  %v4704_v25 = vpack.c.bf16 %v4625_v4, %v4624_v3 }
 0x4f0   : > { %v12053_v39 = vadd.f32 %v9428_v51, %v11367_v5  ;;  %v4417_v52 = vpop.f32.mrb[37].mxu0  ;;  %v3890_v47 = vmax.f32 %v3762_v55, 0.0  ;;  %v13526_v55 = vld [vmem:[#allocation71_spill] sm:$0xff] }
 0x4f1   : > { %v12056_v38 = vadd.f32 %v4417_v52, %v11367_v5  ;;  %v9429_v18 = vpop.f32.mrb[38].mxu0  ;;  %9566 = vmatprep.mubr.bf16.mxu1 %v4704_v25 }
 0x4f2   : > { %13514 = vst [vmem:[#allocation58_spill] sm:$0xff] %v12053_v39  ;;  %v12059_v56 = vadd.f32 %v9429_v18, %v11367_v5  ;;  %v4420_v44 = vpop.f32.mrb[39].mxu0  ;;  %9567 = vmatmul.mubr.bf16.gmra.mrb[32].mxu1 %v4705_v37  ;;  %v4630_v4 = vadd.f32 %v12053_v39, %v3888_v26  ;;  %v13519_v18 = vld [vmem:[#allocation66_spill] sm:$0xff] }
 0x4f3   : > { %13515 = vst [vmem:[#allocation60_spill] sm:$0xff] %v12056_v38  ;;  %v12062_v3 = vadd.f32 %v4420_v44, %v11367_v5  ;;  %v4628_v52 = vadd.f32 %v12056_v38, %v3886_v59  ;;  %v3765_v48 = vadd.f32 %v13519_v18, %v11362_v50  ;;  %v13521_v44 = vld [vmem:[#allocation67_spill] sm:$0xff] }
 0x4f4   : > { %13516 = vst [vmem:[#allocation59_spill] sm:$0xff] %v12059_v56  ;;  %v4631_v51 = vadd.f32 %v12059_v56, %v3889_v24  ;;  %v3763_v33 = vadd.f32 %v11362_v50, %v13521_v44 }
 0x4f5   : > { %13517 = vst [vmem:[#allocation61_spill] sm:$0xff] %v12062_v3  ;;  %v4629_v25 = vadd.f32 %v12062_v3, %v3887_v61  ;;  %v3892_v3 = vmax.f32 %v3764_v43, 0.0  ;;  %v3893_v18 = vmax.f32 %v3765_v48, 0.0  ;;  %v13524_v48 = vld [vmem:[#allocation70_spill] sm:$0xff] }
 0x4f6   : > { %v4707_v37 = vpack.c.bf16 %v4631_v51, %v4630_v4  ;;  %v3891_v44 = vmax.f32 %v3763_v33, 0.0  ;;  %v3768_v43 = vadd.f32 %v13524_v48, %v11362_v50  ;;  %v3766_v33 = vadd.f32 %v11362_v50, %v13526_v55 }
 0x4f7   : > { %v9432_v26 = vpop.f32.mrb[40].mxu0  ;;  %v4706_v39 = vpack.c.bf16 %v4629_v25, %v4628_v52 }
 0x4f8   : > { %v12077_v24 = vadd.f32 %v9432_v26, %v11367_v5  ;;  %v4433_v59 = vpop.f32.mrb[41].mxu0  ;;  %v3894_v55 = vmax.f32 %v3766_v33, 0.0 }
 0x4f9   : > { %v12080_v61 = vadd.f32 %v4433_v59, %v11367_v5  ;;  %v9433_v15 = vpop.f32.mrb[42].mxu0  ;;  %9570 = vmatprep.mubr.bf16.mxu1 %v4706_v39 }
 0x4fa   : > { %13522 = vst [vmem:[#allocation64_spill] sm:$0xff] %v12077_v24  ;;  %v12083_v4 = vadd.f32 %v9433_v15, %v11367_v5  ;;  %v4436_v51 = vpop.f32.mrb[43].mxu0  ;;  %9571 = vmatmul.mubr.bf16.gmra.mrb[36].mxu1 %v4707_v37  ;;  %v4634_v25 = vadd.f32 %v12077_v24, %v3892_v3  ;;  %v13525_v15 = vld [vmem:[#allocation72_spill] sm:$0xff] }
 0x4fb   : > { %v12086_v52 = vadd.f32 %v4436_v51, %v11367_v5  ;;  %v4632_v59 = vadd.f32 %v12080_v61, %v3890_v47  ;;  %v3769_v38 = vadd.f32 %v13525_v15, %v11362_v50  ;;  %v13527_v51 = vld [vmem:[#allocation73_spill] sm:$0xff] }
 0x4fc   : > { %v4635_v26 = vadd.f32 %v12083_v4, %v3893_v18  ;;  %v3767_v56 = vadd.f32 %v11362_v50, %v13527_v51 }
 0x4fd   : > { %13523 = vst [vmem:[#allocation66_spill] sm:$0xff] %v12086_v52  ;;  %v4633_v39 = vadd.f32 %v12086_v52, %v3891_v44  ;;  %v3896_v52 = vmax.f32 %v3768_v43, 0.0  ;;  %v3897_v15 = vmax.f32 %v3769_v38, 0.0  ;;  %v3772_v38 = vadd.f32 %v11597_v13, %v11362_v50 }
 0x4fe   : > { %v4709_v37 = vpack.c.bf16 %v4635_v26, %v4634_v25  ;;  %v3895_v51 = vmax.f32 %v3767_v56, 0.0 }
 0x4ff   : > { %v9436_v3 = vpop.f32.mrb[44].mxu0  ;;  %v4708_v24 = vpack.c.bf16 %v4633_v39, %v4632_v59 }
 0x500   : > { %v12101_v18 = vadd.f32 %v9436_v3, %v11367_v5  ;;  %v4449_v47 = vpop.f32.mrb[45].mxu0 }
 0x501   : > { %v12104_v44 = vadd.f32 %v4449_v47, %v11367_v5  ;;  %v9437_v48 = vpop.f32.mrb[46].mxu0  ;;  %9574 = vmatprep.mubr.bf16.mxu1 %v4708_v24 }
 0x502   : > { %13528 = vst [vmem:[#allocation65_spill] sm:$0xff] %v12101_v18  ;;  %v12107_v25 = vadd.f32 %v9437_v48, %v11367_v5  ;;  %v4452_v26 = vpop.f32.mrb[47].mxu0  ;;  %9575 = vmatmul.mubr.bf16.gmra.mrb[40].mxu1 %v4709_v37  ;;  %v4638_v39 = vadd.f32 %v12101_v18, %v3896_v52  ;;  %v3773_v37 = vadd.f32 %v11606_v30, %v11362_v50 }
 0x503   : > { %13529 = vst [vmem:[#allocation67_spill] sm:$0xff] %v12104_v44  ;;  %v12110_v59 = vadd.f32 %v4452_v26, %v11367_v5  ;;  %v4636_v47 = vadd.f32 %v12104_v44, %v3894_v55  ;;  %v3770_v48 = vadd.f32 %v11362_v50, %v11602_v8  ;;  %v3771_v52 = vadd.f32 %v11362_v50, %v11610_v62 }
 0x504   : > { %13530 = vst [vmem:[#allocation70_spill] sm:$0xff] %v12107_v25  ;;  %v4639_v3 = vadd.f32 %v12107_v25, %v3897_v15  ;;  %v3901_v8 = vmax.f32 %v3773_v37, 0.0 }
 0x505   : > { %13531 = vst [vmem:[#allocation72_spill] sm:$0xff] %v12110_v59  ;;  %v4637_v24 = vadd.f32 %v12110_v59, %v3895_v51  ;;  %v9472_v43 = vpop.f32.mrb[192].mxu1 }
 0x506   : > { %v4711_v33 = vpack.c.bf16 %v4639_v3, %v4638_v39  ;;  %v4819_v56 = vpop.f32.mrb[193].mxu1  ;;  %v3900_v3 = vmax.f32 %v3772_v38, 0.0 }
 0x507   : > { %v9440_v15 = vpop.f32.mrb[48].mxu0  ;;  %v9473_v26 = vpop.f32.mrb[194].mxu1  ;;  %v4710_v55 = vpack.c.bf16 %v4637_v24, %v4636_v47  ;;  %v3898_v47 = vmax.f32 %v3770_v48, 0.0  ;;  %v3899_v24 = vmax.f32 %v3771_v52, 0.0  ;;  %v3777_v48 = vadd.f32 %v11638_v34, %v11362_v50 }
 0x508   : > { %v12125_v51 = vadd.f32 %v9440_v15, %v11367_v5  ;;  %v5331_v59 = vpack.c.bf16 %v9473_v26, %v9472_v43  ;;  %v4465_v44 = vpop.f32.mrb[49].mxu0  ;;  %v4822_v13 = vpop.f32.mrb[195].mxu1 }
 0x509   : > { %v12128_v25 = vadd.f32 %v4465_v44, %v11367_v5  ;;  %v5330_v30 = vpack.c.bf16 %v4822_v13, %v4819_v56  ;;  %v9441_v39 = vpop.f32.mrb[50].mxu0  ;;  %9578 = vmatprep.mubr.bf16.mxu1 %v4710_v55  ;;  %v3774_v55 = vadd.f32 %v11362_v50, %v11634_v29  ;;  %v3775_v13 = vadd.f32 %v11362_v50, %v11642_v20 }
 0x50a   : > { %13532 = vst [vmem:[#allocation71_spill] sm:$0xff] %v12125_v51  ;;  %v12131_v18 = vadd.f32 %v9441_v39, %v11367_v5  ;;  %v4468_v62 = vpop.f32.mrb[51].mxu0  ;;  %9579 = vmatmul.mubr.bf16.gmra.mrb[44].mxu1 %v4711_v33  ;;  %v4642_v43 = vadd.f32 %v12125_v51, %v3900_v3  ;;  %v3776_v33 = vadd.f32 %v11629_v28, %v11362_v50 }
 0x50b   : > { %13533 = vst [vmem:[#allocation73_spill] sm:$0xff] %v12128_v25  ;;  %v12134_v15 = vadd.f32 %v4468_v62, %v11367_v5  ;;  %9598 = vmatprep.subr.bf16.mxu0 %v5330_v30  ;;  %v4640_v56 = vadd.f32 %v12128_v25, %v3898_v47  ;;  %v13600_v25 = vld [vmem:[#allocation101_spill] sm:$0xff] }
 0x50c   : > { %13534 = vst [vmem:[#allocation102_spill] sm:$0xff] %v12131_v18  ;;  %v4643_v44 = vadd.f32 %v12131_v18, %v3901_v8  ;;  %9599 = vmatpush3.bf16.msra.mxu0 %v5330_v30  ;;  %v3904_v29 = vmax.f32 %v3776_v33, 0.0 }
 0x50d   : > { %13535 = vst [vmem:[#allocation103_spill] sm:$0xff] %v12134_v15  ;;  %v4641_v38 = vadd.f32 %v12134_v15, %v3899_v24  ;;  %v9476_v37 = vpop.f32.mrb[196].mxu1  ;;  %9600 = vmatprep.subr.bf16.mxu0 %v5331_v59 }
 0x50e   : > { %v4713_v52 = vpack.c.bf16 %v4643_v44, %v4642_v43  ;;  %v4835_v26 = vpop.f32.mrb[197].mxu1  ;;  %v3905_v44 = vmax.f32 %v3777_v48, 0.0 }
 0x50f   : > { %v9444_v30 = vpop.f32.mrb[52].mxu0  ;;  %v9477_v39 = vpop.f32.mrb[198].mxu1  ;;  %v4712_v3 = vpack.c.bf16 %v4641_v38, %v4640_v56  ;;  %v3902_v56 = vmax.f32 %v3774_v55, 0.0  ;;  %v3903_v38 = vmax.f32 %v3775_v13, 0.0  ;;  %v3781_v55 = vadd.f32 %v11670_v57, %v11362_v50 }
 0x510   : > { %v12149_v8 = vadd.f32 %v9444_v30, %v11367_v5  ;;  %v5333_v62 = vpack.c.bf16 %v9477_v39, %v9476_v37  ;;  %v4481_v47 = vpop.f32.mrb[53].mxu0  ;;  %v4838_v28 = vpop.f32.mrb[199].mxu1  ;;  %9601 = vmatpush3.bf16.msra.mxu0 %v5331_v59  ;;  %v3778_v39 = vadd.f32 %v11362_v50, %v11666_v45 }
 0x511   : > { %v12152_v34 = vadd.f32 %v4481_v47, %v11367_v5  ;;  %v5332_v24 = vpack.c.bf16 %v4838_v28, %v4835_v26  ;;  %v9445_v43 = vpop.f32.mrb[54].mxu0  ;;  %9582 = vmatprep.mubr.bf16.mxu1 %v4712_v3  ;;  %v3779_v3 = vadd.f32 %v11362_v50, %v11674_v63 }
 0x512   : > { %13536 = vst [vmem:[#allocation104_spill] sm:$0xff] %v12149_v8  ;;  %v12155_v20 = vadd.f32 %v9445_v43, %v11367_v5  ;;  %v4484_v15 = vpop.f32.mrb[55].mxu0  ;;  %9583 = vmatmul.mubr.bf16.gmra.mrb[48].mxu1 %v4713_v52  ;;  %v4646_v59 = vadd.f32 %v12149_v8, %v3904_v29  ;;  %v3780_v52 = vadd.f32 %v11661_v21, %v11362_v50  ;;  %v13599_v8 = vld [vmem:[#allocation17_spill] sm:$0xff] }
 0x513   : > { %13537 = vst [vmem:[#allocation105_spill] sm:$0xff] %v12152_v34  ;;  %v12158_v37 = vadd.f32 %v4484_v15, %v11367_v5  ;;  %9602 = vmatprep.subr.bf16.mxu0 %v5332_v24  ;;  %v4644_v26 = vadd.f32 %v12152_v34, %v3902_v56 }
 0x514   : > { %13538 = vst [vmem:[#allocation106_spill] sm:$0xff] %v12155_v20  ;;  %v4647_v30 = vadd.f32 %v12155_v20, %v3905_v44  ;;  %9603 = vmatpush3.bf16.msra.mxu0 %v5332_v24  ;;  %v3908_v45 = vmax.f32 %v3780_v52, 0.0  ;;  %v13598_v20 = vld [vmem:[#allocation16_spill] sm:$0xff] }
 0x515   : > { %13539 = vst [vmem:[#allocation107_spill] sm:$0xff] %v12158_v37  ;;  %v4645_v33 = vadd.f32 %v12158_v37, %v3903_v38  ;;  %v9480_v48 = vpop.f32.mrb[200].mxu1  ;;  %9604 = vmatprep.subr.bf16.mxu0 %v5333_v62 }
 0x516   : > { %v4715_v15 = vpack.c.bf16 %v4647_v30, %v4646_v59  ;;  %v4851_v13 = vpop.f32.mrb[201].mxu1  ;;  %v3909_v59 = vmax.f32 %v3781_v55, 0.0 }
 0x517   : > { %v9448_v47 = vpop.f32.mrb[56].mxu0  ;;  %v9481_v28 = vpop.f32.mrb[202].mxu1  ;;  %v4714_v24 = vpack.c.bf16 %v4645_v33, %v4644_v26  ;;  %v3906_v26 = vmax.f32 %v3778_v39, 0.0  ;;  %v3907_v33 = vmax.f32 %v3779_v3, 0.0  ;;  %v3785_v39 = vadd.f32 %v11702_v35, %v11362_v50 }
 0x518   : > { %v12173_v43 = vadd.f32 %v9448_v47, %v11367_v5  ;;  %v5335_v29 = vpack.c.bf16 %v9481_v28, %v9480_v48  ;;  %v4497_v44 = vpop.f32.mrb[57].mxu0  ;;  %v4854_v21 = vpop.f32.mrb[203].mxu1  ;;  %9605 = vmatpush3.bf16.msra.mxu0 %v5333_v62 }
 0x519   : > { %v12176_v57 = vadd.f32 %v4497_v44, %v11367_v5  ;;  %v5334_v56 = vpack.c.bf16 %v4854_v21, %v4851_v13  ;;  %v9449_v38 = vpop.f32.mrb[58].mxu0  ;;  %9586 = vmatprep.mubr.bf16.mxu1 %v4714_v24  ;;  %v3782_v24 = vadd.f32 %v11362_v50, %v11698_v17  ;;  %v3783_v44 = vadd.f32 %v11362_v50, %v11706_v60 }
 0x51a   : > { %13540 = vst [vmem:[#allocation108_spill] sm:$0xff] %v12173_v43  ;;  %v12179_v63 = vadd.f32 %v9449_v38, %v11367_v5  ;;  %v4500_v30 = vpop.f32.mrb[59].mxu0  ;;  %9587 = vmatmul.mubr.bf16.gmra.mrb[52].mxu1 %v4715_v15  ;;  %v4650_v62 = vadd.f32 %v12173_v43, %v3908_v45  ;;  %v3784_v15 = vadd.f32 %v11693_v23, %v11362_v50 }
 0x51b   : > { %13541 = vst [vmem:[#allocation109_spill] sm:$0xff] %v12176_v57  ;;  %v12182_v48 = vadd.f32 %v4500_v30, %v11367_v5  ;;  %9606 = vmatprep.subr.bf16.mxu0 %v5334_v56  ;;  %v4648_v13 = vadd.f32 %v12176_v57, %v3906_v26  ;;  %v13558_v57 = vld [vmem:[#allocation36_spill] sm:$0xff] }
 0x51c   : > { %13542 = vst [vmem:[#allocation110_spill] sm:$0xff] %v12179_v63  ;;  %v4651_v47 = vadd.f32 %v12179_v63, %v3909_v59  ;;  %9607 = vmatpush3.bf16.msra.mxu0 %v5334_v56  ;;  %v3912_v17 = vmax.f32 %v3784_v15, 0.0  ;;  %v13559_v63 = vld [vmem:[#allocation35_spill] sm:$0xff] }
 0x51d   : > { %13543 = vst [vmem:[#allocation111_spill] sm:$0xff] %v12182_v48  ;;  %v4649_v52 = vadd.f32 %v12182_v48, %v3907_v33  ;;  %v9484_v55 = vpop.f32.mrb[204].mxu1  ;;  %9608 = vmatprep.subr.bf16.mxu0 %v5335_v29 }
 0x51e   : > { %v4717_v3 = vpack.c.bf16 %v4651_v47, %v4650_v62  ;;  %v4867_v28 = vpop.f32.mrb[205].mxu1  ;;  %v3913_v62 = vmax.f32 %v3785_v39, 0.0  ;;  %v3910_v47 = vmax.f32 %v3782_v24, 0.0 }
 0x51f   : > { %v9452_v21 = vpop.f32.mrb[60].mxu0  ;;  %v9485_v56 = vpop.f32.mrb[206].mxu1  ;;  %v4716_v38 = vpack.c.bf16 %v4649_v52, %v4648_v13  ;;  %v3911_v13 = vmax.f32 %v3783_v44, 0.0 }
 0x520   : > { %v12197_v45 = vadd.f32 %v9452_v21, %v11367_v5  ;;  %v5337_v59 = vpack.c.bf16 %v9485_v56, %v9484_v55  ;;  %v4513_v30 = vpop.f32.mrb[61].mxu0  ;;  %v4870_v23 = vpop.f32.mrb[207].mxu1  ;;  %9609 = vmatpush3.bf16.msra.mxu0 %v5335_v29 }
 0x521   : > { %v12200_v35 = vadd.f32 %v4513_v30, %v11367_v5  ;;  %v5336_v26 = vpack.c.bf16 %v4870_v23, %v4867_v28  ;;  %v9453_v33 = vpop.f32.mrb[62].mxu0  ;;  %9590 = vmatprep.mubr.bf16.mxu1 %v4716_v38  ;;  %v10081_v30 = vld [vmem:[%s10556_s15 + $0x8] sm:$0xff]   ;;  %v10082_v23 = vld [vmem:[%s10556_s15 + $0x10] sm:$0xff]  }
 0x522   : > { %13544 = vst [vmem:[#allocation112_spill] sm:$0xff] %v12197_v45  ;;  %v12203_v50 = vadd.f32 %v9453_v33, %v11367_v5  ;;  %v4516_v60 = vpop.f32.mrb[63].mxu0  ;;  %9591 = vmatmul.mubr.bf16.gmra.mrb[56].mxu1 %v4717_v3  ;;  %v4654_v29 = vadd.f32 %v12197_v45, %v3912_v17  ;;  %v10083_v33 = vld [vmem:[%s10556_s15 + $0x40] sm:$0xff]   ;;  %v13557_v45 = vld [vmem:[#allocation32_spill] sm:$0xff] }
 0x523   : > { %13545 = vst [vmem:[#allocation113_spill] sm:$0xff] %v12200_v35  ;;  %v12206_v52 = vadd.f32 %v4516_v60, %v11367_v5  ;;  %9610 = vmatprep.subr.bf16.mxu0 %v5336_v26  ;;  %v4652_v15 = vadd.f32 %v12200_v35, %v3910_v47  ;;  %v10144_v35 = vld [vmem:[%s10556_s15 + $0x1f8] sm:$0xff]  }
 0x524   : > { %13546 = vst [vmem:[#allocation114_spill] sm:$0xff] %v12203_v50  ;;  %v4655_v55 = vadd.f32 %v12203_v50, %v3913_v62  ;;  %9611 = vmatpush3.bf16.msra.mxu0 %v5336_v26  ;;  %v13556_v50 = vld [vmem:[#allocation33_spill] sm:$0xff] }
 0x525   : > { %13547 = vst [vmem:[#allocation115_spill] sm:$0xff] %v12206_v52  ;;  %v4653_v39 = vadd.f32 %v12206_v52, %v3911_v13  ;;  %v9488_v28 = vpop.f32.mrb[208].mxu1  ;;  %9612 = vmatprep.subr.bf16.mxu0 %v5337_v59  ;;  %v10084_v13 = vld [vmem:[%s10556_s15 + $0x18] sm:$0xff]  }
 0x526   : > { %v4719_v3 = vpack.c.bf16 %v4655_v55, %v4654_v29  ;;  %v4883_v24 = vpop.f32.mrb[209].mxu1  ;;  %v10085_v29 = vld [vmem:[%s10556_s15 + $0x20] sm:$0xff]  }
 0x527   : > { %v9489_v44 = vpop.f32.mrb[210].mxu1  ;;  %v4718_v5 = vpack.c.bf16 %v4653_v39, %v4652_v15 }
 0x528   : > { %v5339_v21 = vpack.c.bf16 %v9489_v44, %v9488_v28  ;;  %v4886_v56 = vpop.f32.mrb[211].mxu1  ;;  %9613 = vmatpush3.bf16.msra.mxu0 %v5337_v59  ;;  %v10086_v44 = vld [vmem:[%s10556_s15 + $0x28] sm:$0xff]  }
 0x529   : > { %v5338_v38 = vpack.c.bf16 %v4886_v56, %v4883_v24  ;;  %9594 = vmatprep.mubr.bf16.mxu1 %v4718_v5  ;;  %v10087_v5 = vld [vmem:[%s10556_s15 + $0x30] sm:$0xff]  }
 0x52a   : > { %9595 = vmatmul.mubr.bf16.gmra.mrb[60].mxu1 %v4719_v3 }
 0x52b   : > { %9615 = vmatmul.mubr.bf16.vlgmr.msra.gmra.mrb[64].mxu0 %v10081_v30  ;;  %9630 = vmatprep.subr.bf16.mxu1 %v5338_v38 }
 0x52c   : > { %9631 = vmatpush3.bf16.msra.mxu1 %v5338_v38  ;;  %9618 = vmatprep.mubr.bf16.mxu0 %v10082_v23 }
 0x52d   : > { %v9492_v26 = vpop.f32.mrb[212].mxu1  ;;  %9632 = vmatprep.subr.bf16.mxu1 %v5339_v21  ;;  %9646 = vmatprep.mubr.bf16.mxu1 %v10083_v33  ;;  %v10088_v33 = vld [vmem:[%s10556_s15 + $0x38] sm:$0xff]  }
 0x52e   : > { %v4899_v17 = vpop.f32.mrb[213].mxu1 }
 0x52f   : > { %v9493_v62 = vpop.f32.mrb[214].mxu1 }
 0x530   : > { %v5341_v60 = vpack.c.bf16 %v9493_v62, %v9492_v26  ;;  %v4902_v47 = vpop.f32.mrb[215].mxu1  ;;  %9633 = vmatpush3.bf16.msra.mxu1 %v5339_v21 }
 0x531   : > { %v5340_v59 = vpack.c.bf16 %v4902_v47, %v4899_v17  ;;  %v10089_v17 = vld [vmem:[%s10556_s15 + $0x80] sm:$0xff]  }
 0x533   : > { %9619 = vmatmul.mubr.bf16.gmra.mrb[68].mxu0 %v10084_v13  ;;  %9634 = vmatprep.subr.bf16.mxu1 %v5340_v59 }
 0x534   : > { %9635 = vmatpush3.bf16.msra.mxu1 %v5340_v59  ;;  %9622 = vmatprep.mubr.bf16.mxu0 %v10085_v29 }
 0x535   : > { %v9496_v55 = vpop.f32.mrb[216].mxu1  ;;  %9636 = vmatprep.subr.bf16.mxu1 %v5341_v60 }
 0x536   : > { %v4915_v15 = vpop.f32.mrb[217].mxu1 }
 0x537   : > { %v9497_v39 = vpop.f32.mrb[218].mxu1 }
 0x538   : > { %v5343_v28 = vpack.c.bf16 %v9497_v39, %v9496_v55  ;;  %v4918_v3 = vpop.f32.mrb[219].mxu1  ;;  %9637 = vmatpush3.bf16.msra.mxu1 %v5341_v60  ;;  %v10090_v55 = vld [vmem:[%s10556_s15 + $0x48] sm:$0xff]  }
 0x539   : > { %v5342_v24 = vpack.c.bf16 %v4918_v3, %v4915_v15  ;;  %v10091_v15 = vld [vmem:[%s10556_s15 + $0x50] sm:$0xff]  }
 0x53b   : > { %9623 = vmatmul.mubr.bf16.gmra.mrb[72].mxu0 %v10086_v44  ;;  %9638 = vmatprep.subr.bf16.mxu1 %v5342_v24 }
 0x53c   : > { %9639 = vmatpush3.bf16.msra.mxu1 %v5342_v24  ;;  %9626 = vmatprep.mubr.bf16.mxu0 %v10087_v5 }
 0x53d   : > { %v9500_v21 = vpop.f32.mrb[220].mxu1  ;;  %9640 = vmatprep.subr.bf16.mxu1 %v5343_v28 }
 0x53e   : > { %v4931_v56 = vpop.f32.mrb[221].mxu1 }
 0x53f   : > { %v9501_v38 = vpop.f32.mrb[222].mxu1 }
 0x540   : > { %v5345_v30 = vpack.c.bf16 %v9501_v38, %v9500_v21  ;;  %v4934_v23 = vpop.f32.mrb[223].mxu1  ;;  %9641 = vmatpush3.bf16.msra.mxu1 %v5343_v28  ;;  %v10092_v21 = vld [vmem:[%s10556_s15 + $0x58] sm:$0xff]  }
 0x541   : > { %v5344_v26 = vpack.c.bf16 %v4934_v23, %v4931_v56  ;;  %v10093_v56 = vld [vmem:[%s10556_s15 + $0x60] sm:$0xff]  }
 0x543   : > { %9627 = vmatmul.mubr.bf16.gmra.mrb[76].mxu0 %v10088_v33  ;;  %9642 = vmatprep.subr.bf16.mxu1 %v5344_v26 }
 0x544   : > { %9643 = vmatpush3.bf16.msra.mxu1 %v5344_v26  ;;  %9678 = vmatprep.mubr.bf16.mxu0 %v10089_v17 }
 0x545   : > { %v9504_v62 = vpop.f32.mrb[224].mxu1  ;;  %9644 = vmatprep.subr.bf16.mxu1 %v5345_v30 }
 0x546   : > { %v4947_v60 = vpop.f32.mrb[225].mxu1 }
 0x547   : > { %v9505_v47 = vpop.f32.mrb[226].mxu1 }
 0x548   : > { %v5347_v59 = vpack.c.bf16 %v9505_v47, %v9504_v62  ;;  %v4950_v13 = vpop.f32.mrb[227].mxu1  ;;  %9645 = vmatpush3.bf16.msra.mxu1 %v5345_v30  ;;  %v10094_v62 = vld [vmem:[%s10556_s15 + $0x68] sm:$0xff]  }
 0x549   : > { %v5346_v29 = vpack.c.bf16 %v4950_v13, %v4947_v60  ;;  %v10095_v60 = vld [vmem:[%s10556_s15 + $0x70] sm:$0xff]  }
 0x54b   : > { %9647 = vmatmul.mubr.bf16.vlgmr.msra.gmra.mrb[64].mxu1 %v10090_v55  ;;  %9662 = vmatprep.subr.bf16.mxu0 %v5346_v29 }
 0x54c   : > { %9663 = vmatpush3.bf16.msra.mxu0 %v5346_v29  ;;  %9650 = vmatprep.mubr.bf16.mxu1 %v10091_v15 }
 0x54d   : > { %v9508_v39 = vpop.f32.mrb[228].mxu1  ;;  %9664 = vmatprep.subr.bf16.mxu0 %v5347_v59 }
 0x54e   : > { %v4963_v28 = vpop.f32.mrb[229].mxu1 }
 0x54f   : > { %v9509_v3 = vpop.f32.mrb[230].mxu1 }
 0x550   : > { %v5349_v24 = vpack.c.bf16 %v9509_v3, %v9508_v39  ;;  %v4966_v44 = vpop.f32.mrb[231].mxu1  ;;  %9665 = vmatpush3.bf16.msra.mxu0 %v5347_v59  ;;  %v10096_v39 = vld [vmem:[%s10556_s15 + $0x78] sm:$0xff]  }
 0x551   : > { %v5348_v5 = vpack.c.bf16 %v4966_v44, %v4963_v28  ;;  %v10097_v28 = vld [vmem:[%s10556_s15 + $0xc0] sm:$0xff]  }
 0x553   : > { %9651 = vmatmul.mubr.bf16.gmra.mrb[68].mxu1 %v10092_v21  ;;  %9666 = vmatprep.subr.bf16.mxu0 %v5348_v5 }
 0x554   : > { %9667 = vmatpush3.bf16.msra.mxu0 %v5348_v5  ;;  %9654 = vmatprep.mubr.bf16.mxu1 %v10093_v56 }
 0x555   : > { %v9512_v38 = vpop.f32.mrb[232].mxu1  ;;  %9668 = vmatprep.subr.bf16.mxu0 %v5349_v24 }
 0x556   : > { %v4979_v30 = vpop.f32.mrb[233].mxu1 }
 0x557   : > { %v9513_v23 = vpop.f32.mrb[234].mxu1 }
 0x558   : > { %v5351_v26 = vpack.c.bf16 %v9513_v23, %v9512_v38  ;;  %v4982_v33 = vpop.f32.mrb[235].mxu1  ;;  %9669 = vmatpush3.bf16.msra.mxu0 %v5349_v24  ;;  %v10098_v38 = vld [vmem:[%s10556_s15 + $0x88] sm:$0xff]  }
 0x559   : > { %v5350_v17 = vpack.c.bf16 %v4982_v33, %v4979_v30  ;;  %v10099_v30 = vld [vmem:[%s10556_s15 + $0x90] sm:$0xff]  }
 0x55b   : > { %9655 = vmatmul.mubr.bf16.gmra.mrb[72].mxu1 %v10094_v62  ;;  %9670 = vmatprep.subr.bf16.mxu0 %v5350_v17 }
 0x55c   : > { %9671 = vmatpush3.bf16.msra.mxu0 %v5350_v17  ;;  %9658 = vmatprep.mubr.bf16.mxu1 %v10095_v60 }
 0x55d   : > { %v9516_v47 = vpop.f32.mrb[236].mxu1  ;;  %9672 = vmatprep.subr.bf16.mxu0 %v5351_v26 }
 0x55e   : > { %v4995_v59 = vpop.f32.mrb[237].mxu1 }
 0x55f   : > { %v9517_v13 = vpop.f32.mrb[238].mxu1 }
 0x560   : > { %v5353_v29 = vpack.c.bf16 %v9517_v13, %v9516_v47  ;;  %v4998_v55 = vpop.f32.mrb[239].mxu1  ;;  %9673 = vmatpush3.bf16.msra.mxu0 %v5351_v26  ;;  %v10100_v47 = vld [vmem:[%s10556_s15 + $0x98] sm:$0xff]  }
 0x561   : > { %v5352_v15 = vpack.c.bf16 %v4998_v55, %v4995_v59  ;;  %v10101_v59 = vld [vmem:[%s10556_s15 + $0xa0] sm:$0xff]  }
 0x563   : > { %9659 = vmatmul.mubr.bf16.gmra.mrb[76].mxu1 %v10096_v39  ;;  %9674 = vmatprep.subr.bf16.mxu0 %v5352_v15 }
 0x564   : > { %9675 = vmatpush3.bf16.msra.mxu0 %v5352_v15  ;;  %9710 = vmatprep.mubr.bf16.mxu1 %v10097_v28 }
 0x565   : > { %v9520_v3 = vpop.f32.mrb[240].mxu1  ;;  %9676 = vmatprep.subr.bf16.mxu0 %v5353_v29 }
 0x566   : > { %v5011_v24 = vpop.f32.mrb[241].mxu1 }
 0x567   : > { %v9521_v44 = vpop.f32.mrb[242].mxu1 }
 0x568   : > { %v5355_v5 = vpack.c.bf16 %v9521_v44, %v9520_v3  ;;  %v5014_v21 = vpop.f32.mrb[243].mxu1  ;;  %9677 = vmatpush3.bf16.msra.mxu0 %v5353_v29  ;;  %v10102_v3 = vld [vmem:[%s10556_s15 + $0xa8] sm:$0xff]  }
 0x569   : > { %v5354_v56 = vpack.c.bf16 %v5014_v21, %v5011_v24  ;;  %v10103_v24 = vld [vmem:[%s10556_s15 + $0xb0] sm:$0xff]  }
 0x56b   : > { %9679 = vmatmul.mubr.bf16.vlgmr.msra.gmra.mrb[80].mxu0 %v10098_v38  ;;  %9694 = vmatprep.subr.bf16.mxu1 %v5354_v56 }
 0x56c   : > { %9695 = vmatpush3.bf16.msra.mxu1 %v5354_v56  ;;  %9682 = vmatprep.mubr.bf16.mxu0 %v10099_v30 }
 0x56d   : > { %v9524_v23 = vpop.f32.mrb[244].mxu1  ;;  %9696 = vmatprep.subr.bf16.mxu1 %v5355_v5 }
 0x56e   : > { %v5027_v26 = vpop.f32.mrb[245].mxu1 }
 0x56f   : > { %v9525_v33 = vpop.f32.mrb[246].mxu1 }
 0x570   : > { %v5357_v17 = vpack.c.bf16 %v9525_v33, %v9524_v23  ;;  %v5030_v62 = vpop.f32.mrb[247].mxu1  ;;  %9697 = vmatpush3.bf16.msra.mxu1 %v5355_v5  ;;  %v10104_v23 = vld [vmem:[%s10556_s15 + $0xb8] sm:$0xff]  }
 0x571   : > { %v5356_v60 = vpack.c.bf16 %v5030_v62, %v5027_v26  ;;  %v10105_v26 = vld [vmem:[%s10556_s15 + $0x100] sm:$0xff]  }
 0x573   : > { %9683 = vmatmul.mubr.bf16.gmra.mrb[84].mxu0 %v10100_v47  ;;  %9698 = vmatprep.subr.bf16.mxu1 %v5356_v60 }
 0x574   : > { %9699 = vmatpush3.bf16.msra.mxu1 %v5356_v60  ;;  %9686 = vmatprep.mubr.bf16.mxu0 %v10101_v59 }
 0x575   : > { %v9528_v13 = vpop.f32.mrb[248].mxu1  ;;  %9700 = vmatprep.subr.bf16.mxu1 %v5357_v17 }
 0x576   : > { %v5043_v29 = vpop.f32.mrb[249].mxu1 }
 0x577   : > { %v9529_v55 = vpop.f32.mrb[250].mxu1 }
 0x578   : > { %v5359_v15 = vpack.c.bf16 %v9529_v55, %v9528_v13  ;;  %v5046_v39 = vpop.f32.mrb[251].mxu1  ;;  %9701 = vmatpush3.bf16.msra.mxu1 %v5357_v17  ;;  %v10106_v13 = vld [vmem:[%s10556_s15 + $0xc8] sm:$0xff]  }
 0x579   : > { %v5358_v28 = vpack.c.bf16 %v5046_v39, %v5043_v29  ;;  %v10107_v29 = vld [vmem:[%s10556_s15 + $0xd0] sm:$0xff]  }
 0x57b   : > { %9687 = vmatmul.mubr.bf16.gmra.mrb[88].mxu0 %v10102_v3  ;;  %9702 = vmatprep.subr.bf16.mxu1 %v5358_v28 }
 0x57c   : > { %9703 = vmatpush3.bf16.msra.mxu1 %v5358_v28  ;;  %9690 = vmatprep.mubr.bf16.mxu0 %v10103_v24 }
 0x57d   : > { %v9532_v44 = vpop.f32.mrb[252].mxu1  ;;  %9704 = vmatprep.subr.bf16.mxu1 %v5359_v15 }
 0x57e   : > { %v5059_v5 = vpop.f32.mrb[253].mxu1 }
 0x57f   : > { %v9533_v21 = vpop.f32.mrb[254].mxu1 }
 0x580   : > { %v5361_v56 = vpack.c.bf16 %v9533_v21, %v9532_v44  ;;  %v5062_v38 = vpop.f32.mrb[255].mxu1  ;;  %9705 = vmatpush3.bf16.msra.mxu1 %v5359_v15  ;;  %v10108_v44 = vld [vmem:[%s10556_s15 + $0xd8] sm:$0xff]  }
 0x581   : > { %v5360_v30 = vpack.c.bf16 %v5062_v38, %v5059_v5  ;;  %v10109_v5 = vld [vmem:[%s10556_s15 + $0xe0] sm:$0xff]  }
 0x583   : > { %9691 = vmatmul.mubr.bf16.gmra.mrb[92].mxu0 %v10104_v23  ;;  %9706 = vmatprep.subr.bf16.mxu1 %v5360_v30 }
 0x584   : > { %9707 = vmatpush3.bf16.msra.mxu1 %v5360_v30  ;;  %9742 = vmatprep.mubr.bf16.mxu0 %v10105_v26 }
 0x585   : > { %v9536_v33 = vpop.f32.mrb[0].mxu1  ;;  %9708 = vmatprep.subr.bf16.mxu1 %v5361_v56 }
 0x586   : > { %v5075_v17 = vpop.f32.mrb[1].mxu1 }
 0x587   : > { %v9537_v62 = vpop.f32.mrb[2].mxu1 }
 0x588   : > { %v5363_v60 = vpack.c.bf16 %v9537_v62, %v9536_v33  ;;  %v5078_v47 = vpop.f32.mrb[3].mxu1  ;;  %9709 = vmatpush3.bf16.msra.mxu1 %v5361_v56  ;;  %v10110_v33 = vld [vmem:[%s10556_s15 + $0xe8] sm:$0xff]  }
 0x589   : > { %v5362_v59 = vpack.c.bf16 %v5078_v47, %v5075_v17  ;;  %v10111_v17 = vld [vmem:[%s10556_s15 + $0xf0] sm:$0xff]  }
 0x58b   : > { %9711 = vmatmul.mubr.bf16.vlgmr.msra.gmra.mrb[80].mxu1 %v10106_v13  ;;  %9726 = vmatprep.subr.bf16.mxu0 %v5362_v59 }
 0x58c   : > { %9727 = vmatpush3.bf16.msra.mxu0 %v5362_v59  ;;  %9714 = vmatprep.mubr.bf16.mxu1 %v10107_v29 }
 0x58d   : > { %v9540_v55 = vpop.f32.mrb[4].mxu1  ;;  %9728 = vmatprep.subr.bf16.mxu0 %v5363_v60 }
 0x58e   : > { %v5091_v15 = vpop.f32.mrb[5].mxu1 }
 0x58f   : > { %v9541_v39 = vpop.f32.mrb[6].mxu1 }
 0x590   : > { %v5365_v28 = vpack.c.bf16 %v9541_v39, %v9540_v55  ;;  %v5094_v3 = vpop.f32.mrb[7].mxu1  ;;  %9729 = vmatpush3.bf16.msra.mxu0 %v5363_v60  ;;  %v10112_v55 = vld [vmem:[%s10556_s15 + $0xf8] sm:$0xff]  }
 0x591   : > { %v5364_v24 = vpack.c.bf16 %v5094_v3, %v5091_v15  ;;  %v10113_v15 = vld [vmem:[%s10556_s15 + $0x140] sm:$0xff]  }
 0x593   : > { %9715 = vmatmul.mubr.bf16.gmra.mrb[84].mxu1 %v10108_v44  ;;  %9730 = vmatprep.subr.bf16.mxu0 %v5364_v24 }
 0x594   : > { %9731 = vmatpush3.bf16.msra.mxu0 %v5364_v24  ;;  %9718 = vmatprep.mubr.bf16.mxu1 %v10109_v5 }
 0x595   : > { %v9544_v21 = vpop.f32.mrb[8].mxu1  ;;  %9732 = vmatprep.subr.bf16.mxu0 %v5365_v28 }
 0x596   : > { %v5107_v56 = vpop.f32.mrb[9].mxu1 }
 0x597   : > { %v9545_v38 = vpop.f32.mrb[10].mxu1 }
 0x598   : > { %v5367_v30 = vpack.c.bf16 %v9545_v38, %v9544_v21  ;;  %v5110_v23 = vpop.f32.mrb[11].mxu1  ;;  %9733 = vmatpush3.bf16.msra.mxu0 %v5365_v28  ;;  %v10114_v21 = vld [vmem:[%s10556_s15 + $0x108] sm:$0xff]  }
 0x599   : > { %v5366_v26 = vpack.c.bf16 %v5110_v23, %v5107_v56  ;;  %v10115_v56 = vld [vmem:[%s10556_s15 + $0x110] sm:$0xff]  }
 0x59b   : > { %9719 = vmatmul.mubr.bf16.gmra.mrb[88].mxu1 %v10110_v33  ;;  %9734 = vmatprep.subr.bf16.mxu0 %v5366_v26 }
 0x59c   : > { %9735 = vmatpush3.bf16.msra.mxu0 %v5366_v26  ;;  %9722 = vmatprep.mubr.bf16.mxu1 %v10111_v17 }
 0x59d   : > { %v9548_v62 = vpop.f32.mrb[12].mxu1  ;;  %9736 = vmatprep.subr.bf16.mxu0 %v5367_v30 }
 0x59e   : > { %v5123_v60 = vpop.f32.mrb[13].mxu1 }
 0x59f   : > { %v9549_v47 = vpop.f32.mrb[14].mxu1 }
 0x5a0   : > { %v5369_v59 = vpack.c.bf16 %v9549_v47, %v9548_v62  ;;  %v5126_v13 = vpop.f32.mrb[15].mxu1  ;;  %9737 = vmatpush3.bf16.msra.mxu0 %v5367_v30  ;;  %v10116_v62 = vld [vmem:[%s10556_s15 + $0x118] sm:$0xff]  }
 0x5a1   : > { %v5368_v29 = vpack.c.bf16 %v5126_v13, %v5123_v60  ;;  %v10117_v60 = vld [vmem:[%s10556_s15 + $0x120] sm:$0xff]  }
 0x5a3   : > { %9723 = vmatmul.mubr.bf16.gmra.mrb[92].mxu1 %v10112_v55  ;;  %9738 = vmatprep.subr.bf16.mxu0 %v5368_v29 }
 0x5a4   : > { %9739 = vmatpush3.bf16.msra.mxu0 %v5368_v29  ;;  %9774 = vmatprep.mubr.bf16.mxu1 %v10113_v15 }
 0x5a5   : > { %v9552_v39 = vpop.f32.mrb[16].mxu1  ;;  %9740 = vmatprep.subr.bf16.mxu0 %v5369_v59 }
 0x5a6   : > { %v5139_v28 = vpop.f32.mrb[17].mxu1 }
 0x5a7   : > { %v9553_v3 = vpop.f32.mrb[18].mxu1 }
 0x5a8   : > { %v5371_v24 = vpack.c.bf16 %v9553_v3, %v9552_v39  ;;  %v5142_v44 = vpop.f32.mrb[19].mxu1  ;;  %9741 = vmatpush3.bf16.msra.mxu0 %v5369_v59  ;;  %v10118_v39 = vld [vmem:[%s10556_s15 + $0x128] sm:$0xff]  }
 0x5a9   : > { %v5370_v5 = vpack.c.bf16 %v5142_v44, %v5139_v28  ;;  %v10119_v28 = vld [vmem:[%s10556_s15 + $0x130] sm:$0xff]  }
 0x5ab   : > { %9743 = vmatmul.mubr.bf16.vlgmr.msra.gmra.mrb[96].mxu0 %v10114_v21  ;;  %9758 = vmatprep.subr.bf16.mxu1 %v5370_v5 }
 0x5ac   : > { %9759 = vmatpush3.bf16.msra.mxu1 %v5370_v5  ;;  %9746 = vmatprep.mubr.bf16.mxu0 %v10115_v56 }
 0x5ad   : > { %v9556_v38 = vpop.f32.mrb[20].mxu1  ;;  %9760 = vmatprep.subr.bf16.mxu1 %v5371_v24 }
 0x5ae   : > { %v5155_v30 = vpop.f32.mrb[21].mxu1 }
 0x5af   : > { %v9557_v23 = vpop.f32.mrb[22].mxu1 }
 0x5b0   : > { %v5373_v26 = vpack.c.bf16 %v9557_v23, %v9556_v38  ;;  %v5158_v33 = vpop.f32.mrb[23].mxu1  ;;  %9761 = vmatpush3.bf16.msra.mxu1 %v5371_v24  ;;  %v10120_v38 = vld [vmem:[%s10556_s15 + $0x138] sm:$0xff]  }
 0x5b1   : > { %v5372_v17 = vpack.c.bf16 %v5158_v33, %v5155_v30  ;;  %v10121_v30 = vld [vmem:[%s10556_s15 + $0x180] sm:$0xff]  }
 0x5b3   : > { %9747 = vmatmul.mubr.bf16.gmra.mrb[100].mxu0 %v10116_v62  ;;  %9762 = vmatprep.subr.bf16.mxu1 %v5372_v17 }
 0x5b4   : > { %9763 = vmatpush3.bf16.msra.mxu1 %v5372_v17  ;;  %9750 = vmatprep.mubr.bf16.mxu0 %v10117_v60 }
 0x5b5   : > { %v9560_v47 = vpop.f32.mrb[24].mxu1  ;;  %9764 = vmatprep.subr.bf16.mxu1 %v5373_v26 }
 0x5b6   : > { %v5171_v59 = vpop.f32.mrb[25].mxu1 }
 0x5b7   : > { %v9561_v13 = vpop.f32.mrb[26].mxu1 }
 0x5b8   : > { %v5375_v29 = vpack.c.bf16 %v9561_v13, %v9560_v47  ;;  %v5174_v55 = vpop.f32.mrb[27].mxu1  ;;  %9765 = vmatpush3.bf16.msra.mxu1 %v5373_v26  ;;  %v10122_v47 = vld [vmem:[%s10556_s15 + $0x148] sm:$0xff]  }
 0x5b9   : > { %v5374_v15 = vpack.c.bf16 %v5174_v55, %v5171_v59  ;;  %v10123_v59 = vld [vmem:[%s10556_s15 + $0x150] sm:$0xff]  }
 0x5bb   : > { %9751 = vmatmul.mubr.bf16.gmra.mrb[104].mxu0 %v10118_v39  ;;  %9766 = vmatprep.subr.bf16.mxu1 %v5374_v15 }
 0x5bc   : > { %9767 = vmatpush3.bf16.msra.mxu1 %v5374_v15  ;;  %9754 = vmatprep.mubr.bf16.mxu0 %v10119_v28 }
 0x5bd   : > { %v9564_v3 = vpop.f32.mrb[28].mxu1  ;;  %9768 = vmatprep.subr.bf16.mxu1 %v5375_v29 }
 0x5be   : > { %v5187_v24 = vpop.f32.mrb[29].mxu1 }
 0x5bf   : > { %v9565_v44 = vpop.f32.mrb[30].mxu1 }
 0x5c0   : > { %v5377_v5 = vpack.c.bf16 %v9565_v44, %v9564_v3  ;;  %v5190_v21 = vpop.f32.mrb[31].mxu1  ;;  %9769 = vmatpush3.bf16.msra.mxu1 %v5375_v29  ;;  %v10124_v3 = vld [vmem:[%s10556_s15 + $0x158] sm:$0xff]  }
 0x5c1   : > { %v5376_v56 = vpack.c.bf16 %v5190_v21, %v5187_v24  ;;  %v10125_v24 = vld [vmem:[%s10556_s15 + $0x160] sm:$0xff]  }
 0x5c3   : > { %9755 = vmatmul.mubr.bf16.gmra.mrb[108].mxu0 %v10120_v38  ;;  %9770 = vmatprep.subr.bf16.mxu1 %v5376_v56 }
 0x5c4   : > { %9771 = vmatpush3.bf16.msra.mxu1 %v5376_v56  ;;  %9806 = vmatprep.mubr.bf16.mxu0 %v10121_v30 }
 0x5c5   : > { %v9568_v23 = vpop.f32.mrb[32].mxu1  ;;  %9772 = vmatprep.subr.bf16.mxu1 %v5377_v5 }
 0x5c6   : > { %v5203_v26 = vpop.f32.mrb[33].mxu1 }
 0x5c7   : > { %v9569_v33 = vpop.f32.mrb[34].mxu1 }
 0x5c8   : > { %v5379_v17 = vpack.c.bf16 %v9569_v33, %v9568_v23  ;;  %v5206_v62 = vpop.f32.mrb[35].mxu1  ;;  %9773 = vmatpush3.bf16.msra.mxu1 %v5377_v5  ;;  %v10126_v23 = vld [vmem:[%s10556_s15 + $0x168] sm:$0xff]  }
 0x5c9   : > { %v5378_v60 = vpack.c.bf16 %v5206_v62, %v5203_v26  ;;  %v10127_v26 = vld [vmem:[%s10556_s15 + $0x170] sm:$0xff]  }
 0x5cb   : > { %9775 = vmatmul.mubr.bf16.vlgmr.msra.gmra.mrb[96].mxu1 %v10122_v47  ;;  %9790 = vmatprep.subr.bf16.mxu0 %v5378_v60 }
 0x5cc   : > { %9791 = vmatpush3.bf16.msra.mxu0 %v5378_v60  ;;  %9778 = vmatprep.mubr.bf16.mxu1 %v10123_v59 }
 0x5cd   : > { %v9572_v13 = vpop.f32.mrb[36].mxu1  ;;  %9792 = vmatprep.subr.bf16.mxu0 %v5379_v17 }
 0x5ce   : > { %v5219_v29 = vpop.f32.mrb[37].mxu1 }
 0x5cf   : > { %v9573_v55 = vpop.f32.mrb[38].mxu1 }
 0x5d0   : > { %v5381_v15 = vpack.c.bf16 %v9573_v55, %v9572_v13  ;;  %v5222_v39 = vpop.f32.mrb[39].mxu1  ;;  %9793 = vmatpush3.bf16.msra.mxu0 %v5379_v17  ;;  %v10128_v13 = vld [vmem:[%s10556_s15 + $0x178] sm:$0xff]  }
 0x5d1   : > { %v5380_v28 = vpack.c.bf16 %v5222_v39, %v5219_v29  ;;  %v10129_v29 = vld [vmem:[%s10556_s15 + $0x1c0] sm:$0xff]  }
 0x5d3   : > { %9779 = vmatmul.mubr.bf16.gmra.mrb[100].mxu1 %v10124_v3  ;;  %9794 = vmatprep.subr.bf16.mxu0 %v5380_v28 }
 0x5d4   : > { %9795 = vmatpush3.bf16.msra.mxu0 %v5380_v28  ;;  %9782 = vmatprep.mubr.bf16.mxu1 %v10125_v24 }
 0x5d5   : > { %v9576_v44 = vpop.f32.mrb[40].mxu1  ;;  %9796 = vmatprep.subr.bf16.mxu0 %v5381_v15 }
 0x5d6   : > { %v5235_v5 = vpop.f32.mrb[41].mxu1 }
 0x5d7   : > { %v9577_v21 = vpop.f32.mrb[42].mxu1 }
 0x5d8   : > { %v5383_v56 = vpack.c.bf16 %v9577_v21, %v9576_v44  ;;  %v5238_v38 = vpop.f32.mrb[43].mxu1  ;;  %9797 = vmatpush3.bf16.msra.mxu0 %v5381_v15  ;;  %v10130_v44 = vld [vmem:[%s10556_s15 + $0x188] sm:$0xff]  }
 0x5d9   : > { %v5382_v30 = vpack.c.bf16 %v5238_v38, %v5235_v5  ;;  %v10131_v5 = vld [vmem:[%s10556_s15 + $0x190] sm:$0xff]  }
 0x5db   : > { %9783 = vmatmul.mubr.bf16.gmra.mrb[104].mxu1 %v10126_v23  ;;  %9798 = vmatprep.subr.bf16.mxu0 %v5382_v30 }
 0x5dc   : > { %9799 = vmatpush3.bf16.msra.mxu0 %v5382_v30  ;;  %9786 = vmatprep.mubr.bf16.mxu1 %v10127_v26 }
 0x5dd   : > { %v9580_v33 = vpop.f32.mrb[44].mxu1  ;;  %9800 = vmatprep.subr.bf16.mxu0 %v5383_v56 }
 0x5de   : > { %v5251_v17 = vpop.f32.mrb[45].mxu1 }
 0x5df   : > { %v9581_v62 = vpop.f32.mrb[46].mxu1 }
 0x5e0   : > { %v5385_v60 = vpack.c.bf16 %v9581_v62, %v9580_v33  ;;  %v5254_v47 = vpop.f32.mrb[47].mxu1  ;;  %9801 = vmatpush3.bf16.msra.mxu0 %v5383_v56  ;;  %v10132_v33 = vld [vmem:[%s10556_s15 + $0x198] sm:$0xff]  }
 0x5e1   : > { %v5384_v59 = vpack.c.bf16 %v5254_v47, %v5251_v17  ;;  %v10133_v17 = vld [vmem:[%s10556_s15 + $0x1a0] sm:$0xff]  }
 0x5e3   : > { %9787 = vmatmul.mubr.bf16.gmra.mrb[108].mxu1 %v10128_v13  ;;  %9802 = vmatprep.subr.bf16.mxu0 %v5384_v59 }
 0x5e4   : > { %9803 = vmatpush3.bf16.msra.mxu0 %v5384_v59  ;;  %9838 = vmatprep.mubr.bf16.mxu1 %v10129_v29  ;;  %v13548_v59 = vld [vmem:[#allocation14_spill] sm:$0xff] }
 0x5e5   : > { %v9584_v55 = vpop.f32.mrb[48].mxu1  ;;  %9804 = vmatprep.subr.bf16.mxu0 %v5385_v60  ;;  %v6172_v13 = vsub.s32 3, %v13548_v59 }
 0x5e6   : > { %v5267_v15 = vpop.f32.mrb[49].mxu1 }
 0x5e7   : > { %v9585_v39 = vpop.f32.mrb[50].mxu1 }
 0x5e8   : > { %v5387_v28 = vpack.c.bf16 %v9585_v39, %v9584_v55  ;;  %v5270_v3 = vpop.f32.mrb[51].mxu1  ;;  %9805 = vmatpush3.bf16.msra.mxu0 %v5385_v60  ;;  %v10134_v39 = vld [vmem:[%s10556_s15 + $0x1a8] sm:$0xff]  }
 0x5e9   : > { %v5386_v24 = vpack.c.bf16 %v5270_v3, %v5267_v15 }
 0x5eb   : > { %9807 = vmatmul.mubr.bf16.vlgmr.msra.gmra.mrb[112].mxu0 %v10130_v44  ;;  %9822 = vmatprep.subr.bf16.mxu1 %v5386_v24 }
 0x5ec   : > { %9823 = vmatpush3.bf16.msra.mxu1 %v5386_v24  ;;  %9810 = vmatprep.mubr.bf16.mxu0 %v10131_v5  ;;  %v10136_v24 = vld [vmem:[%s10556_s15 + $0x1b0] sm:$0xff]  }
 0x5ed   : > { %v9588_v21 = vpop.f32.mrb[52].mxu1  ;;  %9824 = vmatprep.subr.bf16.mxu1 %v5387_v28 }
 0x5ee   : > { %v5283_v56 = vpop.f32.mrb[53].mxu1 }
 0x5ef   : > { %v9589_v38 = vpop.f32.mrb[54].mxu1 }
 0x5f0   : > { %v5389_v30 = vpack.c.bf16 %v9589_v38, %v9588_v21  ;;  %v5286_v23 = vpop.f32.mrb[55].mxu1  ;;  %9825 = vmatpush3.bf16.msra.mxu1 %v5387_v28  ;;  %v10135_v28 = vld [vmem:[%s13155_s5] sm:$0xf] }
 0x5f1   : > { %v5388_v26 = vpack.c.bf16 %v5286_v23, %v5283_v56  ;;  %v12270_v3 = vrot.slane %v10135_v28, %v6172_v13 }
 0x5f3   : > { %9811 = vmatmul.mubr.bf16.gmra.mrb[116].mxu0 %v10132_v33  ;;  %9826 = vmatprep.subr.bf16.mxu1 %v5388_v26 }
 0x5f4   : > { %9827 = vmatpush3.bf16.msra.mxu1 %v5388_v26  ;;  %9814 = vmatprep.mubr.bf16.mxu0 %v10133_v17 }
 0x5f5   : > { %v9592_v62 = vpop.f32.mrb[56].mxu1  ;;  %9828 = vmatprep.subr.bf16.mxu1 %v5389_v30 }
 0x5f6   : > { %v5299_v60 = vpop.f32.mrb[57].mxu1 }
 0x5f7   : > { %v9593_v47 = vpop.f32.mrb[58].mxu1 }
 0x5f8   : > { %v5391_v29 = vpack.c.bf16 %v9593_v47, %v9592_v62  ;;  %v5302_v55 = vpop.f32.mrb[59].mxu1  ;;  %9829 = vmatpush3.bf16.msra.mxu1 %v5389_v30 }
 0x5f9   : > { %v5390_v15 = vpack.c.bf16 %v5302_v55, %v5299_v60 }
 0x5fb   : > { %9815 = vmatmul.mubr.bf16.gmra.mrb[120].mxu0 %v10134_v39  ;;  %9830 = vmatprep.subr.bf16.mxu1 %v5390_v15  ;;  %v10137_v39 = vld [vmem:[%s10556_s15 + $0x1b8] sm:$0xff]  }
 0x5fc   : > { %9831 = vmatpush3.bf16.msra.mxu1 %v5390_v15  ;;  %9818 = vmatprep.mubr.bf16.mxu0 %v10136_v24 }
 0x5fd   : > { %v9596_v44 = vpop.f32.mrb[60].mxu1  ;;  %9832 = vmatprep.subr.bf16.mxu1 %v5391_v29 }
 0x5fe   : > { %v5315_v5 = vpop.f32.mrb[61].mxu1  ;;  %v9616_v21 = vpop.f32.mrb[64].mxu0 }
 0x5ff   : > { %v6176_v56 = vadd.f32 %v9616_v21, %v12270_v3  ;;  %v9597_v38 = vpop.f32.mrb[62].mxu1  ;;  %v5428_v30 = vpop.f32.mrb[65].mxu0 }
 0x600   : > { %v5393_v23 = vpack.c.bf16 %v9597_v38, %v9596_v44  ;;  %v6174_v26 = vadd.f32 %v12270_v3, %v5428_v30  ;;  %v5318_v33 = vpop.f32.mrb[63].mxu1  ;;  %v9617_v17 = vpop.f32.mrb[66].mxu0  ;;  %9833 = vmatpush3.bf16.msra.mxu1 %v5391_v29  ;;  %v12294_v38 = vld [vmem:[%s12291_s7] sm:$0xff] }
 0x601   : > { %v6304_v62 = vmax.f32 %v6176_v56, 0.0  ;;  %v5392_v60 = vpack.c.bf16 %v5318_v33, %v5315_v5  ;;  %v6177_v47 = vadd.f32 %v9617_v17, %v12270_v3  ;;  %v5431_v59 = vpop.f32.mrb[67].mxu0  ;;  %v13549_v5 = vld [vmem:[#allocation24_spill] sm:$0xff]  ;;  %v12297_v30 = vld [vmem:[%s12291_s7 + $0x20] sm:$0xff] }
 0x602   : > { %v6302_v13 = vmax.f32 %v6174_v26, 0.0  ;;  %v6175_v55 = vadd.f32 %v12270_v3, %v5431_v59  ;;  %v7893_v26 = vcombine.high %v12294_v38, %v12297_v30 }
 0x603   : > { %v6305_v15 = vmax.f32 %v6177_v47, 0.0  ;;  %9819 = vmatmul.mubr.bf16.gmra.mrb[124].mxu0 %v10137_v39  ;;  %9834 = vmatprep.subr.bf16.mxu1 %v5392_v60  ;;  %v12279_v24 = vadd.f32 %v6304_v62, %v11379_v31 }
 0x604   : > { %v6303_v28 = vmax.f32 %v6175_v55, 0.0  ;;  %9835 = vmatpush3.bf16.msra.mxu1 %v5392_v60  ;;  %v12285_v44 = vadd.f32 %v6302_v13, %v11382_v10  ;;  %7038 = vmatprep.mubr.bf16.mxu0 %v7893_v26  ;;  %v10141_v60 = vld [vmem:[%s10556_s15 + $0x1e0] sm:$0xff]  }
 0x605   : > { %v12282_v29 = vadd.f32 %v6305_v15, %v11385_v22  ;;  %9836 = vmatprep.subr.bf16.mxu1 %v5393_v23  ;;  %v10143_v22 = vld [vmem:[%s10556_s15 + $0x1f0] sm:$0xff]  }
 0x606   : > { %v12288_v21 = vadd.f32 %v6303_v28, %v13549_v5  ;;  %v9620_v56 = vpop.f32.mrb[68].mxu0  ;;  %v10138_v28 = vld [vmem:[%s10556_s15 + $0x1c8] sm:$0xff]  }
 0x607   : > { %v6180_v31 = vadd.f32 %v9620_v56, %v12270_v3  ;;  %v5444_v10 = vpop.f32.mrb[69].mxu0  ;;  %v10139_v56 = vld [vmem:[%s10556_s15 + $0x1d0] sm:$0xff]  }
 0x608   : > { %v6178_v17 = vadd.f32 %v12270_v3, %v5444_v10  ;;  %v9621_v62 = vpop.f32.mrb[70].mxu0  ;;  %9837 = vmatpush3.bf16.msra.mxu1 %v5393_v23 }
 0x609   : > { %v6308_v47 = vmax.f32 %v6180_v31, 0.0  ;;  %v6181_v59 = vadd.f32 %v9621_v62, %v12270_v3  ;;  %v5447_v13 = vpop.f32.mrb[71].mxu0 }
 0x60a   : > { %v6306_v55 = vmax.f32 %v6178_v17, 0.0  ;;  %v6179_v15 = vadd.f32 %v12270_v3, %v5447_v13 }
 0x60b   : > { %v6309_v39 = vmax.f32 %v6181_v59, 0.0  ;;  %9839 = vmatmul.mubr.bf16.vlgmr.msra.gmra.mrb[112].mxu1 %v10138_v28  ;;  %v12314_v10 = vadd.f32 %v6308_v47, %v11405_v54  ;;  %v10142_v54 = vld [vmem:[%s10556_s15 + $0x1e8] sm:$0xff]  }
 0x60c   : > { %v6307_v5 = vmax.f32 %v6179_v15, 0.0  ;;  %9842 = vmatprep.mubr.bf16.mxu1 %v10139_v56  ;;  %v12320_v31 = vadd.f32 %v6306_v55, %v11408_v7 }
 0x60d   : > { %v12317_v23 = vadd.f32 %v6309_v39, %v11411_v1 }
 0x60e   : > { %v12323_v26 = vadd.f32 %v6307_v5, %v11414_v32  ;;  %v9624_v17 = vpop.f32.mrb[72].mxu0  ;;  %v10140_v5 = vld [vmem:[%s10556_s15 + $0x1d8] sm:$0xff]   ;;  %s7683_s15 = sshll.u32 %s13677_s10, 3 }
 0x60f   : > { %v6184_v59 = vadd.f32 %v9624_v17, %v12270_v3  ;;  %v5460_v13 = vpop.f32.mrb[73].mxu0  ;;  %s12794_s16 = scalar_lea.vmem %s13153_s3, %s7683_s15 }
 0x610   : > { %v6182_v1 = vadd.f32 %v12270_v3, %v5460_v13  ;;  %v9625_v47 = vpop.f32.mrb[74].mxu0  ;;  %v13550_v13 = vld [vmem:[#allocation27_spill] sm:$0xff] }
 0x611   : > { %v6312_v15 = vmax.f32 %v6184_v59, 0.0  ;;  %v6185_v7 = vadd.f32 %v9625_v47, %v12270_v3  ;;  %v5463_v55 = vpop.f32.mrb[75].mxu0  ;;  %v13551_v47 = vld [vmem:[#allocation26_spill] sm:$0xff] }
 0x612   : > { %v6310_v32 = vmax.f32 %v6182_v1, 0.0  ;;  %v6183_v39 = vadd.f32 %v12270_v3, %v5463_v55 }
 0x613   : > { %v6313_v28 = vmax.f32 %v6185_v7, 0.0  ;;  %9843 = vmatmul.mubr.bf16.gmra.mrb[116].mxu1 %v10140_v5  ;;  %v12336_v17 = vadd.f32 %v6312_v15, %v11431_v53  ;;  %v13553_v53 = vld [vmem:[#allocation31_spill] sm:$0xff] }
 0x614   : > { %v6311_v56 = vmax.f32 %v6183_v39, 0.0  ;;  %9846 = vmatprep.mubr.bf16.mxu1 %v10141_v60  ;;  %v12342_v59 = vadd.f32 %v6310_v32, %v13550_v13 }
 0x615   : > { %v12339_v62 = vadd.f32 %v6313_v28, %v11437_v49 }
 0x616   : > { %v12345_v1 = vadd.f32 %v6311_v56, %v13551_v47  ;;  %v9628_v55 = vpop.f32.mrb[76].mxu0 }
 0x617   : > { %v6188_v60 = vadd.f32 %v9628_v55, %v12270_v3  ;;  %v5476_v39 = vpop.f32.mrb[77].mxu0  ;;  %v13552_v55 = vld [vmem:[#allocation29_spill] sm:$0xff] }
 0x618   : > { %v6186_v49 = vadd.f32 %v12270_v3, %v5476_v39  ;;  %v9629_v15 = vpop.f32.mrb[78].mxu0  ;;  %v13554_v39 = vld [vmem:[#allocation28_spill] sm:$0xff] }
 0x619   : > { %v6316_v28 = vmax.f32 %v6188_v60, 0.0  ;;  %v6189_v32 = vadd.f32 %v9629_v15, %v12270_v3  ;;  %v5479_v5 = vpop.f32.mrb[79].mxu0  ;;  %v13555_v15 = vld [vmem:[#allocation30_spill] sm:$0xff] }
 0x61a   : > { %v6314_v56 = vmax.f32 %v6186_v49, 0.0  ;;  %v6187_v13 = vadd.f32 %v12270_v3, %v5479_v5 }
 0x61b   : > { %v6317_v47 = vmax.f32 %v6189_v32, 0.0  ;;  %9847 = vmatmul.mubr.bf16.gmra.mrb[120].mxu1 %v10142_v54  ;;  %v12358_v33 = vadd.f32 %v6316_v28, %v13552_v55 }
 0x61c   : > { %v6315_v7 = vmax.f32 %v6187_v13, 0.0  ;;  %9850 = vmatprep.mubr.bf16.mxu1 %v10143_v22  ;;  %v12364_v60 = vadd.f32 %v6314_v56, %v13554_v39 }
 0x61d   : > { %v12361_v52 = vadd.f32 %v6317_v47, %v13553_v53 }
 0x61e   : > { %v12367_v49 = vadd.f32 %v6315_v7, %v13555_v15  ;;  %v9648_v5 = vpop.f32.mrb[64].mxu1 }
 0x61f   : > { %v6192_v32 = vadd.f32 %v9648_v5, %v12270_v3  ;;  %v5525_v22 = vpop.f32.mrb[65].mxu1 }
 0x620   : > { %v6190_v53 = vadd.f32 %v12270_v3, %v5525_v22  ;;  %v9649_v13 = vpop.f32.mrb[66].mxu1 }
 0x621   : > { %v6320_v47 = vmax.f32 %v6192_v32, 0.0  ;;  %v6193_v56 = vadd.f32 %v9649_v13, %v12270_v3  ;;  %v5528_v55 = vpop.f32.mrb[67].mxu1 }
 0x622   : > { %v6318_v39 = vmax.f32 %v6190_v53, 0.0  ;;  %v6191_v7 = vadd.f32 %v12270_v3, %v5528_v55 }
 0x623   : > { %v6321_v15 = vmax.f32 %v6193_v56, 0.0  ;;  %9851 = vmatmul.mubr.bf16.gmra.mrb[124].mxu1 %v10144_v35  ;;  %v6448_v5 = vadd.f32 %v6320_v47, %v13556_v50  ;;  %v13562_v47 = vld [vmem:[#allocation75_spill] sm:$0xff] }
 0x624   : > { %v6319_v54 = vmax.f32 %v6191_v7, 0.0  ;;  %v6446_v28 = vadd.f32 %v6318_v39, %v13558_v57 }
 0x625   : > { %v6449_v48 = vadd.f32 %v6321_v15, %v13557_v45 }
 0x626   : > { %v6447_v22 = vadd.f32 %v6319_v54, %v13559_v63  ;;  %v9652_v43 = vpop.f32.mrb[68].mxu1  ;;  %v13560_v63 = vpack.c.bf16 %v12288_v21, %v12285_v44 }
 0x627   : > { %v6196_v32 = vadd.f32 %v9652_v43, %v12270_v3  ;;  %v5541_v13 = vpop.f32.mrb[69].mxu1  ;;  %v6631_v37 = vpack.c.bf16 %v6449_v48, %v6448_v5  ;;  %v13561_v48 = vld [vmem:[#allocation34_spill] sm:$0xff]  ;;  %v13564_v5 = vld [vmem:[#allocation76_spill] sm:$0xff] }
 0x628   : > { %v6194_v53 = vadd.f32 %v12270_v3, %v5541_v13  ;;  %v9653_v55 = vpop.f32.mrb[70].mxu1  ;;  %v6630_v56 = vpack.c.bf16 %v6447_v22, %v6446_v28  ;;  %v13563_v28 = vld [vmem:[#allocation74_spill] sm:$0xff] }
 0x629   : > { %v6324_v34 = vmax.f32 %v6196_v32, 0.0  ;;  %v6197_v35 = vadd.f32 %v9653_v55, %v12270_v3  ;;  %v5544_v7 = vpop.f32.mrb[71].mxu1  ;;  %v13565_v55 = vpack.c.bf16 %v12282_v29, %v12279_v24  ;;  %v13567_v29 = vld [vmem:[#allocation77_spill] sm:$0xff] }
 0x62a   : > { %v6322_v50 = vmax.f32 %v6194_v53, 0.0  ;;  %v6195_v45 = vadd.f32 %v12270_v3, %v5544_v7  ;;  %8510 = vmatprep.subr.bf16.mxu0 %v6630_v56 }
 0x62b   : > { %v6325_v57 = vmax.f32 %v6197_v35, 0.0  ;;  %8511 = vmatpush3.bf16.msra.mxu0 %v13560_v63  ;;  %v6452_v54 = vadd.f32 %v6324_v34, %v13561_v48  ;;  %v13566_v63 = vpack.c.bf16 %v12323_v26, %v12320_v31  ;;  %v13568_v48 = vld [vmem:[#allocation79_spill] sm:$0xff] }
 0x62c   : > { %v6323_v43 = vmax.f32 %v6195_v45, 0.0  ;;  %8512 = vmatprep.subr.bf16.mxu0 %v6631_v37  ;;  %v6450_v15 = vadd.f32 %v6322_v50, %v13563_v28  ;;  %v13570_v28 = vld [vmem:[#allocation80_spill] sm:$0xff] }
 0x62d   : > { %v6453_v39 = vadd.f32 %v6325_v57, %v13562_v47  ;;  %v13569_v47 = vld [vmem:[#allocation78_spill] sm:$0xff] }
 0x62e   : > { %v6451_v22 = vadd.f32 %v6323_v43, %v13564_v5  ;;  %v9656_v32 = vpop.f32.mrb[72].mxu1 }
 0x62f   : > { %v6200_v13 = vadd.f32 %v9656_v32, %v12270_v3  ;;  %v5557_v53 = vpop.f32.mrb[73].mxu1  ;;  %8513 = vmatpush3.bf16.msra.mxu0 %v13565_v55  ;;  %v6633_v44 = vpack.c.bf16 %v6453_v39, %v6452_v54 }
 0x630   : > { %v6198_v21 = vadd.f32 %v12270_v3, %v5557_v53  ;;  %v9657_v37 = vpop.f32.mrb[74].mxu1  ;;  %v6632_v56 = vpack.c.bf16 %v6451_v22, %v6450_v15 }
 0x631   : > { %v6328_v34 = vmax.f32 %v6200_v13, 0.0  ;;  %v6201_v35 = vadd.f32 %v9657_v37, %v12270_v3  ;;  %v5560_v7 = vpop.f32.mrb[75].mxu1  ;;  %v13571_v13 = vpack.c.bf16 %v12317_v23, %v12314_v10  ;;  %v13573_v23 = vld [vmem:[#allocation81_spill] sm:$0xff] }
 0x632   : > { %v6326_v50 = vmax.f32 %v6198_v21, 0.0  ;;  %v6199_v45 = vadd.f32 %v12270_v3, %v5560_v7  ;;  %8514 = vmatprep.subr.bf16.mxu0 %v6632_v56  ;;  %v13572_v7 = vpack.c.bf16 %v12345_v1, %v12342_v59  ;;  %v13577_v59 = vpack.c.bf16 %v12339_v62, %v12336_v17 }
 0x633   : > { %v6329_v57 = vmax.f32 %v6201_v35, 0.0  ;;  %8515 = vmatpush3.bf16.msra.mxu0 %v13566_v63  ;;  %v6456_v43 = vadd.f32 %v6328_v34, %v13567_v29  ;;  %v13575_v63 = vld [vmem:[#allocation82_spill] sm:$0xff]  ;;  %v13576_v29 = vld [vmem:[#allocation84_spill] sm:$0xff] }
 0x634   : > { %v6327_v24 = vmax.f32 %v6199_v45, 0.0  ;;  %8516 = vmatprep.subr.bf16.mxu0 %v6633_v44  ;;  %v6454_v39 = vadd.f32 %v6326_v50, %v13569_v47  ;;  %v13574_v45 = vld [vmem:[#allocation83_spill] sm:$0xff] }
 0x635   : > { %v6457_v54 = vadd.f32 %v6329_v57, %v13568_v48 }
 0x636   : > { %v6455_v15 = vadd.f32 %v6327_v24, %v13570_v28  ;;  %v9660_v5 = vpop.f32.mrb[76].mxu1 }
 0x637   : > { %v6204_v22 = vadd.f32 %v9660_v5, %v12270_v3  ;;  %v5573_v32 = vpop.f32.mrb[77].mxu1  ;;  %8517 = vmatpush3.bf16.msra.mxu0 %v13571_v13  ;;  %v6635_v31 = vpack.c.bf16 %v6457_v54, %v6456_v43  ;;  %v12428_v13 = vld [vmem:[%s12291_s7 + $0x8] sm:$0xff] }
 0x638   : > { %v6202_v26 = vadd.f32 %v12270_v3, %v5573_v32  ;;  %v9661_v53 = vpop.f32.mrb[78].mxu1  ;;  %v6634_v55 = vpack.c.bf16 %v6455_v15, %v6454_v39 }
 0x639   : > { %v6332_v44 = vmax.f32 %v6204_v22, 0.0  ;;  %v6205_v21 = vadd.f32 %v9661_v53, %v12270_v3  ;;  %v5576_v37 = vpop.f32.mrb[79].mxu1 }
 0x63a   : > { %v6330_v56 = vmax.f32 %v6202_v26, 0.0  ;;  %v6203_v34 = vadd.f32 %v12270_v3, %v5576_v37  ;;  %8518 = vmatprep.subr.bf16.mxu0 %v6634_v55  ;;  %v13578_v55 = vpack.c.bf16 %v12367_v49, %v12364_v60  ;;  %v6566_v37 = vld [vmem:[%s12291_s7 + $0x40] sm:$0xff] }
 0x63b   : > { %v6333_v35 = vmax.f32 %v6205_v21, 0.0  ;;  %8519 = vmatpush3.bf16.msra.mxu0 %v13572_v7  ;;  %v6460_v50 = vadd.f32 %v6332_v44, %v13573_v23  ;;  %v13580_v7 = vld [vmem:[#allocation87_spill] sm:$0xff]  ;;  %v13581_v23 = vld [vmem:[#allocation86_spill] sm:$0xff]  ;;  %v13593_v44 = vld [vmem:[#allocation97_spill] sm:$0xff] }
 0x63c   : > { %v6331_v10 = vmax.f32 %v6203_v34, 0.0  ;;  %8520 = vmatprep.subr.bf16.mxu0 %v6635_v31  ;;  %v6458_v24 = vadd.f32 %v6330_v56, %v13575_v63  ;;  %v12431_v31 = vld [vmem:[%s12291_s7 + $0x28] sm:$0xff]  ;;  %v6570_v56 = vld [vmem:[%s12291_s7 + $0x60] sm:$0xff]  ;;  %v13579_v34 = vld [vmem:[#allocation85_spill] sm:$0xff] }
 0x63d   : > { %v6461_v57 = vadd.f32 %v6333_v35, %v13574_v45  ;;  %v7895_v62 = vcombine.high %v12428_v13, %v12431_v31  ;;  %v13582_v45 = vld [vmem:[#allocation88_spill] sm:$0xff] }
 0x63e   : > { %v6459_v43 = vadd.f32 %v6331_v10, %v13576_v29  ;;  %v9680_v48 = vpop.f32.mrb[80].mxu0  ;;  %v12459_v63 = vld [vmem:[%s12291_s7 + $0x30] sm:$0xff] }
 0x63f   : > { %v6208_v54 = vadd.f32 %v9680_v48, %v12270_v3  ;;  %v5622_v47 = vpop.f32.mrb[81].mxu0  ;;  %8521 = vmatpush3.bf16.msra.mxu0 %v13577_v59  ;;  %v6637_v1 = vpack.c.bf16 %v6461_v57, %v6460_v50  ;;  %7135 = vmatprep.mubr.bf16.mxu1 %v7895_v62  ;;  %v12456_v57 = vld [vmem:[%s12291_s7 + $0x10] sm:$0xff]  ;;  %v13583_v48 = vpack.c.bf16 %v12361_v52, %v12358_v33  ;;  %v6578_v62 = vld [vmem:[%s12291_s7 + $0xa0] sm:$0xff] }
 0x640   : > { %v6206_v39 = vadd.f32 %v12270_v3, %v5622_v47  ;;  %v9681_v28 = vpop.f32.mrb[82].mxu0  ;;  %v6636_v15 = vpack.c.bf16 %v6459_v43, %v6458_v24  ;;  %v13584_v33 = vcombine.low %v12294_v38, %v12297_v30  ;;  %v7900_v38 = vcombine.low %v6566_v37, %v6570_v56  ;;  %v13597_v24 = vld [vmem:[#allocation15_spill] sm:$0xff] }
 0x641   : > { %v6336_v5 = vmax.f32 %v6208_v54, 0.0  ;;  %v6209_v22 = vadd.f32 %v9681_v28, %v12270_v3  ;;  %v5625_v32 = vpop.f32.mrb[83].mxu0  ;;  %v7901_v54 = vcombine.high %v6566_v37, %v6570_v56 }
 0x642   : > { %v6334_v26 = vmax.f32 %v6206_v39, 0.0  ;;  %v6207_v53 = vadd.f32 %v12270_v3, %v5625_v32  ;;  %8522 = vmatprep.subr.bf16.mxu0 %v6636_v15  ;;  %v6594_v39 = vld [vmem:[%s12291_s7 + $0x120] sm:$0xff] }
 0x643   : > { %v6337_v17 = vmax.f32 %v6209_v22, 0.0  ;;  %8523 = vmatpush3.bf16.msra.mxu0 %v13578_v55  ;;  %v12444_v35 = vadd.f32 %v6336_v5, %v13579_v34 }
 0x644   : > { %v6335_v21 = vmax.f32 %v6207_v53, 0.0  ;;  %8524 = vmatprep.subr.bf16.mxu0 %v6637_v1  ;;  %v12450_v50 = vadd.f32 %v6334_v26, %v13581_v23  ;;  %v6574_v53 = vld [vmem:[%s12291_s7 + $0x80] sm:$0xff] }
 0x645   : > { %v12447_v10 = vadd.f32 %v6337_v17, %v13580_v7  ;;  %v13585_v17 = vld [vmem:[#allocation89_spill] sm:$0xff]  ;;  %v13587_v7 = vld [vmem:[#allocation90_spill] sm:$0xff] }
 0x646   : > { %v12453_v60 = vadd.f32 %v6335_v21, %v13582_v45  ;;  %v9684_v49 = vpop.f32.mrb[84].mxu0  ;;  %v13586_v21 = vld [vmem:[#allocation91_spill] sm:$0xff]  ;;  %v13588_v45 = vld [vmem:[#allocation92_spill] sm:$0xff] }
 0x647   : > { %v6212_v29 = vadd.f32 %v9684_v49, %v12270_v3  ;;  %v5638_v43 = vpop.f32.mrb[85].mxu0  ;;  %8525 = vmatpush3.bf16.msra.mxu0 %v13583_v48 }
 0x648   : > { %v6210_v59 = vadd.f32 %v12270_v3, %v5638_v43  ;;  %v9685_v1 = vpop.f32.mrb[86].mxu0 }
 0x649   : > { %v6340_v28 = vmax.f32 %v6212_v29, 0.0  ;;  %v6213_v15 = vadd.f32 %v9685_v1, %v12270_v3  ;;  %v5641_v5 = vpop.f32.mrb[87].mxu0 }
 0x64a   : > { %v6338_v22 = vmax.f32 %v6210_v59, 0.0  ;;  %v6211_v52 = vadd.f32 %v12270_v3, %v5641_v5  ;;  %7039 = vmatmul.mubr.bf16.vlgmr.msra.gmra.mrb[128].mxu0 %v13584_v33 }
 0x64b   : > { %v6341_v32 = vmax.f32 %v6213_v15, 0.0  ;;  %7046 = vmatprep.mubr.bf16.mxu0 %v7901_v54  ;;  %v12480_v55 = vadd.f32 %v6340_v28, %v13585_v17  ;;  %v7909_v54 = vcombine.high %v6574_v53, %v6578_v62  ;;  %v13589_v17 = vld [vmem:[#allocation93_spill] sm:$0xff] }
 0x64c   : > { %v6339_v26 = vmax.f32 %v6211_v52, 0.0  ;;  %v12486_v23 = vadd.f32 %v6338_v22, %v13587_v7  ;;  %v13590_v7 = vld [vmem:[#allocation95_spill] sm:$0xff] }
 0x64d   : > { %v12483_v34 = vadd.f32 %v6341_v32, %v13586_v21  ;;  %v6582_v32 = vld [vmem:[%s12291_s7 + $0xc0] sm:$0xff] }
 0x64e   : > { %v12489_v49 = vadd.f32 %v6339_v26, %v13588_v45  ;;  %v9688_v29 = vpop.f32.mrb[88].mxu0  ;;  %v6586_v26 = vld [vmem:[%s12291_s7 + $0xe0] sm:$0xff] }
 0x64f   : > { %v6216_v43 = vadd.f32 %v9688_v29, %v12270_v3  ;;  %v5654_v48 = vpop.f32.mrb[89].mxu0  ;;  %v13591_v29 = vld [vmem:[#allocation94_spill] sm:$0xff] }
 0x650   : > { %v6214_v1 = vadd.f32 %v12270_v3, %v5654_v48  ;;  %v9689_v28 = vpop.f32.mrb[90].mxu0  ;;  %v13592_v48 = vld [vmem:[#allocation96_spill] sm:$0xff] }
 0x651   : > { %v6344_v15 = vmax.f32 %v6216_v43, 0.0  ;;  %v6217_v5 = vadd.f32 %v9689_v28, %v12270_v3  ;;  %v5657_v22 = vpop.f32.mrb[91].mxu0 }
 0x652   : > { %v6342_v37 = vmax.f32 %v6214_v1, 0.0  ;;  %v6215_v56 = vadd.f32 %v12270_v3, %v5657_v22  ;;  %7047 = vmatmul.mubr.bf16.gmra.mrb[132].mxu0 %v7900_v38  ;;  %v7908_v22 = vcombine.low %v6574_v53, %v6578_v62 }
 0x653   : > { %v6345_v52 = vmax.f32 %v6217_v5, 0.0  ;;  %7054 = vmatprep.mubr.bf16.mxu0 %v7909_v54  ;;  %v12502_v21 = vadd.f32 %v6344_v15, %v13589_v17  ;;  %v7917_v5 = vcombine.high %v6582_v32, %v6586_v26 }
 0x654   : > { %v6343_v33 = vmax.f32 %v6215_v56, 0.0  ;;  %v12508_v43 = vadd.f32 %v6342_v37, %v13591_v29  ;;  %v13594_v56 = vld [vmem:[#allocation99_spill] sm:$0xff] }
 0x655   : > { %v12505_v45 = vadd.f32 %v6345_v52, %v13590_v7 }
 0x656   : > { %v12511_v28 = vadd.f32 %v6343_v33, %v13592_v48  ;;  %v9692_v1 = vpop.f32.mrb[92].mxu0 }
 0x657   : > { %v6220_v54 = vadd.f32 %v9692_v1, %v12270_v3  ;;  %v5670_v15 = vpop.f32.mrb[93].mxu0  ;;  %v6590_v1 = vld [vmem:[%s12291_s7 + $0x100] sm:$0xff] }
 0x658   : > { %v6218_v37 = vadd.f32 %v12270_v3, %v5670_v15  ;;  %v9693_v52 = vpop.f32.mrb[94].mxu0  ;;  %v13595_v15 = vld [vmem:[#allocation98_spill] sm:$0xff] }
 0x659   : > { %v6348_v17 = vmax.f32 %v6220_v54, 0.0  ;;  %v6221_v33 = vadd.f32 %v9693_v52, %v12270_v3  ;;  %v5673_v7 = vpop.f32.mrb[95].mxu0  ;;  %v13596_v52 = vld [vmem:[#allocation100_spill] sm:$0xff] }
 0x65a   : > { %v6346_v53 = vmax.f32 %v6218_v37, 0.0  ;;  %v6219_v62 = vadd.f32 %v12270_v3, %v5673_v7  ;;  %7055 = vmatmul.mubr.bf16.gmra.mrb[136].mxu0 %v7908_v22  ;;  %v7916_v7 = vcombine.low %v6582_v32, %v6586_v26  ;;  %v6602_v22 = vld [vmem:[%s12291_s7 + $0x160] sm:$0xff] }
 0x65b   : > { %v6349_v29 = vmax.f32 %v6221_v33, 0.0  ;;  %7062 = vmatprep.mubr.bf16.mxu0 %v7917_v5  ;;  %v12524_v38 = vadd.f32 %v6348_v17, %v13593_v44  ;;  %v7925_v17 = vcombine.high %v6590_v1, %v6594_v39 }
 0x65c   : > { %v6347_v48 = vmax.f32 %v6219_v62, 0.0  ;;  %v12530_v54 = vadd.f32 %v6346_v53, %v13595_v15 }
 0x65d   : > { %v12527_v30 = vadd.f32 %v6349_v29, %v13594_v56 }
 0x65e   : > { %v12533_v59 = vadd.f32 %v6347_v48, %v13596_v52  ;;  %v9712_v37 = vpop.f32.mrb[80].mxu1 }
 0x65f   : > { %v6224_v5 = vadd.f32 %v9712_v37, %v12270_v3  ;;  %v5719_v44 = vpop.f32.mrb[81].mxu1  ;;  %v6598_v37 = vld [vmem:[%s12291_s7 + $0x140] sm:$0xff] }
 0x660   : > { %v6222_v33 = vadd.f32 %v12270_v3, %v5719_v44  ;;  %v9713_v53 = vpop.f32.mrb[82].mxu1 }
 0x661   : > { %v6352_v62 = vmax.f32 %v6224_v5, 0.0  ;;  %v6225_v29 = vadd.f32 %v9713_v53, %v12270_v3  ;;  %v5722_v48 = vpop.f32.mrb[83].mxu1  ;;  %v7924_v53 = vcombine.low %v6590_v1, %v6594_v39  ;;  %v6610_v1 = vld [vmem:[%s12291_s7 + $0x1a0] sm:$0xff] }
 0x662   : > { %v6350_v32 = vmax.f32 %v6222_v33, 0.0  ;;  %v6223_v26 = vadd.f32 %v12270_v3, %v5722_v48  ;;  %7063 = vmatmul.mubr.bf16.gmra.mrb[140].mxu0 %v7916_v7  ;;  %v7933_v7 = vcombine.high %v6598_v37, %v6602_v22 }
 0x663   : > { %v6353_v15 = vmax.f32 %v6225_v29, 0.0  ;;  %7070 = vmatprep.mubr.bf16.mxu0 %v7925_v17  ;;  %v6480_v47 = vadd.f32 %v6352_v62, %v13597_v24 }
 0x664   : > { %v6351_v52 = vmax.f32 %v6223_v26, 0.0  ;;  %v6478_v44 = vadd.f32 %v6350_v32, %v13599_v8 }
 0x665   : > { %v6481_v56 = vadd.f32 %v6353_v15, %v13598_v20  ;;  %v13603_v15 = vld [vmem:[#allocation18_spill] sm:$0xff] }
 0x666   : > { %v6479_v5 = vadd.f32 %v6351_v52, %v13600_v25  ;;  %v9716_v18 = vpop.f32.mrb[84].mxu1 }
 0x667   : > { %v6228_v33 = vadd.f32 %v9716_v18, %v12270_v3  ;;  %v5735_v51 = vpop.f32.mrb[85].mxu1  ;;  %v6647_v48 = vpack.c.bf16 %v6481_v56, %v6480_v47  ;;  %v13601_v18 = vpack.c.bf16 %v12453_v60, %v12450_v50  ;;  %v13602_v56 = vld [vmem:[#allocation56_spill] sm:$0xff]  ;;  %v13606_v50 = vpack.c.bf16 %v12447_v10, %v12444_v35 }
 0x668   : > { %v6226_v17 = vadd.f32 %v12270_v3, %v5735_v51  ;;  %v9717_v29 = vpop.f32.mrb[86].mxu1  ;;  %v6646_v26 = vpack.c.bf16 %v6479_v5, %v6478_v44  ;;  %v6606_v51 = vld [vmem:[%s12291_s7 + $0x180] sm:$0xff]  ;;  %v13604_v44 = vld [vmem:[#allocation57_spill] sm:$0xff]  ;;  %v13607_v35 = vpack.c.bf16 %v12489_v49, %v12486_v23  ;;  %v13612_v23 = vpack.c.bf16 %v12483_v34, %v12480_v55 }
 0x669   : > { %v6356_v24 = vmax.f32 %v6228_v33, 0.0  ;;  %v6229_v20 = vadd.f32 %v9717_v29, %v12270_v3  ;;  %v5738_v62 = vpop.f32.mrb[87].mxu1  ;;  %v13605_v33 = vld [vmem:[#allocation21_spill] sm:$0xff]  ;;  %v13613_v55 = vpack.c.bf16 %v12511_v28, %v12508_v43  ;;  %v13618_v43 = vpack.c.bf16 %v12505_v45, %v12502_v21 }
 0x66a   : > { %v6354_v8 = vmax.f32 %v6226_v17, 0.0  ;;  %v6227_v25 = vadd.f32 %v12270_v3, %v5738_v62  ;;  %8574 = vmatprep.subr.bf16.mxu1 %v6646_v26  ;;  %7071 = vmatmul.mubr.bf16.gmra.mrb[144].mxu0 %v7924_v53  ;;  %v7932_v53 = vcombine.low %v6598_v37, %v6602_v22  ;;  %v13619_v45 = vpack.c.bf16 %v12533_v59, %v12530_v54  ;;  %v12619_v59 = vld [vmem:[%s12291_s7 + $0x18] sm:$0xff] }
 0x66b   : > { %v6357_v39 = vmax.f32 %v6229_v20, 0.0  ;;  %8575 = vmatpush3.bf16.msra.mxu1 %v13601_v18  ;;  %7078 = vmatprep.mubr.bf16.mxu0 %v7933_v7  ;;  %v6484_v32 = vadd.f32 %v6356_v24, %v13602_v56  ;;  %v6618_v56 = vld [vmem:[%s12291_s7 + $0x1e0] sm:$0xff]  ;;  %v12622_v54 = vld [vmem:[%s12291_s7 + $0x38] sm:$0xff] }
 0x66c   : > { %v6355_v47 = vmax.f32 %v6227_v25, 0.0  ;;  %8576 = vmatprep.subr.bf16.mxu1 %v6647_v48  ;;  %v6482_v5 = vadd.f32 %v6354_v8, %v13604_v44  ;;  %v7941_v48 = vcombine.high %v6606_v51, %v6610_v1 }
 0x66d   : > { %v6485_v52 = vadd.f32 %v6357_v39, %v13603_v15 }
 0x66e   : > { %v6483_v17 = vadd.f32 %v6355_v47, %v13605_v33  ;;  %v9720_v29 = vpop.f32.mrb[88].mxu1  ;;  %v6614_v47 = vld [vmem:[%s12291_s7 + $0x1c0] sm:$0xff] }
 0x66f   : > { %v6232_v26 = vadd.f32 %v9720_v29, %v12270_v3  ;;  %v5751_v20 = vpop.f32.mrb[89].mxu1  ;;  %8577 = vmatpush3.bf16.msra.mxu1 %v13606_v50  ;;  %v6649_v60 = vpack.c.bf16 %v6485_v52, %v6484_v32  ;;  %v13608_v32 = vld [vmem:[#allocation62_spill] sm:$0xff]  ;;  %v13609_v52 = vld [vmem:[#allocation20_spill] sm:$0xff] }
 0x670   : > { %v6230_v7 = vadd.f32 %v12270_v3, %v5751_v20  ;;  %v9721_v24 = vpop.f32.mrb[90].mxu1  ;;  %v6648_v62 = vpack.c.bf16 %v6483_v17, %v6482_v5  ;;  %v13610_v5 = vld [vmem:[#allocation63_spill] sm:$0xff] }
 0x671   : > { %v6360_v8 = vmax.f32 %v6232_v26, 0.0  ;;  %v6233_v25 = vadd.f32 %v9721_v24, %v12270_v3  ;;  %v5754_v39 = vpop.f32.mrb[91].mxu1  ;;  %v13611_v17 = vld [vmem:[#allocation23_spill] sm:$0xff] }
 0x672   : > { %v6358_v22 = vmax.f32 %v6230_v7, 0.0  ;;  %v6231_v37 = vadd.f32 %v12270_v3, %v5754_v39  ;;  %8578 = vmatprep.subr.bf16.mxu1 %v6648_v62  ;;  %7079 = vmatmul.mubr.bf16.gmra.mrb[148].mxu0 %v7932_v53  ;;  %v7940_v53 = vcombine.low %v6606_v51, %v6610_v1 }
 0x673   : > { %v6361_v18 = vmax.f32 %v6233_v25, 0.0  ;;  %8579 = vmatpush3.bf16.msra.mxu1 %v13607_v35  ;;  %7086 = vmatprep.mubr.bf16.mxu0 %v7941_v48  ;;  %v6488_v15 = vadd.f32 %v6360_v8, %v13608_v32 }
 0x674   : > { %v6359_v10 = vmax.f32 %v6231_v37, 0.0  ;;  %8580 = vmatprep.subr.bf16.mxu1 %v6649_v60  ;;  %v6486_v33 = vadd.f32 %v6358_v22, %v13610_v5  ;;  %v7949_v60 = vcombine.high %v6614_v47, %v6618_v56  ;;  %v13614_v22 = vld [vmem:[#allocation68_spill] sm:$0xff]  ;;  %v7948_v5 = vcombine.low %v6614_v47, %v6618_v56 }
 0x675   : > { %v6489_v44 = vadd.f32 %v6361_v18, %v13609_v52  ;;  %v13615_v18 = vld [vmem:[#allocation22_spill] sm:$0xff] }
 0x676   : > { %v6487_v29 = vadd.f32 %v6359_v10, %v13611_v17  ;;  %v9724_v26 = vpop.f32.mrb[92].mxu1  ;;  %v13616_v10 = vld [vmem:[#allocation69_spill] sm:$0xff] }
 0x677   : > { %v6236_v20 = vadd.f32 %v9724_v26, %v12270_v3  ;;  %v5767_v50 = vpop.f32.mrb[93].mxu1  ;;  %8581 = vmatpush3.bf16.msra.mxu1 %v13612_v23  ;;  %v6651_v49 = vpack.c.bf16 %v6489_v44, %v6488_v15  ;;  %v13617_v15 = vld [vmem:[#allocation25_spill] sm:$0xff] }
 0x678   : > { %v6234_v48 = vadd.f32 %v12270_v3, %v5767_v50  ;;  %v9725_v7 = vpop.f32.mrb[94].mxu1  ;;  %v6650_v24 = vpack.c.bf16 %v6487_v29, %v6486_v33  ;;  %v7897_v29 = vcombine.high %v12456_v57, %v12459_v63 }
 0x679   : > { %v6364_v62 = vmax.f32 %v6236_v20, 0.0  ;;  %v6237_v8 = vadd.f32 %v9725_v7, %v12270_v3  ;;  %v5770_v25 = vpop.f32.mrb[95].mxu1  ;;  %v6571_v7 = vld [vmem:[%s12291_s7 + $0x68] sm:$0xff] }
 0x67a   : > { %v6362_v39 = vmax.f32 %v6234_v48, 0.0  ;;  %v6235_v51 = vadd.f32 %v12270_v3, %v5770_v25  ;;  %8582 = vmatprep.subr.bf16.mxu1 %v6650_v24  ;;  %7087 = vmatmul.mubr.bf16.gmra.mrb[152].mxu0 %v7940_v53  ;;  %v6567_v48 = vld [vmem:[%s12291_s7 + $0x48] sm:$0xff]  ;;  %v13620_v24 = vld [vmem:[#allocation37_spill] sm:$0xff] }
 0x67b   : > { %v6365_v1 = vmax.f32 %v6237_v8, 0.0  ;;  %8583 = vmatpush3.bf16.msra.mxu1 %v13613_v55  ;;  %7094 = vmatprep.mubr.bf16.mxu0 %v7949_v60  ;;  %v6492_v37 = vadd.f32 %v6364_v62, %v13614_v22  ;;  %v13621_v8 = vld [vmem:[#allocation38_spill] sm:$0xff] }
 0x67c   : > { %v6363_v34 = vmax.f32 %v6235_v51, 0.0  ;;  %8584 = vmatprep.subr.bf16.mxu1 %v6651_v49  ;;  %v6490_v32 = vadd.f32 %v6362_v39, %v13616_v10  ;;  %v13622_v39 = vld [vmem:[#allocation39_spill] sm:$0xff]  ;;  %v7903_v10 = vcombine.high %v6567_v48, %v6571_v7 }
 0x67d   : > { %v6493_v35 = vadd.f32 %v6365_v1, %v13615_v18  ;;  %v13623_v1 = vld [vmem:[#allocation40_spill] sm:$0xff] }
 0x67e   : > { %v6491_v52 = vadd.f32 %v6363_v34, %v13617_v15  ;;  %v9744_v44 = vpop.f32.mrb[96].mxu0 }
 0x67f   : > { %v6240_v33 = vadd.f32 %v9744_v44, %v12270_v3  ;;  %v5816_v17 = vpop.f32.mrb[97].mxu0  ;;  %8585 = vmatpush3.bf16.msra.mxu1 %v13618_v43  ;;  %v6653_v28 = vpack.c.bf16 %v6493_v35, %v6492_v37  ;;  %v13624_v35 = vpack.c.bf16 %v12527_v30, %v12524_v38  ;;  %v13625_v38 = vcombine.low %v12428_v13, %v12431_v31 }
 0x680   : > { %v6238_v26 = vadd.f32 %v12270_v3, %v5816_v17  ;;  %v9745_v53 = vpop.f32.mrb[98].mxu0  ;;  %v6652_v20 = vpack.c.bf16 %v6491_v52, %v6490_v32  ;;  %v7898_v32 = vcombine.low %v12619_v59, %v12622_v54  ;;  %v7902_v13 = vcombine.low %v6567_v48, %v6571_v7 }
 0x681   : > { %v6368_v50 = vmax.f32 %v6240_v33, 0.0  ;;  %v6241_v47 = vadd.f32 %v9745_v53, %v12270_v3  ;;  %v5819_v56 = vpop.f32.mrb[99].mxu0  ;;  %v6579_v53 = vld [vmem:[%s12291_s7 + $0xa8] sm:$0xff] }
 0x682   : > { %v6366_v23 = vmax.f32 %v6238_v26, 0.0  ;;  %v6239_v49 = vadd.f32 %v12270_v3, %v5819_v56  ;;  %8586 = vmatprep.subr.bf16.mxu1 %v6652_v20  ;;  %7095 = vmatmul.mubr.bf16.gmra.mrb[156].mxu0 %v7948_v5  ;;  %v6575_v26 = vld [vmem:[%s12291_s7 + $0x88] sm:$0xff]  ;;  %v13626_v20 = vld [vmem:[#allocation41_spill] sm:$0xff] }
 0x683   : > { %v6369_v21 = vmax.f32 %v6241_v47, 0.0  ;;  %8587 = vmatpush3.bf16.msra.mxu1 %v13619_v45  ;;  %7232 = vmatprep.mubr.bf16.mxu0 %v7897_v29  ;;  %v12607_v62 = vadd.f32 %v6368_v50, %v13620_v24  ;;  %v13627_v47 = vld [vmem:[#allocation42_spill] sm:$0xff] }
 0x684   : > { %v6367_v60 = vmax.f32 %v6239_v49, 0.0  ;;  %8588 = vmatprep.subr.bf16.mxu1 %v6653_v28  ;;  %v12613_v51 = vadd.f32 %v6366_v23, %v13622_v39  ;;  %v13628_v23 = vld [vmem:[#allocation43_spill] sm:$0xff]  ;;  %v7911_v39 = vcombine.high %v6575_v26, %v6579_v53 }
 0x685   : > { %v12610_v25 = vadd.f32 %v6369_v21, %v13621_v8  ;;  %v13629_v21 = vld [vmem:[#allocation44_spill] sm:$0xff] }
 0x686   : > { %v12616_v55 = vadd.f32 %v6367_v60, %v13623_v1  ;;  %v9748_v34 = vpop.f32.mrb[100].mxu0 }
 0x687   : > { %v6655_v22 = vpack.c.bf16 %v12610_v25, %v12607_v62  ;;  %v6244_v37 = vadd.f32 %v9748_v34, %v12270_v3  ;;  %v5832_v18 = vpop.f32.mrb[101].mxu0  ;;  %8589 = vmatpush3.bf16.msra.mxu1 %v13624_v35  ;;  %v6615_v25 = vld [vmem:[%s12291_s7 + $0x1c8] sm:$0xff] }
 0x688   : > { %v6654_v15 = vpack.c.bf16 %v12616_v55, %v12613_v51  ;;  %v6242_v52 = vadd.f32 %v12270_v3, %v5832_v18  ;;  %v9749_v44 = vpop.f32.mrb[102].mxu0 }
 0x689   : > { %v6372_v5 = vmax.f32 %v6244_v37, 0.0  ;;  %v6245_v33 = vadd.f32 %v9749_v44, %v12270_v3  ;;  %v5835_v17 = vpop.f32.mrb[103].mxu0 }
 0x68a   : > { %v6370_v43 = vmax.f32 %v6242_v52, 0.0  ;;  %v6243_v30 = vadd.f32 %v12270_v3, %v5835_v17  ;;  %7136 = vmatmul.mubr.bf16.vlgmr.msra.gmra.mrb[128].mxu1 %v13625_v38  ;;  %v13630_v17 = vld [vmem:[#allocation45_spill] sm:$0xff] }
 0x68b   : > { %v6373_v28 = vmax.f32 %v6245_v33, 0.0  ;;  %7143 = vmatprep.mubr.bf16.mxu1 %v7903_v10  ;;  %v12643_v50 = vadd.f32 %v6372_v5, %v13626_v20  ;;  %v6583_v5 = vld [vmem:[%s12291_s7 + $0xc8] sm:$0xff] }
 0x68c   : > { %v6371_v29 = vmax.f32 %v6243_v30, 0.0  ;;  %v12649_v49 = vadd.f32 %v6370_v43, %v13628_v23  ;;  %v6587_v33 = vld [vmem:[%s12291_s7 + $0xe8] sm:$0xff] }
 0x68d   : > { %v12646_v56 = vadd.f32 %v6373_v28, %v13627_v47  ;;  %v13631_v28 = vld [vmem:[#allocation47_spill] sm:$0xff]  ;;  %v7910_v47 = vcombine.low %v6575_v26, %v6579_v53 }
 0x68e   : > { %v12652_v45 = vadd.f32 %v6371_v29, %v13629_v21  ;;  %v9752_v60 = vpop.f32.mrb[104].mxu0 }
 0x68f   : > { %v6657_v31 = vpack.c.bf16 %v12646_v56, %v12643_v50  ;;  %v6248_v24 = vadd.f32 %v9752_v60, %v12270_v3  ;;  %v5848_v8 = vpop.f32.mrb[105].mxu0  ;;  %v13634_v56 = vld [vmem:[#allocation49_spill] sm:$0xff] }
 0x690   : > { %v6656_v1 = vpack.c.bf16 %v12652_v45, %v12649_v49  ;;  %v6246_v34 = vadd.f32 %v12270_v3, %v5848_v8  ;;  %v9753_v37 = vpop.f32.mrb[106].mxu0 }
 0x691   : > { %v6376_v18 = vmax.f32 %v6248_v24, 0.0  ;;  %v6249_v35 = vadd.f32 %v9753_v37, %v12270_v3  ;;  %v5851_v10 = vpop.f32.mrb[107].mxu0 }
 0x692   : > { %v6374_v48 = vmax.f32 %v6246_v34, 0.0  ;;  %v6247_v7 = vadd.f32 %v12270_v3, %v5851_v10  ;;  %7144 = vmatmul.mubr.bf16.gmra.mrb[132].mxu1 %v7902_v13  ;;  %v7919_v13 = vcombine.high %v6583_v5, %v6587_v33  ;;  %v6595_v10 = vld [vmem:[%s12291_s7 + $0x128] sm:$0xff] }
 0x693   : > { %v6377_v52 = vmax.f32 %v6249_v35, 0.0  ;;  %7151 = vmatprep.mubr.bf16.mxu1 %v7911_v39  ;;  %v12665_v43 = vadd.f32 %v6376_v18, %v13630_v17  ;;  %v6591_v35 = vld [vmem:[%s12291_s7 + $0x108] sm:$0xff] }
 0x694   : > { %v6375_v44 = vmax.f32 %v6247_v7, 0.0  ;;  %v12671_v38 = vadd.f32 %v6374_v48, %v11888_v0 }
 0x695   : > { %v12668_v30 = vadd.f32 %v6377_v52, %v11891_v27 }
 0x696   : > { %v12674_v29 = vadd.f32 %v6375_v44, %v13631_v28  ;;  %v9756_v20 = vpop.f32.mrb[108].mxu0  ;;  %v13632_v44 = vld [vmem:[#allocation46_spill] sm:$0xff] }
 0x697   : > { %v6659_v23 = vpack.c.bf16 %v12668_v30, %v12665_v43  ;;  %v6252_v21 = vadd.f32 %v9756_v20, %v12270_v3  ;;  %v5864_v60 = vpop.f32.mrb[109].mxu0  ;;  %v7918_v20 = vcombine.low %v6583_v5, %v6587_v33 }
 0x698   : > { %v6658_v27 = vpack.c.bf16 %v12674_v29, %v12671_v38  ;;  %v6250_v0 = vadd.f32 %v12270_v3, %v5864_v60  ;;  %v9757_v24 = vpop.f32.mrb[110].mxu0  ;;  %v7927_v60 = vcombine.high %v6591_v35, %v6595_v10  ;;  %v7899_v29 = vcombine.high %v12619_v59, %v12622_v54 }
 0x699   : > { %v6380_v8 = vmax.f32 %v6252_v21, 0.0  ;;  %v6253_v39 = vadd.f32 %v9757_v24, %v12270_v3  ;;  %v5867_v34 = vpop.f32.mrb[111].mxu0 }
 0x69a   : > { %v6378_v26 = vmax.f32 %v6250_v0, 0.0  ;;  %v6251_v53 = vadd.f32 %v12270_v3, %v5867_v34  ;;  %7152 = vmatmul.mubr.bf16.gmra.mrb[136].mxu1 %v7910_v47 }
 0x69b   : > { %v6381_v37 = vmax.f32 %v6253_v39, 0.0  ;;  %7159 = vmatprep.mubr.bf16.mxu1 %v7919_v13  ;;  %v12687_v48 = vadd.f32 %v6380_v8, %v11909_v41 }
 0x69c   : > { %v6379_v18 = vmax.f32 %v6251_v53, 0.0  ;;  %v12693_v52 = vadd.f32 %v6378_v26, %v11912_v6  ;;  %v6599_v26 = vld [vmem:[%s12291_s7 + $0x148] sm:$0xff] }
 0x69d   : > { %v12690_v7 = vadd.f32 %v6381_v37, %v11915_v58  ;;  %v6603_v53 = vld [vmem:[%s12291_s7 + $0x168] sm:$0xff] }
 0x69e   : > { %v12696_v17 = vadd.f32 %v6379_v18, %v13632_v44  ;;  %v9776_v28 = vpop.f32.mrb[96].mxu1 }
 0x69f   : > { %v6661_v47 = vpack.c.bf16 %v12690_v7, %v12687_v48  ;;  %v6256_v21 = vadd.f32 %v9776_v28, %v12270_v3  ;;  %v5913_v41 = vpop.f32.mrb[97].mxu1 }
 0x6a0   : > { %v6660_v58 = vpack.c.bf16 %v12696_v17, %v12693_v52  ;;  %v6254_v6 = vadd.f32 %v12270_v3, %v5913_v41  ;;  %v9777_v13 = vpop.f32.mrb[98].mxu1  ;;  %v7926_v41 = vcombine.low %v6591_v35, %v6595_v10  ;;  %v13641_v52 = vld [vmem:[#allocation55_spill] sm:$0xff] }
 0x6a1   : > { %v6384_v0 = vmax.f32 %v6256_v21, 0.0  ;;  %v6257_v24 = vadd.f32 %v9777_v13, %v12270_v3  ;;  %v5916_v8 = vpop.f32.mrb[99].mxu1 }
 0x6a2   : > { %v6382_v5 = vmax.f32 %v6254_v6, 0.0  ;;  %v6255_v33 = vadd.f32 %v12270_v3, %v5916_v8  ;;  %7160 = vmatmul.mubr.bf16.gmra.mrb[140].mxu1 %v7918_v20  ;;  %v7935_v20 = vcombine.high %v6599_v26, %v6603_v53 }
 0x6a3   : > { %v6385_v39 = vmax.f32 %v6257_v24, 0.0  ;;  %7167 = vmatprep.mubr.bf16.mxu1 %v7927_v60  ;;  %v6512_v37 = vadd.f32 %v6384_v0, %v11933_v9 }
 0x6a4   : > { %v6383_v34 = vmax.f32 %v6255_v33, 0.0  ;;  %v6510_v44 = vadd.f32 %v6382_v5, %v11936_v16  ;;  %v6607_v5 = vld [vmem:[%s12291_s7 + $0x188] sm:$0xff] }
 0x6a5   : > { %v6513_v18 = vadd.f32 %v6385_v39, %v11939_v42  ;;  %v6611_v39 = vld [vmem:[%s12291_s7 + $0x1a8] sm:$0xff] }
 0x6a6   : > { %v6511_v28 = vadd.f32 %v6383_v34, %v11942_v2  ;;  %v9780_v21 = vpop.f32.mrb[100].mxu1  ;;  %v7943_v55 = vcombine.high %v6607_v5, %v6611_v39 }
 0x6a7   : > { %v6260_v6 = vadd.f32 %v9780_v21, %v12270_v3  ;;  %v5929_v13 = vpop.f32.mrb[101].mxu1  ;;  %v6663_v8 = vpack.c.bf16 %v6513_v18, %v6512_v37  ;;  %v7934_v21 = vcombine.low %v6599_v26, %v6603_v53 }
 0x6a8   : > { %v6258_v60 = vadd.f32 %v12270_v3, %v5929_v13  ;;  %v9781_v24 = vpop.f32.mrb[102].mxu1  ;;  %v6662_v33 = vpack.c.bf16 %v6511_v28, %v6510_v44 }
 0x6a9   : > { %v6388_v9 = vmax.f32 %v6260_v6, 0.0  ;;  %v6261_v42 = vadd.f32 %v9781_v24, %v12270_v3  ;;  %v5932_v0 = vpop.f32.mrb[103].mxu1 }
 0x6aa   : > { %v6386_v16 = vmax.f32 %v6258_v60, 0.0  ;;  %v6259_v2 = vadd.f32 %v12270_v3, %v5932_v0  ;;  %8638 = vmatprep.subr.bf16.mxu0 %v6662_v33  ;;  %7168 = vmatmul.mubr.bf16.gmra.mrb[144].mxu1 %v7926_v41  ;;  %v13633_v33 = vld [vmem:[#allocation48_spill] sm:$0xff]  ;;  %v7942_v0 = vcombine.low %v6607_v5, %v6611_v39 }
 0x6ab   : > { %v6389_v35 = vmax.f32 %v6261_v42, 0.0  ;;  %8639 = vmatpush3.bf16.msra.mxu0 %v6654_v15  ;;  %7175 = vmatprep.mubr.bf16.mxu1 %v7935_v20  ;;  %v6516_v34 = vadd.f32 %v6388_v9, %v11957_v40 }
 0x6ac   : > { %v6387_v10 = vmax.f32 %v6259_v2, 0.0  ;;  %8640 = vmatprep.subr.bf16.mxu0 %v6663_v8  ;;  %v6514_v18 = vadd.f32 %v6386_v16, %v11960_v46 }
 0x6ad   : > { %v6517_v37 = vadd.f32 %v6389_v35, %v11963_v12 }
 0x6ae   : > { %v6515_v44 = vadd.f32 %v6387_v10, %v11966_v36  ;;  %v9784_v28 = vpop.f32.mrb[104].mxu1 }
 0x6af   : > { %v6264_v41 = vadd.f32 %v9784_v28, %v12270_v3  ;;  %v5945_v6 = vpop.f32.mrb[105].mxu1  ;;  %8641 = vmatpush3.bf16.msra.mxu0 %v6655_v22  ;;  %v6665_v51 = vpack.c.bf16 %v6517_v37, %v6516_v34  ;;  %v6619_v22 = vld [vmem:[%s12291_s7 + $0x1e8] sm:$0xff]  ;;  %v13635_v37 = vld [vmem:[#allocation50_spill] sm:$0xff] }
 0x6b0   : > { %v6262_v40 = vadd.f32 %v12270_v3, %v5945_v6  ;;  %v9785_v12 = vpop.f32.mrb[106].mxu1  ;;  %v6664_v15 = vpack.c.bf16 %v6515_v44, %v6514_v18  ;;  %v7951_v45 = vcombine.high %v6615_v25, %v6619_v22  ;;  %v13636_v44 = vld [vmem:[#allocation51_spill] sm:$0xff] }
 0x6b1   : > { %v6392_v46 = vmax.f32 %v6264_v41, 0.0  ;;  %v6265_v36 = vadd.f32 %v9785_v12, %v12270_v3  ;;  %v5948_v13 = vpop.f32.mrb[107].mxu1 }
 0x6b2   : > { %v6390_v26 = vmax.f32 %v6262_v40, 0.0  ;;  %v6263_v53 = vadd.f32 %v12270_v3, %v5948_v13  ;;  %8642 = vmatprep.subr.bf16.mxu0 %v6664_v15  ;;  %7176 = vmatmul.mubr.bf16.gmra.mrb[148].mxu1 %v7934_v21  ;;  %v13637_v21 = vld [vmem:[#allocation52_spill] sm:$0xff] }
 0x6b3   : > { %v6393_v8 = vmax.f32 %v6265_v36, 0.0  ;;  %8643 = vmatpush3.bf16.msra.mxu0 %v6656_v1  ;;  %7183 = vmatprep.mubr.bf16.mxu1 %v7943_v55  ;;  %v6520_v20 = vadd.f32 %v6392_v46, %v11981_v11 }
 0x6b4   : > { %v6391_v62 = vmax.f32 %v6263_v53, 0.0  ;;  %8644 = vmatprep.subr.bf16.mxu0 %v6665_v51  ;;  %v6518_v24 = vadd.f32 %v6390_v26, %v11984_v19  ;;  %v7950_v51 = vcombine.low %v6615_v25, %v6619_v22  ;;  %v13638_v25 = vld [vmem:[#allocation19_spill] sm:$0xff] }
 0x6b5   : > { %v6521_v60 = vadd.f32 %v6393_v8, %v11987_v14  ;;  %v6572_v8 = vld [vmem:[%s12291_s7 + $0x70] sm:$0xff] }
 0x6b6   : > { %v6519_v9 = vadd.f32 %v6391_v62, %v13633_v33  ;;  %v9788_v42 = vpop.f32.mrb[108].mxu1  ;;  %v10314_v62 = vmov 0  }
 0x6b7   : > { %v6268_v16 = vadd.f32 %v9788_v42, %v12270_v3  ;;  %v5961_v2 = vpop.f32.mrb[109].mxu1  ;;  %8645 = vmatpush3.bf16.msra.mxu0 %v6657_v31  ;;  %v6667_v49 = vpack.c.bf16 %v6521_v60, %v6520_v20  ;;  %9917 = vset.pattern.permute.xlu0 %v10314_v62  ;;  %v13639_v20 = vld [vmem:[#allocation53_spill] sm:$0xff] }
 0x6b8   : > { %v6266_v1 = vadd.f32 %v12270_v3, %v5961_v2  ;;  %v9789_v11 = vpop.f32.mrb[110].mxu1  ;;  %v6666_v35 = vpack.c.bf16 %v6519_v9, %v6518_v24  ;;  %9918 = vset.pattern.permute.xlu1 %v10314_v62  ;;  %v13640_v24 = vld [vmem:[#allocation54_spill] sm:$0xff]  ;;  %v6584_v62 = vld [vmem:[%s12291_s7 + $0xd0] sm:$0xff] }
 0x6b9   : > { %v6396_v14 = vmax.f32 %v6268_v16, 0.0  ;;  %v6269_v19 = vadd.f32 %v9789_v11, %v12270_v3  ;;  %v5964_v10 = vpop.f32.mrb[111].mxu1  ;;  %v7396_v11 = vld [vmem:[%s12794_s16 + $0x10] sm:$0xff] }
 0x6ba   : > { %v6394_v34 = vmax.f32 %v6266_v1, 0.0  ;;  %v6267_v5 = vadd.f32 %v12270_v3, %v5964_v10  ;;  %8646 = vmatprep.subr.bf16.mxu0 %v6666_v35  ;;  %7184 = vmatmul.mubr.bf16.gmra.mrb[152].mxu1 %v7942_v0  ;;  %v7394_v1 = vld [vmem:[%s12794_s16] sm:$0xff] }
 0x6bb   : > { %v6397_v39 = vmax.f32 %v6269_v19, 0.0  ;;  %8647 = vmatpush3.bf16.msra.mxu0 %v6658_v27  ;;  %7191 = vmatprep.mubr.bf16.mxu1 %v7951_v45  ;;  %v6524_v31 = vadd.f32 %v6396_v14, %v13634_v56  ;;  %v13642_v19 = vcombine.low %v12456_v57, %v12459_v63  ;;  %v7397_v56 = vld [vmem:[%s12794_s16 + $0x18] sm:$0xff] }
 0x6bc   : > { %v6395_v50 = vmax.f32 %v6267_v5, 0.0  ;;  %8648 = vmatprep.subr.bf16.mxu0 %v6667_v49  ;;  %v6522_v28 = vadd.f32 %v6394_v34, %v13636_v44  ;;  %7412 = vperm.xlu0 %9917, %v7394_v1   ;;  %v7395_v34 = vld [vmem:[%s12794_s16 + $0x8] sm:$0xff]  ;;  %v13646_v63 = vld [vmem:[#allocation61_spill] sm:$0xff] }
 0x6bd   : > { %v6525_v18 = vadd.f32 %v6397_v39, %v13635_v37  ;;  %7422 = vperm.xlu1 %9918, %v7396_v11   ;;  %v6576_v39 = vld [vmem:[%s12291_s7 + $0x90] sm:$0xff] }
 0x6be   : > { %v6523_v41 = vadd.f32 %v6395_v50, %v13637_v21  ;;  %v9808_v6 = vpop.f32.mrb[112].mxu0  ;;  %v6580_v50 = vld [vmem:[%s12291_s7 + $0xb0] sm:$0xff] }
 0x6bf   : > { %v6272_v55 = vadd.f32 %v9808_v6, %v12270_v3  ;;  %v6010_v40 = vpop.f32.mrb[113].mxu0  ;;  %8649 = vmatpush3.bf16.msra.mxu0 %v6659_v23  ;;  %v6669_v38 = vpack.c.bf16 %v6525_v18, %v6524_v31  ;;  %v6568_v23 = vld [vmem:[%s12291_s7 + $0x50] sm:$0xff]  ;;  %v13643_v31 = vld [vmem:[#allocation58_spill] sm:$0xff]  ;;  %v13644_v18 = vld [vmem:[#allocation59_spill] sm:$0xff] }
 0x6c0   : > { %v6270_v27 = vadd.f32 %v12270_v3, %v6010_v40  ;;  %v9809_v12 = vpop.f32.mrb[114].mxu0  ;;  %v6668_v15 = vpack.c.bf16 %v6523_v41, %v6522_v28  ;;  %v7905_v16 = vcombine.high %v6568_v23, %v6572_v8  ;;  %v13645_v28 = vld [vmem:[#allocation60_spill] sm:$0xff]  ;;  %v7904_v6 = vcombine.low %v6568_v23, %v6572_v8  ;;  %7417 = vperm.xlu0 %9917, %v7395_v34  }
 0x6c1   : > { %v6400_v46 = vmax.f32 %v6272_v55, 0.0  ;;  %v6273_v36 = vadd.f32 %v9809_v12, %v12270_v3  ;;  %v6013_v13 = vpop.f32.mrb[115].mxu0  ;;  %7427 = vperm.xlu1 %9918, %v7397_v56   ;;  %v7400_v23 = vld [vmem:[%s12794_s16 + $0x30] sm:$0xff] }
 0x6c2   : > { %v6398_v26 = vmax.f32 %v6270_v27, 0.0  ;;  %v6271_v53 = vadd.f32 %v12270_v3, %v6013_v13  ;;  %8650 = vmatprep.subr.bf16.mxu0 %v6668_v15  ;;  %7192 = vmatmul.mubr.bf16.gmra.mrb[156].mxu1 %v7950_v51  ;;  %v7404_v56 = vld [vmem:[%s12794_s16 + $0x50] sm:$0xff] }
 0x6c3   : > { %v6401_v43 = vmax.f32 %v6273_v36, 0.0  ;;  %8651 = vmatpush3.bf16.msra.mxu0 %v6660_v58  ;;  %7329 = vmatprep.mubr.bf16.mxu1 %v7899_v29  ;;  %v12771_v22 = vadd.f32 %v6400_v46, %v13638_v25  ;;  %v7398_v29 = vld [vmem:[%s12794_s16 + $0x20] sm:$0xff]  ;;  %v7399_v46 = vld [vmem:[%s12794_s16 + $0x28] sm:$0xff]  ;;  %v6588_v25 = vld [vmem:[%s12291_s7 + $0xf0] sm:$0xff] }
 0x6c4   : > { %v6399_v30 = vmax.f32 %v6271_v53, 0.0  ;;  %8652 = vmatprep.subr.bf16.mxu0 %v6669_v38  ;;  %v12777_v33 = vadd.f32 %v6398_v26, %v13640_v24  ;;  %v7913_v38 = vcombine.high %v6576_v39, %v6580_v50  ;;  %7432 = vperm.xlu0 %9917, %v7398_v29   ;;  %v13647_v24 = vld [vmem:[#allocation64_spill] sm:$0xff]  ;;  %v7921_v1 = vcombine.high %v6584_v62, %v6588_v25 }
 0x6c5   : > { %v12774_v60 = vadd.f32 %v6401_v43, %v13639_v20  ;;  %7437 = vperm.xlu1 %9918, %v7399_v46   ;;  %v7401_v20 = vld [vmem:[%s12794_s16 + $0x38] sm:$0xff] }
 0x6c6   : > { %v12780_v17 = vadd.f32 %v6399_v30, %v13641_v52  ;;  %v9812_v58 = vpop.f32.mrb[116].mxu0 }
 0x6c7   : > { %v6671_v9 = vpack.c.bf16 %v12774_v60, %v12771_v22  ;;  %v6276_v42 = vadd.f32 %v9812_v58, %v12270_v3  ;;  %v6026_v0 = vpop.f32.mrb[117].mxu0  ;;  %8653 = vmatpush3.bf16.msra.mxu0 %v6661_v47  ;;  %v6616_v60 = vld [vmem:[%s12291_s7 + $0x1d0] sm:$0xff] }
 0x6c8   : > { %v6670_v2 = vpack.c.bf16 %v12780_v17, %v12777_v33  ;;  %v6274_v49 = vadd.f32 %v12270_v3, %v6026_v0  ;;  %v9813_v45 = vpop.f32.mrb[118].mxu0  ;;  %v13648_v0 = vld [vmem:[#allocation66_spill] sm:$0xff]  ;;  %7442 = vperm.xlu0 %9917, %v7400_v23  }
 0x6c9   : > { %v6404_v48 = vmax.f32 %v6276_v42, 0.0  ;;  %v6277_v7 = vadd.f32 %v9813_v45, %v12270_v3  ;;  %v6029_v47 = vpop.f32.mrb[119].mxu0  ;;  %v7912_v45 = vcombine.low %v6576_v39, %v6580_v50  ;;  %7447 = vperm.xlu1 %9918, %v7401_v20  }
 0x6ca   : > { %v6402_v35 = vmax.f32 %v6274_v49, 0.0  ;;  %v6275_v14 = vadd.f32 %v12270_v3, %v6029_v47  ;;  %7233 = vmatmul.mubr.bf16.vlgmr.msra.gmra.mrb[160].mxu0 %v13642_v19 }
 0x6cb   : > { %v6405_v10 = vmax.f32 %v6277_v7, 0.0  ;;  %7240 = vmatprep.mubr.bf16.mxu0 %v7905_v16  ;;  %v12808_v37 = vadd.f32 %v6404_v48, %v13643_v31 }
 0x6cc   : > { %v6403_v5 = vmax.f32 %v6275_v14, 0.0  ;;  %v12814_v57 = vadd.f32 %v6402_v35, %v13645_v28  ;;  %v7403_v14 = vld [vmem:[%s12794_s16 + $0x48] sm:$0xff]  ;;  %v6596_v28 = vld [vmem:[%s12291_s7 + $0x130] sm:$0xff] }
 0x6cd   : > { %v12811_v44 = vadd.f32 %v6405_v10, %v13644_v18  ;;  %7457 = vperm.xlu1 %9918, %v7403_v14   ;;  %v6592_v18 = vld [vmem:[%s12291_s7 + $0x110] sm:$0xff]  ;;  %v13653_v14 = vld [vmem:[#allocation71_spill] sm:$0xff] }
 0x6ce   : > { %v12817_v21 = vadd.f32 %v6403_v5, %v13646_v63  ;;  %v9816_v41 = vpop.f32.mrb[120].mxu0  ;;  %v7405_v63 = vld [vmem:[%s12794_s16 + $0x58] sm:$0xff] }
 0x6cf   : > { %v6673_v51 = vpack.c.bf16 %v12811_v44, %v12808_v37  ;;  %v6280_v55 = vadd.f32 %v9816_v41, %v12270_v3  ;;  %v6042_v40 = vpop.f32.mrb[121].mxu0  ;;  %v13649_v41 = vld [vmem:[#allocation65_spill] sm:$0xff]  ;;  %v13665_v44 = vld [vmem:[#allocation112_spill] sm:$0xff] }
 0x6d0   : > { %v6672_v27 = vpack.c.bf16 %v12817_v21, %v12814_v57  ;;  %v6278_v12 = vadd.f32 %v12270_v3, %v6042_v40  ;;  %v9817_v15 = vpop.f32.mrb[122].mxu0 }
 0x6d1   : > { %v6408_v36 = vmax.f32 %v6280_v55, 0.0  ;;  %v6281_v13 = vadd.f32 %v9817_v15, %v12270_v3  ;;  %v6045_v26 = vpop.f32.mrb[123].mxu0  ;;  %v13650_v55 = vld [vmem:[#allocation70_spill] sm:$0xff]  ;;  %7467 = vperm.xlu1 %9918, %v7405_v63   ;;  %v7928_v63 = vcombine.low %v6592_v18, %v6596_v28 }
 0x6d2   : > { %v6406_v53 = vmax.f32 %v6278_v12, 0.0  ;;  %v6279_v43 = vadd.f32 %v12270_v3, %v6045_v26  ;;  %7241 = vmatmul.mubr.bf16.gmra.mrb[164].mxu0 %v7904_v6  ;;  %v13652_v12 = vld [vmem:[#allocation72_spill] sm:$0xff] }
 0x6d3   : > { %v6409_v30 = vmax.f32 %v6281_v13, 0.0  ;;  %7248 = vmatprep.mubr.bf16.mxu0 %v7913_v38  ;;  %v12834_v52 = vadd.f32 %v6408_v36, %v13647_v24  ;;  %v13651_v38 = vld [vmem:[#allocation67_spill] sm:$0xff]  ;;  %v7920_v36 = vcombine.low %v6584_v62, %v6588_v25 }
 0x6d4   : > { %v6407_v8 = vmax.f32 %v6279_v43, 0.0  ;;  %v12840_v42 = vadd.f32 %v6406_v53, %v12080_v61  ;;  %v7929_v43 = vcombine.high %v6592_v18, %v6596_v28  ;;  %v7407_v62 = vld [vmem:[%s12794_s16 + $0x68] sm:$0xff] }
 0x6d5   : > { %v12837_v58 = vadd.f32 %v6409_v30, %v12083_v4  ;;  %v7402_v4 = vld [vmem:[%s12794_s16 + $0x40] sm:$0xff]  ;;  %7477 = vperm.xlu1 %9918, %v7407_v62   ;;  %v6608_v62 = vld [vmem:[%s12291_s7 + $0x190] sm:$0xff] }
 0x6d6   : > { %v12843_v16 = vadd.f32 %v6407_v8, %v13648_v0  ;;  %v9820_v49 = vpop.f32.mrb[124].mxu0  ;;  %7452 = vperm.xlu0 %9917, %v7402_v4   ;;  %v7406_v30 = vld [vmem:[%s12794_s16 + $0x60] sm:$0xff]  ;;  %v6600_v4 = vld [vmem:[%s12291_s7 + $0x150] sm:$0xff] }
 0x6d7   : > { %v6675_v48 = vpack.c.bf16 %v12837_v58, %v12834_v52  ;;  %v6284_v7 = vadd.f32 %v9820_v49, %v12270_v3  ;;  %v6058_v47 = vpop.f32.mrb[125].mxu0  ;;  %v6577_v58 = vld [vmem:[%s12291_s7 + $0x98] sm:$0xff] }
 0x6d8   : > { %v6674_v61 = vpack.c.bf16 %v12843_v16, %v12840_v42  ;;  %v6282_v11 = vadd.f32 %v12270_v3, %v6058_v47  ;;  %v9821_v35 = vpop.f32.mrb[126].mxu0  ;;  %v7408_v47 = vld [vmem:[%s12794_s16 + $0x70] sm:$0xff] }
 0x6d9   : > { %v6412_v19 = vmax.f32 %v6284_v7, 0.0  ;;  %v6285_v10 = vadd.f32 %v9821_v35, %v12270_v3  ;;  %v6061_v34 = vpop.f32.mrb[127].mxu0  ;;  %v7409_v35 = vld [vmem:[%s12794_s16 + $0x78] sm:$0xff] }
 0x6da   : > { %v6410_v5 = vmax.f32 %v6282_v11, 0.0  ;;  %v6283_v39 = vadd.f32 %v12270_v3, %v6061_v34  ;;  %7249 = vmatmul.mubr.bf16.gmra.mrb[168].mxu0 %v7912_v45  ;;  %7462 = vperm.xlu0 %9917, %v7404_v56   ;;  %v6604_v11 = vld [vmem:[%s12291_s7 + $0x170] sm:$0xff] }
 0x6db   : > { %v6413_v50 = vmax.f32 %v6285_v10, 0.0  ;;  %7256 = vmatprep.mubr.bf16.mxu0 %v7921_v1  ;;  %v12860_v6 = vadd.f32 %v6412_v19, %v13649_v41  ;;  %v13654_v10 = vld [vmem:[#allocation102_spill] sm:$0xff]  ;;  %7487 = vperm.xlu1 %9918, %v7409_v35  }
 0x6dc   : > { %v6411_v31 = vmax.f32 %v6283_v39, 0.0  ;;  %v12866_v29 = vadd.f32 %v6410_v5, %v13651_v38  ;;  %v13655_v5 = vld [vmem:[#allocation73_spill] sm:$0xff] }
 0x6dd   : > { %v12863_v40 = vadd.f32 %v6413_v50, %v13650_v55  ;;  %v13656_v50 = vld [vmem:[#allocation103_spill] sm:$0xff] }
 0x6de   : > { %v12869_v15 = vadd.f32 %v6411_v31, %v13652_v12  ;;  %v9840_v46 = vpop.f32.mrb[112].mxu1  ;;  %7472 = vperm.xlu0 %9917, %v7406_v30   ;;  %v7937_v12 = vcombine.high %v6600_v4, %v6604_v11 }
 0x6df   : > { %v6677_v13 = vpack.c.bf16 %v12863_v40, %v12860_v6  ;;  %v6288_v26 = vadd.f32 %v9840_v46, %v12270_v3  ;;  %v6107_v53 = vpop.f32.mrb[113].mxu1  ;;  %v6593_v40 = vld [vmem:[%s12291_s7 + $0x118] sm:$0xff] }
 0x6e0   : > { %v6676_v23 = vpack.c.bf16 %v12869_v15, %v12866_v29  ;;  %v6286_v8 = vadd.f32 %v12270_v3, %v6107_v53  ;;  %v9841_v20 = vpop.f32.mrb[114].mxu1 }
 0x6e1   : > { %v6416_v25 = vmax.f32 %v6288_v26, 0.0  ;;  %v6289_v24 = vadd.f32 %v9841_v20, %v12270_v3  ;;  %v6110_v0 = vpop.f32.mrb[115].mxu1 }
 0x6e2   : > { %v6414_v49 = vmax.f32 %v6286_v8, 0.0  ;;  %v6287_v45 = vadd.f32 %v12270_v3, %v6110_v0  ;;  %7257 = vmatmul.mubr.bf16.gmra.mrb[172].mxu0 %v7920_v36  ;;  %7482 = vperm.xlu0 %9917, %v7408_v47  }
 0x6e3   : > { %v6417_v7 = vmax.f32 %v6289_v24, 0.0  ;;  %7264 = vmatprep.mubr.bf16.mxu0 %v7929_v43  ;;  %v6544_v19 = vadd.f32 %v6416_v25, %v13653_v14  ;;  %v6612_v25 = vld [vmem:[%s12291_s7 + $0x1b0] sm:$0xff] }
 0x6e4   : > { %v6415_v1 = vmax.f32 %v6287_v45, 0.0  ;;  %v6542_v39 = vadd.f32 %v6414_v49, %v13655_v5  ;;  %v13657_v24 = vld [vmem:[#allocation104_spill] sm:$0xff]  ;;  %v13658_v49 = vld [vmem:[#allocation106_spill] sm:$0xff]  ;;  %v7945_v17 = vcombine.high %v6608_v62, %v6612_v25 }
 0x6e5   : > { %v6545_v34 = vadd.f32 %v6417_v7, %v13654_v10  ;;  %v13659_v7 = vld [vmem:[#allocation105_spill] sm:$0xff] }
 0x6e6   : > { %v6543_v56 = vadd.f32 %v6415_v1, %v13656_v50  ;;  %v9844_v31 = vpop.f32.mrb[116].mxu1  ;;  %v13660_v1 = vld [vmem:[#allocation107_spill] sm:$0xff] }
 0x6e7   : > { %v6292_v41 = vadd.f32 %v9844_v31, %v12270_v3  ;;  %v6123_v55 = vpop.f32.mrb[117].mxu1  ;;  %v6679_v38 = vpack.c.bf16 %v6545_v34, %v6544_v19  ;;  %v7936_v19 = vcombine.low %v6600_v4, %v6604_v11 }
 0x6e8   : > { %v6290_v46 = vadd.f32 %v12270_v3, %v6123_v55  ;;  %v9845_v36 = vpop.f32.mrb[118].mxu1  ;;  %v6678_v26 = vpack.c.bf16 %v6543_v56, %v6542_v39 }
 0x6e9   : > { %v6420_v53 = vmax.f32 %v6292_v41, 0.0  ;;  %v6293_v43 = vadd.f32 %v9845_v36, %v12270_v3  ;;  %v6126_v30 = vpop.f32.mrb[119].mxu1  ;;  %v13661_v41 = vld [vmem:[#allocation108_spill] sm:$0xff] }
 0x6ea   : > { %v6418_v8 = vmax.f32 %v6290_v46, 0.0  ;;  %v6291_v18 = vadd.f32 %v12270_v3, %v6126_v30  ;;  %8702 = vmatprep.subr.bf16.mxu1 %v6678_v26  ;;  %7265 = vmatmul.mubr.bf16.gmra.mrb[176].mxu0 %v7928_v63  ;;  %v13663_v46 = vld [vmem:[#allocation109_spill] sm:$0xff]  ;;  %v13664_v26 = vld [vmem:[#allocation111_spill] sm:$0xff]  ;;  %v7944_v30 = vcombine.low %v6608_v62, %v6612_v25 }
 0x6eb   : > { %v6421_v28 = vmax.f32 %v6293_v43, 0.0  ;;  %8703 = vmatpush3.bf16.msra.mxu1 %v6670_v2  ;;  %7272 = vmatprep.mubr.bf16.mxu0 %v7937_v12  ;;  %v6548_v0 = vadd.f32 %v6420_v53, %v13657_v24 }
 0x6ec   : > { %v6419_v20 = vmax.f32 %v6291_v18, 0.0  ;;  %8704 = vmatprep.subr.bf16.mxu1 %v6679_v38  ;;  %v6546_v47 = vadd.f32 %v6418_v8, %v13659_v7  ;;  %v13662_v38 = vld [vmem:[#allocation110_spill] sm:$0xff] }
 0x6ed   : > { %v6549_v45 = vadd.f32 %v6421_v28, %v13658_v49  ;;  %v13666_v7 = vld [vmem:[#allocation114_spill] sm:$0xff] }
 0x6ee   : > { %v6547_v35 = vadd.f32 %v6419_v20, %v13660_v1  ;;  %v9848_v14 = vpop.f32.mrb[120].mxu1  ;;  %v13667_v1 = vld [vmem:[#allocation113_spill] sm:$0xff] }
 0x6ef   : > { %v6296_v10 = vadd.f32 %v9848_v14, %v12270_v3  ;;  %v6139_v34 = vpop.f32.mrb[121].mxu1  ;;  %8705 = vmatpush3.bf16.msra.mxu1 %v6671_v9  ;;  %v6681_v33 = vpack.c.bf16 %v6549_v45, %v6548_v0  ;;  %v6620_v9 = vld [vmem:[%s12291_s7 + $0x1f0] sm:$0xff]  ;;  %v13668_v14 = vld [vmem:[#allocation115_spill] sm:$0xff] }
 0x6f0   : > { %v6294_v2 = vadd.f32 %v12270_v3, %v6139_v34  ;;  %v9849_v5 = vpop.f32.mrb[122].mxu1  ;;  %v6680_v39 = vpack.c.bf16 %v6547_v35, %v6546_v47  ;;  %v7953_v21 = vcombine.high %v6616_v60, %v6620_v9  ;;  %v6589_v34 = vld [vmem:[%s12291_s7 + $0xf8] sm:$0xff] }
 0x6f1   : > { %v6424_v50 = vmax.f32 %v6296_v10, 0.0  ;;  %v6297_v56 = vadd.f32 %v9849_v5, %v12270_v3  ;;  %v6142_v31 = vpop.f32.mrb[123].mxu1  ;;  %v6573_v10 = vld [vmem:[%s12291_s7 + $0x78] sm:$0xff] }
 0x6f2   : > { %v6422_v4 = vmax.f32 %v6294_v2, 0.0  ;;  %v6295_v11 = vadd.f32 %v12270_v3, %v6142_v31  ;;  %8706 = vmatprep.subr.bf16.mxu1 %v6680_v39  ;;  %7273 = vmatmul.mubr.bf16.gmra.mrb[180].mxu0 %v7936_v19  ;;  %v7952_v19 = vcombine.low %v6616_v60, %v6620_v9  ;;  %v6605_v31 = vld [vmem:[%s12291_s7 + $0x178] sm:$0xff] }
 0x6f3   : > { %v6425_v63 = vmax.f32 %v6297_v56, 0.0  ;;  %8707 = vmatpush3.bf16.msra.mxu1 %v6672_v27  ;;  %7280 = vmatprep.mubr.bf16.mxu0 %v7945_v17  ;;  %v6552_v55 = vadd.f32 %v6424_v50, %v13661_v41  ;;  %v6601_v56 = vld [vmem:[%s12291_s7 + $0x158] sm:$0xff] }
 0x6f4   : > { %v6423_v22 = vmax.f32 %v6295_v11, 0.0  ;;  %8708 = vmatprep.subr.bf16.mxu1 %v6681_v33  ;;  %v6550_v36 = vadd.f32 %v6422_v4, %v13663_v46 }
 0x6f5   : > { %v6553_v12 = vadd.f32 %v6425_v63, %v13662_v38  ;;  %v6609_v38 = vld [vmem:[%s12291_s7 + $0x198] sm:$0xff] }
 0x6f6   : > { %v6551_v53 = vadd.f32 %v6423_v22, %v13664_v26  ;;  %v9852_v43 = vpop.f32.mrb[124].mxu1  ;;  %v7939_v22 = vcombine.high %v6601_v56, %v6605_v31 }
 0x6f7   : > { %v6300_v8 = vadd.f32 %v9852_v43, %v12270_v3  ;;  %v6155_v18 = vpop.f32.mrb[125].mxu1  ;;  %8709 = vmatpush3.bf16.msra.mxu1 %v6673_v51  ;;  %v6683_v57 = vpack.c.bf16 %v6553_v12, %v6552_v55  ;;  %v6613_v12 = vld [vmem:[%s12291_s7 + $0x1b8] sm:$0xff] }
 0x6f8   : > { %v6298_v27 = vadd.f32 %v12270_v3, %v6155_v18  ;;  %v9853_v28 = vpop.f32.mrb[126].mxu1  ;;  %v6682_v20 = vpack.c.bf16 %v6551_v53, %v6550_v36  ;;  %v7938_v36 = vcombine.low %v6601_v56, %v6605_v31  ;;  %v7947_v53 = vcombine.high %v6609_v38, %v6613_v12 }
 0x6f9   : > { %v6428_v24 = vmax.f32 %v6300_v8, 0.0  ;;  %v6301_v0 = vadd.f32 %v9853_v28, %v12270_v3  ;;  %v6158_v49 = vpop.f32.mrb[127].mxu1  ;;  %v7946_v28 = vcombine.low %v6609_v38, %v6613_v12 }
 0x6fa   : > { %v6426_v45 = vmax.f32 %v6298_v27, 0.0  ;;  %v6299_v62 = vadd.f32 %v12270_v3, %v6158_v49  ;;  %8710 = vmatprep.subr.bf16.mxu1 %v6682_v20  ;;  %7281 = vmatmul.mubr.bf16.gmra.mrb[184].mxu0 %v7944_v30 }
 0x6fb   : > { %v6429_v25 = vmax.f32 %v6301_v0, 0.0  ;;  %8711 = vmatpush3.bf16.msra.mxu1 %v6674_v61  ;;  %7288 = vmatprep.mubr.bf16.mxu0 %v7953_v21  ;;  %v6556_v51 = vadd.f32 %v6428_v24, %v13665_v44  ;;  %v6569_v61 = vld [vmem:[%s12291_s7 + $0x58] sm:$0xff] }
 0x6fc   : > { %v6427_v37 = vmax.f32 %v6299_v62, 0.0  ;;  %8712 = vmatprep.subr.bf16.mxu1 %v6683_v57  ;;  %v6554_v35 = vadd.f32 %v6426_v45, %v13667_v1  ;;  %v7907_v52 = vcombine.high %v6569_v61, %v6573_v10  ;;  %v7906_v29 = vcombine.low %v6569_v61, %v6573_v10  ;;  %v6617_v57 = vld [vmem:[%s12291_s7 + $0x1d8] sm:$0xff] }
 0x6fd   : > { %v6557_v47 = vadd.f32 %v6429_v25, %v13666_v7  ;;  %v6621_v21 = vld [vmem:[%s12291_s7 + $0x1f8] sm:$0xff] }
 0x6fe   : > { %v6555_v3 = vadd.f32 %v6427_v37, %v13668_v14  ;;  %v7955_v24 = vcombine.high %v6617_v57, %v6621_v21  ;;  %v7954_v37 = vcombine.low %v6617_v57, %v6621_v21 }
 0x6ff   : > { %8713 = vmatpush3.bf16.msra.mxu1 %v6675_v48  ;;  %v6685_v42 = vpack.c.bf16 %v6557_v47, %v6556_v51  ;;  %v6581_v48 = vld [vmem:[%s12291_s7 + $0xb8] sm:$0xff] }
 0x700   : > { %v6684_v16 = vpack.c.bf16 %v6555_v3, %v6554_v35  ;;  %v7915_v15 = vcombine.high %v6577_v58, %v6581_v48  ;;  %v7914_v33 = vcombine.low %v6577_v58, %v6581_v48 }
 0x702   : > { %8714 = vmatprep.subr.bf16.mxu1 %v6684_v16  ;;  %7289 = vmatmul.mubr.bf16.gmra.mrb[188].mxu0 %v7952_v19 }
 0x703   : > { %8715 = vmatpush3.bf16.msra.mxu1 %v6676_v23  ;;  %v6585_v23 = vld [vmem:[%s12291_s7 + $0xd8] sm:$0xff] }
 0x704   : > { %8716 = vmatprep.subr.bf16.mxu1 %v6685_v42  ;;  %v7923_v6 = vcombine.high %v6585_v23, %v6589_v34  ;;  %v7922_v54 = vcombine.low %v6585_v23, %v6589_v34 }
 0x707   : > { %8717 = vmatpush3.bf16.msra.mxu1 %v6677_v13  ;;  %v6597_v13 = vld [vmem:[%s12291_s7 + $0x138] sm:$0xff] }
 0x708   : > { %v7931_v17 = vcombine.high %v6593_v40, %v6597_v13  ;;  %v7930_v11 = vcombine.low %v6593_v40, %v6597_v13 }
 0x70a   : > { %7330 = vmatmul.mubr.bf16.vlgmr.msra.gmra.mrb[160].mxu1 %v7898_v32 }
 0x70b   : > { %7337 = vmatprep.mubr.bf16.mxu1 %v7907_v52 }
 0x712   : > { %7338 = vmatmul.mubr.bf16.gmra.mrb[164].mxu1 %v7906_v29 }
 0x713   : > { %7345 = vmatprep.mubr.bf16.mxu1 %v7915_v15 }
 0x71a   : > { %7346 = vmatmul.mubr.bf16.gmra.mrb[168].mxu1 %v7914_v33 }
 0x71b   : > { %7353 = vmatprep.mubr.bf16.mxu1 %v7923_v6 }
 0x71d   : > { %v8526_v59 = vpop.f32.mrb[128].mxu0 }
 0x71e   : > { %v8527_v32 = vpop.f32.mrb[129].mxu0 }
 0x71f   : > { %v12952_v2 = vadd.f32 %v8527_v32, %v8526_v59  ;;  %v8529_v5 = vpop.f32.mrb[130].mxu0 }
 0x720   : > { %v8530_v39 = vpop.f32.mrb[131].mxu0 }
 0x721   : > { %v12954_v50 = vadd.f32 %v8530_v39, %v8529_v5 }
 0x722   : > { %7354 = vmatmul.mubr.bf16.gmra.mrb[172].mxu1 %v7922_v54 }
 0x723   : > { %7361 = vmatprep.mubr.bf16.mxu1 %v7931_v17 }
 0x725   : > { %v8532_v4 = vpop.f32.mrb[132].mxu0 }
 0x726   : > { %v8533_v63 = vpop.f32.mrb[133].mxu0 }
 0x727   : > { %v12958_v60 = vadd.f32 %v8533_v63, %v8532_v4  ;;  %v8535_v9 = vpop.f32.mrb[134].mxu0 }
 0x728   : > { %v8536_v41 = vpop.f32.mrb[135].mxu0 }
 0x729   : > { %v12960_v55 = vadd.f32 %v8536_v41, %v8535_v9 }
 0x72a   : > { %7362 = vmatmul.mubr.bf16.gmra.mrb[176].mxu1 %v7930_v11 }
 0x72b   : > { %7369 = vmatprep.mubr.bf16.mxu1 %v7939_v22 }
 0x72d   : > { %v8538_v46 = vpop.f32.mrb[136].mxu0 }
 0x72e   : > { %v8539_v26 = vpop.f32.mrb[137].mxu0 }
 0x72f   : > { %v12964_v43 = vadd.f32 %v8539_v26, %v8538_v46  ;;  %v8541_v30 = vpop.f32.mrb[138].mxu0 }
 0x730   : > { %v8542_v8 = vpop.f32.mrb[139].mxu0 }
 0x731   : > { %v12966_v18 = vadd.f32 %v8542_v8, %v8541_v30 }
 0x732   : > { %7370 = vmatmul.mubr.bf16.gmra.mrb[180].mxu1 %v7938_v36 }
 0x733   : > { %7377 = vmatprep.mubr.bf16.mxu1 %v7947_v53 }
 0x735   : > { %v8544_v27 = vpop.f32.mrb[140].mxu0 }
 0x736   : > { %v8545_v20 = vpop.f32.mrb[141].mxu0 }
 0x737   : > { %v8546_v0 = vadd.f32 %v8545_v20, %v8544_v27  ;;  %v8547_v49 = vpop.f32.mrb[142].mxu0 }
 0x738   : > { %v8548_v45 = vpop.f32.mrb[143].mxu0 }
 0x739   : > { %v8549_v62 = vadd.f32 %v8548_v45, %v8547_v49 }
 0x73a   : > { %7378 = vmatmul.mubr.bf16.gmra.mrb[184].mxu1 %v7946_v28 }
 0x73b   : > { %7385 = vmatprep.mubr.bf16.mxu1 %v7955_v24 }
 0x73d   : > { %v8550_v25 = vpop.f32.mrb[144].mxu0 }
 0x73e   : > { %v8551_v44 = vpop.f32.mrb[145].mxu0 }
 0x73f   : > { %v8552_v51 = vadd.f32 %v8551_v44, %v8550_v25  ;;  %v8553_v7 = vpop.f32.mrb[146].mxu0 }
 0x740   : > { %v8554_v47 = vpop.f32.mrb[147].mxu0 }
 0x741   : > { %v8555_v1 = vadd.f32 %v8554_v47, %v8553_v7 }
 0x742   : > { %7386 = vmatmul.mubr.bf16.gmra.mrb[188].mxu1 %v7954_v37 }
 0x745   : > { %v8556_v35 = vpop.f32.mrb[148].mxu0 }
 0x746   : > { %v8557_v14 = vpop.f32.mrb[149].mxu0 }
 0x747   : > { %v8558_v3 = vadd.f32 %v8557_v14, %v8556_v35  ;;  %v8559_v19 = vpop.f32.mrb[150].mxu0 }
 0x748   : > { %v8560_v42 = vpop.f32.mrb[151].mxu0 }
 0x749   : > { %v8561_v16 = vadd.f32 %v8560_v42, %v8559_v19 }
 0x74d   : > { %v8562_v61 = vpop.f32.mrb[152].mxu0 }
 0x74e   : > { %v8563_v10 = vpop.f32.mrb[153].mxu0 }
 0x74f   : > { %v12970_v52 = vadd.f32 %v8563_v10, %v8562_v61  ;;  %v8565_v58 = vpop.f32.mrb[154].mxu0 }
 0x750   : > { %v8566_v48 = vpop.f32.mrb[155].mxu0 }
 0x751   : > { %v8567_v29 = vadd.f32 %v8566_v48, %v8565_v58 }
 0x755   : > { %v8568_v15 = vpop.f32.mrb[156].mxu0 }
 0x756   : > { %v8569_v23 = vpop.f32.mrb[157].mxu0 }
 0x757   : > { %v12972_v34 = vadd.f32 %v8569_v23, %v8568_v15  ;;  %v8571_v33 = vpop.f32.mrb[158].mxu0 }
 0x758   : > { %v8572_v6 = vpop.f32.mrb[159].mxu0 }
 0x759   : > { %v12974_v40 = vadd.f32 %v8572_v6, %v8571_v33 }
 0x75d   : > { %v8590_v13 = vpop.f32.mrb[128].mxu1 }
 0x75e   : > { %v8591_v59 = vpop.f32.mrb[129].mxu1 }
 0x75f   : > { %v8592_v54 = vadd.f32 %v8591_v59, %v8590_v13  ;;  %v8593_v32 = vpop.f32.mrb[130].mxu1 }
 0x760   : > { %v8594_v17 = vpop.f32.mrb[131].mxu1 }
 0x761   : > { %v12977_v5 = vadd.f32 %v8592_v54, %v12952_v2  ;;  %v8595_v39 = vadd.f32 %v8594_v17, %v8593_v32 }
 0x763   : > { %v12980_v56 = vadd.f32 %v8595_v39, %v12954_v50 }
 0x765   : > { %v8596_v31 = vpop.f32.mrb[132].mxu1 }
 0x766   : > { %v8597_v4 = vpop.f32.mrb[133].mxu1 }
 0x767   : > { %v8598_v11 = vadd.f32 %v8597_v4, %v8596_v31  ;;  %v8599_v63 = vpop.f32.mrb[134].mxu1 }
 0x768   : > { %v8600_v22 = vpop.f32.mrb[135].mxu1 }
 0x769   : > { %v12983_v9 = vadd.f32 %v8598_v11, %v12958_v60  ;;  %v8601_v41 = vadd.f32 %v8600_v22, %v8599_v63 }
 0x76b   : > { %v12986_v38 = vadd.f32 %v8601_v41, %v12960_v55 }
 0x76d   : > { %v8602_v12 = vpop.f32.mrb[136].mxu1 }
 0x76e   : > { %v8603_v46 = vpop.f32.mrb[137].mxu1 }
 0x76f   : > { %v8604_v2 = vadd.f32 %v8603_v46, %v8602_v12  ;;  %v8605_v36 = vpop.f32.mrb[138].mxu1 }
 0x770   : > { %v8606_v26 = vpop.f32.mrb[139].mxu1 }
 0x771   : > { %v12989_v50 = vadd.f32 %v8604_v2, %v12964_v43  ;;  %v8607_v53 = vadd.f32 %v8606_v26, %v8605_v36 }
 0x773   : > { %v12992_v30 = vadd.f32 %v8607_v53, %v12966_v18 }
 0x775   : > { %v8608_v8 = vpop.f32.mrb[140].mxu1 }
 0x776   : > { %v8609_v57 = vpop.f32.mrb[141].mxu1 }
 0x777   : > { %v8610_v60 = vadd.f32 %v8609_v57, %v8608_v8  ;;  %v8611_v21 = vpop.f32.mrb[142].mxu1 }
 0x778   : > { %v8612_v27 = vpop.f32.mrb[143].mxu1 }
 0x779   : > { %v12994_v28 = vadd.f32 %v8610_v60, %v8546_v0  ;;  %v8613_v55 = vadd.f32 %v8612_v27, %v8611_v21 }
 0x77b   : > { %v12996_v20 = vadd.f32 %v8613_v55, %v8549_v62 }
 0x77d   : > { %v8614_v24 = vpop.f32.mrb[144].mxu1 }
 0x77e   : > { %v8615_v49 = vpop.f32.mrb[145].mxu1 }
 0x77f   : > { %v8616_v45 = vadd.f32 %v8615_v49, %v8614_v24  ;;  %v8617_v25 = vpop.f32.mrb[146].mxu1 }
 0x780   : > { %v8618_v43 = vpop.f32.mrb[147].mxu1 }
 0x781   : > { %v12998_v37 = vadd.f32 %v8616_v45, %v8552_v51  ;;  %v8619_v44 = vadd.f32 %v8618_v43, %v8617_v25 }
 0x783   : > { %v13000_v18 = vadd.f32 %v8619_v44, %v8555_v1 }
 0x785   : > { %v8620_v7 = vpop.f32.mrb[148].mxu1 }
 0x786   : > { %v8621_v47 = vpop.f32.mrb[149].mxu1 }
 0x787   : > { %v8622_v35 = vadd.f32 %v8621_v47, %v8620_v7  ;;  %v8623_v14 = vpop.f32.mrb[150].mxu1 }
 0x788   : > { %v8624_v19 = vpop.f32.mrb[151].mxu1 }
 0x789   : > { %v13002_v0 = vadd.f32 %v8622_v35, %v8558_v3  ;;  %v8625_v42 = vadd.f32 %v8624_v19, %v8623_v14 }
 0x78b   : > { %v13004_v62 = vadd.f32 %v8625_v42, %v8561_v16 }
 0x78d   : > { %v8626_v61 = vpop.f32.mrb[152].mxu1 }
 0x78e   : > { %v8627_v10 = vpop.f32.mrb[153].mxu1 }
 0x78f   : > { %v8628_v58 = vadd.f32 %v8627_v10, %v8626_v61  ;;  %v8629_v48 = vpop.f32.mrb[154].mxu1 }
 0x790   : > { %v8630_v15 = vpop.f32.mrb[155].mxu1 }
 0x791   : > { %v13007_v51 = vadd.f32 %v8628_v58, %v12970_v52  ;;  %v8631_v1 = vadd.f32 %v8630_v15, %v8629_v48 }
 0x793   : > { %v13009_v23 = vadd.f32 %v8631_v1, %v8567_v29 }
 0x795   : > { %v8632_v33 = vpop.f32.mrb[156].mxu1 }
 0x796   : > { %v8633_v6 = vpop.f32.mrb[157].mxu1 }
 0x797   : > { %v8634_v13 = vadd.f32 %v8633_v6, %v8632_v33  ;;  %v8635_v59 = vpop.f32.mrb[158].mxu1 }
 0x798   : > { %v8636_v3 = vpop.f32.mrb[159].mxu1 }
 0x799   : > { %v13012_v54 = vadd.f32 %v8634_v13, %v12972_v34  ;;  %v8637_v16 = vadd.f32 %v8636_v3, %v8635_v59 }
 0x79b   : > { %v13015_v32 = vadd.f32 %v8637_v16, %v12974_v40 }
 0x79d   : > { %v8654_v17 = vpop.f32.mrb[160].mxu0 }
 0x79e   : > { %v8655_v39 = vpop.f32.mrb[161].mxu0 }
 0x79f   : > { %v8656_v31 = vadd.f32 %v8655_v39, %v8654_v17  ;;  %v8657_v52 = vpop.f32.mrb[162].mxu0 }
 0x7a0   : > { %v8658_v4 = vpop.f32.mrb[163].mxu0 }
 0x7a1   : > { %v13018_v29 = vadd.f32 %v8656_v31, %v12977_v5  ;;  %v8659_v11 = vadd.f32 %v8658_v4, %v8657_v52  ;;  %v7413_v4 = vpop.permute.xlu0 %7412 }
 0x7a3   : > { %v13021_v63 = vadd.f32 %v8659_v11, %v12980_v56 }
 0x7a5   : > { %v8660_v22 = vpop.f32.mrb[164].mxu0 }
 0x7a6   : > { %v8661_v41 = vpop.f32.mrb[165].mxu0 }
 0x7a7   : > { %v8662_v34 = vadd.f32 %v8661_v41, %v8660_v22  ;;  %v8663_v12 = vpop.f32.mrb[166].mxu0 }
 0x7a8   : > { %v8664_v46 = vpop.f32.mrb[167].mxu0 }
 0x7a9   : > { %v13024_v40 = vadd.f32 %v8662_v34, %v12983_v9  ;;  %v8665_v2 = vadd.f32 %v8664_v46, %v8663_v12  ;;  %v7418_v46 = vpop.permute.xlu0 %7417 }
 0x7ab   : > { %v13027_v36 = vadd.f32 %v8665_v2, %v12986_v38 }
 0x7ad   : > { %v8666_v26 = vpop.f32.mrb[168].mxu0 }
 0x7ae   : > { %v8667_v53 = vpop.f32.mrb[169].mxu0 }
 0x7af   : > { %v8668_v5 = vadd.f32 %v8667_v53, %v8666_v26  ;;  %v8669_v8 = vpop.f32.mrb[170].mxu0 }
 0x7b0   : > { %v8670_v57 = vpop.f32.mrb[171].mxu0 }
 0x7b1   : > { %v13030_v56 = vadd.f32 %v8668_v5, %v12989_v50  ;;  %v8671_v60 = vadd.f32 %v8670_v57, %v8669_v8  ;;  %v7423_v5 = vpop.permute.xlu1 %7422 }
 0x7b3   : > { %v13033_v21 = vadd.f32 %v8671_v60, %v12992_v30 }
 0x7b5   : > { %v8672_v27 = vpop.f32.mrb[172].mxu0 }
 0x7b6   : > { %v8673_v55 = vpop.f32.mrb[173].mxu0 }
 0x7b7   : > { %v8674_v9 = vadd.f32 %v8673_v55, %v8672_v27  ;;  %v8675_v24 = vpop.f32.mrb[174].mxu0 }
 0x7b8   : > { %v8676_v49 = vpop.f32.mrb[175].mxu0 }
 0x7b9   : > { %v13036_v38 = vadd.f32 %v8674_v9, %v12994_v28  ;;  %v8677_v45 = vadd.f32 %v8676_v49, %v8675_v24  ;;  %v7428_v9 = vpop.permute.xlu1 %7427 }
 0x7bb   : > { %v13039_v25 = vadd.f32 %v8677_v45, %v12996_v20 }
 0x7bd   : > { %v8678_v43 = vpop.f32.mrb[176].mxu0 }
 0x7be   : > { %v8679_v44 = vpop.f32.mrb[177].mxu0 }
 0x7bf   : > { %v8680_v50 = vadd.f32 %v8679_v44, %v8678_v43  ;;  %v8681_v7 = vpop.f32.mrb[178].mxu0 }
 0x7c0   : > { %v8682_v47 = vpop.f32.mrb[179].mxu0 }
 0x7c1   : > { %v13042_v30 = vadd.f32 %v8680_v50, %v12998_v37  ;;  %v8683_v35 = vadd.f32 %v8682_v47, %v8681_v7 }
 0x7c3   : > { %v13045_v14 = vadd.f32 %v8683_v35, %v13000_v18  ;;  %v7433_v35 = vpop.permute.xlu0 %7432 }
 0x7c5   : > { %v8684_v19 = vpop.f32.mrb[180].mxu0 }
 0x7c6   : > { %v8685_v42 = vpop.f32.mrb[181].mxu0 }
 0x7c7   : > { %v8686_v28 = vadd.f32 %v8685_v42, %v8684_v19  ;;  %v8687_v61 = vpop.f32.mrb[182].mxu0  ;;  %v7438_v42 = vpop.permute.xlu1 %7437 }
 0x7c8   : > { %v8688_v10 = vpop.f32.mrb[183].mxu0 }
 0x7c9   : > { %v13048_v20 = vadd.f32 %v8686_v28, %v13002_v0  ;;  %v8689_v58 = vadd.f32 %v8688_v10, %v8687_v61 }
 0x7cb   : > { %v13051_v48 = vadd.f32 %v8689_v58, %v13004_v62 }
 0x7cd   : > { %v8690_v15 = vpop.f32.mrb[184].mxu0 }
 0x7ce   : > { %v8691_v1 = vpop.f32.mrb[185].mxu0 }
 0x7cf   : > { %v8692_v37 = vadd.f32 %v8691_v1, %v8690_v15  ;;  %v8693_v33 = vpop.f32.mrb[186].mxu0 }
 0x7d0   : > { %v8694_v6 = vpop.f32.mrb[187].mxu0 }
 0x7d1   : > { %v13054_v18 = vadd.f32 %v8692_v37, %v13007_v51  ;;  %v8695_v13 = vadd.f32 %v8694_v6, %v8693_v33  ;;  %v7443_v33 = vpop.permute.xlu0 %7442 }
 0x7d3   : > { %v13057_v59 = vadd.f32 %v8695_v13, %v13009_v23 }
 0x7d5   : > { %v8696_v3 = vpop.f32.mrb[188].mxu0 }
 0x7d6   : > { %v8697_v0 = vpop.f32.mrb[189].mxu0 }
 0x7d7   : > { %v8698_v16 = vadd.f32 %v8697_v0, %v8696_v3  ;;  %v8699_v17 = vpop.f32.mrb[190].mxu0 }
 0x7d8   : > { %v8700_v39 = vpop.f32.mrb[191].mxu0 }
 0x7d9   : > { %v13060_v62 = vadd.f32 %v8698_v16, %v13012_v54  ;;  %v8701_v31 = vadd.f32 %v8700_v39, %v8699_v17 }
 0x7db   : > { %v13063_v52 = vadd.f32 %v8701_v31, %v13015_v32 }
 0x7dd   : > { %v8718_v51 = vpop.f32.mrb[160].mxu1 }
 0x7de   : > { %v8719_v11 = vpop.f32.mrb[161].mxu1 }
 0x7df   : > { %v8720_v22 = vadd.f32 %v8719_v11, %v8718_v51  ;;  %v8721_v41 = vpop.f32.mrb[162].mxu1  ;;  %v7453_v51 = vpop.permute.xlu0 %7452 }
 0x7e0   : > { %v8722_v23 = vpop.f32.mrb[163].mxu1 }
 0x7e1   : > { %v7332_v34 = vadd.f32 %v8720_v22, %v13018_v29  ;;  %v8723_v12 = vadd.f32 %v8722_v23, %v8721_v41 }
 0x7e3   : > { %v7490_v2 = vmul.f32 %v7413_v4, %v7332_v34  ;;  %v7335_v26 = vadd.f32 %v8723_v12, %v13021_v63 }
 0x7e5   : > { %7506 = vst [vmem:[%s13068_s27] sm:$0xff] %v7490_v2  ;;  %v7491_v54 = vmul.f32 %v7418_v46, %v7335_v26  ;;  %v8724_v32 = vpop.f32.mrb[164].mxu1 }
 0x7e6   : > { %v8725_v53 = vpop.f32.mrb[165].mxu1 }
 0x7e7   : > { %7507 = vst [vmem:[%s13068_s27 + $0x8] sm:$0xff] %v7491_v54  ;;  %v8726_v8 = vadd.f32 %v8725_v53, %v8724_v32  ;;  %v8727_v57 = vpop.f32.mrb[166].mxu1  ;;  %v7463_v54 = vpop.permute.xlu0 %7462 }
 0x7e8   : > { %v8728_v29 = vpop.f32.mrb[167].mxu1 }
 0x7e9   : > { %v7340_v60 = vadd.f32 %v8726_v8, %v13024_v40  ;;  %v8729_v27 = vadd.f32 %v8728_v29, %v8727_v57 }
 0x7eb   : > { %v7492_v55 = vmul.f32 %v7423_v5, %v7340_v60  ;;  %v7343_v63 = vadd.f32 %v8729_v27, %v13027_v36 }
 0x7ed   : > { %7508 = vst [vmem:[%s13068_s27 + $0x10] sm:$0xff] %v7492_v55  ;;  %v7493_v24 = vmul.f32 %v7428_v9, %v7343_v63  ;;  %v8730_v49 = vpop.f32.mrb[168].mxu1 }
 0x7ee   : > { %v8731_v45 = vpop.f32.mrb[169].mxu1 }
 0x7ef   : > { %7509 = vst [vmem:[%s13068_s27 + $0x18] sm:$0xff] %v7493_v24  ;;  %v8732_v43 = vadd.f32 %v8731_v45, %v8730_v49  ;;  %v8733_v44 = vpop.f32.mrb[170].mxu1 }
 0x7f0   : > { %v8734_v50 = vpop.f32.mrb[171].mxu1 }
 0x7f1   : > { %v8735_v7 = vadd.f32 %v8734_v50, %v8733_v44  ;;  %v7348_v47 = vadd.f32 %v8732_v43, %v13030_v56 }
 0x7f3   : > { %v7351_v40 = vadd.f32 %v8735_v7, %v13033_v21  ;;  %v7494_v19 = vmul.f32 %v7433_v35, %v7348_v47  ;;  %v7448_v21 = vpop.permute.xlu1 %7447 }
 0x7f5   : > { %v7495_v36 = vmul.f32 %v7438_v42, %v7351_v40  ;;  %7510 = vst [vmem:[%s13068_s27 + $0x20] sm:$0xff] %v7494_v19  ;;  %v8736_v28 = vpop.f32.mrb[172].mxu1 }
 0x7f6   : > { %v8737_v61 = vpop.f32.mrb[173].mxu1 }
 0x7f7   : > { %7511 = vst [vmem:[%s13068_s27 + $0x28] sm:$0xff] %v7495_v36  ;;  %v8738_v10 = vadd.f32 %v8737_v61, %v8736_v28  ;;  %v8739_v58 = vpop.f32.mrb[174].mxu1 }
 0x7f8   : > { %v8740_v15 = vpop.f32.mrb[175].mxu1 }
 0x7f9   : > { %v8741_v1 = vadd.f32 %v8740_v15, %v8739_v58  ;;  %v7356_v37 = vadd.f32 %v8738_v10, %v13036_v38 }
 0x7fb   : > { %v7359_v56 = vadd.f32 %v8741_v1, %v13039_v25  ;;  %v7496_v6 = vmul.f32 %v7443_v33, %v7356_v37  ;;  %v7458_v25 = vpop.permute.xlu1 %7457 }
 0x7fd   : > { %v7497_v13 = vmul.f32 %v7448_v21, %v7359_v56  ;;  %7512 = vst [vmem:[%s13068_s27 + $0x30] sm:$0xff] %v7496_v6  ;;  %v8742_v3 = vpop.f32.mrb[176].mxu1 }
 0x7fe   : > { %v8743_v0 = vpop.f32.mrb[177].mxu1 }
 0x7ff   : > { %7513 = vst [vmem:[%s13068_s27 + $0x38] sm:$0xff] %v7497_v13  ;;  %v8744_v16 = vadd.f32 %v8743_v0, %v8742_v3  ;;  %v8745_v17 = vpop.f32.mrb[178].mxu1 }
 0x800   : > { %v8746_v39 = vpop.f32.mrb[179].mxu1 }
 0x801   : > { %v8747_v31 = vadd.f32 %v8746_v39, %v8745_v17  ;;  %v7364_v4 = vadd.f32 %v8744_v16, %v13042_v30 }
 0x803   : > { %v7367_v38 = vadd.f32 %v8747_v31, %v13045_v14  ;;  %v7498_v11 = vmul.f32 %v7453_v51, %v7364_v4  ;;  %v7468_v14 = vpop.permute.xlu1 %7467 }
 0x805   : > { %v7499_v22 = vmul.f32 %v7458_v25, %v7367_v38  ;;  %7514 = vst [vmem:[%s13068_s27 + $0x40] sm:$0xff] %v7498_v11  ;;  %v8748_v41 = vpop.f32.mrb[180].mxu1 }
 0x806   : > { %v8749_v23 = vpop.f32.mrb[181].mxu1 }
 0x807   : > { %7515 = vst [vmem:[%s13068_s27 + $0x48] sm:$0xff] %v7499_v22  ;;  %v8750_v34 = vadd.f32 %v8749_v23, %v8748_v41  ;;  %v8751_v12 = vpop.f32.mrb[182].mxu1  ;;  %v7478_v9 = vpop.permute.xlu1 %7477 }
 0x808   : > { %v8752_v46 = vpop.f32.mrb[183].mxu1 }
 0x809   : > { %v8753_v2 = vadd.f32 %v8752_v46, %v8751_v12  ;;  %v7372_v26 = vadd.f32 %v8750_v34, %v13048_v20  ;;  %v7473_v20 = vpop.permute.xlu0 %7472 }
 0x80b   : > { %v7375_v30 = vadd.f32 %v8753_v2, %v13051_v48  ;;  %v7500_v32 = vmul.f32 %v7463_v54, %v7372_v26  ;;  %v7488_v40 = vpop.permute.xlu1 %7487 }
 0x80d   : > { %v7501_v53 = vmul.f32 %v7468_v14, %v7375_v30  ;;  %7516 = vst [vmem:[%s13068_s27 + $0x50] sm:$0xff] %v7500_v32  ;;  %v8754_v5 = vpop.f32.mrb[184].mxu1 }
 0x80e   : > { %v8755_v8 = vpop.f32.mrb[185].mxu1 }
 0x80f   : > { %7517 = vst [vmem:[%s13068_s27 + $0x58] sm:$0xff] %v7501_v53  ;;  %v8756_v57 = vadd.f32 %v8755_v8, %v8754_v5  ;;  %v8757_v29 = vpop.f32.mrb[186].mxu1 }
 0x810   : > { %v8758_v60 = vpop.f32.mrb[187].mxu1 }
 0x811   : > { %v8759_v27 = vadd.f32 %v8758_v60, %v8757_v29  ;;  %v7380_v55 = vadd.f32 %v8756_v57, %v13054_v18 }
 0x813   : > { %v7383_v48 = vadd.f32 %v8759_v27, %v13057_v59  ;;  %v7502_v63 = vmul.f32 %v7473_v20, %v7380_v55  ;;  %v7483_v59 = vpop.permute.xlu0 %7482 }
 0x815   : > { %v7503_v24 = vmul.f32 %v7478_v9, %v7383_v48  ;;  %7518 = vst [vmem:[%s13068_s27 + $0x60] sm:$0xff] %v7502_v63  ;;  %v8760_v49 = vpop.f32.mrb[188].mxu1 }
 0x816   : > { %v8761_v45 = vpop.f32.mrb[189].mxu1 }
 0x817   : > { %7519 = vst [vmem:[%s13068_s27 + $0x68] sm:$0xff] %v7503_v24  ;;  %v8762_v43 = vadd.f32 %v8761_v45, %v8760_v49  ;;  %v8763_v44 = vpop.f32.mrb[190].mxu1 }
 0x818   : > { %v8764_v50 = vpop.f32.mrb[191].mxu1 }
 0x819   : > { %v8765_v7 = vadd.f32 %v8764_v50, %v8763_v44  ;;  %v7388_v18 = vadd.f32 %v8762_v43, %v13060_v62 }
 0x81b   : > { %v7391_v47 = vadd.f32 %v8765_v7, %v13063_v52  ;;  %v7504_v35 = vmul.f32 %v7483_v59, %v7388_v18 }
 0x81d   : > { %v7505_v19 = vmul.f32 %v7488_v40, %v7391_v47  ;;  %7520 = vst [vmem:[%s13068_s27 + $0x70] sm:$0xff] %v7504_v35 }
 0x81f   : > { %7521 = vst [vmem:[%s13068_s27 + $0x78] sm:$0xff] %v7505_v19 }
 0x820   : > { %10248 = shalt.err (!%p10245_p11)
}
 0x821   : > { %s10249_s0 = scalar_lea.hbm %s13103_s29, 2048  ;;  %s10253_s15 = scalar_lea.hbm %s13156_s6, 8192 }
 0x822   : > { %p10250_p7 = scmp.ne.s32.totalorder %s13103_s29, %s10249_s0  ;;  %p10254_p1 = scmp.lt.u32.totalorder %s13103_s29, %s13156_s6 }
 0x823   : > { %p10255_p0 = scmp.lt.u32.totalorder %s10253_s15, %s10249_s0  ;;  %p10257_p5 = scmp.lt.u32.totalorder %s10249_s0, %s13103_s29 }
 0x824   : > { %p10251_p2 = pnand %p10250_p7, %p13669_p6 }
 0x825   : > { %p10256_p12 = por %p10255_p0, %p10254_p1 }
 0x826   : > { %p10252_p4 = pneg %p10251_p2 }
 0x827   : > { %p10258_p10 = por %p10257_p5, %p10256_p12 }
 0x829   : > { %p10259_p13 = pnand %p10258_p10, %p10252_p4 }
 0x82b   : > { %10262 = shalt.err (!%p10259_p13)
}
 0x82c   : > { %s10316_s16 = smov 128   ;;  %s10317_s14 = smov 8  }
 0x82d   : > { %9860 = dma.vmem_to_hbm [thread:$0]  (%p13669_p6), %s13105_s20, 2048, %s13103_s29, %s7523_s25, %s10316_s16, %s10316_s16, %s10317_s14  }
 0x82e PF: > { %p9877_p3 = scmp.ge.s32.totalorder %s10305_s24, 2  ;;  %s7551_s27 = sand.u32 1, %s10293_s21  }
 0x82f   : > { %p13670_p8 = scmp.ne.s32.totalorder %s13295_s9, 0  ;;  %s7552_s13 = scalar_lea.sflag [#allocation4], %s7551_s27 }
 0x831   : > { %p9873_p9 = pnand %p9877_p3, %p13670_p8 }
 0x833   : > { %10288 = dma.done.wait (!%p9873_p9), %s7552_s13, 2048  }
 0x834   : > { %10290 = vsyncadd (!%p9873_p9), %s7552_s13, 4294965248  ;;  %s13671_s24 = sld [smem:[#allocation12_spill]]  ;;  %s13672_s17 = sld [smem:[#allocation13_spill]] }
 0x835   : > { %s13673_s21 = smov %s10297_s22  ;;  %s13674_s22 = smov %s10301_s23 }
 0x83a   : > { %p22_p11 = scmp.ge.s32.totalorder %s13671_s24, 6   ;;  %s13675_s23 = smov %s13672_s17 }
 0x83c   :  { %24 = sbr.rel (!%p22_p11) target bundleno = 10 (0xa), region = 119 }
 0x843   :  { %7557 = vsyncpa [#allocation3], 1 }
 0x844   :  { %7559 = vsyncpa [#allocation3 + $0x1], 1 }
 0x845   :  { %7560 = vsyncpa [#allocation6], 1 }
 0x846   :  { %7562 = vsyncpa [#allocation6 + $0x1], 1 }
 0x847   :  { %7563 = vsyncpa [#allocation4], 1 }
 0x848   :  { %7565 = vsyncpa [#allocation4 + $0x1], 1 }

</bundles_post_ra>
